<compile_context>
chip_gen: v5e
topology: v5e:2x2
jax: 0.10.0
libtpu: 0.0.40
codegen_flags: <defaults>
</compile_context>

<pallas_src>
import functools

import jax
import jax.numpy as jnp
from jax.experimental import pallas as pl
from jax.experimental.pallas import tpu as pltpu


_VMEM_LIMIT = 48 * 1024 * 1024   # < v7x's 64 MiB physical; > 16/32 MiB defaults


# ----------------------------------------------------------------------------
# Encoder GRU kernel: full sequence in one call, returns final hidden state.
# PyTorch nn.GRU gate math (gate order r, z, n) with fused (H, 3H) weights.
# ----------------------------------------------------------------------------
def _gru_last_state_kernel(T, B, H, x_ref, wi_ref, wh_ref, bi_ref, bh_ref,
                           h_out_ref):
    # x_ref: (T*B, H) bf16, time-major rows (row = t*B + b).
    # Hoisted input projection: one bf16 MXU pass with f32 accumulation.
    gi = jnp.dot(x_ref[...], wi_ref[...],
                 preferred_element_type=jnp.float32) + bi_ref[...]   # (T*B, 3H)
    wh = wh_ref[...]                                                 # (H, 3H) bf16
    bh = bh_ref[...]
    h = jnp.zeros((B, H), jnp.float32)
    # TODO(synk): for long T, stage gi in VMEM + lax.fori_loop(unroll=k) and
    #             add a T grid axis so the x DMA pipelines with compute.
    # TODO(synk): stage wh in the MXU across steps (matmul_push_rhs/acc/pop).
    for t in range(T):                       # short static trip-count -> unroll
        gi_t = gi[t * B:(t + 1) * B, :]
        gh = jnp.dot(h.astype(jnp.bfloat16), wh,
                     preferred_element_type=jnp.float32) + bh
        r = jax.nn.sigmoid(gi_t[:, 0:H] + gh[:, 0:H])
        z = jax.nn.sigmoid(gi_t[:, H:2 * H] + gh[:, H:2 * H])
        n = jnp.tanh(gi_t[:, 2 * H:3 * H] + r * gh[:, 2 * H:3 * H])
        h = (1.0 - z) * n + z * h
    h_out_ref[...] = h                                    # lane-dense (H = 128)


def gru_encoder(x_flat, wi, wh, bi, bh, T, B, H):
    """x_flat: (T*B, H) bf16 time-major. Returns final hidden state (B, H) f32."""
    kernel = functools.partial(_gru_last_state_kernel, T, B, H)
    return pl.pallas_call(
        kernel,
        out_shape=jax.ShapeDtypeStruct((B, H), jnp.float32),
        in_specs=[pl.BlockSpec(memory_space=pltpu.MemorySpace.VMEM)] * 5,
        out_specs=pl.BlockSpec(memory_space=pltpu.MemorySpace.VMEM),
        compiler_params=pltpu.CompilerParams(vmem_limit_bytes=_VMEM_LIMIT),
    )(x_flat, wi, wh, bi, bh)


# ----------------------------------------------------------------------------
# Fused decoder GRU(s) + classifier + CrossEntropy(ignore_index) kernel.
#
# Grid axis v tiles the vocabulary ("arbitrary", sequential): the recurrence
# (both decoders interleaved) runs once at v == 0 and writes its hidden states
# to VMEM scratch; every v step streams one (H, V_TILE) classifier block and
# updates an online logsumexp; the last v step emits the mean CE per decoder.
# ----------------------------------------------------------------------------
def _decoder_ce_kernel(T_dec, B, H, V_TILE, ndec, pad_id,
                       x_ref, henc_ref, wix_ref, wiz_ref, wh_ref, bi_ref,
                       bh_ref, cw_ref, cb_ref, tgt_ref, loss_ref,
                       h_ref, m_ref, s_ref, g_ref):
    N = T_dec * B
    v = pl.program_id(0)
    nv = pl.num_programs(0)

    # ---- recurrence: once, with the two decoders interleaved ----------------
    @pl.when(v == 0)
    def _():
        henc = henc_ref[...]                                       # (B, H) bf16
        gi, wh, bh = [], [], []
        for d in range(ndec):
            # Time-invariant projections, hoisted out of the recurrence.
            gix = jnp.dot(x_ref[d], wix_ref[d],
                          preferred_element_type=jnp.float32)      # (N, 3H)
            gic = jnp.dot(henc, wiz_ref[d],
                          preferred_element_type=jnp.float32) + bi_ref[d]  # (B,3H)
            # Hoist the "+ gi_c" (and its broadcast) out of the serial loop.
            gi.append(gix + jnp.concatenate([gic] * T_dec, axis=0))  # (N, 3H)
            wh.append(wh_ref[d])                                     # (H, 3H) bf16
            bh.append(bh_ref[d])
        h = [jnp.zeros((B, H), jnp.float32) for _ in range(ndec)]
        hs = [[] for _ in range(ndec)]
        # TODO(synk): stage wh[d] in the MXU across steps (push_rhs/acc/pop).
        for t in range(T_dec):
            # Back-to-back MXU pushes for the two independent recurrences so
            # the second hides the first's latency (single-TC v5e/v6e lever).
            gh = [jnp.dot(h[d].astype(jnp.bfloat16), wh[d],
                          preferred_element_type=jnp.float32) + bh[d]
                  for d in range(ndec)]
            for d in range(ndec):
                gi_t = gi[d][t * B:(t + 1) * B, :]
                r = jax.nn.sigmoid(gi_t[:, 0:H] + gh[d][:, 0:H])
                z = jax.nn.sigmoid(gi_t[:, H:2 * H] + gh[d][:, H:2 * H])
                n = jnp.tanh(gi_t[:, 2 * H:3 * H] + r * gh[d][:, 2 * H:3 * H])
                h[d] = (1.0 - z) * n + z * h[d]
                hs[d].append(h[d])
        for d in range(ndec):
            # One stacked store instead of T_dec tiny masked stores.
            h_ref[d] = jnp.concatenate(hs[d], axis=0).astype(jnp.bfloat16)
            m_ref[d] = jnp.full((N, 1), -jnp.inf, jnp.float32)
            s_ref[d] = jnp.zeros((N, 1), jnp.float32)
            g_ref[d] = jnp.zeros((N, 1), jnp.float32)

    # ---- streamed classifier tile + online logsumexp (every v step) ---------
    v_off = v * V_TILE
    for d in range(ndec):
        logits = jnp.dot(h_ref[d], cw_ref[d],
                         preferred_element_type=jnp.float32) + cb_ref[d]  # (N,Vt)
        tgt = tgt_ref[d]                                                  # (N, 1)
        hit = (jax.lax.broadcasted_iota(jnp.int32, logits.shape, 1)
               + v_off) == tgt
        g_ref[d] = g_ref[d] + jnp.sum(jnp.where(hit, logits, 0.0),
                                      axis=-1, keepdims=True)
        m_prev = m_ref[d]
        m_new = jnp.maximum(m_prev, jnp.max(logits, axis=-1, keepdims=True))
        s_ref[d] = (s_ref[d] * jnp.exp(m_prev - m_new)
                    + jnp.sum(jnp.exp(logits - m_new), axis=-1, keepdims=True))
        m_ref[d] = m_new

    # ---- finalize: mean CE over non-pad targets ------------------------------
    @pl.when(v == nv - 1)
    def _():
        for d in range(ndec):
            lse = m_ref[d] + jnp.log(s_ref[d])                       # (N, 1)
            valid = (tgt_ref[d] != pad_id).astype(jnp.float32)       # (N, 1)
            loss_sum = jnp.sum(valid * (lse - g_ref[d]), axis=0, keepdims=True)
            count = jnp.sum(valid, axis=0, keepdims=True)
            # NOTE: 0/0 -> NaN if every target is pad (PyTorch mean-CE parity).
            mean = loss_sum / count                                   # (1, 1)
            loss_ref[d] = jnp.broadcast_to(mean, (1, 128))            # lane-dense


def decoder_ce_losses(params, cfg, h_enc, items):
    """items: list of (decoder_slot, sent) sharing one (B, T) shape.
    Returns per-decoder mean CE losses, shape (len(items),)."""
    B, T = items[0][1].shape
    H, V = cfg.hidden_size, cfg.vocab_size
    S = len(items)
    T_dec = T - 1
    N = T_dec * B

    # Classifier stream tile over the vocab axis.
    # TODO(synk): at production V/H, size V_TILE (and Buffered depth) from
    #             pltpu.get_tpu_info().vmem_capacity_bytes (64 MiB on v7x).
    V_TILE = 128 if (V % 128 == 0) else V
    NV = V // V_TILE

    # Time-major flattened ids for decoder inputs (sent[:, :-1]) and targets
    # (sent[:, 1:]); row = t*B + b in both, matching the kernel layout.
    in_ids = jnp.stack(
        [jnp.transpose(s[:, :-1]).reshape(-1) for _, s in items], axis=0)  # (S, N)
    x = jnp.take(params["embed"], in_ids, axis=0).astype(jnp.bfloat16)     # (S, N, H)
    tgt = jnp.stack(
        [jnp.transpose(s[:, 1:]).reshape(-1) for _, s in items],
        axis=0).astype(jnp.int32)[..., None]                               # (S, N, 1)

    slots = [d for d, _ in items]
    if slots == [0, 1]:
        sel = lambda a: a
    else:
        d0 = slots[0]
        sel = lambda a: a[d0:d0 + 1]

    kernel = functools.partial(_decoder_ce_kernel, T_dec, B, H, V_TILE, S,
                               cfg.pad_token_id)
    out = pl.pallas_call(
        kernel,
        out_shape=jax.ShapeDtypeStruct((S, 1, 128), jnp.float32),
        grid_spec=pltpu.PrefetchScalarGridSpec(
            num_scalar_prefetch=0,
            grid=(NV,),
            in_specs=[
                pl.BlockSpec((S, N, H), lambda v: (0, 0, 0)),         # x (bf16)
                pl.BlockSpec((B, H), lambda v: (0, 0)),               # h_enc (bf16)
                pl.BlockSpec((S, H, 3 * H), lambda v: (0, 0, 0)),     # wi_x (bf16)
                pl.BlockSpec((S, H, 3 * H), lambda v: (0, 0, 0)),     # wi_z (bf16)
                pl.BlockSpec((S, H, 3 * H), lambda v: (0, 0, 0)),     # wh (bf16)
                pl.BlockSpec((S, 1, 3 * H), lambda v: (0, 0, 0)),     # bi (f32)
                pl.BlockSpec((S, 1, 3 * H), lambda v: (0, 0, 0)),     # bh (f32)
                pl.BlockSpec((S, H, V_TILE), lambda v: (0, 0, v)),    # cls_w stream
                pl.BlockSpec((S, 1, V_TILE), lambda v: (0, 0, v)),    # cls_b stream
                pl.BlockSpec((S, N, 1), lambda v: (0, 0, 0)),         # targets
            ],
            out_specs=pl.BlockSpec((S, 1, 128), lambda v: (0, 0, 0)),
            scratch_shapes=[
                pltpu.VMEM((S, N, H), jnp.bfloat16),   # decoder hidden states
                pltpu.VMEM((S, N, 1), jnp.float32),    # running max (logsumexp)
                pltpu.VMEM((S, N, 1), jnp.float32),    # running sum-of-exp
                pltpu.VMEM((S, N, 1), jnp.float32),    # gold-logit accumulator
            ],
        ),
        compiler_params=pltpu.CompilerParams(
            dimension_semantics=("arbitrary",),
            vmem_limit_bytes=_VMEM_LIMIT),
    )(x, h_enc.astype(jnp.bfloat16),
      sel(params["dec_wi_x"]).astype(jnp.bfloat16),
      sel(params["dec_wi_z"]).astype(jnp.bfloat16),
      sel(params["dec_wh"]).astype(jnp.bfloat16),
      sel(params["dec_bi"]), sel(params["dec_bh"]),
      sel(params["cls_w"]).astype(jnp.bfloat16), sel(params["cls_b"]), tgt)
    return out[:, 0, 0]


# ----------------------------------------------------------------------------
# SkipThought model (parameters + forward)
# ----------------------------------------------------------------------------
class SkipThoughtConfig:
    # H is a multiple of 128 so the r/z/n gate slices are lane-tile aligned and
    # all h / logits stores are lane-dense; V a multiple of 128 for the stream.
    vocab_size = 256
    hidden_size = 128
    pad_token_id = 0
    hidden_dropout_prob = 0.1   # dropout declared but unused in forward


def init_params(key, cfg):
    H, V = cfg.hidden_size, cfg.vocab_size
    keys = jax.random.split(key, 11)

    def w(k, shape):
        return 0.1 * jax.random.normal(k, shape, jnp.float32)

    return {
        "embed": w(keys[0], (V, H)),
        # encoder GRU (input size H); gates fused along columns, order r,z,n
        "enc_wi": w(keys[1], (H, 3 * H)),
        "enc_wh": w(keys[2], (H, 3 * H)),
        "enc_bi": w(keys[3], (1, 3 * H)),
        "enc_bh": w(keys[4], (1, 3 * H)),
        # decoder1 / decoder3 stacked on leading axis (input = [embed ; h_enc],
        # i.e. Wi of the 2H-input GRU split into wi_x (embed) and wi_z (h_enc))
        "dec_wi_x": w(keys[5], (2, H, 3 * H)),
        "dec_wi_z": w(keys[6], (2, H, 3 * H)),
        "dec_wh":   w(keys[7], (2, H, 3 * H)),
        "dec_bi":   w(keys[8], (2, 1, 3 * H)),
        "dec_bh":   w(keys[9], (2, 1, 3 * H)),
        # classifier1 / classifier3 stacked
        "cls_w": w(keys[10], (2, H, V)),
        "cls_b": jnp.zeros((2, 1, V), jnp.float32),
    }


def skip_thought_forward(params, cfg, sent2, sent1=None, sent3=None):
    H = cfg.hidden_size
    B, T2 = sent2.shape

    # TODO(synk): embedding gather is a data-dependent HBM gather; kept in
    #             plain JAX (gathered directly in time-major order).
    x2 = jnp.take(params["embed"], jnp.transpose(sent2).reshape(-1),
                  axis=0).astype(jnp.bfloat16)
    h_enc = gru_encoder(x2,
                        params["enc_wi"].astype(jnp.bfloat16),
                        params["enc_wh"].astype(jnp.bfloat16),
                        params["enc_bi"], params["enc_bh"], T2, B, H)

    if sent1 is None and sent3 is None:
        return h_enc                                              # (B, H)

    if (sent1 is not None and sent3 is not None
            and sent1.shape == sent3.shape):
        losses = decoder_ce_losses(params, cfg, h_enc,
                                   [(0, sent1), (1, sent3)])
        return losses[0] + losses[1]

    loss = jnp.float32(0.0)
    if sent1 is not None:
        loss = loss + decoder_ce_losses(params, cfg, h_enc, [(0, sent1)])[0]
    if sent3 is not None:
        loss = loss + decoder_ce_losses(params, cfg, h_enc, [(1, sent3)])[0]
    return loss


# ----------------------------------------------------------------------------
# Pure-JAX f32 reference (same math) for a sanity check.
# ----------------------------------------------------------------------------
def _gru_cell_ref(h, gi, wh, bh, H):
    gh = h @ wh + bh
    r = jax.nn.sigmoid(gi[:, 0:H] + gh[:, 0:H])
    z = jax.nn.sigmoid(gi[:, H:2 * H] + gh[:, H:2 * H])
    n = jnp.tanh(gi[:, 2 * H:3 * H] + r * gh[:, 2 * H:3 * H])
    return (1.0 - z) * n + z * h


def reference_forward(params, cfg, sent2, sent1=None, sent3=None):
    H, V, pad = cfg.hidden_size, cfg.vocab_size, cfg.pad_token_id
    emb = params["embed"]
    B, T2 = sent2.shape
    x2 = jnp.take(emb, sent2, axis=0)
    h = jnp.zeros((B, H), jnp.float32)
    for t in range(T2):
        gi = x2[:, t, :] @ params["enc_wi"] + params["enc_bi"]
        h = _gru_cell_ref(h, gi, params["enc_wh"], params["enc_bh"], H)
    h_enc = h
    if sent1 is None and sent3 is None:
        return h_enc
    total = jnp.float32(0.0)
    for d, sent in ((0, sent1), (1, sent3)):
        if sent is None:
            continue
        B, T = sent.shape
        xs = jnp.take(emb, sent, axis=0)
        gi_c = h_enc @ params["dec_wi_z"][d] + params["dec_bi"][d]
        h = jnp.zeros((B, H), jnp.float32)
        hs = []
        for t in range(T - 1):
            gi = xs[:, t, :] @ params["dec_wi_x"][d] + gi_c
            h = _gru_cell_ref(h, gi, params["dec_wh"][d], params["dec_bh"][d], H)
            hs.append(h)
        h_all = jnp.stack(hs, axis=1)                               # (B, T-1, H)
        logits = (h_all @ params["cls_w"][d] + params["cls_b"][d]).reshape(-1, V)
        tgt = sent[:, 1:].reshape(-1)
        m = jnp.max(logits, axis=-1)
        lse = m + jnp.log(jnp.sum(jnp.exp(logits - m[:, None]), axis=-1))
        gold = jnp.take_along_axis(logits, tgt[:, None], axis=-1)[:, 0]
        valid = (tgt != pad).astype(jnp.float32)
        total = total + jnp.sum(valid * (lse - gold)) / jnp.sum(valid)
    return total


if __name__ == "__main__":
    cfg = SkipThoughtConfig()
    B, T = 2, 8

    key = jax.random.PRNGKey(0)
    kp, k1, k2, k3 = jax.random.split(key, 4)
    params = init_params(kp, cfg)

    # token ids; pad_token_id (0) may appear and is ignored by the loss
    sent1 = jax.random.randint(k1, (B, T), 0, cfg.vocab_size, dtype=jnp.int32)
    sent2 = jax.random.randint(k2, (B, T), 0, cfg.vocab_size, dtype=jnp.int32)
    sent3 = jax.random.randint(k3, (B, T), 0, cfg.vocab_size, dtype=jnp.int32)

    @jax.jit
    def train_fn(p, s2, s1, s3):
        return skip_thought_forward(p, cfg, s2, s1, s3)

    @jax.jit
    def encode_fn(p, s2):
        return skip_thought_forward(p, cfg, s2)

    # Training mode: scalar loss (CE over decoder1 + CE over decoder3).
    loss = jax.block_until_ready(train_fn(params, sent2, sent1, sent3))
    # Encoder-only mode: final encoder hidden state (B, H).
    enc = jax.block_until_ready(encode_fn(params, sent2))

    assert loss.shape == ()
    assert enc.shape == (B, cfg.hidden_size)
    assert bool(jnp.isfinite(loss)) and bool(jnp.all(jnp.isfinite(enc)))

    # Sanity check against the f32 reference (loose tol: bf16 MXU operands).
    ref_loss = reference_forward(params, cfg, sent2, sent1, sent3)
    ref_enc = reference_forward(params, cfg, sent2)
    assert jnp.allclose(enc, ref_enc, rtol=3e-2, atol=3e-2)
    assert jnp.allclose(loss, ref_loss, rtol=5e-2, atol=5e-2)

    print("KERNEL_OK")
</pallas_src>

<mosaic_0001>
module attributes {stable_mosaic.version = 11 : i64} {
  func.func @_gru_last_state_kernel(%arg0: memref<16x128xbf16, #tpu.memory_space<vmem>>, %arg1: memref<128x384xbf16, #tpu.memory_space<vmem>>, %arg2: memref<128x384xbf16, #tpu.memory_space<vmem>>, %arg3: memref<1x384xf32, #tpu.memory_space<vmem>>, %arg4: memref<1x384xf32, #tpu.memory_space<vmem>>, %arg5: memref<2x128xf32, #tpu.memory_space<vmem>>) attributes {dimension_semantics = [], scalar_prefetch = 0 : i64, scratch_operands = 0 : i64, tpu.core_type = #tpu.core_type<tc>} {
    %c0 = arith.constant 0 : index
    %c0_0 = arith.constant 0 : index
    %0 = vector.load %arg0[%c0, %c0_0] : memref<16x128xbf16, #tpu.memory_space<vmem>>, vector<16x128xbf16>
    %c0_1 = arith.constant 0 : index
    %c0_2 = arith.constant 0 : index
    %1 = vector.load %arg1[%c0_1, %c0_2] : memref<128x384xbf16, #tpu.memory_space<vmem>>, vector<128x384xbf16>
    %cst = arith.constant dense<0.000000e+00> : vector<16x384xf32>
    %2 = tpu.matmul %0, %1, %cst {dimension_numbers = #tpu.dot_dimension_numbers<[1], [0], [0], [1], [0, 0, 1, 1], [], []>} : vector<16x128xbf16>, vector<128x384xbf16>, vector<16x384xf32> -> vector<16x384xf32>
    %c0_3 = arith.constant 0 : index
    %c0_4 = arith.constant 0 : index
    %3 = vector.load %arg3[%c0_3, %c0_4] : memref<1x384xf32, #tpu.memory_space<vmem>>, vector<1x384xf32>
    %4 = vector.broadcast %3 : vector<1x384xf32> to vector<16x384xf32>
    %5 = arith.addf %2, %4 : vector<16x384xf32>
    %c0_5 = arith.constant 0 : index
    %c0_6 = arith.constant 0 : index
    %6 = vector.load %arg2[%c0_5, %c0_6] : memref<128x384xbf16, #tpu.memory_space<vmem>>, vector<128x384xbf16>
    %c0_7 = arith.constant 0 : index
    %c0_8 = arith.constant 0 : index
    %7 = vector.load %arg4[%c0_7, %c0_8] : memref<1x384xf32, #tpu.memory_space<vmem>>, vector<1x384xf32>
    %cst_9 = arith.constant 0.000000e+00 : f32
    %8 = vector.broadcast %cst_9 : f32 to vector<2x128xf32>
    %9 = vector.extract_strided_slice %5 {offsets = [0, 0], sizes = [2, 384], strides = [1, 1]} : vector<16x384xf32> to vector<2x384xf32>
    %10 = arith.truncf %8 : vector<2x128xf32> to vector<2x128xbf16>
    %cst_10 = arith.constant dense<0.000000e+00> : vector<2x384xf32>
    %11 = tpu.matmul %10, %6, %cst_10 {dimension_numbers = #tpu.dot_dimension_numbers<[1], [0], [0], [1], [0, 0, 1, 1], [], []>} : vector<2x128xbf16>, vector<128x384xbf16>, vector<2x384xf32> -> vector<2x384xf32>
    %12 = vector.broadcast %7 : vector<1x384xf32> to vector<2x384xf32>
    %13 = arith.addf %11, %12 : vector<2x384xf32>
    %14 = vector.extract_strided_slice %9 {offsets = [0, 0], sizes = [2, 128], strides = [1, 1]} : vector<2x384xf32> to vector<2x128xf32>
    %15 = vector.extract_strided_slice %13 {offsets = [0, 0], sizes = [2, 128], strides = [1, 1]} : vector<2x384xf32> to vector<2x128xf32>
    %16 = arith.addf %14, %15 : vector<2x128xf32>
    %17 = arith.negf %16 : vector<2x128xf32>
    %18 = math.exp %17 : vector<2x128xf32>
    %cst_11 = arith.constant 1.000000e+00 : f32
    %19 = vector.broadcast %cst_11 : f32 to vector<2x128xf32>
    %20 = arith.addf %19, %18 : vector<2x128xf32>
    %21 = arith.divf %19, %20 : vector<2x128xf32>
    %22 = vector.extract_strided_slice %9 {offsets = [0, 128], sizes = [2, 128], strides = [1, 1]} : vector<2x384xf32> to vector<2x128xf32>
    %23 = vector.extract_strided_slice %13 {offsets = [0, 128], sizes = [2, 128], strides = [1, 1]} : vector<2x384xf32> to vector<2x128xf32>
    %24 = arith.addf %22, %23 : vector<2x128xf32>
    %25 = arith.negf %24 : vector<2x128xf32>
    %26 = math.exp %25 : vector<2x128xf32>
    %cst_12 = arith.constant 1.000000e+00 : f32
    %27 = vector.broadcast %cst_12 : f32 to vector<2x128xf32>
    %28 = arith.addf %27, %26 : vector<2x128xf32>
    %29 = arith.divf %27, %28 : vector<2x128xf32>
    %30 = vector.extract_strided_slice %9 {offsets = [0, 256], sizes = [2, 128], strides = [1, 1]} : vector<2x384xf32> to vector<2x128xf32>
    %31 = vector.extract_strided_slice %13 {offsets = [0, 256], sizes = [2, 128], strides = [1, 1]} : vector<2x384xf32> to vector<2x128xf32>
    %32 = arith.mulf %21, %31 : vector<2x128xf32>
    %33 = arith.addf %30, %32 : vector<2x128xf32>
    %34 = math.tanh %33 : vector<2x128xf32>
    %cst_13 = arith.constant 1.000000e+00 : f32
    %35 = vector.broadcast %cst_13 : f32 to vector<2x128xf32>
    %36 = arith.subf %35, %29 : vector<2x128xf32>
    %37 = arith.mulf %36, %34 : vector<2x128xf32>
    %38 = arith.mulf %29, %8 : vector<2x128xf32>
    %39 = arith.addf %37, %38 : vector<2x128xf32>
    %40 = vector.extract_strided_slice %5 {offsets = [2, 0], sizes = [2, 384], strides = [1, 1]} : vector<16x384xf32> to vector<2x384xf32>
    %41 = arith.truncf %39 : vector<2x128xf32> to vector<2x128xbf16>
    %cst_14 = arith.constant dense<0.000000e+00> : vector<2x384xf32>
    %42 = tpu.matmul %41, %6, %cst_14 {dimension_numbers = #tpu.dot_dimension_numbers<[1], [0], [0], [1], [0, 0, 1, 1], [], []>} : vector<2x128xbf16>, vector<128x384xbf16>, vector<2x384xf32> -> vector<2x384xf32>
    %43 = vector.broadcast %7 : vector<1x384xf32> to vector<2x384xf32>
    %44 = arith.addf %42, %43 : vector<2x384xf32>
    %45 = vector.extract_strided_slice %40 {offsets = [0, 0], sizes = [2, 128], strides = [1, 1]} : vector<2x384xf32> to vector<2x128xf32>
    %46 = vector.extract_strided_slice %44 {offsets = [0, 0], sizes = [2, 128], strides = [1, 1]} : vector<2x384xf32> to vector<2x128xf32>
    %47 = arith.addf %45, %46 : vector<2x128xf32>
    %48 = arith.negf %47 : vector<2x128xf32>
    %49 = math.exp %48 : vector<2x128xf32>
    %cst_15 = arith.constant 1.000000e+00 : f32
    %50 = vector.broadcast %cst_15 : f32 to vector<2x128xf32>
    %51 = arith.addf %50, %49 : vector<2x128xf32>
    %52 = arith.divf %50, %51 : vector<2x128xf32>
    %53 = vector.extract_strided_slice %40 {offsets = [0, 128], sizes = [2, 128], strides = [1, 1]} : vector<2x384xf32> to vector<2x128xf32>
    %54 = vector.extract_strided_slice %44 {offsets = [0, 128], sizes = [2, 128], strides = [1, 1]} : vector<2x384xf32> to vector<2x128xf32>
    %55 = arith.addf %53, %54 : vector<2x128xf32>
    %56 = arith.negf %55 : vector<2x128xf32>
    %57 = math.exp %56 : vector<2x128xf32>
    %cst_16 = arith.constant 1.000000e+00 : f32
    %58 = vector.broadcast %cst_16 : f32 to vector<2x128xf32>
    %59 = arith.addf %58, %57 : vector<2x128xf32>
    %60 = arith.divf %58, %59 : vector<2x128xf32>
    %61 = vector.extract_strided_slice %40 {offsets = [0, 256], sizes = [2, 128], strides = [1, 1]} : vector<2x384xf32> to vector<2x128xf32>
    %62 = vector.extract_strided_slice %44 {offsets = [0, 256], sizes = [2, 128], strides = [1, 1]} : vector<2x384xf32> to vector<2x128xf32>
    %63 = arith.mulf %52, %62 : vector<2x128xf32>
    %64 = arith.addf %61, %63 : vector<2x128xf32>
    %65 = math.tanh %64 : vector<2x128xf32>
    %cst_17 = arith.constant 1.000000e+00 : f32
    %66 = vector.broadcast %cst_17 : f32 to vector<2x128xf32>
    %67 = arith.subf %66, %60 : vector<2x128xf32>
    %68 = arith.mulf %67, %65 : vector<2x128xf32>
    %69 = arith.mulf %60, %39 : vector<2x128xf32>
    %70 = arith.addf %68, %69 : vector<2x128xf32>
    %71 = vector.extract_strided_slice %5 {offsets = [4, 0], sizes = [2, 384], strides = [1, 1]} : vector<16x384xf32> to vector<2x384xf32>
    %72 = arith.truncf %70 : vector<2x128xf32> to vector<2x128xbf16>
    %cst_18 = arith.constant dense<0.000000e+00> : vector<2x384xf32>
    %73 = tpu.matmul %72, %6, %cst_18 {dimension_numbers = #tpu.dot_dimension_numbers<[1], [0], [0], [1], [0, 0, 1, 1], [], []>} : vector<2x128xbf16>, vector<128x384xbf16>, vector<2x384xf32> -> vector<2x384xf32>
    %74 = vector.broadcast %7 : vector<1x384xf32> to vector<2x384xf32>
    %75 = arith.addf %73, %74 : vector<2x384xf32>
    %76 = vector.extract_strided_slice %71 {offsets = [0, 0], sizes = [2, 128], strides = [1, 1]} : vector<2x384xf32> to vector<2x128xf32>
    %77 = vector.extract_strided_slice %75 {offsets = [0, 0], sizes = [2, 128], strides = [1, 1]} : vector<2x384xf32> to vector<2x128xf32>
    %78 = arith.addf %76, %77 : vector<2x128xf32>
    %79 = arith.negf %78 : vector<2x128xf32>
    %80 = math.exp %79 : vector<2x128xf32>
    %cst_19 = arith.constant 1.000000e+00 : f32
    %81 = vector.broadcast %cst_19 : f32 to vector<2x128xf32>
    %82 = arith.addf %81, %80 : vector<2x128xf32>
    %83 = arith.divf %81, %82 : vector<2x128xf32>
    %84 = vector.extract_strided_slice %71 {offsets = [0, 128], sizes = [2, 128], strides = [1, 1]} : vector<2x384xf32> to vector<2x128xf32>
    %85 = vector.extract_strided_slice %75 {offsets = [0, 128], sizes = [2, 128], strides = [1, 1]} : vector<2x384xf32> to vector<2x128xf32>
    %86 = arith.addf %84, %85 : vector<2x128xf32>
    %87 = arith.negf %86 : vector<2x128xf32>
    %88 = math.exp %87 : vector<2x128xf32>
    %cst_20 = arith.constant 1.000000e+00 : f32
    %89 = vector.broadcast %cst_20 : f32 to vector<2x128xf32>
    %90 = arith.addf %89, %88 : vector<2x128xf32>
    %91 = arith.divf %89, %90 : vector<2x128xf32>
    %92 = vector.extract_strided_slice %71 {offsets = [0, 256], sizes = [2, 128], strides = [1, 1]} : vector<2x384xf32> to vector<2x128xf32>
    %93 = vector.extract_strided_slice %75 {offsets = [0, 256], sizes = [2, 128], strides = [1, 1]} : vector<2x384xf32> to vector<2x128xf32>
    %94 = arith.mulf %83, %93 : vector<2x128xf32>
    %95 = arith.addf %92, %94 : vector<2x128xf32>
    %96 = math.tanh %95 : vector<2x128xf32>
    %cst_21 = arith.constant 1.000000e+00 : f32
    %97 = vector.broadcast %cst_21 : f32 to vector<2x128xf32>
    %98 = arith.subf %97, %91 : vector<2x128xf32>
    %99 = arith.mulf %98, %96 : vector<2x128xf32>
    %100 = arith.mulf %91, %70 : vector<2x128xf32>
    %101 = arith.addf %99, %100 : vector<2x128xf32>
    %102 = vector.extract_strided_slice %5 {offsets = [6, 0], sizes = [2, 384], strides = [1, 1]} : vector<16x384xf32> to vector<2x384xf32>
    %103 = arith.truncf %101 : vector<2x128xf32> to vector<2x128xbf16>
    %cst_22 = arith.constant dense<0.000000e+00> : vector<2x384xf32>
    %104 = tpu.matmul %103, %6, %cst_22 {dimension_numbers = #tpu.dot_dimension_numbers<[1], [0], [0], [1], [0, 0, 1, 1], [], []>} : vector<2x128xbf16>, vector<128x384xbf16>, vector<2x384xf32> -> vector<2x384xf32>
    %105 = vector.broadcast %7 : vector<1x384xf32> to vector<2x384xf32>
    %106 = arith.addf %104, %105 : vector<2x384xf32>
    %107 = vector.extract_strided_slice %102 {offsets = [0, 0], sizes = [2, 128], strides = [1, 1]} : vector<2x384xf32> to vector<2x128xf32>
    %108 = vector.extract_strided_slice %106 {offsets = [0, 0], sizes = [2, 128], strides = [1, 1]} : vector<2x384xf32> to vector<2x128xf32>
    %109 = arith.addf %107, %108 : vector<2x128xf32>
    %110 = arith.negf %109 : vector<2x128xf32>
    %111 = math.exp %110 : vector<2x128xf32>
    %cst_23 = arith.constant 1.000000e+00 : f32
    %112 = vector.broadcast %cst_23 : f32 to vector<2x128xf32>
    %113 = arith.addf %112, %111 : vector<2x128xf32>
    %114 = arith.divf %112, %113 : vector<2x128xf32>
    %115 = vector.extract_strided_slice %102 {offsets = [0, 128], sizes = [2, 128], strides = [1, 1]} : vector<2x384xf32> to vector<2x128xf32>
    %116 = vector.extract_strided_slice %106 {offsets = [0, 128], sizes = [2, 128], strides = [1, 1]} : vector<2x384xf32> to vector<2x128xf32>
    %117 = arith.addf %115, %116 : vector<2x128xf32>
    %118 = arith.negf %117 : vector<2x128xf32>
    %119 = math.exp %118 : vector<2x128xf32>
    %cst_24 = arith.constant 1.000000e+00 : f32
    %120 = vector.broadcast %cst_24 : f32 to vector<2x128xf32>
    %121 = arith.addf %120, %119 : vector<2x128xf32>
    %122 = arith.divf %120, %121 : vector<2x128xf32>
    %123 = vector.extract_strided_slice %102 {offsets = [0, 256], sizes = [2, 128], strides = [1, 1]} : vector<2x384xf32> to vector<2x128xf32>
    %124 = vector.extract_strided_slice %106 {offsets = [0, 256], sizes = [2, 128], strides = [1, 1]} : vector<2x384xf32> to vector<2x128xf32>
    %125 = arith.mulf %114, %124 : vector<2x128xf32>
    %126 = arith.addf %123, %125 : vector<2x128xf32>
    %127 = math.tanh %126 : vector<2x128xf32>
    %cst_25 = arith.constant 1.000000e+00 : f32
    %128 = vector.broadcast %cst_25 : f32 to vector<2x128xf32>
    %129 = arith.subf %128, %122 : vector<2x128xf32>
    %130 = arith.mulf %129, %127 : vector<2x128xf32>
    %131 = arith.mulf %122, %101 : vector<2x128xf32>
    %132 = arith.addf %130, %131 : vector<2x128xf32>
    %133 = vector.extract_strided_slice %5 {offsets = [8, 0], sizes = [2, 384], strides = [1, 1]} : vector<16x384xf32> to vector<2x384xf32>
    %134 = arith.truncf %132 : vector<2x128xf32> to vector<2x128xbf16>
    %cst_26 = arith.constant dense<0.000000e+00> : vector<2x384xf32>
    %135 = tpu.matmul %134, %6, %cst_26 {dimension_numbers = #tpu.dot_dimension_numbers<[1], [0], [0], [1], [0, 0, 1, 1], [], []>} : vector<2x128xbf16>, vector<128x384xbf16>, vector<2x384xf32> -> vector<2x384xf32>
    %136 = vector.broadcast %7 : vector<1x384xf32> to vector<2x384xf32>
    %137 = arith.addf %135, %136 : vector<2x384xf32>
    %138 = vector.extract_strided_slice %133 {offsets = [0, 0], sizes = [2, 128], strides = [1, 1]} : vector<2x384xf32> to vector<2x128xf32>
    %139 = vector.extract_strided_slice %137 {offsets = [0, 0], sizes = [2, 128], strides = [1, 1]} : vector<2x384xf32> to vector<2x128xf32>
    %140 = arith.addf %138, %139 : vector<2x128xf32>
    %141 = arith.negf %140 : vector<2x128xf32>
    %142 = math.exp %141 : vector<2x128xf32>
    %cst_27 = arith.constant 1.000000e+00 : f32
    %143 = vector.broadcast %cst_27 : f32 to vector<2x128xf32>
    %144 = arith.addf %143, %142 : vector<2x128xf32>
    %145 = arith.divf %143, %144 : vector<2x128xf32>
    %146 = vector.extract_strided_slice %133 {offsets = [0, 128], sizes = [2, 128], strides = [1, 1]} : vector<2x384xf32> to vector<2x128xf32>
    %147 = vector.extract_strided_slice %137 {offsets = [0, 128], sizes = [2, 128], strides = [1, 1]} : vector<2x384xf32> to vector<2x128xf32>
    %148 = arith.addf %146, %147 : vector<2x128xf32>
    %149 = arith.negf %148 : vector<2x128xf32>
    %150 = math.exp %149 : vector<2x128xf32>
    %cst_28 = arith.constant 1.000000e+00 : f32
    %151 = vector.broadcast %cst_28 : f32 to vector<2x128xf32>
    %152 = arith.addf %151, %150 : vector<2x128xf32>
    %153 = arith.divf %151, %152 : vector<2x128xf32>
    %154 = vector.extract_strided_slice %133 {offsets = [0, 256], sizes = [2, 128], strides = [1, 1]} : vector<2x384xf32> to vector<2x128xf32>
    %155 = vector.extract_strided_slice %137 {offsets = [0, 256], sizes = [2, 128], strides = [1, 1]} : vector<2x384xf32> to vector<2x128xf32>
    %156 = arith.mulf %145, %155 : vector<2x128xf32>
    %157 = arith.addf %154, %156 : vector<2x128xf32>
    %158 = math.tanh %157 : vector<2x128xf32>
    %cst_29 = arith.constant 1.000000e+00 : f32
    %159 = vector.broadcast %cst_29 : f32 to vector<2x128xf32>
    %160 = arith.subf %159, %153 : vector<2x128xf32>
    %161 = arith.mulf %160, %158 : vector<2x128xf32>
    %162 = arith.mulf %153, %132 : vector<2x128xf32>
    %163 = arith.addf %161, %162 : vector<2x128xf32>
    %164 = vector.extract_strided_slice %5 {offsets = [10, 0], sizes = [2, 384], strides = [1, 1]} : vector<16x384xf32> to vector<2x384xf32>
    %165 = arith.truncf %163 : vector<2x128xf32> to vector<2x128xbf16>
    %cst_30 = arith.constant dense<0.000000e+00> : vector<2x384xf32>
    %166 = tpu.matmul %165, %6, %cst_30 {dimension_numbers = #tpu.dot_dimension_numbers<[1], [0], [0], [1], [0, 0, 1, 1], [], []>} : vector<2x128xbf16>, vector<128x384xbf16>, vector<2x384xf32> -> vector<2x384xf32>
    %167 = vector.broadcast %7 : vector<1x384xf32> to vector<2x384xf32>
    %168 = arith.addf %166, %167 : vector<2x384xf32>
    %169 = vector.extract_strided_slice %164 {offsets = [0, 0], sizes = [2, 128], strides = [1, 1]} : vector<2x384xf32> to vector<2x128xf32>
    %170 = vector.extract_strided_slice %168 {offsets = [0, 0], sizes = [2, 128], strides = [1, 1]} : vector<2x384xf32> to vector<2x128xf32>
    %171 = arith.addf %169, %170 : vector<2x128xf32>
    %172 = arith.negf %171 : vector<2x128xf32>
    %173 = math.exp %172 : vector<2x128xf32>
    %cst_31 = arith.constant 1.000000e+00 : f32
    %174 = vector.broadcast %cst_31 : f32 to vector<2x128xf32>
    %175 = arith.addf %174, %173 : vector<2x128xf32>
    %176 = arith.divf %174, %175 : vector<2x128xf32>
    %177 = vector.extract_strided_slice %164 {offsets = [0, 128], sizes = [2, 128], strides = [1, 1]} : vector<2x384xf32> to vector<2x128xf32>
    %178 = vector.extract_strided_slice %168 {offsets = [0, 128], sizes = [2, 128], strides = [1, 1]} : vector<2x384xf32> to vector<2x128xf32>
    %179 = arith.addf %177, %178 : vector<2x128xf32>
    %180 = arith.negf %179 : vector<2x128xf32>
    %181 = math.exp %180 : vector<2x128xf32>
    %cst_32 = arith.constant 1.000000e+00 : f32
    %182 = vector.broadcast %cst_32 : f32 to vector<2x128xf32>
    %183 = arith.addf %182, %181 : vector<2x128xf32>
    %184 = arith.divf %182, %183 : vector<2x128xf32>
    %185 = vector.extract_strided_slice %164 {offsets = [0, 256], sizes = [2, 128], strides = [1, 1]} : vector<2x384xf32> to vector<2x128xf32>
    %186 = vector.extract_strided_slice %168 {offsets = [0, 256], sizes = [2, 128], strides = [1, 1]} : vector<2x384xf32> to vector<2x128xf32>
    %187 = arith.mulf %176, %186 : vector<2x128xf32>
    %188 = arith.addf %185, %187 : vector<2x128xf32>
    %189 = math.tanh %188 : vector<2x128xf32>
    %cst_33 = arith.constant 1.000000e+00 : f32
    %190 = vector.broadcast %cst_33 : f32 to vector<2x128xf32>
    %191 = arith.subf %190, %184 : vector<2x128xf32>
    %192 = arith.mulf %191, %189 : vector<2x128xf32>
    %193 = arith.mulf %184, %163 : vector<2x128xf32>
    %194 = arith.addf %192, %193 : vector<2x128xf32>
    %195 = vector.extract_strided_slice %5 {offsets = [12, 0], sizes = [2, 384], strides = [1, 1]} : vector<16x384xf32> to vector<2x384xf32>
    %196 = arith.truncf %194 : vector<2x128xf32> to vector<2x128xbf16>
    %cst_34 = arith.constant dense<0.000000e+00> : vector<2x384xf32>
    %197 = tpu.matmul %196, %6, %cst_34 {dimension_numbers = #tpu.dot_dimension_numbers<[1], [0], [0], [1], [0, 0, 1, 1], [], []>} : vector<2x128xbf16>, vector<128x384xbf16>, vector<2x384xf32> -> vector<2x384xf32>
    %198 = vector.broadcast %7 : vector<1x384xf32> to vector<2x384xf32>
    %199 = arith.addf %197, %198 : vector<2x384xf32>
    %200 = vector.extract_strided_slice %195 {offsets = [0, 0], sizes = [2, 128], strides = [1, 1]} : vector<2x384xf32> to vector<2x128xf32>
    %201 = vector.extract_strided_slice %199 {offsets = [0, 0], sizes = [2, 128], strides = [1, 1]} : vector<2x384xf32> to vector<2x128xf32>
    %202 = arith.addf %200, %201 : vector<2x128xf32>
    %203 = arith.negf %202 : vector<2x128xf32>
    %204 = math.exp %203 : vector<2x128xf32>
    %cst_35 = arith.constant 1.000000e+00 : f32
    %205 = vector.broadcast %cst_35 : f32 to vector<2x128xf32>
    %206 = arith.addf %205, %204 : vector<2x128xf32>
    %207 = arith.divf %205, %206 : vector<2x128xf32>
    %208 = vector.extract_strided_slice %195 {offsets = [0, 128], sizes = [2, 128], strides = [1, 1]} : vector<2x384xf32> to vector<2x128xf32>
    %209 = vector.extract_strided_slice %199 {offsets = [0, 128], sizes = [2, 128], strides = [1, 1]} : vector<2x384xf32> to vector<2x128xf32>
    %210 = arith.addf %208, %209 : vector<2x128xf32>
    %211 = arith.negf %210 : vector<2x128xf32>
    %212 = math.exp %211 : vector<2x128xf32>
    %cst_36 = arith.constant 1.000000e+00 : f32
    %213 = vector.broadcast %cst_36 : f32 to vector<2x128xf32>
    %214 = arith.addf %213, %212 : vector<2x128xf32>
    %215 = arith.divf %213, %214 : vector<2x128xf32>
    %216 = vector.extract_strided_slice %195 {offsets = [0, 256], sizes = [2, 128], strides = [1, 1]} : vector<2x384xf32> to vector<2x128xf32>
    %217 = vector.extract_strided_slice %199 {offsets = [0, 256], sizes = [2, 128], strides = [1, 1]} : vector<2x384xf32> to vector<2x128xf32>
    %218 = arith.mulf %207, %217 : vector<2x128xf32>
    %219 = arith.addf %216, %218 : vector<2x128xf32>
    %220 = math.tanh %219 : vector<2x128xf32>
    %cst_37 = arith.constant 1.000000e+00 : f32
    %221 = vector.broadcast %cst_37 : f32 to vector<2x128xf32>
    %222 = arith.subf %221, %215 : vector<2x128xf32>
    %223 = arith.mulf %222, %220 : vector<2x128xf32>
    %224 = arith.mulf %215, %194 : vector<2x128xf32>
    %225 = arith.addf %223, %224 : vector<2x128xf32>
    %226 = vector.extract_strided_slice %5 {offsets = [14, 0], sizes = [2, 384], strides = [1, 1]} : vector<16x384xf32> to vector<2x384xf32>
    %227 = arith.truncf %225 : vector<2x128xf32> to vector<2x128xbf16>
    %cst_38 = arith.constant dense<0.000000e+00> : vector<2x384xf32>
    %228 = tpu.matmul %227, %6, %cst_38 {dimension_numbers = #tpu.dot_dimension_numbers<[1], [0], [0], [1], [0, 0, 1, 1], [], []>} : vector<2x128xbf16>, vector<128x384xbf16>, vector<2x384xf32> -> vector<2x384xf32>
    %229 = vector.broadcast %7 : vector<1x384xf32> to vector<2x384xf32>
    %230 = arith.addf %228, %229 : vector<2x384xf32>
    %231 = vector.extract_strided_slice %226 {offsets = [0, 0], sizes = [2, 128], strides = [1, 1]} : vector<2x384xf32> to vector<2x128xf32>
    %232 = vector.extract_strided_slice %230 {offsets = [0, 0], sizes = [2, 128], strides = [1, 1]} : vector<2x384xf32> to vector<2x128xf32>
    %233 = arith.addf %231, %232 : vector<2x128xf32>
    %234 = arith.negf %233 : vector<2x128xf32>
    %235 = math.exp %234 : vector<2x128xf32>
    %cst_39 = arith.constant 1.000000e+00 : f32
    %236 = vector.broadcast %cst_39 : f32 to vector<2x128xf32>
    %237 = arith.addf %236, %235 : vector<2x128xf32>
    %238 = arith.divf %236, %237 : vector<2x128xf32>
    %239 = vector.extract_strided_slice %226 {offsets = [0, 128], sizes = [2, 128], strides = [1, 1]} : vector<2x384xf32> to vector<2x128xf32>
    %240 = vector.extract_strided_slice %230 {offsets = [0, 128], sizes = [2, 128], strides = [1, 1]} : vector<2x384xf32> to vector<2x128xf32>
    %241 = arith.addf %239, %240 : vector<2x128xf32>
    %242 = arith.negf %241 : vector<2x128xf32>
    %243 = math.exp %242 : vector<2x128xf32>
    %cst_40 = arith.constant 1.000000e+00 : f32
    %244 = vector.broadcast %cst_40 : f32 to vector<2x128xf32>
    %245 = arith.addf %244, %243 : vector<2x128xf32>
    %246 = arith.divf %244, %245 : vector<2x128xf32>
    %247 = vector.extract_strided_slice %226 {offsets = [0, 256], sizes = [2, 128], strides = [1, 1]} : vector<2x384xf32> to vector<2x128xf32>
    %248 = vector.extract_strided_slice %230 {offsets = [0, 256], sizes = [2, 128], strides = [1, 1]} : vector<2x384xf32> to vector<2x128xf32>
    %249 = arith.mulf %238, %248 : vector<2x128xf32>
    %250 = arith.addf %247, %249 : vector<2x128xf32>
    %251 = math.tanh %250 : vector<2x128xf32>
    %cst_41 = arith.constant 1.000000e+00 : f32
    %252 = vector.broadcast %cst_41 : f32 to vector<2x128xf32>
    %253 = arith.subf %252, %246 : vector<2x128xf32>
    %254 = arith.mulf %253, %251 : vector<2x128xf32>
    %255 = arith.mulf %246, %225 : vector<2x128xf32>
    %256 = arith.addf %254, %255 : vector<2x128xf32>
    %c0_42 = arith.constant 0 : index
    %c0_43 = arith.constant 0 : index
    %257 = vector.load %arg5[%c0_42, %c0_43] : memref<2x128xf32, #tpu.memory_space<vmem>>, vector<2x128xf32>
    tpu.vector_store %arg5[%c0_42, %c0_43], %256 {strides = array<i32>} : memref<2x128xf32, #tpu.memory_space<vmem>>, vector<2x128xf32>,
    return
  }
}

module attributes {stable_mosaic.version = 11 : i64} {
  func.func @_decoder_ce_kernel(%arg0: i32, %arg1: memref<2x14x128xbf16, #tpu.memory_space<vmem>>, %arg2: memref<2x128xbf16, #tpu.memory_space<vmem>>, %arg3: memref<2x128x384xbf16, #tpu.memory_space<vmem>>, %arg4: memref<2x128x384xbf16, #tpu.memory_space<vmem>>, %arg5: memref<2x128x384xbf16, #tpu.memory_space<vmem>>, %arg6: memref<2x1x384xf32, #tpu.memory_space<vmem>>, %arg7: memref<2x1x384xf32, #tpu.memory_space<vmem>>, %arg8: memref<2x128x128xbf16, #tpu.memory_space<vmem>>, %arg9: memref<2x1x128xf32, #tpu.memory_space<vmem>>, %arg10: memref<2x14x1xi32, #tpu.memory_space<vmem>>, %arg11: memref<2x1x128xf32, #tpu.memory_space<vmem>>, %arg12: memref<2x14x128xbf16, #tpu.memory_space<vmem>>, %arg13: memref<2x14x1xf32, #tpu.memory_space<vmem>>, %arg14: memref<2x14x1xf32, #tpu.memory_space<vmem>>, %arg15: memref<2x14x1xf32, #tpu.memory_space<vmem>>) attributes {dimension_semantics = [#tpu.dimension_semantics<arbitrary>], iteration_bounds = array<i64: 2>, scalar_prefetch = 0 : i64, scratch_operands = 4 : i64, tpu.core_type = #tpu.core_type<tc>, window_params = [{pipeline_mode = #tpu.pipeline_mode<synchronous>, transform_indices = @transform_0, window_bounds = array<i64: 2, 14, 128>}, {pipeline_mode = #tpu.pipeline_mode<synchronous>, transform_indices = @transform_1, window_bounds = array<i64: 2, 128>}, {pipeline_mode = #tpu.pipeline_mode<synchronous>, transform_indices = @transform_2, window_bounds = array<i64: 2, 128, 384>}, {pipeline_mode = #tpu.pipeline_mode<synchronous>, transform_indices = @transform_3, window_bounds = array<i64: 2, 128, 384>}, {pipeline_mode = #tpu.pipeline_mode<synchronous>, transform_indices = @transform_4, window_bounds = array<i64: 2, 128, 384>}, {pipeline_mode = #tpu.pipeline_mode<synchronous>, transform_indices = @transform_5, window_bounds = array<i64: 2, 1, 384>}, {pipeline_mode = #tpu.pipeline_mode<synchronous>, transform_indices = @transform_6, window_bounds = array<i64: 2, 1, 384>}, {transform_indices = @transform_7, window_bounds = array<i64: 2, 128, 128>}, {transform_indices = @transform_8, window_bounds = array<i64: 2, 1, 128>}, {pipeline_mode = #tpu.pipeline_mode<synchronous>, transform_indices = @transform_9, window_bounds = array<i64: 2, 14, 1>}, {pipeline_mode = #tpu.pipeline_mode<synchronous>, transform_indices = @transform_10, window_bounds = array<i64: 2, 1, 128>}]} {
    %c0_i32 = arith.constant 0 : i32
    %0 = arith.cmpi eq, %arg0, %c0_i32 : i32
    %1 = arith.extui %0 : i1 to i32
    %c0_i32_0 = arith.constant 0 : i32
    %2 = arith.cmpi ne, %1, %c0_i32_0 : i32
    scf.if %2 {
      %c0_69 = arith.constant 0 : index
      %c0_70 = arith.constant 0 : index
      %103 = vector.load %arg2[%c0_69, %c0_70] : memref<2x128xbf16, #tpu.memory_space<vmem>>, vector<2x128xbf16>
      %c0_71 = arith.constant 0 : index
      %c0_72 = arith.constant 0 : index
      %c0_73 = arith.constant 0 : index
      %104 = vector.load %arg1[%c0_71, %c0_72, %c0_73] : memref<2x14x128xbf16, #tpu.memory_space<vmem>>, vector<1x14x128xbf16>
      %105 = vector.shape_cast %104 : vector<1x14x128xbf16> to vector<14x128xbf16>
      %c0_74 = arith.constant 0 : index
      %c0_75 = arith.constant 0 : index
      %c0_76 = arith.constant 0 : index
      %106 = vector.load %arg3[%c0_74, %c0_75, %c0_76] : memref<2x128x384xbf16, #tpu.memory_space<vmem>>, vector<1x128x384xbf16>
      %107 = vector.shape_cast %106 : vector<1x128x384xbf16> to vector<128x384xbf16>
      %cst_77 = arith.constant dense<0.000000e+00> : vector<14x384xf32>
      %108 = tpu.matmul %105, %107, %cst_77 {dimension_numbers = #tpu.dot_dimension_numbers<[1], [0], [0], [1], [0, 0, 1, 1], [], []>} : vector<14x128xbf16>, vector<128x384xbf16>, vector<14x384xf32> -> vector<14x384xf32>
      %c0_78 = arith.constant 0 : index
      %c0_79 = arith.constant 0 : index
      %c0_80 = arith.constant 0 : index
      %109 = vector.load %arg4[%c0_78, %c0_79, %c0_80] : memref<2x128x384xbf16, #tpu.memory_space<vmem>>, vector<1x128x384xbf16>
      %110 = vector.shape_cast %109 : vector<1x128x384xbf16> to vector<128x384xbf16>
      %cst_81 = arith.constant dense<0.000000e+00> : vector<2x384xf32>
      %111 = tpu.matmul %103, %110, %cst_81 {dimension_numbers = #tpu.dot_dimension_numbers<[1], [0], [0], [1], [0, 0, 1, 1], [], []>} : vector<2x128xbf16>, vector<128x384xbf16>, vector<2x384xf32> -> vector<2x384xf32>
      %c0_82 = arith.constant 0 : index
      %c0_83 = arith.constant 0 : index
      %c0_84 = arith.constant 0 : index
      %112 = vector.load %arg6[%c0_82, %c0_83, %c0_84] : memref<2x1x384xf32, #tpu.memory_space<vmem>>, vector<1x1x384xf32>
      %113 = vector.shape_cast %112 : vector<1x1x384xf32> to vector<1x384xf32>
      %114 = vector.broadcast %113 : vector<1x384xf32> to vector<2x384xf32>
      %115 = arith.addf %111, %114 : vector<2x384xf32>
      %116 = tpu.concatenate %115, %115, %115, %115, %115, %115, %115 in 0 : vector<2x384xf32>, vector<2x384xf32>, vector<2x384xf32>, vector<2x384xf32>, vector<2x384xf32>, vector<2x384xf32>, vector<2x384xf32> -> vector<14x384xf32>
      %117 = arith.addf %108, %116 : vector<14x384xf32>
      %c0_85 = arith.constant 0 : index
      %c0_86 = arith.constant 0 : index
      %c0_87 = arith.constant 0 : index
      %118 = vector.load %arg5[%c0_85, %c0_86, %c0_87] : memref<2x128x384xbf16, #tpu.memory_space<vmem>>, vector<1x128x384xbf16>
      %119 = vector.shape_cast %118 : vector<1x128x384xbf16> to vector<128x384xbf16>
      %c0_88 = arith.constant 0 : index
      %c0_89 = arith.constant 0 : index
      %c0_90 = arith.constant 0 : index
      %120 = vector.load %arg7[%c0_88, %c0_89, %c0_90] : memref<2x1x384xf32, #tpu.memory_space<vmem>>, vector<1x1x384xf32>
      %121 = vector.shape_cast %120 : vector<1x1x384xf32> to vector<1x384xf32>
      %c1_91 = arith.constant 1 : index
      %c0_92 = arith.constant 0 : index
      %c0_93 = arith.constant 0 : index
      %122 = vector.load %arg1[%c1_91, %c0_92, %c0_93] : memref<2x14x128xbf16, #tpu.memory_space<vmem>>, vector<1x14x128xbf16>
      %123 = vector.shape_cast %122 : vector<1x14x128xbf16> to vector<14x128xbf16>
      %c1_94 = arith.constant 1 : index
      %c0_95 = arith.constant 0 : index
      %c0_96 = arith.constant 0 : index
      %124 = vector.load %arg3[%c1_94, %c0_95, %c0_96] : memref<2x128x384xbf16, #tpu.memory_space<vmem>>, vector<1x128x384xbf16>
      %125 = vector.shape_cast %124 : vector<1x128x384xbf16> to vector<128x384xbf16>
      %cst_97 = arith.constant dense<0.000000e+00> : vector<14x384xf32>
      %126 = tpu.matmul %123, %125, %cst_97 {dimension_numbers = #tpu.dot_dimension_numbers<[1], [0], [0], [1], [0, 0, 1, 1], [], []>} : vector<14x128xbf16>, vector<128x384xbf16>, vector<14x384xf32> -> vector<14x384xf32>
      %c1_98 = arith.constant 1 : index
      %c0_99 = arith.constant 0 : index
      %c0_100 = arith.constant 0 : index
      %127 = vector.load %arg4[%c1_98, %c0_99, %c0_100] : memref<2x128x384xbf16, #tpu.memory_space<vmem>>, vector<1x128x384xbf16>
      %128 = vector.shape_cast %127 : vector<1x128x384xbf16> to vector<128x384xbf16>
      %cst_101 = arith.constant dense<0.000000e+00> : vector<2x384xf32>
      %129 = tpu.matmul %103, %128, %cst_101 {dimension_numbers = #tpu.dot_dimension_numbers<[1], [0], [0], [1], [0, 0, 1, 1], [], []>} : vector<2x128xbf16>, vector<128x384xbf16>, vector<2x384xf32> -> vector<2x384xf32>
      %c1_102 = arith.constant 1 : index
      %c0_103 = arith.constant 0 : index
      %c0_104 = arith.constant 0 : index
      %130 = vector.load %arg6[%c1_102, %c0_103, %c0_104] : memref<2x1x384xf32, #tpu.memory_space<vmem>>, vector<1x1x384xf32>
      %131 = vector.shape_cast %130 : vector<1x1x384xf32> to vector<1x384xf32>
      %132 = vector.broadcast %131 : vector<1x384xf32> to vector<2x384xf32>
      %133 = arith.addf %129, %132 : vector<2x384xf32>
      %134 = tpu.concatenate %133, %133, %133, %133, %133, %133, %133 in 0 : vector<2x384xf32>, vector<2x384xf32>, vector<2x384xf32>, vector<2x384xf32>, vector<2x384xf32>, vector<2x384xf32>, vector<2x384xf32> -> vector<14x384xf32>
      %135 = arith.addf %126, %134 : vector<14x384xf32>
      %c1_105 = arith.constant 1 : index
      %c0_106 = arith.constant 0 : index
      %c0_107 = arith.constant 0 : index
      %136 = vector.load %arg5[%c1_105, %c0_106, %c0_107] : memref<2x128x384xbf16, #tpu.memory_space<vmem>>, vector<1x128x384xbf16>
      %137 = vector.shape_cast %136 : vector<1x128x384xbf16> to vector<128x384xbf16>
      %c1_108 = arith.constant 1 : index
      %c0_109 = arith.constant 0 : index
      %c0_110 = arith.constant 0 : index
      %138 = vector.load %arg7[%c1_108, %c0_109, %c0_110] : memref<2x1x384xf32, #tpu.memory_space<vmem>>, vector<1x1x384xf32>
      %139 = vector.shape_cast %138 : vector<1x1x384xf32> to vector<1x384xf32>
      %cst_111 = arith.constant 0.000000e+00 : f32
      %140 = vector.broadcast %cst_111 : f32 to vector<2x128xf32>
      %cst_112 = arith.constant 0.000000e+00 : f32
      %141 = vector.broadcast %cst_112 : f32 to vector<2x128xf32>
      %142 = arith.truncf %140 : vector<2x128xf32> to vector<2x128xbf16>
      %cst_113 = arith.constant dense<0.000000e+00> : vector<2x384xf32>
      %143 = tpu.matmul %142, %119, %cst_113 {dimension_numbers = #tpu.dot_dimension_numbers<[1], [0], [0], [1], [0, 0, 1, 1], [], []>} : vector<2x128xbf16>, vector<128x384xbf16>, vector<2x384xf32> -> vector<2x384xf32>
      %144 = vector.broadcast %121 : vector<1x384xf32> to vector<2x384xf32>
      %145 = arith.addf %143, %144 : vector<2x384xf32>
      %146 = arith.truncf %141 : vector<2x128xf32> to vector<2x128xbf16>
      %cst_114 = arith.constant dense<0.000000e+00> : vector<2x384xf32>
      %147 = tpu.matmul %146, %137, %cst_114 {dimension_numbers = #tpu.dot_dimension_numbers<[1], [0], [0], [1], [0, 0, 1, 1], [], []>} : vector<2x128xbf16>, vector<128x384xbf16>, vector<2x384xf32> -> vector<2x384xf32>
      %148 = vector.broadcast %139 : vector<1x384xf32> to vector<2x384xf32>
      %149 = arith.addf %147, %148 : vector<2x384xf32>
      %150 = vector.extract_strided_slice %117 {offsets = [0, 0], sizes = [2, 384], strides = [1, 1]} : vector<14x384xf32> to vector<2x384xf32>
      %151 = vector.extract_strided_slice %150 {offsets = [0, 0], sizes = [2, 128], strides = [1, 1]} : vector<2x384xf32> to vector<2x128xf32>
      %152 = vector.extract_strided_slice %145 {offsets = [0, 0], sizes = [2, 128], strides = [1, 1]} : vector<2x384xf32> to vector<2x128xf32>
      %153 = arith.addf %151, %152 : vector<2x128xf32>
      %154 = arith.negf %153 : vector<2x128xf32>
      %155 = math.exp %154 : vector<2x128xf32>
      %cst_115 = arith.constant 1.000000e+00 : f32
      %156 = vector.broadcast %cst_115 : f32 to vector<2x128xf32>
      %157 = arith.addf %156, %155 : vector<2x128xf32>
      %158 = arith.divf %156, %157 : vector<2x128xf32>
      %159 = vector.extract_strided_slice %150 {offsets = [0, 128], sizes = [2, 128], strides = [1, 1]} : vector<2x384xf32> to vector<2x128xf32>
      %160 = vector.extract_strided_slice %145 {offsets = [0, 128], sizes = [2, 128], strides = [1, 1]} : vector<2x384xf32> to vector<2x128xf32>
      %161 = arith.addf %159, %160 : vector<2x128xf32>
      %162 = arith.negf %161 : vector<2x128xf32>
      %163 = math.exp %162 : vector<2x128xf32>
      %cst_116 = arith.constant 1.000000e+00 : f32
      %164 = vector.broadcast %cst_116 : f32 to vector<2x128xf32>
      %165 = arith.addf %164, %163 : vector<2x128xf32>
      %166 = arith.divf %164, %165 : vector<2x128xf32>
      %167 = vector.extract_strided_slice %150 {offsets = [0, 256], sizes = [2, 128], strides = [1, 1]} : vector<2x384xf32> to vector<2x128xf32>
      %168 = vector.extract_strided_slice %145 {offsets = [0, 256], sizes = [2, 128], strides = [1, 1]} : vector<2x384xf32> to vector<2x128xf32>
      %169 = arith.mulf %158, %168 : vector<2x128xf32>
      %170 = arith.addf %167, %169 : vector<2x128xf32>
      %171 = math.tanh %170 : vector<2x128xf32>
      %cst_117 = arith.constant 1.000000e+00 : f32
      %172 = vector.broadcast %cst_117 : f32 to vector<2x128xf32>
      %173 = arith.subf %172, %166 : vector<2x128xf32>
      %174 = arith.mulf %173, %171 : vector<2x128xf32>
      %175 = arith.mulf %166, %140 : vector<2x128xf32>
      %176 = arith.addf %174, %175 : vector<2x128xf32>
      %177 = vector.extract_strided_slice %135 {offsets = [0, 0], sizes = [2, 384], strides = [1, 1]} : vector<14x384xf32> to vector<2x384xf32>
      %178 = vector.extract_strided_slice %177 {offsets = [0, 0], sizes = [2, 128], strides = [1, 1]} : vector<2x384xf32> to vector<2x128xf32>
      %179 = vector.extract_strided_slice %149 {offsets = [0, 0], sizes = [2, 128], strides = [1, 1]} : vector<2x384xf32> to vector<2x128xf32>
      %180 = arith.addf %178, %179 : vector<2x128xf32>
      %181 = arith.negf %180 : vector<2x128xf32>
      %182 = math.exp %181 : vector<2x128xf32>
      %cst_118 = arith.constant 1.000000e+00 : f32
      %183 = vector.broadcast %cst_118 : f32 to vector<2x128xf32>
      %184 = arith.addf %183, %182 : vector<2x128xf32>
      %185 = arith.divf %183, %184 : vector<2x128xf32>
      %186 = vector.extract_strided_slice %177 {offsets = [0, 128], sizes = [2, 128], strides = [1, 1]} : vector<2x384xf32> to vector<2x128xf32>
      %187 = vector.extract_strided_slice %149 {offsets = [0, 128], sizes = [2, 128], strides = [1, 1]} : vector<2x384xf32> to vector<2x128xf32>
      %188 = arith.addf %186, %187 : vector<2x128xf32>
      %189 = arith.negf %188 : vector<2x128xf32>
      %190 = math.exp %189 : vector<2x128xf32>
      %cst_119 = arith.constant 1.000000e+00 : f32
      %191 = vector.broadcast %cst_119 : f32 to vector<2x128xf32>
      %192 = arith.addf %191, %190 : vector<2x128xf32>
      %193 = arith.divf %191, %192 : vector<2x128xf32>
      %194 = vector.extract_strided_slice %177 {offsets = [0, 256], sizes = [2, 128], strides = [1, 1]} : vector<2x384xf32> to vector<2x128xf32>
      %195 = vector.extract_strided_slice %149 {offsets = [0, 256], sizes = [2, 128], strides = [1, 1]} : vector<2x384xf32> to vector<2x128xf32>
      %196 = arith.mulf %185, %195 : vector<2x128xf32>
      %197 = arith.addf %194, %196 : vector<2x128xf32>
      %198 = math.tanh %197 : vector<2x128xf32>
      %cst_120 = arith.constant 1.000000e+00 : f32
      %199 = vector.broadcast %cst_120 : f32 to vector<2x128xf32>
      %200 = arith.subf %199, %193 : vector<2x128xf32>
      %201 = arith.mulf %200, %198 : vector<2x128xf32>
      %202 = arith.mulf %193, %141 : vector<2x128xf32>
      %203 = arith.addf %201, %202 : vector<2x128xf32>
      %204 = arith.truncf %176 : vector<2x128xf32> to vector<2x128xbf16>
      %cst_121 = arith.constant dense<0.000000e+00> : vector<2x384xf32>
      %205 = tpu.matmul %204, %119, %cst_121 {dimension_numbers = #tpu.dot_dimension_numbers<[1], [0], [0], [1], [0, 0, 1, 1], [], []>} : vector<2x128xbf16>, vector<128x384xbf16>, vector<2x384xf32> -> vector<2x384xf32>
      %206 = vector.broadcast %121 : vector<1x384xf32> to vector<2x384xf32>
      %207 = arith.addf %205, %206 : vector<2x384xf32>
      %208 = arith.truncf %203 : vector<2x128xf32> to vector<2x128xbf16>
      %cst_122 = arith.constant dense<0.000000e+00> : vector<2x384xf32>
      %209 = tpu.matmul %208, %137, %cst_122 {dimension_numbers = #tpu.dot_dimension_numbers<[1], [0], [0], [1], [0, 0, 1, 1], [], []>} : vector<2x128xbf16>, vector<128x384xbf16>, vector<2x384xf32> -> vector<2x384xf32>
      %210 = vector.broadcast %139 : vector<1x384xf32> to vector<2x384xf32>
      %211 = arith.addf %209, %210 : vector<2x384xf32>
      %212 = vector.extract_strided_slice %117 {offsets = [2, 0], sizes = [2, 384], strides = [1, 1]} : vector<14x384xf32> to vector<2x384xf32>
      %213 = vector.extract_strided_slice %212 {offsets = [0, 0], sizes = [2, 128], strides = [1, 1]} : vector<2x384xf32> to vector<2x128xf32>
      %214 = vector.extract_strided_slice %207 {offsets = [0, 0], sizes = [2, 128], strides = [1, 1]} : vector<2x384xf32> to vector<2x128xf32>
      %215 = arith.addf %213, %214 : vector<2x128xf32>
      %216 = arith.negf %215 : vector<2x128xf32>
      %217 = math.exp %216 : vector<2x128xf32>
      %cst_123 = arith.constant 1.000000e+00 : f32
      %218 = vector.broadcast %cst_123 : f32 to vector<2x128xf32>
      %219 = arith.addf %218, %217 : vector<2x128xf32>
      %220 = arith.divf %218, %219 : vector<2x128xf32>
      %221 = vector.extract_strided_slice %212 {offsets = [0, 128], sizes = [2, 128], strides = [1, 1]} : vector<2x384xf32> to vector<2x128xf32>
      %222 = vector.extract_strided_slice %207 {offsets = [0, 128], sizes = [2, 128], strides = [1, 1]} : vector<2x384xf32> to vector<2x128xf32>
      %223 = arith.addf %221, %222 : vector<2x128xf32>
      %224 = arith.negf %223 : vector<2x128xf32>
      %225 = math.exp %224 : vector<2x128xf32>
      %cst_124 = arith.constant 1.000000e+00 : f32
      %226 = vector.broadcast %cst_124 : f32 to vector<2x128xf32>
      %227 = arith.addf %226, %225 : vector<2x128xf32>
      %228 = arith.divf %226, %227 : vector<2x128xf32>
      %229 = vector.extract_strided_slice %212 {offsets = [0, 256], sizes = [2, 128], strides = [1, 1]} : vector<2x384xf32> to vector<2x128xf32>
      %230 = vector.extract_strided_slice %207 {offsets = [0, 256], sizes = [2, 128], strides = [1, 1]} : vector<2x384xf32> to vector<2x128xf32>
      %231 = arith.mulf %220, %230 : vector<2x128xf32>
      %232 = arith.addf %229, %231 : vector<2x128xf32>
      %233 = math.tanh %232 : vector<2x128xf32>
      %cst_125 = arith.constant 1.000000e+00 : f32
      %234 = vector.broadcast %cst_125 : f32 to vector<2x128xf32>
      %235 = arith.subf %234, %228 : vector<2x128xf32>
      %236 = arith.mulf %235, %233 : vector<2x128xf32>
      %237 = arith.mulf %228, %176 : vector<2x128xf32>
      %238 = arith.addf %236, %237 : vector<2x128xf32>
      %239 = vector.extract_strided_slice %135 {offsets = [2, 0], sizes = [2, 384], strides = [1, 1]} : vector<14x384xf32> to vector<2x384xf32>
      %240 = vector.extract_strided_slice %239 {offsets = [0, 0], sizes = [2, 128], strides = [1, 1]} : vector<2x384xf32> to vector<2x128xf32>
      %241 = vector.extract_strided_slice %211 {offsets = [0, 0], sizes = [2, 128], strides = [1, 1]} : vector<2x384xf32> to vector<2x128xf32>
      %242 = arith.addf %240, %241 : vector<2x128xf32>
      %243 = arith.negf %242 : vector<2x128xf32>
      %244 = math.exp %243 : vector<2x128xf32>
      %cst_126 = arith.constant 1.000000e+00 : f32
      %245 = vector.broadcast %cst_126 : f32 to vector<2x128xf32>
      %246 = arith.addf %245, %244 : vector<2x128xf32>
      %247 = arith.divf %245, %246 : vector<2x128xf32>
      %248 = vector.extract_strided_slice %239 {offsets = [0, 128], sizes = [2, 128], strides = [1, 1]} : vector<2x384xf32> to vector<2x128xf32>
      %249 = vector.extract_strided_slice %211 {offsets = [0, 128], sizes = [2, 128], strides = [1, 1]} : vector<2x384xf32> to vector<2x128xf32>
      %250 = arith.addf %248, %249 : vector<2x128xf32>
      %251 = arith.negf %250 : vector<2x128xf32>
      %252 = math.exp %251 : vector<2x128xf32>
      %cst_127 = arith.constant 1.000000e+00 : f32
      %253 = vector.broadcast %cst_127 : f32 to vector<2x128xf32>
      %254 = arith.addf %253, %252 : vector<2x128xf32>
      %255 = arith.divf %253, %254 : vector<2x128xf32>
      %256 = vector.extract_strided_slice %239 {offsets = [0, 256], sizes = [2, 128], strides = [1, 1]} : vector<2x384xf32> to vector<2x128xf32>
      %257 = vector.extract_strided_slice %211 {offsets = [0, 256], sizes = [2, 128], strides = [1, 1]} : vector<2x384xf32> to vector<2x128xf32>
      %258 = arith.mulf %247, %257 : vector<2x128xf32>
      %259 = arith.addf %256, %258 : vector<2x128xf32>
      %260 = math.tanh %259 : vector<2x128xf32>
      %cst_128 = arith.constant 1.000000e+00 : f32
      %261 = vector.broadcast %cst_128 : f32 to vector<2x128xf32>
      %262 = arith.subf %261, %255 : vector<2x128xf32>
      %263 = arith.mulf %262, %260 : vector<2x128xf32>
      %264 = arith.mulf %255, %203 : vector<2x128xf32>
      %265 = arith.addf %263, %264 : vector<2x128xf32>
      %266 = arith.truncf %238 : vector<2x128xf32> to vector<2x128xbf16>
      %cst_129 = arith.constant dense<0.000000e+00> : vector<2x384xf32>
      %267 = tpu.matmul %266, %119, %cst_129 {dimension_numbers = #tpu.dot_dimension_numbers<[1], [0], [0], [1], [0, 0, 1, 1], [], []>} : vector<2x128xbf16>, vector<128x384xbf16>, vector<2x384xf32> -> vector<2x384xf32>
      %268 = vector.broadcast %121 : vector<1x384xf32> to vector<2x384xf32>
      %269 = arith.addf %267, %268 : vector<2x384xf32>
      %270 = arith.truncf %265 : vector<2x128xf32> to vector<2x128xbf16>
      %cst_130 = arith.constant dense<0.000000e+00> : vector<2x384xf32>
      %271 = tpu.matmul %270, %137, %cst_130 {dimension_numbers = #tpu.dot_dimension_numbers<[1], [0], [0], [1], [0, 0, 1, 1], [], []>} : vector<2x128xbf16>, vector<128x384xbf16>, vector<2x384xf32> -> vector<2x384xf32>
      %272 = vector.broadcast %139 : vector<1x384xf32> to vector<2x384xf32>
      %273 = arith.addf %271, %272 : vector<2x384xf32>
      %274 = vector.extract_strided_slice %117 {offsets = [4, 0], sizes = [2, 384], strides = [1, 1]} : vector<14x384xf32> to vector<2x384xf32>
      %275 = vector.extract_strided_slice %274 {offsets = [0, 0], sizes = [2, 128], strides = [1, 1]} : vector<2x384xf32> to vector<2x128xf32>
      %276 = vector.extract_strided_slice %269 {offsets = [0, 0], sizes = [2, 128], strides = [1, 1]} : vector<2x384xf32> to vector<2x128xf32>
      %277 = arith.addf %275, %276 : vector<2x128xf32>
      %278 = arith.negf %277 : vector<2x128xf32>
      %279 = math.exp %278 : vector<2x128xf32>
      %cst_131 = arith.constant 1.000000e+00 : f32
      %280 = vector.broadcast %cst_131 : f32 to vector<2x128xf32>
      %281 = arith.addf %280, %279 : vector<2x128xf32>
      %282 = arith.divf %280, %281 : vector<2x128xf32>
      %283 = vector.extract_strided_slice %274 {offsets = [0, 128], sizes = [2, 128], strides = [1, 1]} : vector<2x384xf32> to vector<2x128xf32>
      %284 = vector.extract_strided_slice %269 {offsets = [0, 128], sizes = [2, 128], strides = [1, 1]} : vector<2x384xf32> to vector<2x128xf32>
      %285 = arith.addf %283, %284 : vector<2x128xf32>
      %286 = arith.negf %285 : vector<2x128xf32>
      %287 = math.exp %286 : vector<2x128xf32>
      %cst_132 = arith.constant 1.000000e+00 : f32
      %288 = vector.broadcast %cst_132 : f32 to vector<2x128xf32>
      %289 = arith.addf %288, %287 : vector<2x128xf32>
      %290 = arith.divf %288, %289 : vector<2x128xf32>
      %291 = vector.extract_strided_slice %274 {offsets = [0, 256], sizes = [2, 128], strides = [1, 1]} : vector<2x384xf32> to vector<2x128xf32>
      %292 = vector.extract_strided_slice %269 {offsets = [0, 256], sizes = [2, 128], strides = [1, 1]} : vector<2x384xf32> to vector<2x128xf32>
      %293 = arith.mulf %282, %292 : vector<2x128xf32>
      %294 = arith.addf %291, %293 : vector<2x128xf32>
      %295 = math.tanh %294 : vector<2x128xf32>
      %cst_133 = arith.constant 1.000000e+00 : f32
      %296 = vector.broadcast %cst_133 : f32 to vector<2x128xf32>
      %297 = arith.subf %296, %290 : vector<2x128xf32>
      %298 = arith.mulf %297, %295 : vector<2x128xf32>
      %299 = arith.mulf %290, %238 : vector<2x128xf32>
      %300 = arith.addf %298, %299 : vector<2x128xf32>
      %301 = vector.extract_strided_slice %135 {offsets = [4, 0], sizes = [2, 384], strides = [1, 1]} : vector<14x384xf32> to vector<2x384xf32>
      %302 = vector.extract_strided_slice %301 {offsets = [0, 0], sizes = [2, 128], strides = [1, 1]} : vector<2x384xf32> to vector<2x128xf32>
      %303 = vector.extract_strided_slice %273 {offsets = [0, 0], sizes = [2, 128], strides = [1, 1]} : vector<2x384xf32> to vector<2x128xf32>
      %304 = arith.addf %302, %303 : vector<2x128xf32>
      %305 = arith.negf %304 : vector<2x128xf32>
      %306 = math.exp %305 : vector<2x128xf32>
      %cst_134 = arith.constant 1.000000e+00 : f32
      %307 = vector.broadcast %cst_134 : f32 to vector<2x128xf32>
      %308 = arith.addf %307, %306 : vector<2x128xf32>
      %309 = arith.divf %307, %308 : vector<2x128xf32>
      %310 = vector.extract_strided_slice %301 {offsets = [0, 128], sizes = [2, 128], strides = [1, 1]} : vector<2x384xf32> to vector<2x128xf32>
      %311 = vector.extract_strided_slice %273 {offsets = [0, 128], sizes = [2, 128], strides = [1, 1]} : vector<2x384xf32> to vector<2x128xf32>
      %312 = arith.addf %310, %311 : vector<2x128xf32>
      %313 = arith.negf %312 : vector<2x128xf32>
      %314 = math.exp %313 : vector<2x128xf32>
      %cst_135 = arith.constant 1.000000e+00 : f32
      %315 = vector.broadcast %cst_135 : f32 to vector<2x128xf32>
      %316 = arith.addf %315, %314 : vector<2x128xf32>
      %317 = arith.divf %315, %316 : vector<2x128xf32>
      %318 = vector.extract_strided_slice %301 {offsets = [0, 256], sizes = [2, 128], strides = [1, 1]} : vector<2x384xf32> to vector<2x128xf32>
      %319 = vector.extract_strided_slice %273 {offsets = [0, 256], sizes = [2, 128], strides = [1, 1]} : vector<2x384xf32> to vector<2x128xf32>
      %320 = arith.mulf %309, %319 : vector<2x128xf32>
      %321 = arith.addf %318, %320 : vector<2x128xf32>
      %322 = math.tanh %321 : vector<2x128xf32>
      %cst_136 = arith.constant 1.000000e+00 : f32
      %323 = vector.broadcast %cst_136 : f32 to vector<2x128xf32>
      %324 = arith.subf %323, %317 : vector<2x128xf32>
      %325 = arith.mulf %324, %322 : vector<2x128xf32>
      %326 = arith.mulf %317, %265 : vector<2x128xf32>
      %327 = arith.addf %325, %326 : vector<2x128xf32>
      %328 = arith.truncf %300 : vector<2x128xf32> to vector<2x128xbf16>
      %cst_137 = arith.constant dense<0.000000e+00> : vector<2x384xf32>
      %329 = tpu.matmul %328, %119, %cst_137 {dimension_numbers = #tpu.dot_dimension_numbers<[1], [0], [0], [1], [0, 0, 1, 1], [], []>} : vector<2x128xbf16>, vector<128x384xbf16>, vector<2x384xf32> -> vector<2x384xf32>
      %330 = vector.broadcast %121 : vector<1x384xf32> to vector<2x384xf32>
      %331 = arith.addf %329, %330 : vector<2x384xf32>
      %332 = arith.truncf %327 : vector<2x128xf32> to vector<2x128xbf16>
      %cst_138 = arith.constant dense<0.000000e+00> : vector<2x384xf32>
      %333 = tpu.matmul %332, %137, %cst_138 {dimension_numbers = #tpu.dot_dimension_numbers<[1], [0], [0], [1], [0, 0, 1, 1], [], []>} : vector<2x128xbf16>, vector<128x384xbf16>, vector<2x384xf32> -> vector<2x384xf32>
      %334 = vector.broadcast %139 : vector<1x384xf32> to vector<2x384xf32>
      %335 = arith.addf %333, %334 : vector<2x384xf32>
      %336 = vector.extract_strided_slice %117 {offsets = [6, 0], sizes = [2, 384], strides = [1, 1]} : vector<14x384xf32> to vector<2x384xf32>
      %337 = vector.extract_strided_slice %336 {offsets = [0, 0], sizes = [2, 128], strides = [1, 1]} : vector<2x384xf32> to vector<2x128xf32>
      %338 = vector.extract_strided_slice %331 {offsets = [0, 0], sizes = [2, 128], strides = [1, 1]} : vector<2x384xf32> to vector<2x128xf32>
      %339 = arith.addf %337, %338 : vector<2x128xf32>
      %340 = arith.negf %339 : vector<2x128xf32>
      %341 = math.exp %340 : vector<2x128xf32>
      %cst_139 = arith.constant 1.000000e+00 : f32
      %342 = vector.broadcast %cst_139 : f32 to vector<2x128xf32>
      %343 = arith.addf %342, %341 : vector<2x128xf32>
      %344 = arith.divf %342, %343 : vector<2x128xf32>
      %345 = vector.extract_strided_slice %336 {offsets = [0, 128], sizes = [2, 128], strides = [1, 1]} : vector<2x384xf32> to vector<2x128xf32>
      %346 = vector.extract_strided_slice %331 {offsets = [0, 128], sizes = [2, 128], strides = [1, 1]} : vector<2x384xf32> to vector<2x128xf32>
      %347 = arith.addf %345, %346 : vector<2x128xf32>
      %348 = arith.negf %347 : vector<2x128xf32>
      %349 = math.exp %348 : vector<2x128xf32>
      %cst_140 = arith.constant 1.000000e+00 : f32
      %350 = vector.broadcast %cst_140 : f32 to vector<2x128xf32>
      %351 = arith.addf %350, %349 : vector<2x128xf32>
      %352 = arith.divf %350, %351 : vector<2x128xf32>
      %353 = vector.extract_strided_slice %336 {offsets = [0, 256], sizes = [2, 128], strides = [1, 1]} : vector<2x384xf32> to vector<2x128xf32>
      %354 = vector.extract_strided_slice %331 {offsets = [0, 256], sizes = [2, 128], strides = [1, 1]} : vector<2x384xf32> to vector<2x128xf32>
      %355 = arith.mulf %344, %354 : vector<2x128xf32>
      %356 = arith.addf %353, %355 : vector<2x128xf32>
      %357 = math.tanh %356 : vector<2x128xf32>
      %cst_141 = arith.constant 1.000000e+00 : f32
      %358 = vector.broadcast %cst_141 : f32 to vector<2x128xf32>
      %359 = arith.subf %358, %352 : vector<2x128xf32>
      %360 = arith.mulf %359, %357 : vector<2x128xf32>
      %361 = arith.mulf %352, %300 : vector<2x128xf32>
      %362 = arith.addf %360, %361 : vector<2x128xf32>
      %363 = vector.extract_strided_slice %135 {offsets = [6, 0], sizes = [2, 384], strides = [1, 1]} : vector<14x384xf32> to vector<2x384xf32>
      %364 = vector.extract_strided_slice %363 {offsets = [0, 0], sizes = [2, 128], strides = [1, 1]} : vector<2x384xf32> to vector<2x128xf32>
      %365 = vector.extract_strided_slice %335 {offsets = [0, 0], sizes = [2, 128], strides = [1, 1]} : vector<2x384xf32> to vector<2x128xf32>
      %366 = arith.addf %364, %365 : vector<2x128xf32>
      %367 = arith.negf %366 : vector<2x128xf32>
      %368 = math.exp %367 : vector<2x128xf32>
      %cst_142 = arith.constant 1.000000e+00 : f32
      %369 = vector.broadcast %cst_142 : f32 to vector<2x128xf32>
      %370 = arith.addf %369, %368 : vector<2x128xf32>
      %371 = arith.divf %369, %370 : vector<2x128xf32>
      %372 = vector.extract_strided_slice %363 {offsets = [0, 128], sizes = [2, 128], strides = [1, 1]} : vector<2x384xf32> to vector<2x128xf32>
      %373 = vector.extract_strided_slice %335 {offsets = [0, 128], sizes = [2, 128], strides = [1, 1]} : vector<2x384xf32> to vector<2x128xf32>
      %374 = arith.addf %372, %373 : vector<2x128xf32>
      %375 = arith.negf %374 : vector<2x128xf32>
      %376 = math.exp %375 : vector<2x128xf32>
      %cst_143 = arith.constant 1.000000e+00 : f32
      %377 = vector.broadcast %cst_143 : f32 to vector<2x128xf32>
      %378 = arith.addf %377, %376 : vector<2x128xf32>
      %379 = arith.divf %377, %378 : vector<2x128xf32>
      %380 = vector.extract_strided_slice %363 {offsets = [0, 256], sizes = [2, 128], strides = [1, 1]} : vector<2x384xf32> to vector<2x128xf32>
      %381 = vector.extract_strided_slice %335 {offsets = [0, 256], sizes = [2, 128], strides = [1, 1]} : vector<2x384xf32> to vector<2x128xf32>
      %382 = arith.mulf %371, %381 : vector<2x128xf32>
      %383 = arith.addf %380, %382 : vector<2x128xf32>
      %384 = math.tanh %383 : vector<2x128xf32>
      %cst_144 = arith.constant 1.000000e+00 : f32
      %385 = vector.broadcast %cst_144 : f32 to vector<2x128xf32>
      %386 = arith.subf %385, %379 : vector<2x128xf32>
      %387 = arith.mulf %386, %384 : vector<2x128xf32>
      %388 = arith.mulf %379, %327 : vector<2x128xf32>
      %389 = arith.addf %387, %388 : vector<2x128xf32>
      %390 = arith.truncf %362 : vector<2x128xf32> to vector<2x128xbf16>
      %cst_145 = arith.constant dense<0.000000e+00> : vector<2x384xf32>
      %391 = tpu.matmul %390, %119, %cst_145 {dimension_numbers = #tpu.dot_dimension_numbers<[1], [0], [0], [1], [0, 0, 1, 1], [], []>} : vector<2x128xbf16>, vector<128x384xbf16>, vector<2x384xf32> -> vector<2x384xf32>
      %392 = vector.broadcast %121 : vector<1x384xf32> to vector<2x384xf32>
      %393 = arith.addf %391, %392 : vector<2x384xf32>
      %394 = arith.truncf %389 : vector<2x128xf32> to vector<2x128xbf16>
      %cst_146 = arith.constant dense<0.000000e+00> : vector<2x384xf32>
      %395 = tpu.matmul %394, %137, %cst_146 {dimension_numbers = #tpu.dot_dimension_numbers<[1], [0], [0], [1], [0, 0, 1, 1], [], []>} : vector<2x128xbf16>, vector<128x384xbf16>, vector<2x384xf32> -> vector<2x384xf32>
      %396 = vector.broadcast %139 : vector<1x384xf32> to vector<2x384xf32>
      %397 = arith.addf %395, %396 : vector<2x384xf32>
      %398 = vector.extract_strided_slice %117 {offsets = [8, 0], sizes = [2, 384], strides = [1, 1]} : vector<14x384xf32> to vector<2x384xf32>
      %399 = vector.extract_strided_slice %398 {offsets = [0, 0], sizes = [2, 128], strides = [1, 1]} : vector<2x384xf32> to vector<2x128xf32>
      %400 = vector.extract_strided_slice %393 {offsets = [0, 0], sizes = [2, 128], strides = [1, 1]} : vector<2x384xf32> to vector<2x128xf32>
      %401 = arith.addf %399, %400 : vector<2x128xf32>
      %402 = arith.negf %401 : vector<2x128xf32>
      %403 = math.exp %402 : vector<2x128xf32>
      %cst_147 = arith.constant 1.000000e+00 : f32
      %404 = vector.broadcast %cst_147 : f32 to vector<2x128xf32>
      %405 = arith.addf %404, %403 : vector<2x128xf32>
      %406 = arith.divf %404, %405 : vector<2x128xf32>
      %407 = vector.extract_strided_slice %398 {offsets = [0, 128], sizes = [2, 128], strides = [1, 1]} : vector<2x384xf32> to vector<2x128xf32>
      %408 = vector.extract_strided_slice %393 {offsets = [0, 128], sizes = [2, 128], strides = [1, 1]} : vector<2x384xf32> to vector<2x128xf32>
      %409 = arith.addf %407, %408 : vector<2x128xf32>
      %410 = arith.negf %409 : vector<2x128xf32>
      %411 = math.exp %410 : vector<2x128xf32>
      %cst_148 = arith.constant 1.000000e+00 : f32
      %412 = vector.broadcast %cst_148 : f32 to vector<2x128xf32>
      %413 = arith.addf %412, %411 : vector<2x128xf32>
      %414 = arith.divf %412, %413 : vector<2x128xf32>
      %415 = vector.extract_strided_slice %398 {offsets = [0, 256], sizes = [2, 128], strides = [1, 1]} : vector<2x384xf32> to vector<2x128xf32>
      %416 = vector.extract_strided_slice %393 {offsets = [0, 256], sizes = [2, 128], strides = [1, 1]} : vector<2x384xf32> to vector<2x128xf32>
      %417 = arith.mulf %406, %416 : vector<2x128xf32>
      %418 = arith.addf %415, %417 : vector<2x128xf32>
      %419 = math.tanh %418 : vector<2x128xf32>
      %cst_149 = arith.constant 1.000000e+00 : f32
      %420 = vector.broadcast %cst_149 : f32 to vector<2x128xf32>
      %421 = arith.subf %420, %414 : vector<2x128xf32>
      %422 = arith.mulf %421, %419 : vector<2x128xf32>
      %423 = arith.mulf %414, %362 : vector<2x128xf32>
      %424 = arith.addf %422, %423 : vector<2x128xf32>
      %425 = vector.extract_strided_slice %135 {offsets = [8, 0], sizes = [2, 384], strides = [1, 1]} : vector<14x384xf32> to vector<2x384xf32>
      %426 = vector.extract_strided_slice %425 {offsets = [0, 0], sizes = [2, 128], strides = [1, 1]} : vector<2x384xf32> to vector<2x128xf32>
      %427 = vector.extract_strided_slice %397 {offsets = [0, 0], sizes = [2, 128], strides = [1, 1]} : vector<2x384xf32> to vector<2x128xf32>
      %428 = arith.addf %426, %427 : vector<2x128xf32>
      %429 = arith.negf %428 : vector<2x128xf32>
      %430 = math.exp %429 : vector<2x128xf32>
      %cst_150 = arith.constant 1.000000e+00 : f32
      %431 = vector.broadcast %cst_150 : f32 to vector<2x128xf32>
      %432 = arith.addf %431, %430 : vector<2x128xf32>
      %433 = arith.divf %431, %432 : vector<2x128xf32>
      %434 = vector.extract_strided_slice %425 {offsets = [0, 128], sizes = [2, 128], strides = [1, 1]} : vector<2x384xf32> to vector<2x128xf32>
      %435 = vector.extract_strided_slice %397 {offsets = [0, 128], sizes = [2, 128], strides = [1, 1]} : vector<2x384xf32> to vector<2x128xf32>
      %436 = arith.addf %434, %435 : vector<2x128xf32>
      %437 = arith.negf %436 : vector<2x128xf32>
      %438 = math.exp %437 : vector<2x128xf32>
      %cst_151 = arith.constant 1.000000e+00 : f32
      %439 = vector.broadcast %cst_151 : f32 to vector<2x128xf32>
      %440 = arith.addf %439, %438 : vector<2x128xf32>
      %441 = arith.divf %439, %440 : vector<2x128xf32>
      %442 = vector.extract_strided_slice %425 {offsets = [0, 256], sizes = [2, 128], strides = [1, 1]} : vector<2x384xf32> to vector<2x128xf32>
      %443 = vector.extract_strided_slice %397 {offsets = [0, 256], sizes = [2, 128], strides = [1, 1]} : vector<2x384xf32> to vector<2x128xf32>
      %444 = arith.mulf %433, %443 : vector<2x128xf32>
      %445 = arith.addf %442, %444 : vector<2x128xf32>
      %446 = math.tanh %445 : vector<2x128xf32>
      %cst_152 = arith.constant 1.000000e+00 : f32
      %447 = vector.broadcast %cst_152 : f32 to vector<2x128xf32>
      %448 = arith.subf %447, %441 : vector<2x128xf32>
      %449 = arith.mulf %448, %446 : vector<2x128xf32>
      %450 = arith.mulf %441, %389 : vector<2x128xf32>
      %451 = arith.addf %449, %450 : vector<2x128xf32>
      %452 = arith.truncf %424 : vector<2x128xf32> to vector<2x128xbf16>
      %cst_153 = arith.constant dense<0.000000e+00> : vector<2x384xf32>
      %453 = tpu.matmul %452, %119, %cst_153 {dimension_numbers = #tpu.dot_dimension_numbers<[1], [0], [0], [1], [0, 0, 1, 1], [], []>} : vector<2x128xbf16>, vector<128x384xbf16>, vector<2x384xf32> -> vector<2x384xf32>
      %454 = vector.broadcast %121 : vector<1x384xf32> to vector<2x384xf32>
      %455 = arith.addf %453, %454 : vector<2x384xf32>
      %456 = arith.truncf %451 : vector<2x128xf32> to vector<2x128xbf16>
      %cst_154 = arith.constant dense<0.000000e+00> : vector<2x384xf32>
      %457 = tpu.matmul %456, %137, %cst_154 {dimension_numbers = #tpu.dot_dimension_numbers<[1], [0], [0], [1], [0, 0, 1, 1], [], []>} : vector<2x128xbf16>, vector<128x384xbf16>, vector<2x384xf32> -> vector<2x384xf32>
      %458 = vector.broadcast %139 : vector<1x384xf32> to vector<2x384xf32>
      %459 = arith.addf %457, %458 : vector<2x384xf32>
      %460 = vector.extract_strided_slice %117 {offsets = [10, 0], sizes = [2, 384], strides = [1, 1]} : vector<14x384xf32> to vector<2x384xf32>
      %461 = vector.extract_strided_slice %460 {offsets = [0, 0], sizes = [2, 128], strides = [1, 1]} : vector<2x384xf32> to vector<2x128xf32>
      %462 = vector.extract_strided_slice %455 {offsets = [0, 0], sizes = [2, 128], strides = [1, 1]} : vector<2x384xf32> to vector<2x128xf32>
      %463 = arith.addf %461, %462 : vector<2x128xf32>
      %464 = arith.negf %463 : vector<2x128xf32>
      %465 = math.exp %464 : vector<2x128xf32>
      %cst_155 = arith.constant 1.000000e+00 : f32
      %466 = vector.broadcast %cst_155 : f32 to vector<2x128xf32>
      %467 = arith.addf %466, %465 : vector<2x128xf32>
      %468 = arith.divf %466, %467 : vector<2x128xf32>
      %469 = vector.extract_strided_slice %460 {offsets = [0, 128], sizes = [2, 128], strides = [1, 1]} : vector<2x384xf32> to vector<2x128xf32>
      %470 = vector.extract_strided_slice %455 {offsets = [0, 128], sizes = [2, 128], strides = [1, 1]} : vector<2x384xf32> to vector<2x128xf32>
      %471 = arith.addf %469, %470 : vector<2x128xf32>
      %472 = arith.negf %471 : vector<2x128xf32>
      %473 = math.exp %472 : vector<2x128xf32>
      %cst_156 = arith.constant 1.000000e+00 : f32
      %474 = vector.broadcast %cst_156 : f32 to vector<2x128xf32>
      %475 = arith.addf %474, %473 : vector<2x128xf32>
      %476 = arith.divf %474, %475 : vector<2x128xf32>
      %477 = vector.extract_strided_slice %460 {offsets = [0, 256], sizes = [2, 128], strides = [1, 1]} : vector<2x384xf32> to vector<2x128xf32>
      %478 = vector.extract_strided_slice %455 {offsets = [0, 256], sizes = [2, 128], strides = [1, 1]} : vector<2x384xf32> to vector<2x128xf32>
      %479 = arith.mulf %468, %478 : vector<2x128xf32>
      %480 = arith.addf %477, %479 : vector<2x128xf32>
      %481 = math.tanh %480 : vector<2x128xf32>
      %cst_157 = arith.constant 1.000000e+00 : f32
      %482 = vector.broadcast %cst_157 : f32 to vector<2x128xf32>
      %483 = arith.subf %482, %476 : vector<2x128xf32>
      %484 = arith.mulf %483, %481 : vector<2x128xf32>
      %485 = arith.mulf %476, %424 : vector<2x128xf32>
      %486 = arith.addf %484, %485 : vector<2x128xf32>
      %487 = vector.extract_strided_slice %135 {offsets = [10, 0], sizes = [2, 384], strides = [1, 1]} : vector<14x384xf32> to vector<2x384xf32>
      %488 = vector.extract_strided_slice %487 {offsets = [0, 0], sizes = [2, 128], strides = [1, 1]} : vector<2x384xf32> to vector<2x128xf32>
      %489 = vector.extract_strided_slice %459 {offsets = [0, 0], sizes = [2, 128], strides = [1, 1]} : vector<2x384xf32> to vector<2x128xf32>
      %490 = arith.addf %488, %489 : vector<2x128xf32>
      %491 = arith.negf %490 : vector<2x128xf32>
      %492 = math.exp %491 : vector<2x128xf32>
      %cst_158 = arith.constant 1.000000e+00 : f32
      %493 = vector.broadcast %cst_158 : f32 to vector<2x128xf32>
      %494 = arith.addf %493, %492 : vector<2x128xf32>
      %495 = arith.divf %493, %494 : vector<2x128xf32>
      %496 = vector.extract_strided_slice %487 {offsets = [0, 128], sizes = [2, 128], strides = [1, 1]} : vector<2x384xf32> to vector<2x128xf32>
      %497 = vector.extract_strided_slice %459 {offsets = [0, 128], sizes = [2, 128], strides = [1, 1]} : vector<2x384xf32> to vector<2x128xf32>
      %498 = arith.addf %496, %497 : vector<2x128xf32>
      %499 = arith.negf %498 : vector<2x128xf32>
      %500 = math.exp %499 : vector<2x128xf32>
      %cst_159 = arith.constant 1.000000e+00 : f32
      %501 = vector.broadcast %cst_159 : f32 to vector<2x128xf32>
      %502 = arith.addf %501, %500 : vector<2x128xf32>
      %503 = arith.divf %501, %502 : vector<2x128xf32>
      %504 = vector.extract_strided_slice %487 {offsets = [0, 256], sizes = [2, 128], strides = [1, 1]} : vector<2x384xf32> to vector<2x128xf32>
      %505 = vector.extract_strided_slice %459 {offsets = [0, 256], sizes = [2, 128], strides = [1, 1]} : vector<2x384xf32> to vector<2x128xf32>
      %506 = arith.mulf %495, %505 : vector<2x128xf32>
      %507 = arith.addf %504, %506 : vector<2x128xf32>
      %508 = math.tanh %507 : vector<2x128xf32>
      %cst_160 = arith.constant 1.000000e+00 : f32
      %509 = vector.broadcast %cst_160 : f32 to vector<2x128xf32>
      %510 = arith.subf %509, %503 : vector<2x128xf32>
      %511 = arith.mulf %510, %508 : vector<2x128xf32>
      %512 = arith.mulf %503, %451 : vector<2x128xf32>
      %513 = arith.addf %511, %512 : vector<2x128xf32>
      %514 = arith.truncf %486 : vector<2x128xf32> to vector<2x128xbf16>
      %cst_161 = arith.constant dense<0.000000e+00> : vector<2x384xf32>
      %515 = tpu.matmul %514, %119, %cst_161 {dimension_numbers = #tpu.dot_dimension_numbers<[1], [0], [0], [1], [0, 0, 1, 1], [], []>} : vector<2x128xbf16>, vector<128x384xbf16>, vector<2x384xf32> -> vector<2x384xf32>
      %516 = vector.broadcast %121 : vector<1x384xf32> to vector<2x384xf32>
      %517 = arith.addf %515, %516 : vector<2x384xf32>
      %518 = arith.truncf %513 : vector<2x128xf32> to vector<2x128xbf16>
      %cst_162 = arith.constant dense<0.000000e+00> : vector<2x384xf32>
      %519 = tpu.matmul %518, %137, %cst_162 {dimension_numbers = #tpu.dot_dimension_numbers<[1], [0], [0], [1], [0, 0, 1, 1], [], []>} : vector<2x128xbf16>, vector<128x384xbf16>, vector<2x384xf32> -> vector<2x384xf32>
      %520 = vector.broadcast %139 : vector<1x384xf32> to vector<2x384xf32>
      %521 = arith.addf %519, %520 : vector<2x384xf32>
      %522 = vector.extract_strided_slice %117 {offsets = [12, 0], sizes = [2, 384], strides = [1, 1]} : vector<14x384xf32> to vector<2x384xf32>
      %523 = vector.extract_strided_slice %522 {offsets = [0, 0], sizes = [2, 128], strides = [1, 1]} : vector<2x384xf32> to vector<2x128xf32>
      %524 = vector.extract_strided_slice %517 {offsets = [0, 0], sizes = [2, 128], strides = [1, 1]} : vector<2x384xf32> to vector<2x128xf32>
      %525 = arith.addf %523, %524 : vector<2x128xf32>
      %526 = arith.negf %525 : vector<2x128xf32>
      %527 = math.exp %526 : vector<2x128xf32>
      %cst_163 = arith.constant 1.000000e+00 : f32
      %528 = vector.broadcast %cst_163 : f32 to vector<2x128xf32>
      %529 = arith.addf %528, %527 : vector<2x128xf32>
      %530 = arith.divf %528, %529 : vector<2x128xf32>
      %531 = vector.extract_strided_slice %522 {offsets = [0, 128], sizes = [2, 128], strides = [1, 1]} : vector<2x384xf32> to vector<2x128xf32>
      %532 = vector.extract_strided_slice %517 {offsets = [0, 128], sizes = [2, 128], strides = [1, 1]} : vector<2x384xf32> to vector<2x128xf32>
      %533 = arith.addf %531, %532 : vector<2x128xf32>
      %534 = arith.negf %533 : vector<2x128xf32>
      %535 = math.exp %534 : vector<2x128xf32>
      %cst_164 = arith.constant 1.000000e+00 : f32
      %536 = vector.broadcast %cst_164 : f32 to vector<2x128xf32>
      %537 = arith.addf %536, %535 : vector<2x128xf32>
      %538 = arith.divf %536, %537 : vector<2x128xf32>
      %539 = vector.extract_strided_slice %522 {offsets = [0, 256], sizes = [2, 128], strides = [1, 1]} : vector<2x384xf32> to vector<2x128xf32>
      %540 = vector.extract_strided_slice %517 {offsets = [0, 256], sizes = [2, 128], strides = [1, 1]} : vector<2x384xf32> to vector<2x128xf32>
      %541 = arith.mulf %530, %540 : vector<2x128xf32>
      %542 = arith.addf %539, %541 : vector<2x128xf32>
      %543 = math.tanh %542 : vector<2x128xf32>
      %cst_165 = arith.constant 1.000000e+00 : f32
      %544 = vector.broadcast %cst_165 : f32 to vector<2x128xf32>
      %545 = arith.subf %544, %538 : vector<2x128xf32>
      %546 = arith.mulf %545, %543 : vector<2x128xf32>
      %547 = arith.mulf %538, %486 : vector<2x128xf32>
      %548 = arith.addf %546, %547 : vector<2x128xf32>
      %549 = vector.extract_strided_slice %135 {offsets = [12, 0], sizes = [2, 384], strides = [1, 1]} : vector<14x384xf32> to vector<2x384xf32>
      %550 = vector.extract_strided_slice %549 {offsets = [0, 0], sizes = [2, 128], strides = [1, 1]} : vector<2x384xf32> to vector<2x128xf32>
      %551 = vector.extract_strided_slice %521 {offsets = [0, 0], sizes = [2, 128], strides = [1, 1]} : vector<2x384xf32> to vector<2x128xf32>
      %552 = arith.addf %550, %551 : vector<2x128xf32>
      %553 = arith.negf %552 : vector<2x128xf32>
      %554 = math.exp %553 : vector<2x128xf32>
      %cst_166 = arith.constant 1.000000e+00 : f32
      %555 = vector.broadcast %cst_166 : f32 to vector<2x128xf32>
      %556 = arith.addf %555, %554 : vector<2x128xf32>
      %557 = arith.divf %555, %556 : vector<2x128xf32>
      %558 = vector.extract_strided_slice %549 {offsets = [0, 128], sizes = [2, 128], strides = [1, 1]} : vector<2x384xf32> to vector<2x128xf32>
      %559 = vector.extract_strided_slice %521 {offsets = [0, 128], sizes = [2, 128], strides = [1, 1]} : vector<2x384xf32> to vector<2x128xf32>
      %560 = arith.addf %558, %559 : vector<2x128xf32>
      %561 = arith.negf %560 : vector<2x128xf32>
      %562 = math.exp %561 : vector<2x128xf32>
      %cst_167 = arith.constant 1.000000e+00 : f32
      %563 = vector.broadcast %cst_167 : f32 to vector<2x128xf32>
      %564 = arith.addf %563, %562 : vector<2x128xf32>
      %565 = arith.divf %563, %564 : vector<2x128xf32>
      %566 = vector.extract_strided_slice %549 {offsets = [0, 256], sizes = [2, 128], strides = [1, 1]} : vector<2x384xf32> to vector<2x128xf32>
      %567 = vector.extract_strided_slice %521 {offsets = [0, 256], sizes = [2, 128], strides = [1, 1]} : vector<2x384xf32> to vector<2x128xf32>
      %568 = arith.mulf %557, %567 : vector<2x128xf32>
      %569 = arith.addf %566, %568 : vector<2x128xf32>
      %570 = math.tanh %569 : vector<2x128xf32>
      %cst_168 = arith.constant 1.000000e+00 : f32
      %571 = vector.broadcast %cst_168 : f32 to vector<2x128xf32>
      %572 = arith.subf %571, %565 : vector<2x128xf32>
      %573 = arith.mulf %572, %570 : vector<2x128xf32>
      %574 = arith.mulf %565, %513 : vector<2x128xf32>
      %575 = arith.addf %573, %574 : vector<2x128xf32>
      %576 = tpu.concatenate %176, %238, %300, %362, %424, %486, %548 in 0 : vector<2x128xf32>, vector<2x128xf32>, vector<2x128xf32>, vector<2x128xf32>, vector<2x128xf32>, vector<2x128xf32>, vector<2x128xf32> -> vector<14x128xf32>
      %577 = arith.truncf %576 : vector<14x128xf32> to vector<14x128xbf16>
      %c0_169 = arith.constant 0 : index
      %c0_170 = arith.constant 0 : index
      %c0_171 = arith.constant 0 : index
      %578 = vector.load %arg12[%c0_169, %c0_170, %c0_171] : memref<2x14x128xbf16, #tpu.memory_space<vmem>>, vector<1x14x128xbf16>
      %579 = vector.shape_cast %578 : vector<1x14x128xbf16> to vector<14x128xbf16>
      %580 = vector.shape_cast %577 : vector<14x128xbf16> to vector<1x14x128xbf16>
      tpu.vector_store %arg12[%c0_169, %c0_170, %c0_171], %580 {strides = array<i32>} : memref<2x14x128xbf16, #tpu.memory_space<vmem>>, vector<1x14x128xbf16>,
      %cst_172 = arith.constant 0xFF800000 : f32
      %581 = vector.broadcast %cst_172 : f32 to vector<14x1xf32>
      %c0_173 = arith.constant 0 : index
      %c0_174 = arith.constant 0 : index
      %c0_175 = arith.constant 0 : index
      %582 = vector.load %arg13[%c0_173, %c0_174, %c0_175] : memref<2x14x1xf32, #tpu.memory_space<vmem>>, vector<1x14x1xf32>
      %583 = vector.shape_cast %582 : vector<1x14x1xf32> to vector<14x1xf32>
      %584 = vector.shape_cast %581 : vector<14x1xf32> to vector<1x14x1xf32>
      tpu.vector_store %arg13[%c0_173, %c0_174, %c0_175], %584 {strides = array<i32>} : memref<2x14x1xf32, #tpu.memory_space<vmem>>, vector<1x14x1xf32>,
      %cst_176 = arith.constant 0.000000e+00 : f32
      %585 = vector.broadcast %cst_176 : f32 to vector<14x1xf32>
      %c0_177 = arith.constant 0 : index
      %c0_178 = arith.constant 0 : index
      %c0_179 = arith.constant 0 : index
      %586 = vector.load %arg14[%c0_177, %c0_178, %c0_179] : memref<2x14x1xf32, #tpu.memory_space<vmem>>, vector<1x14x1xf32>
      %587 = vector.shape_cast %586 : vector<1x14x1xf32> to vector<14x1xf32>
      %588 = vector.shape_cast %585 : vector<14x1xf32> to vector<1x14x1xf32>
      tpu.vector_store %arg14[%c0_177, %c0_178, %c0_179], %588 {strides = array<i32>} : memref<2x14x1xf32, #tpu.memory_space<vmem>>, vector<1x14x1xf32>,
      %cst_180 = arith.constant 0.000000e+00 : f32
      %589 = vector.broadcast %cst_180 : f32 to vector<14x1xf32>
      %c0_181 = arith.constant 0 : index
      %c0_182 = arith.constant 0 : index
      %c0_183 = arith.constant 0 : index
      %590 = vector.load %arg15[%c0_181, %c0_182, %c0_183] : memref<2x14x1xf32, #tpu.memory_space<vmem>>, vector<1x14x1xf32>
      %591 = vector.shape_cast %590 : vector<1x14x1xf32> to vector<14x1xf32>
      %592 = vector.shape_cast %589 : vector<14x1xf32> to vector<1x14x1xf32>
      tpu.vector_store %arg15[%c0_181, %c0_182, %c0_183], %592 {strides = array<i32>} : memref<2x14x1xf32, #tpu.memory_space<vmem>>, vector<1x14x1xf32>,
      %593 = tpu.concatenate %203, %265, %327, %389, %451, %513, %575 in 0 : vector<2x128xf32>, vector<2x128xf32>, vector<2x128xf32>, vector<2x128xf32>, vector<2x128xf32>, vector<2x128xf32>, vector<2x128xf32> -> vector<14x128xf32>
      %594 = arith.truncf %593 : vector<14x128xf32> to vector<14x128xbf16>
      %c1_184 = arith.constant 1 : index
      %c0_185 = arith.constant 0 : index
      %c0_186 = arith.constant 0 : index
      %595 = vector.load %arg12[%c1_184, %c0_185, %c0_186] : memref<2x14x128xbf16, #tpu.memory_space<vmem>>, vector<1x14x128xbf16>
      %596 = vector.shape_cast %595 : vector<1x14x128xbf16> to vector<14x128xbf16>
      %597 = vector.shape_cast %594 : vector<14x128xbf16> to vector<1x14x128xbf16>
      tpu.vector_store %arg12[%c1_184, %c0_185, %c0_186], %597 {strides = array<i32>} : memref<2x14x128xbf16, #tpu.memory_space<vmem>>, vector<1x14x128xbf16>,
      %cst_187 = arith.constant 0xFF800000 : f32
      %598 = vector.broadcast %cst_187 : f32 to vector<14x1xf32>
      %c1_188 = arith.constant 1 : index
      %c0_189 = arith.constant 0 : index
      %c0_190 = arith.constant 0 : index
      %599 = vector.load %arg13[%c1_188, %c0_189, %c0_190] : memref<2x14x1xf32, #tpu.memory_space<vmem>>, vector<1x14x1xf32>
      %600 = vector.shape_cast %599 : vector<1x14x1xf32> to vector<14x1xf32>
      %601 = vector.shape_cast %598 : vector<14x1xf32> to vector<1x14x1xf32>
      tpu.vector_store %arg13[%c1_188, %c0_189, %c0_190], %601 {strides = array<i32>} : memref<2x14x1xf32, #tpu.memory_space<vmem>>, vector<1x14x1xf32>,
      %cst_191 = arith.constant 0.000000e+00 : f32
      %602 = vector.broadcast %cst_191 : f32 to vector<14x1xf32>
      %c1_192 = arith.constant 1 : index
      %c0_193 = arith.constant 0 : index
      %c0_194 = arith.constant 0 : index
      %603 = vector.load %arg14[%c1_192, %c0_193, %c0_194] : memref<2x14x1xf32, #tpu.memory_space<vmem>>, vector<1x14x1xf32>
      %604 = vector.shape_cast %603 : vector<1x14x1xf32> to vector<14x1xf32>
      %605 = vector.shape_cast %602 : vector<14x1xf32> to vector<1x14x1xf32>
      tpu.vector_store %arg14[%c1_192, %c0_193, %c0_194], %605 {strides = array<i32>} : memref<2x14x1xf32, #tpu.memory_space<vmem>>, vector<1x14x1xf32>,
      %cst_195 = arith.constant 0.000000e+00 : f32
      %606 = vector.broadcast %cst_195 : f32 to vector<14x1xf32>
      %c1_196 = arith.constant 1 : index
      %c0_197 = arith.constant 0 : index
      %c0_198 = arith.constant 0 : index
      %607 = vector.load %arg15[%c1_196, %c0_197, %c0_198] : memref<2x14x1xf32, #tpu.memory_space<vmem>>, vector<1x14x1xf32>
      %608 = vector.shape_cast %607 : vector<1x14x1xf32> to vector<14x1xf32>
      %609 = vector.shape_cast %606 : vector<14x1xf32> to vector<1x14x1xf32>
      tpu.vector_store %arg15[%c1_196, %c0_197, %c0_198], %609 {strides = array<i32>} : memref<2x14x1xf32, #tpu.memory_space<vmem>>, vector<1x14x1xf32>,
    } else {
    }
    %c128_i32 = arith.constant 128 : i32
    %3 = arith.muli %arg0, %c128_i32 : i32
    %c0 = arith.constant 0 : index
    %c0_1 = arith.constant 0 : index
    %c0_2 = arith.constant 0 : index
    %4 = vector.load %arg12[%c0, %c0_1, %c0_2] : memref<2x14x128xbf16, #tpu.memory_space<vmem>>, vector<1x14x128xbf16>
    %5 = vector.shape_cast %4 : vector<1x14x128xbf16> to vector<14x128xbf16>
    %c0_3 = arith.constant 0 : index
    %c0_4 = arith.constant 0 : index
    %c0_5 = arith.constant 0 : index
    %6 = vector.load %arg8[%c0_3, %c0_4, %c0_5] : memref<2x128x128xbf16, #tpu.memory_space<vmem>>, vector<1x128x128xbf16>
    %7 = vector.shape_cast %6 : vector<1x128x128xbf16> to vector<128x128xbf16>
    %cst = arith.constant dense<0.000000e+00> : vector<14x128xf32>
    %8 = tpu.matmul %5, %7, %cst {dimension_numbers = #tpu.dot_dimension_numbers<[1], [0], [0], [1], [0, 0, 1, 1], [], []>} : vector<14x128xbf16>, vector<128x128xbf16>, vector<14x128xf32> -> vector<14x128xf32>
    %c0_6 = arith.constant 0 : index
    %c0_7 = arith.constant 0 : index
    %c0_8 = arith.constant 0 : index
    %9 = vector.load %arg9[%c0_6, %c0_7, %c0_8] : memref<2x1x128xf32, #tpu.memory_space<vmem>>, vector<1x1x128xf32>
    %10 = vector.shape_cast %9 : vector<1x1x128xf32> to vector<1x128xf32>
    %11 = vector.broadcast %10 : vector<1x128xf32> to vector<14x128xf32>
    %12 = arith.addf %8, %11 : vector<14x128xf32>
    %c0_9 = arith.constant 0 : index
    %c0_10 = arith.constant 0 : index
    %c0_11 = arith.constant 0 : index
    %13 = vector.load %arg10[%c0_9, %c0_10, %c0_11] : memref<2x14x1xi32, #tpu.memory_space<vmem>>, vector<1x14x1xi32>
    %14 = vector.shape_cast %13 : vector<1x14x1xi32> to vector<14x1xi32>
    %15 = tpu.iota {dimensions = array<i32: 1>} : vector<14x128xi32>
    %16 = vector.broadcast %3 : i32 to vector<14x128xi32>
    %17 = arith.addi %15, %16 : vector<14x128xi32>
    %18 = vector.broadcast %14 : vector<14x1xi32> to vector<14x128xi32>
    %19 = arith.cmpi eq, %17, %18 : vector<14x128xi32>
    %c0_12 = arith.constant 0 : index
    %c0_13 = arith.constant 0 : index
    %c0_14 = arith.constant 0 : index
    %20 = vector.load %arg15[%c0_12, %c0_13, %c0_14] : memref<2x14x1xf32, #tpu.memory_space<vmem>>, vector<1x14x1xf32>
    %21 = vector.shape_cast %20 : vector<1x14x1xf32> to vector<14x1xf32>
    %cst_15 = arith.constant 0.000000e+00 : f32
    %22 = vector.broadcast %cst_15 : f32 to vector<14x128xf32>
    %23 = arith.select %19, %12, %22 : vector<14x128xi1>, vector<14x128xf32>
    %cst_16 = arith.constant dense<0.000000e+00> : vector<14xf32>
    %24 = vector.multi_reduction <add>, %23, %cst_16 [1] : vector<14x128xf32> to vector<14xf32>
    %25 = vector.shape_cast %24 : vector<14xf32> to vector<14x1xf32>
    %26 = arith.addf %21, %25 : vector<14x1xf32>
    %c0_17 = arith.constant 0 : index
    %c0_18 = arith.constant 0 : index
    %c0_19 = arith.constant 0 : index
    %27 = vector.load %arg15[%c0_17, %c0_18, %c0_19] : memref<2x14x1xf32, #tpu.memory_space<vmem>>, vector<1x14x1xf32>
    %28 = vector.shape_cast %27 : vector<1x14x1xf32> to vector<14x1xf32>
    %29 = vector.shape_cast %26 : vector<14x1xf32> to vector<1x14x1xf32>
    tpu.vector_store %arg15[%c0_17, %c0_18, %c0_19], %29 {strides = array<i32>} : memref<2x14x1xf32, #tpu.memory_space<vmem>>, vector<1x14x1xf32>,
    %c0_20 = arith.constant 0 : index
    %c0_21 = arith.constant 0 : index
    %c0_22 = arith.constant 0 : index
    %30 = vector.load %arg13[%c0_20, %c0_21, %c0_22] : memref<2x14x1xf32, #tpu.memory_space<vmem>>, vector<1x14x1xf32>
    %31 = vector.shape_cast %30 : vector<1x14x1xf32> to vector<14x1xf32>
    %cst_23 = arith.constant dense<0xFF800000> : vector<14xf32>
    %32 = vector.multi_reduction <maximumf>, %12, %cst_23 [1] : vector<14x128xf32> to vector<14xf32>
    %33 = vector.shape_cast %32 : vector<14xf32> to vector<14x1xf32>
    %34 = arith.maximumf %31, %33 : vector<14x1xf32>
    %c0_24 = arith.constant 0 : index
    %c0_25 = arith.constant 0 : index
    %c0_26 = arith.constant 0 : index
    %35 = vector.load %arg14[%c0_24, %c0_25, %c0_26] : memref<2x14x1xf32, #tpu.memory_space<vmem>>, vector<1x14x1xf32>
    %36 = vector.shape_cast %35 : vector<1x14x1xf32> to vector<14x1xf32>
    %37 = arith.subf %31, %34 : vector<14x1xf32>
    %38 = math.exp %37 : vector<14x1xf32>
    %39 = arith.mulf %36, %38 : vector<14x1xf32>
    %40 = vector.broadcast %34 : vector<14x1xf32> to vector<14x128xf32>
    %41 = arith.subf %12, %40 : vector<14x128xf32>
    %42 = math.exp %41 : vector<14x128xf32>
    %cst_27 = arith.constant dense<0.000000e+00> : vector<14xf32>
    %43 = vector.multi_reduction <add>, %42, %cst_27 [1] : vector<14x128xf32> to vector<14xf32>
    %44 = vector.shape_cast %43 : vector<14xf32> to vector<14x1xf32>
    %45 = arith.addf %39, %44 : vector<14x1xf32>
    %c0_28 = arith.constant 0 : index
    %c0_29 = arith.constant 0 : index
    %c0_30 = arith.constant 0 : index
    %46 = vector.load %arg14[%c0_28, %c0_29, %c0_30] : memref<2x14x1xf32, #tpu.memory_space<vmem>>, vector<1x14x1xf32>
    %47 = vector.shape_cast %46 : vector<1x14x1xf32> to vector<14x1xf32>
    %48 = vector.shape_cast %45 : vector<14x1xf32> to vector<1x14x1xf32>
    tpu.vector_store %arg14[%c0_28, %c0_29, %c0_30], %48 {strides = array<i32>} : memref<2x14x1xf32, #tpu.memory_space<vmem>>, vector<1x14x1xf32>,
    %c0_31 = arith.constant 0 : index
    %c0_32 = arith.constant 0 : index
    %c0_33 = arith.constant 0 : index
    %49 = vector.load %arg13[%c0_31, %c0_32, %c0_33] : memref<2x14x1xf32, #tpu.memory_space<vmem>>, vector<1x14x1xf32>
    %50 = vector.shape_cast %49 : vector<1x14x1xf32> to vector<14x1xf32>
    %51 = vector.shape_cast %34 : vector<14x1xf32> to vector<1x14x1xf32>
    tpu.vector_store %arg13[%c0_31, %c0_32, %c0_33], %51 {strides = array<i32>} : memref<2x14x1xf32, #tpu.memory_space<vmem>>, vector<1x14x1xf32>,
    %c1 = arith.constant 1 : index
    %c0_34 = arith.constant 0 : index
    %c0_35 = arith.constant 0 : index
    %52 = vector.load %arg12[%c1, %c0_34, %c0_35] : memref<2x14x128xbf16, #tpu.memory_space<vmem>>, vector<1x14x128xbf16>
    %53 = vector.shape_cast %52 : vector<1x14x128xbf16> to vector<14x128xbf16>
    %c1_36 = arith.constant 1 : index
    %c0_37 = arith.constant 0 : index
    %c0_38 = arith.constant 0 : index
    %54 = vector.load %arg8[%c1_36, %c0_37, %c0_38] : memref<2x128x128xbf16, #tpu.memory_space<vmem>>, vector<1x128x128xbf16>
    %55 = vector.shape_cast %54 : vector<1x128x128xbf16> to vector<128x128xbf16>
    %cst_39 = arith.constant dense<0.000000e+00> : vector<14x128xf32>
    %56 = tpu.matmul %53, %55, %cst_39 {dimension_numbers = #tpu.dot_dimension_numbers<[1], [0], [0], [1], [0, 0, 1, 1], [], []>} : vector<14x128xbf16>, vector<128x128xbf16>, vector<14x128xf32> -> vector<14x128xf32>
    %c1_40 = arith.constant 1 : index
    %c0_41 = arith.constant 0 : index
    %c0_42 = arith.constant 0 : index
    %57 = vector.load %arg9[%c1_40, %c0_41, %c0_42] : memref<2x1x128xf32, #tpu.memory_space<vmem>>, vector<1x1x128xf32>
    %58 = vector.shape_cast %57 : vector<1x1x128xf32> to vector<1x128xf32>
    %59 = vector.broadcast %58 : vector<1x128xf32> to vector<14x128xf32>
    %60 = arith.addf %56, %59 : vector<14x128xf32>
    %c1_43 = arith.constant 1 : index
    %c0_44 = arith.constant 0 : index
    %c0_45 = arith.constant 0 : index
    %61 = vector.load %arg10[%c1_43, %c0_44, %c0_45] : memref<2x14x1xi32, #tpu.memory_space<vmem>>, vector<1x14x1xi32>
    %62 = vector.shape_cast %61 : vector<1x14x1xi32> to vector<14x1xi32>
    %63 = tpu.iota {dimensions = array<i32: 1>} : vector<14x128xi32>
    %64 = vector.broadcast %3 : i32 to vector<14x128xi32>
    %65 = arith.addi %63, %64 : vector<14x128xi32>
    %66 = vector.broadcast %62 : vector<14x1xi32> to vector<14x128xi32>
    %67 = arith.cmpi eq, %65, %66 : vector<14x128xi32>
    %c1_46 = arith.constant 1 : index
    %c0_47 = arith.constant 0 : index
    %c0_48 = arith.constant 0 : index
    %68 = vector.load %arg15[%c1_46, %c0_47, %c0_48] : memref<2x14x1xf32, #tpu.memory_space<vmem>>, vector<1x14x1xf32>
    %69 = vector.shape_cast %68 : vector<1x14x1xf32> to vector<14x1xf32>
    %cst_49 = arith.constant 0.000000e+00 : f32
    %70 = vector.broadcast %cst_49 : f32 to vector<14x128xf32>
    %71 = arith.select %67, %60, %70 : vector<14x128xi1>, vector<14x128xf32>
    %cst_50 = arith.constant dense<0.000000e+00> : vector<14xf32>
    %72 = vector.multi_reduction <add>, %71, %cst_50 [1] : vector<14x128xf32> to vector<14xf32>
    %73 = vector.shape_cast %72 : vector<14xf32> to vector<14x1xf32>
    %74 = arith.addf %69, %73 : vector<14x1xf32>
    %c1_51 = arith.constant 1 : index
    %c0_52 = arith.constant 0 : index
    %c0_53 = arith.constant 0 : index
    %75 = vector.load %arg15[%c1_51, %c0_52, %c0_53] : memref<2x14x1xf32, #tpu.memory_space<vmem>>, vector<1x14x1xf32>
    %76 = vector.shape_cast %75 : vector<1x14x1xf32> to vector<14x1xf32>
    %77 = vector.shape_cast %74 : vector<14x1xf32> to vector<1x14x1xf32>
    tpu.vector_store %arg15[%c1_51, %c0_52, %c0_53], %77 {strides = array<i32>} : memref<2x14x1xf32, #tpu.memory_space<vmem>>, vector<1x14x1xf32>,
    %c1_54 = arith.constant 1 : index
    %c0_55 = arith.constant 0 : index
    %c0_56 = arith.constant 0 : index
    %78 = vector.load %arg13[%c1_54, %c0_55, %c0_56] : memref<2x14x1xf32, #tpu.memory_space<vmem>>, vector<1x14x1xf32>
    %79 = vector.shape_cast %78 : vector<1x14x1xf32> to vector<14x1xf32>
    %cst_57 = arith.constant dense<0xFF800000> : vector<14xf32>
    %80 = vector.multi_reduction <maximumf>, %60, %cst_57 [1] : vector<14x128xf32> to vector<14xf32>
    %81 = vector.shape_cast %80 : vector<14xf32> to vector<14x1xf32>
    %82 = arith.maximumf %79, %81 : vector<14x1xf32>
    %c1_58 = arith.constant 1 : index
    %c0_59 = arith.constant 0 : index
    %c0_60 = arith.constant 0 : index
    %83 = vector.load %arg14[%c1_58, %c0_59, %c0_60] : memref<2x14x1xf32, #tpu.memory_space<vmem>>, vector<1x14x1xf32>
    %84 = vector.shape_cast %83 : vector<1x14x1xf32> to vector<14x1xf32>
    %85 = arith.subf %79, %82 : vector<14x1xf32>
    %86 = math.exp %85 : vector<14x1xf32>
    %87 = arith.mulf %84, %86 : vector<14x1xf32>
    %88 = vector.broadcast %82 : vector<14x1xf32> to vector<14x128xf32>
    %89 = arith.subf %60, %88 : vector<14x128xf32>
    %90 = math.exp %89 : vector<14x128xf32>
    %cst_61 = arith.constant dense<0.000000e+00> : vector<14xf32>
    %91 = vector.multi_reduction <add>, %90, %cst_61 [1] : vector<14x128xf32> to vector<14xf32>
    %92 = vector.shape_cast %91 : vector<14xf32> to vector<14x1xf32>
    %93 = arith.addf %87, %92 : vector<14x1xf32>
    %c1_62 = arith.constant 1 : index
    %c0_63 = arith.constant 0 : index
    %c0_64 = arith.constant 0 : index
    %94 = vector.load %arg14[%c1_62, %c0_63, %c0_64] : memref<2x14x1xf32, #tpu.memory_space<vmem>>, vector<1x14x1xf32>
    %95 = vector.shape_cast %94 : vector<1x14x1xf32> to vector<14x1xf32>
    %96 = vector.shape_cast %93 : vector<14x1xf32> to vector<1x14x1xf32>
    tpu.vector_store %arg14[%c1_62, %c0_63, %c0_64], %96 {strides = array<i32>} : memref<2x14x1xf32, #tpu.memory_space<vmem>>, vector<1x14x1xf32>,
    %c1_65 = arith.constant 1 : index
    %c0_66 = arith.constant 0 : index
    %c0_67 = arith.constant 0 : index
    %97 = vector.load %arg13[%c1_65, %c0_66, %c0_67] : memref<2x14x1xf32, #tpu.memory_space<vmem>>, vector<1x14x1xf32>
    %98 = vector.shape_cast %97 : vector<1x14x1xf32> to vector<14x1xf32>
    %99 = vector.shape_cast %82 : vector<14x1xf32> to vector<1x14x1xf32>
    tpu.vector_store %arg13[%c1_65, %c0_66, %c0_67], %99 {strides = array<i32>} : memref<2x14x1xf32, #tpu.memory_space<vmem>>, vector<1x14x1xf32>,
    %c1_i32 = arith.constant 1 : i32
    %100 = arith.cmpi eq, %arg0, %c1_i32 : i32
    %101 = arith.extui %100 : i1 to i32
    %c0_i32_68 = arith.constant 0 : i32
    %102 = arith.cmpi ne, %101, %c0_i32_68 : i32
    scf.if %102 {
      %c0_69 = arith.constant 0 : index
      %c0_70 = arith.constant 0 : index
      %c0_71 = arith.constant 0 : index
      %103 = vector.load %arg13[%c0_69, %c0_70, %c0_71] : memref<2x14x1xf32, #tpu.memory_space<vmem>>, vector<1x14x1xf32>
      %104 = vector.shape_cast %103 : vector<1x14x1xf32> to vector<14x1xf32>
      %c0_72 = arith.constant 0 : index
      %c0_73 = arith.constant 0 : index
      %c0_74 = arith.constant 0 : index
      %105 = vector.load %arg14[%c0_72, %c0_73, %c0_74] : memref<2x14x1xf32, #tpu.memory_space<vmem>>, vector<1x14x1xf32>
      %106 = vector.shape_cast %105 : vector<1x14x1xf32> to vector<14x1xf32>
      %107 = math.log %106 : vector<14x1xf32>
      %108 = arith.addf %104, %107 : vector<14x1xf32>
      %c0_75 = arith.constant 0 : index
      %c0_76 = arith.constant 0 : index
      %c0_77 = arith.constant 0 : index
      %109 = vector.load %arg10[%c0_75, %c0_76, %c0_77] : memref<2x14x1xi32, #tpu.memory_space<vmem>>, vector<1x14x1xi32>
      %110 = vector.shape_cast %109 : vector<1x14x1xi32> to vector<14x1xi32>
      %c0_i32_78 = arith.constant 0 : i32
      %111 = vector.broadcast %c0_i32_78 : i32 to vector<14x1xi32>
      %112 = arith.cmpi ne, %110, %111 : vector<14x1xi32>
      %113 = arith.extui %112 : vector<14x1xi1> to vector<14x1xi32>
      %114 = arith.sitofp %113 : vector<14x1xi32> to vector<14x1xf32>
      %c0_79 = arith.constant 0 : index
      %c0_80 = arith.constant 0 : index
      %c0_81 = arith.constant 0 : index
      %115 = vector.load %arg15[%c0_79, %c0_80, %c0_81] : memref<2x14x1xf32, #tpu.memory_space<vmem>>, vector<1x14x1xf32>
      %116 = vector.shape_cast %115 : vector<1x14x1xf32> to vector<14x1xf32>
      %117 = arith.subf %108, %116 : vector<14x1xf32>
      %118 = arith.mulf %114, %117 : vector<14x1xf32>
      %cst_82 = arith.constant dense<0.000000e+00> : vector<1xf32>
      %119 = vector.multi_reduction <add>, %118, %cst_82 [0] : vector<14x1xf32> to vector<1xf32>
      %120 = vector.shape_cast %119 : vector<1xf32> to vector<1x1xf32>
      %cst_83 = arith.constant dense<0.000000e+00> : vector<1xf32>
      %121 = vector.multi_reduction <add>, %114, %cst_83 [0] : vector<14x1xf32> to vector<1xf32>
      %122 = vector.shape_cast %121 : vector<1xf32> to vector<1x1xf32>
      %123 = arith.divf %120, %122 : vector<1x1xf32>
      %124 = vector.shape_cast %123 : vector<1x1xf32> to vector<1x1xf32>
      %125 = vector.broadcast %124 : vector<1x1xf32> to vector<1x128xf32>
      %c0_84 = arith.constant 0 : index
      %c0_85 = arith.constant 0 : index
      %c0_86 = arith.constant 0 : index
      %126 = vector.load %arg11[%c0_84, %c0_85, %c0_86] : memref<2x1x128xf32, #tpu.memory_space<vmem>>, vector<1x1x128xf32>
      %127 = vector.shape_cast %126 : vector<1x1x128xf32> to vector<1x128xf32>
      %128 = vector.shape_cast %125 : vector<1x128xf32> to vector<1x1x128xf32>
      tpu.vector_store %arg11[%c0_84, %c0_85, %c0_86], %128 {strides = array<i32>} : memref<2x1x128xf32, #tpu.memory_space<vmem>>, vector<1x1x128xf32>,
      %c1_87 = arith.constant 1 : index
      %c0_88 = arith.constant 0 : index
      %c0_89 = arith.constant 0 : index
      %129 = vector.load %arg13[%c1_87, %c0_88, %c0_89] : memref<2x14x1xf32, #tpu.memory_space<vmem>>, vector<1x14x1xf32>
      %130 = vector.shape_cast %129 : vector<1x14x1xf32> to vector<14x1xf32>
      %c1_90 = arith.constant 1 : index
      %c0_91 = arith.constant 0 : index
      %c0_92 = arith.constant 0 : index
      %131 = vector.load %arg14[%c1_90, %c0_91, %c0_92] : memref<2x14x1xf32, #tpu.memory_space<vmem>>, vector<1x14x1xf32>
      %132 = vector.shape_cast %131 : vector<1x14x1xf32> to vector<14x1xf32>
      %133 = math.log %132 : vector<14x1xf32>
      %134 = arith.addf %130, %133 : vector<14x1xf32>
      %c1_93 = arith.constant 1 : index
      %c0_94 = arith.constant 0 : index
      %c0_95 = arith.constant 0 : index
      %135 = vector.load %arg10[%c1_93, %c0_94, %c0_95] : memref<2x14x1xi32, #tpu.memory_space<vmem>>, vector<1x14x1xi32>
      %136 = vector.shape_cast %135 : vector<1x14x1xi32> to vector<14x1xi32>
      %c0_i32_96 = arith.constant 0 : i32
      %137 = vector.broadcast %c0_i32_96 : i32 to vector<14x1xi32>
      %138 = arith.cmpi ne, %136, %137 : vector<14x1xi32>
      %139 = arith.extui %138 : vector<14x1xi1> to vector<14x1xi32>
      %140 = arith.sitofp %139 : vector<14x1xi32> to vector<14x1xf32>
      %c1_97 = arith.constant 1 : index
      %c0_98 = arith.constant 0 : index
      %c0_99 = arith.constant 0 : index
      %141 = vector.load %arg15[%c1_97, %c0_98, %c0_99] : memref<2x14x1xf32, #tpu.memory_space<vmem>>, vector<1x14x1xf32>
      %142 = vector.shape_cast %141 : vector<1x14x1xf32> to vector<14x1xf32>
      %143 = arith.subf %134, %142 : vector<14x1xf32>
      %144 = arith.mulf %140, %143 : vector<14x1xf32>
      %cst_100 = arith.constant dense<0.000000e+00> : vector<1xf32>
      %145 = vector.multi_reduction <add>, %144, %cst_100 [0] : vector<14x1xf32> to vector<1xf32>
      %146 = vector.shape_cast %145 : vector<1xf32> to vector<1x1xf32>
      %cst_101 = arith.constant dense<0.000000e+00> : vector<1xf32>
      %147 = vector.multi_reduction <add>, %140, %cst_101 [0] : vector<14x1xf32> to vector<1xf32>
      %148 = vector.shape_cast %147 : vector<1xf32> to vector<1x1xf32>
      %149 = arith.divf %146, %148 : vector<1x1xf32>
      %150 = vector.shape_cast %149 : vector<1x1xf32> to vector<1x1xf32>
      %151 = vector.broadcast %150 : vector<1x1xf32> to vector<1x128xf32>
      %c1_102 = arith.constant 1 : index
      %c0_103 = arith.constant 0 : index
      %c0_104 = arith.constant 0 : index
      %152 = vector.load %arg11[%c1_102, %c0_103, %c0_104] : memref<2x1x128xf32, #tpu.memory_space<vmem>>, vector<1x1x128xf32>
      %153 = vector.shape_cast %152 : vector<1x1x128xf32> to vector<1x128xf32>
      %154 = vector.shape_cast %151 : vector<1x128xf32> to vector<1x1x128xf32>
      tpu.vector_store %arg11[%c1_102, %c0_103, %c0_104], %154 {strides = array<i32>} : memref<2x1x128xf32, #tpu.memory_space<vmem>>, vector<1x1x128xf32>,
    } else {
    }
    return
  }
  func.func @transform_0(%arg0: i32) -> (i32, i32, i32) {
    %c0_i32 = arith.constant 0 : i32
    %c0_i32_0 = arith.constant 0 : i32
    %c0_i32_1 = arith.constant 0 : i32
    %c0_i32_2 = arith.constant 0 : i32
    return %c0_i32, %c0_i32_0, %c0_i32_1 : i32, i32, i32
  }
  func.func @transform_1(%arg0: i32) -> (i32, i32) {
    %c0_i32 = arith.constant 0 : i32
    %c0_i32_0 = arith.constant 0 : i32
    %c0_i32_1 = arith.constant 0 : i32
    return %c0_i32, %c0_i32_0 : i32, i32
  }
  func.func @transform_2(%arg0: i32) -> (i32, i32, i32) {
    %c0_i32 = arith.constant 0 : i32
    %c0_i32_0 = arith.constant 0 : i32
    %c0_i32_1 = arith.constant 0 : i32
    %c0_i32_2 = arith.constant 0 : i32
    return %c0_i32, %c0_i32_0, %c0_i32_1 : i32, i32, i32
  }
  func.func @transform_3(%arg0: i32) -> (i32, i32, i32) {
    %c0_i32 = arith.constant 0 : i32
    %c0_i32_0 = arith.constant 0 : i32
    %c0_i32_1 = arith.constant 0 : i32
    %c0_i32_2 = arith.constant 0 : i32
    return %c0_i32, %c0_i32_0, %c0_i32_1 : i32, i32, i32
  }
  func.func @transform_4(%arg0: i32) -> (i32, i32, i32) {
    %c0_i32 = arith.constant 0 : i32
    %c0_i32_0 = arith.constant 0 : i32
    %c0_i32_1 = arith.constant 0 : i32
    %c0_i32_2 = arith.constant 0 : i32
    return %c0_i32, %c0_i32_0, %c0_i32_1 : i32, i32, i32
  }
  func.func @transform_5(%arg0: i32) -> (i32, i32, i32) {
    %c0_i32 = arith.constant 0 : i32
    %c0_i32_0 = arith.constant 0 : i32
    %c0_i32_1 = arith.constant 0 : i32
    %c0_i32_2 = arith.constant 0 : i32
    return %c0_i32, %c0_i32_0, %c0_i32_1 : i32, i32, i32
  }
  func.func @transform_6(%arg0: i32) -> (i32, i32, i32) {
    %c0_i32 = arith.constant 0 : i32
    %c0_i32_0 = arith.constant 0 : i32
    %c0_i32_1 = arith.constant 0 : i32
    %c0_i32_2 = arith.constant 0 : i32
    return %c0_i32, %c0_i32_0, %c0_i32_1 : i32, i32, i32
  }
  func.func @transform_7(%arg0: i32) -> (i32, i32, i32) {
    %c0_i32 = arith.constant 0 : i32
    %c0_i32_0 = arith.constant 0 : i32
    %c0_i32_1 = arith.constant 0 : i32
    return %c0_i32, %c0_i32_0, %arg0 : i32, i32, i32
  }
  func.func @transform_8(%arg0: i32) -> (i32, i32, i32) {
    %c0_i32 = arith.constant 0 : i32
    %c0_i32_0 = arith.constant 0 : i32
    %c0_i32_1 = arith.constant 0 : i32
    return %c0_i32, %c0_i32_0, %arg0 : i32, i32, i32
  }
  func.func @transform_9(%arg0: i32) -> (i32, i32, i32) {
    %c0_i32 = arith.constant 0 : i32
    %c0_i32_0 = arith.constant 0 : i32
    %c0_i32_1 = arith.constant 0 : i32
    %c0_i32_2 = arith.constant 0 : i32
    return %c0_i32, %c0_i32_0, %c0_i32_1 : i32, i32, i32
  }
  func.func @transform_10(%arg0: i32) -> (i32, i32, i32) {
    %c0_i32 = arith.constant 0 : i32
    %c0_i32_0 = arith.constant 0 : i32
    %c0_i32_1 = arith.constant 0 : i32
    %c0_i32_2 = arith.constant 0 : i32
    return %c0_i32, %c0_i32_0, %c0_i32_1 : i32, i32, i32
  }
}

</mosaic_0001>

<bundles_post_ra>
// kernel: train_fn.2
= control target key start
LH: loop header
LB: loop body
LE: loop exit
PB: predicated region body
PF: predicated region fallthrough
CT: control target
= control target key end

     0   :  { %s2231_s1 = inlined_call_operand.vmem [shape: bf16[128,384], index: 1, kind: input, shape index: {}]   ;;  %s2232_s2 = inlined_call_operand.vmem [shape: bf16[128,384], index: 2, kind: input, shape index: {}]   ;;  %s2233_s0 = inlined_call_operand.vmem [shape: bf16[16,128], index: 0, kind: input, shape index: {}]   ;;  %s2234_s3 = inlined_call_operand.vmem [shape: f32[1,384], index: 3, kind: input, shape index: {}]   ;;  %s2235_s4 = inlined_call_operand.vmem [shape: f32[1,384], index: 4, kind: input, shape index: {}]   ;;  %s2236_s5 = inlined_call_operand.vmem [shape: f32[2,128], index: 5, kind: output, shape index: {}]  }
   0x1   :  { %v1287_v0 = vld [vmem:[%s2231_s1 + $0xa8] sm:$0xf]  ;;  %v1432_v1 = vld [vmem:[%s2231_s1 + $0xb0] sm:$0xf0]  ;;  %v1275_v5 = vld [vmem:[%s2231_s1 + $0x90] sm:$0xf] }
   0x2   :  { %v1383_v2 = vld [vmem:[%s2232_s2 + $0xa8] sm:$0xf]  ;;  %v1288_v3 = vor.u32 %v1432_v1, %v1287_v0  ;;  %v1456_v4 = vld [vmem:[%s2232_s2 + $0xb0] sm:$0xf0]  ;;  %v1429_v6 = vld [vmem:[%s2231_s1 + $0x98] sm:$0xf0] }
   0x3   :  { %v1588_v7 = vor.u32 %v1456_v4, %v1383_v2  ;;  %v1371_v8 = vld [vmem:[%s2232_s2 + $0x90] sm:$0xf]  ;;  %v1453_v9 = vld [vmem:[%s2232_s2 + $0x98] sm:$0xf0]  ;;  %v1431_v10 = vld [vmem:[%s2231_s1 + $0xac] sm:$0xf]  ;;  %v1276_v11 = vor.u32 %v1429_v6, %v1275_v5 }
   0x4   :  { %197 = vmatpush.bf16.msra.mxu0 %v1288_v3  ;;  %v1289_v12 = vld [vmem:[%s2231_s1 + $0xb4] sm:$0xf0]  ;;  %v1603_v13 = vor.u32 %v1453_v9, %v1371_v8  ;;  %v1426_v16 = vld [vmem:[%s2231_s1 + $0x80] sm:$0xf0]  ;;  %v1428_v17 = vld [vmem:[%s2231_s1 + $0x94] sm:$0xf] }
   0x5   :  { %407 = vmatpush.bf16.msra.mxu3 %v1588_v7  ;;  %v1292_v14 = vor.u32 %v1431_v10, %v1289_v12  ;;  %v1263_v15 = vld [vmem:[%s2231_s1 + $0x78] sm:$0xf]  ;;  %v1450_v19 = vld [vmem:[%s2232_s2 + $0x80] sm:$0xf0]  ;;  %v1277_v20 = vld [vmem:[%s2231_s1 + $0x9c] sm:$0xf0] }
   0x6   :  { %v1359_v18 = vld [vmem:[%s2232_s2 + $0x78] sm:$0xf]  ;;  %v1280_v21 = vor.u32 %v1428_v17, %v1277_v20  ;;  %v1264_v22 = vor.u32 %v1426_v16, %v1263_v15  ;;  %v1425_v23 = vld [vmem:[%s2231_s1 + $0x7c] sm:$0xf]  ;;  %v1265_v24 = vld [vmem:[%s2231_s1 + $0x84] sm:$0xf0] }
   0x7   :  { %211 = vmatpush.bf16.msra.mxu1 %v1292_v14  ;;  %v1630_v25 = vor.u32 %v1450_v19, %v1359_v18  ;;  %v1251_v26 = vld [vmem:[%s2231_s1 + $0x60] sm:$0xf]  ;;  %v1423_v27 = vld [vmem:[%s2231_s1 + $0x68] sm:$0xf0]  ;;  %v1268_v30 = vor.u32 %v1425_v23, %v1265_v24  ;;  %v1422_v32 = vld [vmem:[%s2231_s1 + $0x64] sm:$0xf] }
   0x8   :  { %198 = vmatpush.bf16.msra.mxu0 %v1276_v11  ;;  %v1347_v28 = vld [vmem:[%s2232_s2 + $0x60] sm:$0xf]  ;;  %v1447_v29 = vld [vmem:[%s2232_s2 + $0x68] sm:$0xf0]  ;;  %v1252_v31 = vor.u32 %v1423_v27, %v1251_v26  ;;  %v1253_v33 = vld [vmem:[%s2231_s1 + $0x6c] sm:$0xf0] }
   0x9   :  { %408 = vmatpush.bf16.msra.mxu3 %v1603_v13  ;;  %v1651_v34 = vor.u32 %v1447_v29, %v1347_v28  ;;  %v1239_v35 = vld [vmem:[%s2231_s1 + $0x48] sm:$0xf]  ;;  %v1420_v36 = vld [vmem:[%s2231_s1 + $0x50] sm:$0xf0]  ;;  %v1256_v39 = vor.u32 %v1422_v32, %v1253_v33  ;;  %v1227_v41 = vld [vmem:[%s2231_s1 + $0x30] sm:$0xf] }
   0xa   :  { %v1335_v37 = vld [vmem:[%s2232_s2 + $0x48] sm:$0xf]  ;;  %v1444_v38 = vld [vmem:[%s2232_s2 + $0x50] sm:$0xf0]  ;;  %v1240_v40 = vor.u32 %v1420_v36, %v1239_v35  ;;  %v1419_v42 = vld [vmem:[%s2231_s1 + $0x4c] sm:$0xf] }
   0xb   :  { %212 = vmatpush.bf16.msra.mxu1 %v1280_v21  ;;  %v1241_v43 = vld [vmem:[%s2231_s1 + $0x54] sm:$0xf0]  ;;  %v1675_v44 = vor.u32 %v1444_v38, %v1335_v37  ;;  %v1417_v45 = vld [vmem:[%s2231_s1 + $0x38] sm:$0xf0]  ;;  %v1295_v46 = vld [vmem:[%s2231_s1 + $0xb0] sm:$0xf] }
   0xc   :  { %199 = vmatpush.bf16.msra.mxu0 %v1264_v22  ;;  %v1433_v47 = vld [vmem:[%s2231_s1 + $0xb8] sm:$0xf0]  ;;  %v1323_v48 = vld [vmem:[%s2232_s2 + $0x30] sm:$0xf]  ;;  %v1244_v51 = vor.u32 %v1419_v42, %v1241_v43  ;;  %v1283_v52 = vld [vmem:[%s2231_s1 + $0x98] sm:$0xf]  ;;  %v1228_v54 = vor.u32 %v1417_v45, %v1227_v41 }
   0xd   :  { %409 = vmatpush.bf16.msra.mxu3 %v1630_v25  ;;  %v1441_v49 = vld [vmem:[%s2232_s2 + $0x38] sm:$0xf0]  ;;  %v1296_v50 = vor.u32 %v1433_v47, %v1295_v46  ;;  %v1430_v53 = vld [vmem:[%s2231_s1 + $0xa0] sm:$0xf0]  ;;  %v1215_v55 = vld [vmem:[%s2231_s1 + $0x18] sm:$0xf] }
   0xe   :  { %v1416_v56 = vld [vmem:[%s2231_s1 + $0x34] sm:$0xf]  ;;  %v1229_v57 = vld [vmem:[%s2231_s1 + $0x3c] sm:$0xf0]  ;;  %v1284_v58 = vor.u32 %v1430_v53, %v1283_v52  ;;  %v1708_v59 = vor.u32 %v1441_v49, %v1323_v48  ;;  %v1414_v60 = vld [vmem:[%s2231_s1 + $0x20] sm:$0xf0] }
   0xf   :  { %213 = vmatpush.bf16.msra.mxu1 %v1268_v30  ;;  %225 = vmatpush.bf16.msra.mxu2 %v1296_v50  ;;  %v1271_v61 = vld [vmem:[%s2231_s1 + $0x80] sm:$0xf]  ;;  %v1427_v62 = vld [vmem:[%s2231_s1 + $0x88] sm:$0xf0]  ;;  %v1311_v63 = vld [vmem:[%s2232_s2 + $0x18] sm:$0xf]  ;;  %v1232_v1 = vor.u32 %v1416_v56, %v1229_v57  ;;  %v1216_v3 = vor.u32 %v1414_v60, %v1215_v55 }
  0x10   :  { %200 = vmatpush.bf16.msra.mxu0 %v1252_v31  ;;  %v1438_v0 = vld [vmem:[%s2232_s2 + $0x20] sm:$0xf0]  ;;  %v1203_v2 = vld [vmem:[%s2231_s1] sm:$0xf]  ;;  %v1411_v4 = vld [vmem:[%s2231_s1 + $0x8] sm:$0xf0]  ;;  %v1272_v8 = vor.u32 %v1427_v62, %v1271_v61 }
  0x11   :  { %410 = vmatpush.bf16.msra.mxu3 %v1651_v34  ;;  %v1413_v5 = vld [vmem:[%s2231_s1 + $0x1c] sm:$0xf]  ;;  %v1217_v6 = vld [vmem:[%s2231_s1 + $0x24] sm:$0xf0]  ;;  %v1738_v9 = vor.u32 %v1438_v0, %v1311_v63  ;;  %v1299_v10 = vld [vmem:[%s2232_s2] sm:$0xf]  ;;  %v1204_v18 = vor.u32 %v1411_v4, %v1203_v2 }
  0x12   :  { %v1259_v11 = vld [vmem:[%s2231_s1 + $0x68] sm:$0xf]  ;;  %v1424_v12 = vld [vmem:[%s2231_s1 + $0x70] sm:$0xf0]  ;;  %v1435_v14 = vld [vmem:[%s2232_s2 + $0x8] sm:$0xf0]  ;;  %v1220_v17 = vor.u32 %v1413_v5, %v1217_v6 }
  0x13   :  { %214 = vmatpush.bf16.msra.mxu1 %v1256_v39  ;;  %226 = vmatpush.bf16.msra.mxu2 %v1284_v58  ;;  %v1455_v15 = vld [vmem:[%s2232_s2 + $0xac] sm:$0xf]  ;;  %v1385_v16 = vld [vmem:[%s2232_s2 + $0xb4] sm:$0xf0]  ;;  %v1410_v19 = vld [vmem:[%s2231_s1 + $0x4] sm:$0xf]  ;;  %v1260_v21 = vor.u32 %v1424_v12, %v1259_v11  ;;  %v1765_v22 = vor.u32 %v1435_v14, %v1299_v10 }
  0x14   :  { %201 = vmatpush.bf16.msra.mxu0 %v1240_v40  ;;  %v1205_v20 = vld [vmem:[%s2231_s1 + $0xc] sm:$0xf0]  ;;  %v1767_v23 = vor.u32 %v1455_v15, %v1385_v16  ;;  %v1452_v24 = vld [vmem:[%s2232_s2 + $0x94] sm:$0xf]  ;;  %v1457_v27 = vld [vmem:[%s2232_s2 + $0xb8] sm:$0xf0] }
  0x15   :  { %411 = vmatpush.bf16.msra.mxu3 %v1675_v44  ;;  %v1391_v26 = vld [vmem:[%s2232_s2 + $0xb0] sm:$0xf]  ;;  %v1373_v28 = vld [vmem:[%s2232_s2 + $0x9c] sm:$0xf0]  ;;  %v1421_v30 = vld [vmem:[%s2231_s1 + $0x58] sm:$0xf0]  ;;  %v1208_v31 = vor.u32 %v1410_v19, %v1205_v20 }
  0x16   :  { %v1247_v29 = vld [vmem:[%s2231_s1 + $0x50] sm:$0xf]  ;;  %v1790_v32 = vld [vmem:[%s2233_s0] sm:$0xff]  ;;  %v1792_v33 = vor.u32 %v1457_v27, %v1391_v26  ;;  %v1796_v35 = vor.u32 %v1452_v24, %v1373_v28  ;;  %v1449_v36 = vld [vmem:[%s2232_s2 + $0x7c] sm:$0xf]  ;;  %v1539_v43 = vmov 0  }
  0x17   :  { %215 = vmatpush.bf16.msra.mxu1 %v1244_v51  ;;  %227 = vmatpush.bf16.msra.mxu2 %v1272_v8  ;;  %v1379_v37 = vld [vmem:[%s2232_s2 + $0x98] sm:$0xf]  ;;  %v1454_v38 = vld [vmem:[%s2232_s2 + $0xa0] sm:$0xf0]  ;;  %v1248_v39 = vor.u32 %v1421_v30, %v1247_v29  ;;  %v1361_v40 = vld [vmem:[%s2232_s2 + $0x84] sm:$0xf0] }
  0x18   :  { %202 = vmatpush.bf16.msra.mxu0 %v1228_v54  ;;  %v1235_v41 = vld [vmem:[%s2231_s1 + $0x38] sm:$0xf]  ;;  %v1418_v42 = vld [vmem:[%s2231_s1 + $0x40] sm:$0xf0]  ;;  %v1820_v45 = vor.u32 %v1454_v38, %v1379_v37  ;;  %v1823_v46 = vor.u32 %v1449_v36, %v1361_v40  ;;  %v1367_v48 = vld [vmem:[%s2232_s2 + $0x80] sm:$0xf] }
  0x19   :  { %412 = vmatpush.bf16.msra.mxu3 %v1708_v59  ;;  %v1446_v47 = vld [vmem:[%s2232_s2 + $0x64] sm:$0xf]  ;;  %v1451_v49 = vld [vmem:[%s2232_s2 + $0x88] sm:$0xf0]  ;;  %v1236_v50 = vor.u32 %v1418_v42, %v1235_v41  ;;  %v1349_v51 = vld [vmem:[%s2232_s2 + $0x6c] sm:$0xf0] }
  0x1a   :  { %v1223_v52 = vld [vmem:[%s2231_s1 + $0x20] sm:$0xf]  ;;  %v1415_v53 = vld [vmem:[%s2231_s1 + $0x28] sm:$0xf0]  ;;  %v1846_v54 = vor.u32 %v1451_v49, %v1367_v48  ;;  %v1849_v55 = vor.u32 %v1446_v47, %v1349_v51  ;;  %v1355_v57 = vld [vmem:[%s2232_s2 + $0x68] sm:$0xf] }
  0x1b   :  { %216 = vmatpush.bf16.msra.mxu1 %v1232_v1  ;;  %228 = vmatpush.bf16.msra.mxu2 %v1260_v21  ;;  %v1443_v56 = vld [vmem:[%s2232_s2 + $0x4c] sm:$0xf]  ;;  %v1448_v58 = vld [vmem:[%s2232_s2 + $0x70] sm:$0xf0]  ;;  %v1224_v60 = vor.u32 %v1415_v53, %v1223_v52  ;;  %v1337_v61 = vld [vmem:[%s2232_s2 + $0x54] sm:$0xf0] }
  0x1c   :  { %203 = vmatpush.bf16.msra.mxu0 %v1216_v3  ;;  %v1211_v62 = vld [vmem:[%s2231_s1 + $0x8] sm:$0xf]  ;;  %v1412_v63 = vld [vmem:[%s2231_s1 + $0x10] sm:$0xf0]  ;;  %v1871_v0 = vor.u32 %v1448_v58, %v1355_v57  ;;  %v1874_v1 = vor.u32 %v1443_v56, %v1337_v61  ;;  %v1343_v2 = vld [vmem:[%s2232_s2 + $0x50] sm:$0xf] }
  0x1d   :  { %413 = vmatpush.bf16.msra.mxu3 %v1738_v9  ;;  %v1445_v3 = vld [vmem:[%s2232_s2 + $0x58] sm:$0xf0]  ;;  %v1212_v4 = vor.u32 %v1412_v63, %v1211_v62  ;;  %v1440_v5 = vld [vmem:[%s2232_s2 + $0x34] sm:$0xf]  ;;  %v1325_v6 = vld [vmem:[%s2232_s2 + $0x3c] sm:$0xf0] }
  0x1e   :  { %v1890_v8 = vor.u32 %v1445_v3, %v1343_v2  ;;  %v1893_v10 = vor.u32 %v1440_v5, %v1325_v6  ;;  %v1331_v11 = vld [vmem:[%s2232_s2 + $0x38] sm:$0xf]  ;;  %v1442_v12 = vld [vmem:[%s2232_s2 + $0x40] sm:$0xf0]  ;;  %v1437_v14 = vld [vmem:[%s2232_s2 + $0x1c] sm:$0xf] }
  0x1f   :  { %217 = vmatpush.bf16.msra.mxu1 %v1220_v17  ;;  %229 = vmatpush.bf16.msra.mxu2 %v1248_v39  ;;  %v1313_v15 = vld [vmem:[%s2232_s2 + $0x24] sm:$0xf0]  ;;  %v1910_v16 = vor.u32 %v1442_v12, %v1331_v11  ;;  %v1439_v19 = vld [vmem:[%s2232_s2 + $0x28] sm:$0xf0]  ;;  %v1434_v20 = vld [vmem:[%s2232_s2 + $0x4] sm:$0xf] }
  0x20   :  { %204 = vmatpush.bf16.msra.mxu0 %v1204_v18  ;;  %v1914_v17 = vor.u32 %v1437_v14, %v1313_v15  ;;  %v1319_v18 = vld [vmem:[%s2232_s2 + $0x20] sm:$0xf]  ;;  %v1301_v21 = vld [vmem:[%s2232_s2 + $0xc] sm:$0xf0]  ;;  %v1307_v27 = vld [vmem:[%s2232_s2 + $0x8] sm:$0xf] }
  0x21   :  { %414 = vmatpush.bf16.msra.mxu3 %v1765_v22  ;;  %v1931_v24 = vor.u32 %v1439_v19, %v1319_v18  ;;  %v1934_v26 = vor.u32 %v1434_v20, %v1301_v21  ;;  %v1436_v28 = vld [vmem:[%s2232_s2 + $0x10] sm:$0xf0]  ;;  %v2008_v30 = vld [vmem:[%s2234_s3] sm:$0x7] }
  0x22   :  { %v1945_v29 = vor.u32 %v1436_v28, %v1307_v27  ;;  %v57_v36 = vperm.slane %v2008_v30, 0 }
  0x23   :  { %218 = vmatpush.bf16.msra.mxu1 %v1208_v31  ;;  %205 = vmatmul.bf16.vlgmr.msra.gmra.mxu0 %v1790_v32 }
  0x24   :  { %420 = vmatpush.bf16.msrb.mxu0 %v1767_v23  ;;  %415 = vmatmul.bf16.vlgmr.msra.gmra.mxu3 %v1539_v43 }
  0x25   :  { %507 = vmatpush.bf16.msrb.mxu3 %v1767_v23  ;;  %230 = vmatpush.bf16.msra.mxu2 %v1236_v50 }
  0x26   :  { %219 = vmatmul.bf16.vlgmr.msra.gmra.mxu1 %v1790_v32 }
  0x27   :  { %433 = vmatpush.bf16.msrb.mxu1 %v1792_v33 }
  0x28   :  { %421 = vmatpush.bf16.msrb.mxu0 %v1796_v35 }
  0x29   :  { %508 = vmatpush.bf16.msrb.mxu3 %v1796_v35  ;;  %231 = vmatpush.bf16.msra.mxu2 %v1224_v60 }
  0x2b   :  { %434 = vmatpush.bf16.msrb.mxu1 %v1820_v45 }
  0x2c   :  { %422 = vmatpush.bf16.msrb.mxu0 %v1823_v46 }
  0x2d   :  { %509 = vmatpush.bf16.msrb.mxu3 %v1823_v46  ;;  %232 = vmatpush.bf16.msra.mxu2 %v1212_v4 }
  0x2f   :  { %435 = vmatpush.bf16.msrb.mxu1 %v1846_v54 }
  0x30   :  { %423 = vmatpush.bf16.msrb.mxu0 %v1849_v55  ;;  %233 = vmatmul.bf16.vlgmr.msra.gmra.mxu2 %v1790_v32  ;;  %v271_v32 = vld [vmem:[%s2235_s4] sm:$0x7] }
  0x31   :  { %510 = vmatpush.bf16.msrb.mxu3 %v1849_v55  ;;  %494 = vmatpush.bf16.msrb.mxu2 %v1588_v7  ;;  %v2014_v38 = vperm.slane %v271_v32, 0  ;;  %v2025_v57 = vperm.slane %v271_v32, 1  ;;  %v2031_v18 = vperm.slane %v271_v32, 2 }
  0x33   :  { %436 = vmatpush.bf16.msrb.mxu1 %v1871_v0 }
  0x34   :  { %424 = vmatpush.bf16.msrb.mxu0 %v1874_v1 }
  0x35   :  { %511 = vmatpush.bf16.msrb.mxu3 %v1874_v1  ;;  %495 = vmatpush.bf16.msrb.mxu2 %v1603_v13 }
  0x37   :  { %437 = vmatpush.bf16.msrb.mxu1 %v1890_v8 }
  0x38   :  { %425 = vmatpush.bf16.msrb.mxu0 %v1893_v10 }
  0x39   :  { %512 = vmatpush.bf16.msrb.mxu3 %v1893_v10  ;;  %496 = vmatpush.bf16.msrb.mxu2 %v1630_v25 }
  0x3b   :  { %438 = vmatpush.bf16.msrb.mxu1 %v1910_v16 }
  0x3c   :  { %426 = vmatpush.bf16.msrb.mxu0 %v1914_v17 }
  0x3d   :  { %513 = vmatpush.bf16.msrb.mxu3 %v1914_v17  ;;  %497 = vmatpush.bf16.msrb.mxu2 %v1651_v34 }
  0x3f   :  { %439 = vmatpush.bf16.msrb.mxu1 %v1931_v24 }
  0x40   :  { %427 = vmatpush.bf16.msrb.mxu0 %v1934_v26 }
  0x41   :  { %514 = vmatpush.bf16.msrb.mxu3 %v1934_v26  ;;  %498 = vmatpush.bf16.msrb.mxu2 %v1675_v44 }
  0x43   :  { %428 = vmatmul.bf16.vlgmr.msrb.gmra.mxu0 %v1539_v43  ;;  %440 = vmatpush.bf16.msrb.mxu1 %v1945_v29 }
  0x44   :  { %520 = vmatpush.bf16.msra.mxu0 %v1792_v33 }
  0x45   :  { %622 = vmatpush.bf16.msra.mxu3 %v1792_v33  ;;  %499 = vmatpush.bf16.msrb.mxu2 %v1708_v59 }
  0x46   :  { %441 = vmatmul.bf16.vlgmr.msrb.gmra.mxu1 %v1539_v43  ;;  %v58_v43 = vperm.slane %v2008_v30, 1 }
  0x47   :  { %596 = vmatpush.bf16.msra.mxu1 %v1588_v7 }
  0x48   :  { %521 = vmatpush.bf16.msra.mxu0 %v1820_v45 }
  0x49   :  { %623 = vmatpush.bf16.msra.mxu3 %v1820_v45  ;;  %500 = vmatpush.bf16.msrb.mxu2 %v1738_v9 }
  0x4b   :  { %597 = vmatpush.bf16.msra.mxu1 %v1603_v13 }
  0x4c   :  { %522 = vmatpush.bf16.msra.mxu0 %v1846_v54 }
  0x4d   :  { %624 = vmatpush.bf16.msra.mxu3 %v1846_v54  ;;  %501 = vmatpush.bf16.msrb.mxu2 %v1765_v22 }
  0x4f   :  { %598 = vmatpush.bf16.msra.mxu1 %v1630_v25 }
  0x50   :  { %523 = vmatpush.bf16.msra.mxu0 %v1871_v0 }
  0x51   :  { %625 = vmatpush.bf16.msra.mxu3 %v1871_v0  ;;  %609 = vmatpush.bf16.msra.mxu2 %v1767_v23 }
  0x53   :  { %599 = vmatpush.bf16.msra.mxu1 %v1651_v34 }
  0x54   :  { %524 = vmatpush.bf16.msra.mxu0 %v1890_v8 }
  0x55   :  { %626 = vmatpush.bf16.msra.mxu3 %v1890_v8  ;;  %610 = vmatpush.bf16.msra.mxu2 %v1796_v35 }
  0x57   :  { %600 = vmatpush.bf16.msra.mxu1 %v1675_v44 }
  0x58   :  { %525 = vmatpush.bf16.msra.mxu0 %v1910_v16 }
  0x59   :  { %627 = vmatpush.bf16.msra.mxu3 %v1910_v16  ;;  %611 = vmatpush.bf16.msra.mxu2 %v1823_v46 }
  0x5b   :  { %601 = vmatpush.bf16.msra.mxu1 %v1708_v59 }
  0x5c   :  { %526 = vmatpush.bf16.msra.mxu0 %v1931_v24 }
  0x5d   :  { %628 = vmatpush.bf16.msra.mxu3 %v1931_v24  ;;  %612 = vmatpush.bf16.msra.mxu2 %v1849_v55 }
  0x5f   :  { %602 = vmatpush.bf16.msra.mxu1 %v1738_v9 }
  0x60   :  { %527 = vmatpush.bf16.msra.mxu0 %v1945_v29 }
  0x61   :  { %629 = vmatpush.bf16.msra.mxu3 %v1945_v29  ;;  %613 = vmatpush.bf16.msra.mxu2 %v1874_v1 }
  0x63   :  { %603 = vmatpush.bf16.msra.mxu1 %v1765_v22 }
  0x64   :  { %698 = vmatpush.bf16.msrb.mxu0 %v1588_v7 }
  0x65   :  { %614 = vmatpush.bf16.msra.mxu2 %v1893_v10 }
  0x67   :  { %711 = vmatpush.bf16.msrb.mxu1 %v1767_v23 }
  0x68   :  { %699 = vmatpush.bf16.msrb.mxu0 %v1603_v13 }
  0x69   :  { %615 = vmatpush.bf16.msra.mxu2 %v1914_v17 }
  0x6b   :  { %712 = vmatpush.bf16.msrb.mxu1 %v1796_v35 }
  0x6c   :  { %700 = vmatpush.bf16.msrb.mxu0 %v1630_v25 }
  0x6d   :  { %616 = vmatpush.bf16.msra.mxu2 %v1934_v26 }
  0x6f   :  { %713 = vmatpush.bf16.msrb.mxu1 %v1823_v46 }
  0x70   :  { %701 = vmatpush.bf16.msrb.mxu0 %v1651_v34 }
  0x73   :  { %714 = vmatpush.bf16.msrb.mxu1 %v1849_v55 }
  0x74   :  { %702 = vmatpush.bf16.msrb.mxu0 %v1675_v44 }
  0x77   :  { %715 = vmatpush.bf16.msrb.mxu1 %v1874_v1 }
  0x78   :  { %703 = vmatpush.bf16.msrb.mxu0 %v1708_v59 }
  0x7b   :  { %716 = vmatpush.bf16.msrb.mxu1 %v1893_v10 }
  0x7c   :  { %704 = vmatpush.bf16.msrb.mxu0 %v1738_v9 }
  0x7f   :  { %717 = vmatpush.bf16.msrb.mxu1 %v1914_v17 }
  0x80   :  { %705 = vmatpush.bf16.msrb.mxu0 %v1765_v22 }
  0x83   :  { %718 = vmatpush.bf16.msrb.mxu1 %v1934_v26 }
  0xa0   :  { %v206_v31 = vpop.f32.mrf.mxu0 }
  0xa1   :  { %v2016_v39 = vadd.f32 %v206_v31, %v57_v36 }
  0xa3   :  { %v220_v37 = vpop.f32.mrf.mxu1 }
  0xa4   :  { %v2027_v58 = vadd.f32 %v220_v37, %v58_v43 }
  0xa7   :  { %v416_v40 = vpop.f32.mrf.mxu3 }
  0xa8   :  { %v417_v41 = vadd.f32 %v416_v40, %v2014_v38  ;;  %v208_v42 = vpop.f32.mrf.mxu0 }
  0xa9   :  { %v2020_v47 = vadd.f32 %v208_v42, %v57_v36  ;;  %v59_v36 = vperm.slane %v2008_v30, 2 }
  0xaa   :  { %v446_v48 = vadd.f32 %v417_v41, %v2016_v39 }
  0xab   :  { %v222_v49 = vpop.f32.mrf.mxu1 }
  0xac   :  { %v1393_v50 = vmul.f32 -1.442695, %v446_v48  ;;  %v2023_v51 = vadd.f32 %v222_v49, %v58_v43 }
  0xae   :  { %1459 = vpow2.f32 %v1393_v50 }
  0xaf   :  { %v418_v52 = vpop.f32.mrf.mxu3 }
  0xb3   :  { %v234_v40 = vpop.f32.mrf.mxu2 }
  0xb4   :  { %v1460_v53 = vpop.eup %1459  ;;  %v2037_v42 = vadd.f32 %v234_v40, %v59_v36 }
  0xb5   :  { %v450_v56 = vadd.f32 1.0, %v1460_v53 }
  0xb7   :  { %1461 = vrcp.f32 %v450_v56  ;;  %vm456_vm0 = vweird.f32 %v450_v56  ;;  %v462_v14 = vand.u32 2147483648, %v450_v56  ;;  %v460_v19 = vand.u32 2147483647, %v450_v56 }
  0xb9   :  { %v463_v28 = vor.u32 1.1754944e-38, %v462_v14  ;;  %vm461_vm3 = vcmp.eq.f32.partialorder %v460_v19, 8.507059e+37 }
  0xbd   :  { %v1462_v60 = vpop.eup %1461 }
  0xbe   :  { %v452_v63 = vmul.f32 %v1462_v60, %v450_v56  ;;  %vm457_vm1 = vweird.f32 %v1462_v60 }
  0xbf   :  { %vm458_vm2 = vmor %vm456_vm0, %vm457_vm1 }
  0xc0   :  { %v429_v61 = vpop.f32.mrf.mxu0  ;;  %v453_v4 = vsub.f32 1.0, %v452_v63 }
  0xc1   :  { %v430_v62 = vadd.f32 %v429_v61, %v2025_v57 }
  0xc2   :  { %v454_v6 = vmul.f32 %v1462_v60, %v453_v4 }
  0xc3   :  { %v466_v2 = vadd.f32 %v430_v62, %v2027_v58  ;;  %v442_v3 = vpop.f32.mrf.mxu1 }
  0xc4   :  { %v455_v12 = vadd.f32 %v1462_v60, %v454_v6  ;;  %v443_v31 = vadd.f32 %v442_v3, %v2031_v18 }
  0xc5   :  { %v1394_v5 = vmul.f32 -1.442695, %v466_v2 }
  0xc6   :  { %v459_v27 = vsel %vm458_vm2, %v1462_v60, %v455_v12 }
  0xc7   :  { %1463 = vpow2.f32 %v1394_v5  ;;  %v464_v37 = vsel %vm461_vm3, %v463_v28, %v459_v27 }
  0xc8   :  { %v431_v11 = vpop.f32.mrf.mxu0  ;;  %v486_v41 = vmul.f32 %v464_v37, %v443_v31 }
  0xc9   :  { %v2068_v11 = vpop.f32.mrf.mxu2 }
  0xca   :  { %v487_v48 = vadd.f32 %v486_v41, %v2037_v42 }
  0xcb   :  { %v444_v15 = vpop.f32.mrf.mxu1 }
  0xcd   :  { %v1464_v20 = vpop.eup %1463 }
  0xce   :  { %v470_v21 = vadd.f32 1.0, %v1464_v20 }
  0xd0   :  { %1465 = vrcp.f32 %v470_v21  ;;  %v482_v50 = vand.u32 2147483648, %v470_v21  ;;  %v480_v53 = vand.u32 2147483647, %v470_v21  ;;  %vm476_vm5 = vweird.f32 %v470_v21 }
  0xd1   :  { %1467 = vtanh.f32 %v487_v48 }
  0xd2   :  { %v483_v60 = vor.u32 1.1754944e-38, %v482_v50  ;;  %vm481_vm7 = vcmp.eq.f32.partialorder %v480_v53, 8.507059e+37 }
  0xd6   :  { %v1466_v32 = vpop.eup %1465 }
  0xd7   :  { %v472_v43 = vmul.f32 %v1466_v32, %v470_v21  ;;  %vm477_vm4 = vweird.f32 %v1466_v32  ;;  %v1468_v2 = vpop.eup %1467 }
  0xd8   :  { %vm478_vm6 = vmor %vm476_vm5, %vm477_vm4 }
  0xd9   :  { %v473_v49 = vsub.f32 1.0, %v472_v43 }
  0xdb   :  { %v474_v52 = vmul.f32 %v1466_v32, %v473_v49 }
  0xdd   :  { %v475_v56 = vadd.f32 %v1466_v32, %v474_v52 }
  0xdf   :  { %v479_v61 = vsel %vm478_vm6, %v1466_v32, %v475_v56 }
  0xe0   :  { %v484_v62 = vsel %vm481_vm7, %v483_v60, %v479_v61 }
  0xe1   :  { %v489_v63 = vsub.f32 1.0, %v484_v62  ;;  %v491_v4 = vmul.f32 0.0, %v484_v62 }
  0xe3   :  { %v490_v3 = vmul.f32 %v1468_v2, %v489_v63 }
  0xe5   :  { %v2040_v5 = vadd.f32 %v491_v4, %v490_v3 }
  0xe7   :  { %v493_v6 = vpack.c.bf16 %v2040_v5, %v2040_v5 }
  0xe9   :  { %502 = vmatmul.bf16.vlgmr.msrb.gmra.mxu2 %v493_v6  ;;  %515 = vmatmul.bf16.vlgmr.msrb.gmra.mxu3 %v493_v6 }
  0xea   :  { %528 = vmatmul.bf16.vlgmr.msra.gmra.mxu0 %v493_v6  ;;  %724 = vmatpush.bf16.msrb.mxu2 %v1792_v33 }
  0xeb   :  { %800 = vmatpush.bf16.msrb.mxu3 %v1588_v7  ;;  %813 = vmatpush.bf16.msra.mxu0 %v1767_v23 }
  0xee   :  { %725 = vmatpush.bf16.msrb.mxu2 %v1820_v45 }
  0xef   :  { %801 = vmatpush.bf16.msrb.mxu3 %v1603_v13  ;;  %814 = vmatpush.bf16.msra.mxu0 %v1796_v35 }
  0xf2   :  { %726 = vmatpush.bf16.msrb.mxu2 %v1846_v54 }
  0xf3   :  { %802 = vmatpush.bf16.msrb.mxu3 %v1630_v25  ;;  %815 = vmatpush.bf16.msra.mxu0 %v1823_v46 }
  0xf6   :  { %727 = vmatpush.bf16.msrb.mxu2 %v1871_v0 }
  0xf7   :  { %803 = vmatpush.bf16.msrb.mxu3 %v1651_v34  ;;  %816 = vmatpush.bf16.msra.mxu0 %v1849_v55 }
  0xfa   :  { %728 = vmatpush.bf16.msrb.mxu2 %v1890_v8 }
  0xfb   :  { %804 = vmatpush.bf16.msrb.mxu3 %v1675_v44  ;;  %817 = vmatpush.bf16.msra.mxu0 %v1874_v1 }
  0xfe   :  { %729 = vmatpush.bf16.msrb.mxu2 %v1910_v16 }
  0xff   :  { %805 = vmatpush.bf16.msrb.mxu3 %v1708_v59  ;;  %818 = vmatpush.bf16.msra.mxu0 %v1893_v10 }
 0x102   :  { %730 = vmatpush.bf16.msrb.mxu2 %v1931_v24 }
 0x103   :  { %806 = vmatpush.bf16.msrb.mxu3 %v1738_v9  ;;  %819 = vmatpush.bf16.msra.mxu0 %v1914_v17 }
 0x106   :  { %731 = vmatpush.bf16.msrb.mxu2 %v1945_v29 }
 0x107   :  { %807 = vmatpush.bf16.msrb.mxu3 %v1765_v22  ;;  %820 = vmatpush.bf16.msra.mxu0 %v1934_v26 }
 0x167   :  { %v529_v12 = vpop.f32.mrf.mxu0 }
 0x168   :  { %v530_v3 = vadd.f32 %v529_v12, %v2031_v18 }
 0x16c   :  { %v503_v14 = vpop.f32.mrf.mxu2  ;;  %v516_v15 = vpop.f32.mrf.mxu3 }
 0x16d   :  { %v504_v19 = vadd.f32 %v503_v14, %v2014_v38  ;;  %v517_v20 = vadd.f32 %v516_v15, %v2025_v57 }
 0x16f   :  { %v534_v21 = vrot.slane %v504_v19, 6  ;;  %v557_v27 = vrot.slane %v517_v20, 6  ;;  %v531_v28 = vpop.f32.mrf.mxu0  ;;  %v580_v20 = vrot.slane %v530_v3, 6 }
 0x171   :  { %v536_v31 = vadd.f32 %v534_v21, %v2016_v39  ;;  %v559_v37 = vadd.f32 %v557_v27, %v2027_v58 }
 0x173   :  { %v1395_v40 = vmul.f32 -1.442695, %v536_v31  ;;  %v1396_v41 = vmul.f32 -1.442695, %v559_v37 }
 0x174   :  { %v505_v32 = vpop.f32.mrf.mxu2  ;;  %v518_v43 = vpop.f32.mrf.mxu3 }
 0x175   :  { %1469 = vpow2.f32 %v1395_v40 }
 0x176   :  { %1471 = vpow2.f32 %v1396_v41 }
 0x17b   :  { %v1470_v48 = vpop.eup %1469 }
 0x17c   :  { %v1472_v49 = vpop.eup %1471  ;;  %v540_v50 = vadd.f32 1.0, %v1470_v48  ;;  %v588_v48 = vrot.slane %v2040_v5, 6 }
 0x17d   :  { %v563_v52 = vadd.f32 1.0, %v1472_v49 }
 0x17e   :  { %1473 = vrcp.f32 %v540_v50  ;;  %v552_v63 = vand.u32 2147483648, %v540_v50  ;;  %v550_v6 = vand.u32 2147483647, %v540_v50  ;;  %vm546_vm9 = vweird.f32 %v540_v50 }
 0x17f   :  { %1475 = vrcp.f32 %v563_v52  ;;  %v575_v31 = vand.u32 2147483648, %v563_v52  ;;  %vm569_vm13 = vweird.f32 %v563_v52  ;;  %v573_v40 = vand.u32 2147483647, %v563_v52 }
 0x180   :  { %v553_v19 = vor.u32 1.1754944e-38, %v552_v63  ;;  %vm551_vm11 = vcmp.eq.f32.partialorder %v550_v6, 8.507059e+37 }
 0x181   :  { %v576_v32 = vor.u32 1.1754944e-38, %v575_v31  ;;  %vm574_vm15 = vcmp.eq.f32.partialorder %v573_v40, 8.507059e+37 }
 0x184   :  { %v1474_v53 = vpop.eup %1473 }
 0x185   :  { %v1476_v56 = vpop.eup %1475  ;;  %v542_v60 = vmul.f32 %v1474_v53, %v540_v50  ;;  %vm547_vm8 = vweird.f32 %v1474_v53 }
 0x186   :  { %v565_v61 = vmul.f32 %v1476_v56, %v563_v52  ;;  %vm548_vm10 = vmor %vm546_vm9, %vm547_vm8  ;;  %vm570_vm12 = vweird.f32 %v1476_v56 }
 0x187   :  { %v543_v62 = vsub.f32 1.0, %v542_v60  ;;  %vm571_vm14 = vmor %vm569_vm13, %vm570_vm12 }
 0x188   :  { %v566_v2 = vsub.f32 1.0, %v565_v61 }
 0x189   :  { %v544_v4 = vmul.f32 %v1474_v53, %v543_v62 }
 0x18a   :  { %v567_v14 = vmul.f32 %v1476_v56, %v566_v2 }
 0x18b   :  { %v545_v15 = vadd.f32 %v1474_v53, %v544_v4 }
 0x18c   :  { %v568_v28 = vadd.f32 %v1476_v56, %v567_v14 }
 0x18d   :  { %v549_v21 = vsel %vm548_vm10, %v1474_v53, %v545_v15 }
 0x18e   :  { %v554_v27 = vsel %vm551_vm11, %v553_v19, %v549_v21  ;;  %v572_v41 = vsel %vm571_vm14, %v1476_v56, %v568_v28 }
 0x18f   :  { %v582_v37 = vmul.f32 %v580_v20, %v554_v27  ;;  %v577_v43 = vsel %vm574_vm15, %v576_v32, %v572_v41 }
 0x190   :  { %v585_v49 = vsub.f32 1.0, %v577_v43  ;;  %v590_v60 = vmul.f32 %v588_v48, %v577_v43 }
 0x191   :  { %v583_v12 = vadd.f32 %v582_v37, %v2037_v42 }
 0x193   :  { %1477 = vtanh.f32 %v583_v12 }
 0x199   :  { %v1478_v50 = vpop.eup %1477 }
 0x19a   :  { %v586_v53 = vmul.f32 %v1478_v50, %v585_v49 }
 0x19c   :  { %v2077_v61 = vadd.f32 %v590_v60, %v586_v53 }
 0x19e   :  { %v592_v62 = vpack.c.bf16 %v2077_v61, %v2077_v61 }
 0x1a0   :  { %v594_v52 = vrot.slane %v592_v62, 1 }
 0x1a2   :  { %604 = vmatmul.bf16.vlgmr.msra.gmra.mxu1 %v594_v52  ;;  %617 = vmatmul.bf16.vlgmr.msra.gmra.mxu2 %v594_v52 }
 0x1a3   :  { %630 = vmatmul.bf16.vlgmr.msra.gmra.mxu3 %v594_v52  ;;  %826 = vmatpush.bf16.msra.mxu1 %v1792_v33 }
 0x1a4   :  { %890 = vmatpush.bf16.msra.mxu2 %v1588_v7  ;;  %903 = vmatpush.bf16.msra.mxu3 %v1767_v23 }
 0x1a7   :  { %827 = vmatpush.bf16.msra.mxu1 %v1820_v45 }
 0x1a8   :  { %891 = vmatpush.bf16.msra.mxu2 %v1603_v13  ;;  %904 = vmatpush.bf16.msra.mxu3 %v1796_v35 }
 0x1ab   :  { %828 = vmatpush.bf16.msra.mxu1 %v1846_v54 }
 0x1ac   :  { %892 = vmatpush.bf16.msra.mxu2 %v1630_v25  ;;  %905 = vmatpush.bf16.msra.mxu3 %v1823_v46 }
 0x1af   :  { %829 = vmatpush.bf16.msra.mxu1 %v1871_v0 }
 0x1b0   :  { %893 = vmatpush.bf16.msra.mxu2 %v1651_v34  ;;  %906 = vmatpush.bf16.msra.mxu3 %v1849_v55 }
 0x1b3   :  { %830 = vmatpush.bf16.msra.mxu1 %v1890_v8 }
 0x1b4   :  { %894 = vmatpush.bf16.msra.mxu2 %v1675_v44  ;;  %907 = vmatpush.bf16.msra.mxu3 %v1874_v1 }
 0x1b7   :  { %831 = vmatpush.bf16.msra.mxu1 %v1910_v16 }
 0x1b8   :  { %895 = vmatpush.bf16.msra.mxu2 %v1708_v59  ;;  %908 = vmatpush.bf16.msra.mxu3 %v1893_v10 }
 0x1bb   :  { %832 = vmatpush.bf16.msra.mxu1 %v1931_v24 }
 0x1bc   :  { %896 = vmatpush.bf16.msra.mxu2 %v1738_v9  ;;  %909 = vmatpush.bf16.msra.mxu3 %v1914_v17 }
 0x1bf   :  { %833 = vmatpush.bf16.msra.mxu1 %v1945_v29 }
 0x1c0   :  { %897 = vmatpush.bf16.msra.mxu2 %v1765_v22  ;;  %910 = vmatpush.bf16.msra.mxu3 %v1934_v26 }
 0x21f   :  { %v605_v5 = vpop.f32.mrf.mxu1 }
 0x220   :  { %v606_v56 = vadd.f32 %v605_v5, %v2014_v38 }
 0x222   :  { %v636_v63 = vrot.slane %v606_v56, 4 }
 0x224   :  { %v638_v2 = vadd.f32 %v636_v63, %v2016_v39 }
 0x225   :  { %v618_v3 = vpop.f32.mrf.mxu2 }
 0x226   :  { %v1397_v4 = vmul.f32 -1.442695, %v638_v2  ;;  %v619_v6 = vadd.f32 %v618_v3, %v2025_v57  ;;  %v631_v14 = vpop.f32.mrf.mxu3 }
 0x227   :  { %v607_v15 = vpop.f32.mrf.mxu1  ;;  %v632_v49 = vadd.f32 %v631_v14, %v2031_v18 }
 0x228   :  { %1479 = vpow2.f32 %v1397_v4  ;;  %v659_v19 = vrot.slane %v619_v6, 4 }
 0x229   :  { %v682_v2 = vrot.slane %v632_v49, 4 }
 0x22a   :  { %v661_v20 = vadd.f32 %v659_v19, %v2027_v58 }
 0x22c   :  { %v1398_v21 = vmul.f32 -1.442695, %v661_v20 }
 0x22d   :  { %v620_v27 = vpop.f32.mrf.mxu2 }
 0x22e   :  { %v1480_v28 = vpop.eup %1479  ;;  %1481 = vpow2.f32 %v1398_v21  ;;  %v633_v31 = vpop.f32.mrf.mxu3 }
 0x22f   :  { %v642_v37 = vadd.f32 1.0, %v1480_v28  ;;  %v690_v31 = vrot.slane %v2077_v61, 6 }
 0x231   :  { %1483 = vrcp.f32 %v642_v37  ;;  %v654_v48 = vand.u32 2147483648, %v642_v37  ;;  %v652_v53 = vand.u32 2147483647, %v642_v37  ;;  %vm648_vm1 = vweird.f32 %v642_v37 }
 0x233   :  { %v655_v5 = vor.u32 1.1754944e-38, %v654_v48  ;;  %vm653_vm3 = vcmp.eq.f32.partialorder %v652_v53, 8.507059e+37 }
 0x234   :  { %v1482_v40 = vpop.eup %1481 }
 0x235   :  { %v665_v12 = vadd.f32 1.0, %v1482_v40 }
 0x237   :  { %v1484_v41 = vpop.eup %1483  ;;  %1485 = vrcp.f32 %v665_v12  ;;  %v677_v15 = vand.u32 2147483648, %v665_v12  ;;  %v675_v19 = vand.u32 2147483647, %v665_v12  ;;  %vm671_vm5 = vweird.f32 %v665_v12 }
 0x238   :  { %v644_v32 = vmul.f32 %v1484_v41, %v642_v37  ;;  %vm649_vm0 = vweird.f32 %v1484_v41 }
 0x239   :  { %vm650_vm2 = vmor %vm648_vm1, %vm649_vm0  ;;  %v678_v27 = vor.u32 1.1754944e-38, %v677_v15  ;;  %vm676_vm7 = vcmp.eq.f32.partialorder %v675_v19, 8.507059e+37 }
 0x23a   :  { %v645_v43 = vsub.f32 1.0, %v644_v32 }
 0x23c   :  { %v646_v50 = vmul.f32 %v1484_v41, %v645_v43 }
 0x23d   :  { %v1486_v60 = vpop.eup %1485 }
 0x23e   :  { %v667_v62 = vmul.f32 %v1486_v60, %v665_v12  ;;  %v647_v52 = vadd.f32 %v1484_v41, %v646_v50  ;;  %vm672_vm4 = vweird.f32 %v1486_v60 }
 0x23f   :  { %vm673_vm6 = vmor %vm671_vm5, %vm672_vm4 }
 0x240   :  { %v668_v56 = vsub.f32 1.0, %v667_v62  ;;  %v651_v63 = vsel %vm650_vm2, %v1484_v41, %v647_v52 }
 0x241   :  { %v656_v3 = vsel %vm653_vm3, %v655_v5, %v651_v63 }
 0x242   :  { %v669_v4 = vmul.f32 %v1486_v60, %v668_v56  ;;  %v684_v6 = vmul.f32 %v682_v2, %v656_v3 }
 0x244   :  { %v685_v14 = vadd.f32 %v684_v6, %v2037_v42  ;;  %v670_v20 = vadd.f32 %v1486_v60, %v669_v4 }
 0x246   :  { %1487 = vtanh.f32 %v685_v14  ;;  %v674_v21 = vsel %vm673_vm6, %v1486_v60, %v670_v20 }
 0x247   :  { %v679_v28 = vsel %vm676_vm7, %v678_v27, %v674_v21 }
 0x248   :  { %v687_v37 = vsub.f32 1.0, %v679_v28  ;;  %v692_v32 = vmul.f32 %v690_v31, %v679_v28 }
 0x24c   :  { %v1488_v40 = vpop.eup %1487 }
 0x24d   :  { %v688_v41 = vmul.f32 %v1488_v40, %v687_v37 }
 0x24f   :  { %v2112_v43 = vadd.f32 %v692_v32, %v688_v41 }
 0x251   :  { %v694_v12 = vpack.c.bf16 %v2112_v43, %v2112_v43 }
 0x253   :  { %v696_v48 = vrot.slane %v694_v12, 2 }
 0x255   :  { %706 = vmatmul.bf16.vlgmr.msrb.gmra.mxu0 %v696_v48  ;;  %719 = vmatmul.bf16.vlgmr.msrb.gmra.mxu1 %v696_v48 }
 0x256   :  { %732 = vmatmul.bf16.vlgmr.msrb.gmra.mxu2 %v696_v48  ;;  %916 = vmatpush.bf16.msrb.mxu0 %v1792_v33 }
 0x257   :  { %992 = vmatpush.bf16.msrb.mxu1 %v1588_v7  ;;  %1005 = vmatpush.bf16.msrb.mxu2 %v1767_v23 }
 0x25a   :  { %917 = vmatpush.bf16.msrb.mxu0 %v1820_v45 }
 0x25b   :  { %993 = vmatpush.bf16.msrb.mxu1 %v1603_v13  ;;  %1006 = vmatpush.bf16.msrb.mxu2 %v1796_v35 }
 0x25e   :  { %918 = vmatpush.bf16.msrb.mxu0 %v1846_v54 }
 0x25f   :  { %994 = vmatpush.bf16.msrb.mxu1 %v1630_v25  ;;  %1007 = vmatpush.bf16.msrb.mxu2 %v1823_v46 }
 0x262   :  { %919 = vmatpush.bf16.msrb.mxu0 %v1871_v0 }
 0x263   :  { %995 = vmatpush.bf16.msrb.mxu1 %v1651_v34  ;;  %1008 = vmatpush.bf16.msrb.mxu2 %v1849_v55 }
 0x266   :  { %920 = vmatpush.bf16.msrb.mxu0 %v1890_v8 }
 0x267   :  { %996 = vmatpush.bf16.msrb.mxu1 %v1675_v44  ;;  %1009 = vmatpush.bf16.msrb.mxu2 %v1874_v1 }
 0x26a   :  { %921 = vmatpush.bf16.msrb.mxu0 %v1910_v16 }
 0x26b   :  { %997 = vmatpush.bf16.msrb.mxu1 %v1708_v59  ;;  %1010 = vmatpush.bf16.msrb.mxu2 %v1893_v10 }
 0x26e   :  { %922 = vmatpush.bf16.msrb.mxu0 %v1931_v24 }
 0x26f   :  { %998 = vmatpush.bf16.msrb.mxu1 %v1738_v9  ;;  %1011 = vmatpush.bf16.msrb.mxu2 %v1914_v17 }
 0x272   :  { %923 = vmatpush.bf16.msrb.mxu0 %v1945_v29 }
 0x273   :  { %999 = vmatpush.bf16.msrb.mxu1 %v1765_v22  ;;  %1012 = vmatpush.bf16.msrb.mxu2 %v1934_v26 }
 0x2d2   :  { %v707_v61 = vpop.f32.mrf.mxu0  ;;  %v720_v49 = vpop.f32.mrf.mxu1 }
 0x2d3   :  { %v708_v50 = vadd.f32 %v707_v61, %v2014_v38  ;;  %v721_v53 = vadd.f32 %v720_v49, %v2025_v57 }
 0x2d5   :  { %v738_v60 = vrot.slane %v708_v50, 2  ;;  %v761_v62 = vrot.slane %v721_v53, 2 }
 0x2d7   :  { %v740_v52 = vadd.f32 %v738_v60, %v2016_v39  ;;  %v763_v5 = vadd.f32 %v761_v62, %v2027_v58 }
 0x2d9   :  { %v1399_v56 = vmul.f32 -1.442695, %v740_v52  ;;  %v1400_v63 = vmul.f32 -1.442695, %v763_v5  ;;  %v733_v2 = vpop.f32.mrf.mxu2 }
 0x2da   :  { %v709_v3 = vpop.f32.mrf.mxu0  ;;  %v722_v4 = vpop.f32.mrf.mxu1  ;;  %v734_v40 = vadd.f32 %v733_v2, %v2031_v18 }
 0x2db   :  { %1489 = vpow2.f32 %v1399_v56  ;;  %v792_v4 = vrot.slane %v2112_v43, 6 }
 0x2dc   :  { %1491 = vpow2.f32 %v1400_v63  ;;  %v784_v50 = vrot.slane %v734_v40, 2 }
 0x2e1   :  { %v1490_v6 = vpop.eup %1489  ;;  %v735_v15 = vpop.f32.mrf.mxu2 }
 0x2e2   :  { %v1492_v19 = vpop.eup %1491  ;;  %v744_v14 = vadd.f32 1.0, %v1490_v6 }
 0x2e3   :  { %v767_v20 = vadd.f32 1.0, %v1492_v19 }
 0x2e4   :  { %1493 = vrcp.f32 %v744_v14  ;;  %v756_v37 = vand.u32 2147483648, %v744_v14  ;;  %v754_v32 = vand.u32 2147483647, %v744_v14  ;;  %vm750_vm9 = vweird.f32 %v744_v14 }
 0x2e5   :  { %1495 = vrcp.f32 %v767_v20  ;;  %v779_v52 = vand.u32 2147483648, %v767_v20  ;;  %vm773_vm13 = vweird.f32 %v767_v20  ;;  %v777_v5 = vand.u32 2147483647, %v767_v20 }
 0x2e6   :  { %v757_v61 = vor.u32 1.1754944e-38, %v756_v37  ;;  %vm755_vm11 = vcmp.eq.f32.partialorder %v754_v32, 8.507059e+37 }
 0x2e7   :  { %v780_v2 = vor.u32 1.1754944e-38, %v779_v52  ;;  %vm778_vm15 = vcmp.eq.f32.partialorder %v777_v5, 8.507059e+37 }
 0x2ea   :  { %v1494_v21 = vpop.eup %1493 }
 0x2eb   :  { %v1496_v27 = vpop.eup %1495  ;;  %v746_v28 = vmul.f32 %v1494_v21, %v744_v14  ;;  %vm751_vm8 = vweird.f32 %v1494_v21 }
 0x2ec   :  { %v769_v39 = vmul.f32 %v1496_v27, %v767_v20  ;;  %vm752_vm10 = vmor %vm750_vm9, %vm751_vm8  ;;  %vm774_vm12 = vweird.f32 %v1496_v27 }
 0x2ed   :  { %v747_v31 = vsub.f32 1.0, %v746_v28  ;;  %vm775_vm14 = vmor %vm773_vm13, %vm774_vm12 }
 0x2ee   :  { %v770_v58 = vsub.f32 1.0, %v769_v39 }
 0x2ef   :  { %v748_v41 = vmul.f32 %v1494_v21, %v747_v31 }
 0x2f0   :  { %v771_v12 = vmul.f32 %v1496_v27, %v770_v58 }
 0x2f1   :  { %v749_v48 = vadd.f32 %v1494_v21, %v748_v41 }
 0x2f2   :  { %v772_v60 = vadd.f32 %v1496_v27, %v771_v12 }
 0x2f3   :  { %v753_v49 = vsel %vm752_vm10, %v1494_v21, %v749_v48 }
 0x2f4   :  { %v758_v53 = vsel %vm755_vm11, %v757_v61, %v753_v49  ;;  %v776_v63 = vsel %vm775_vm14, %v1496_v27, %v772_v60  ;;  %v2183_v60 = vadd.f32 %v2068_v11, %v59_v36 }
 0x2f5   :  { %v786_v62 = vmul.f32 %v784_v50, %v758_v53  ;;  %v781_v3 = vsel %vm778_vm15, %v780_v2, %v776_v63 }
 0x2f6   :  { %v789_v6 = vsub.f32 1.0, %v781_v3  ;;  %v794_v14 = vmul.f32 %v792_v4, %v781_v3 }
 0x2f7   :  { %v787_v56 = vadd.f32 %v786_v62, %v2037_v42 }
 0x2f9   :  { %1497 = vtanh.f32 %v787_v56 }
 0x2ff   :  { %v1498_v15 = vpop.eup %1497 }
 0x300   :  { %v790_v19 = vmul.f32 %v1498_v15, %v789_v6 }
 0x302   :  { %v2147_v21 = vadd.f32 %v794_v14, %v790_v19 }
 0x304   :  { %v796_v28 = vpack.c.bf16 %v2147_v21, %v2147_v21  ;;  %v885_v4 = vrot.slane %v2147_v21, 6 }
 0x306   :  { %v798_v20 = vrot.slane %v796_v28, 3 }
 0x308   :  { %808 = vmatmul.bf16.vlgmr.msrb.gmra.mxu3 %v798_v20  ;;  %821 = vmatmul.bf16.vlgmr.msra.gmra.mxu0 %v798_v20 }
 0x309   :  { %834 = vmatmul.bf16.vlgmr.msra.gmra.mxu1 %v798_v20  ;;  %1018 = vmatpush.bf16.msrb.mxu3 %v1792_v33 }
 0x30a   :  { %1094 = vmatpush.bf16.msra.mxu0 %v1588_v7  ;;  %1107 = vmatpush.bf16.msra.mxu1 %v1767_v23 }
 0x30d   :  { %1019 = vmatpush.bf16.msrb.mxu3 %v1820_v45 }
 0x30e   :  { %1095 = vmatpush.bf16.msra.mxu0 %v1603_v13  ;;  %1108 = vmatpush.bf16.msra.mxu1 %v1796_v35 }
 0x311   :  { %1020 = vmatpush.bf16.msrb.mxu3 %v1846_v54 }
 0x312   :  { %1096 = vmatpush.bf16.msra.mxu0 %v1630_v25  ;;  %1109 = vmatpush.bf16.msra.mxu1 %v1823_v46 }
 0x315   :  { %1021 = vmatpush.bf16.msrb.mxu3 %v1871_v0 }
 0x316   :  { %1097 = vmatpush.bf16.msra.mxu0 %v1651_v34  ;;  %1110 = vmatpush.bf16.msra.mxu1 %v1849_v55 }
 0x319   :  { %1022 = vmatpush.bf16.msrb.mxu3 %v1890_v8 }
 0x31a   :  { %1098 = vmatpush.bf16.msra.mxu0 %v1675_v44  ;;  %1111 = vmatpush.bf16.msra.mxu1 %v1874_v1 }
 0x31d   :  { %1023 = vmatpush.bf16.msrb.mxu3 %v1910_v16 }
 0x31e   :  { %1099 = vmatpush.bf16.msra.mxu0 %v1708_v59  ;;  %1112 = vmatpush.bf16.msra.mxu1 %v1893_v10 }
 0x321   :  { %1024 = vmatpush.bf16.msrb.mxu3 %v1931_v24 }
 0x322   :  { %1100 = vmatpush.bf16.msra.mxu0 %v1738_v9  ;;  %1113 = vmatpush.bf16.msra.mxu1 %v1914_v17 }
 0x325   :  { %1025 = vmatpush.bf16.msrb.mxu3 %v1945_v29 }
 0x326   :  { %1101 = vmatpush.bf16.msra.mxu0 %v1765_v22  ;;  %1114 = vmatpush.bf16.msra.mxu1 %v1934_v26 }
 0x385   :  { %v822_v7 = vpop.f32.mrf.mxu0 }
 0x386   :  { %v823_v13 = vadd.f32 %v822_v7, %v2025_v57  ;;  %v835_v25 = vpop.f32.mrf.mxu1 }
 0x387   :  { %v836_v61 = vadd.f32 %v835_v25, %v2031_v18 }
 0x388   :  { %v859_v34 = vadd.f32 %v823_v13, %v2023_v51 }
 0x38a   :  { %v1402_v44 = vmul.f32 -1.442695, %v859_v34 }
 0x38b   :  { %v809_v59 = vpop.f32.mrf.mxu3 }
 0x38c   :  { %1499 = vpow2.f32 %v1402_v44  ;;  %v810_v23 = vadd.f32 %v809_v59, %v2014_v38 }
 0x38d   :  { %v824_v9 = vpop.f32.mrf.mxu0 }
 0x38e   :  { %v839_v35 = vadd.f32 %v810_v23, %v2020_v47  ;;  %v837_v46 = vpop.f32.mrf.mxu1 }
 0x390   :  { %v1401_v55 = vmul.f32 -1.442695, %v839_v35 }
 0x392   :  { %v1500_v1 = vpop.eup %1499  ;;  %1501 = vpow2.f32 %v1401_v55 }
 0x393   :  { %v863_v22 = vadd.f32 1.0, %v1500_v1  ;;  %v811_v10 = vpop.f32.mrf.mxu3 }
 0x395   :  { %1503 = vrcp.f32 %v863_v22  ;;  %v875_v62 = vand.u32 2147483648, %v863_v22  ;;  %vm869_vm5 = vweird.f32 %v863_v22  ;;  %v873_v5 = vand.u32 2147483647, %v863_v22 }
 0x397   :  { %v876_v2 = vor.u32 1.1754944e-38, %v875_v62  ;;  %vm874_vm7 = vcmp.eq.f32.partialorder %v873_v5, 8.507059e+37 }
 0x398   :  { %v1502_v17 = vpop.eup %1501 }
 0x399   :  { %v843_v26 = vadd.f32 1.0, %v1502_v17 }
 0x39b   :  { %1505 = vrcp.f32 %v843_v26  ;;  %v1504_v42 = vpop.eup %1503  ;;  %v855_v37 = vand.u32 2147483648, %v843_v26  ;;  %v853_v41 = vand.u32 2147483647, %v843_v26  ;;  %vm849_vm1 = vweird.f32 %v843_v26 }
 0x39c   :  { %v865_v43 = vmul.f32 %v1504_v42, %v863_v22  ;;  %vm870_vm4 = vweird.f32 %v1504_v42 }
 0x39d   :  { %v856_v48 = vor.u32 1.1754944e-38, %v855_v37  ;;  %vm854_vm3 = vcmp.eq.f32.partialorder %v853_v41, 8.507059e+37  ;;  %vm871_vm6 = vmor %vm869_vm5, %vm870_vm4 }
 0x39e   :  { %v866_v31 = vsub.f32 1.0, %v865_v43 }
 0x3a0   :  { %v867_v32 = vmul.f32 %v1504_v42, %v866_v31 }
 0x3a1   :  { %v1506_v27 = vpop.eup %1505 }
 0x3a2   :  { %v845_v39 = vmul.f32 %v1506_v27, %v843_v26  ;;  %vm850_vm0 = vweird.f32 %v1506_v27  ;;  %v868_v53 = vadd.f32 %v1504_v42, %v867_v32 }
 0x3a3   :  { %vm851_vm2 = vmor %vm849_vm1, %vm850_vm0 }
 0x3a4   :  { %v846_v58 = vsub.f32 1.0, %v845_v39  ;;  %v872_v63 = vsel %vm871_vm6, %v1504_v42, %v868_v53 }
 0x3a5   :  { %v877_v3 = vsel %vm874_vm7, %v876_v2, %v872_v63 }
 0x3a6   :  { %v847_v40 = vmul.f32 %v1506_v27, %v846_v58  ;;  %v882_v6 = vsub.f32 1.0, %v877_v3  ;;  %v887_v19 = vmul.f32 %v885_v4, %v877_v3 }
 0x3a8   :  { %v848_v12 = vadd.f32 %v1506_v27, %v847_v40 }
 0x3aa   :  { %v852_v49 = vsel %vm851_vm2, %v1506_v27, %v848_v12 }
 0x3ab   :  { %v857_v50 = vsel %vm854_vm3, %v856_v48, %v852_v49 }
 0x3ac   :  { %v879_v52 = vmul.f32 %v857_v50, %v836_v61 }
 0x3ae   :  { %v880_v56 = vadd.f32 %v879_v52, %v2183_v60 }
 0x3b0   :  { %1507 = vtanh.f32 %v880_v56 }
 0x3b6   :  { %v1508_v15 = vpop.eup %1507 }
 0x3b7   :  { %v883_v30 = vmul.f32 %v1508_v15, %v882_v6 }
 0x3b9   :  { %v2187_v36 = vadd.f32 %v887_v19, %v883_v30 }
 0x3bb   :  { %v889_v11 = vpack.c.bf16 %v2187_v36, %v2187_v36  ;;  %v984_v50 = vrot.slane %v2187_v36, 6 }
 0x3bd   :  { %898 = vmatmul.bf16.vlgmr.msra.gmra.mxu2 %v889_v11  ;;  %911 = vmatmul.bf16.vlgmr.msra.gmra.mxu3 %v889_v11 }
 0x3be   :  { %924 = vmatmul.bf16.vlgmr.msrb.gmra.mxu0 %v889_v11  ;;  %1120 = vmatpush.bf16.msra.mxu2 %v1792_v33 }
 0x3c2   :  { %1121 = vmatpush.bf16.msra.mxu2 %v1820_v45 }
 0x3c6   :  { %1122 = vmatpush.bf16.msra.mxu2 %v1846_v54 }
 0x3ca   :  { %1123 = vmatpush.bf16.msra.mxu2 %v1871_v0 }
 0x3ce   :  { %1124 = vmatpush.bf16.msra.mxu2 %v1890_v8 }
 0x3d2   :  { %1125 = vmatpush.bf16.msra.mxu2 %v1910_v16 }
 0x3d6   :  { %1126 = vmatpush.bf16.msra.mxu2 %v1931_v24 }
 0x3da   :  { %1127 = vmatpush.bf16.msra.mxu2 %v1945_v29 }
 0x43b   :  { %v925_v14 = vpop.f32.mrf.mxu0 }
 0x43c   :  { %v926_v10 = vadd.f32 %v925_v14, %v2031_v18 }
 0x43e   :  { %v976_v39 = vrot.slane %v926_v10, 6 }
 0x440   :  { %v899_v21 = vpop.f32.mrf.mxu2  ;;  %v912_v28 = vpop.f32.mrf.mxu3 }
 0x441   :  { %v900_v20 = vadd.f32 %v899_v21, %v2014_v38  ;;  %v913_v33 = vadd.f32 %v912_v28, %v2025_v57 }
 0x443   :  { %v930_v45 = vrot.slane %v900_v20, 6  ;;  %v953_v7 = vrot.slane %v913_v33, 6  ;;  %v927_v54 = vpop.f32.mrf.mxu0 }
 0x445   :  { %v932_v0 = vadd.f32 %v930_v45, %v2020_v47  ;;  %v955_v8 = vadd.f32 %v953_v7, %v2023_v51 }
 0x447   :  { %v1403_v13 = vmul.f32 -1.442695, %v932_v0  ;;  %v1404_v16 = vmul.f32 -1.442695, %v955_v8 }
 0x448   :  { %v901_v25 = vpop.f32.mrf.mxu2  ;;  %v914_v24 = vpop.f32.mrf.mxu3 }
 0x449   :  { %1509 = vpow2.f32 %v1403_v13 }
 0x44a   :  { %1511 = vpow2.f32 %v1404_v16 }
 0x44f   :  { %v1510_v29 = vpop.eup %1509 }
 0x450   :  { %v1512_v34 = vpop.eup %1511  ;;  %v936_v44 = vadd.f32 1.0, %v1510_v29 }
 0x451   :  { %v959_v59 = vadd.f32 1.0, %v1512_v34 }
 0x452   :  { %1513 = vrcp.f32 %v936_v44  ;;  %v948_v1 = vand.u32 2147483648, %v936_v44  ;;  %v946_v26 = vand.u32 2147483647, %v936_v44  ;;  %vm942_vm9 = vweird.f32 %v936_v44 }
 0x453   :  { %1515 = vrcp.f32 %v959_v59  ;;  %v971_v40 = vand.u32 2147483648, %v959_v59  ;;  %vm965_vm13 = vweird.f32 %v959_v59  ;;  %v969_v32 = vand.u32 2147483647, %v959_v59 }
 0x454   :  { %v949_v27 = vor.u32 1.1754944e-38, %v948_v1  ;;  %vm947_vm11 = vcmp.eq.f32.partialorder %v946_v26, 8.507059e+37 }
 0x455   :  { %v972_v61 = vor.u32 1.1754944e-38, %v971_v40  ;;  %vm970_vm15 = vcmp.eq.f32.partialorder %v969_v32, 8.507059e+37 }
 0x458   :  { %v1514_v23 = vpop.eup %1513 }
 0x459   :  { %v1516_v9 = vpop.eup %1515  ;;  %v938_v35 = vmul.f32 %v1514_v23, %v936_v44  ;;  %vm943_vm8 = vweird.f32 %v1514_v23 }
 0x45a   :  { %v961_v46 = vmul.f32 %v1516_v9, %v959_v59  ;;  %vm944_vm10 = vmor %vm942_vm9, %vm943_vm8  ;;  %vm966_vm12 = vweird.f32 %v1516_v9 }
 0x45b   :  { %v939_v55 = vsub.f32 1.0, %v938_v35  ;;  %vm967_vm14 = vmor %vm965_vm13, %vm966_vm12 }
 0x45c   :  { %v962_v22 = vsub.f32 1.0, %v961_v46 }
 0x45d   :  { %v940_v17 = vmul.f32 %v1514_v23, %v939_v55 }
 0x45e   :  { %v963_v42 = vmul.f32 %v1516_v9, %v962_v22 }
 0x45f   :  { %v941_v43 = vadd.f32 %v1514_v23, %v940_v17 }
 0x460   :  { %v964_v37 = vadd.f32 %v1516_v9, %v963_v42 }
 0x461   :  { %v945_v31 = vsel %vm944_vm10, %v1514_v23, %v941_v43 }
 0x462   :  { %v950_v58 = vsel %vm947_vm11, %v949_v27, %v945_v31  ;;  %v968_v48 = vsel %vm967_vm14, %v1516_v9, %v964_v37 }
 0x463   :  { %v978_v41 = vmul.f32 %v976_v39, %v950_v58  ;;  %v973_v49 = vsel %vm970_vm15, %v972_v61, %v968_v48 }
 0x464   :  { %v981_v53 = vsub.f32 1.0, %v973_v49  ;;  %v986_v5 = vmul.f32 %v984_v50, %v973_v49 }
 0x465   :  { %v979_v12 = vadd.f32 %v978_v41, %v2183_v60 }
 0x467   :  { %1517 = vtanh.f32 %v979_v12 }
 0x46d   :  { %v1518_v62 = vpop.eup %1517 }
 0x46e   :  { %v982_v52 = vmul.f32 %v1518_v62, %v981_v53 }
 0x470   :  { %v2206_v56 = vadd.f32 %v986_v5, %v982_v52 }
 0x472   :  { %v988_v63 = vpack.c.bf16 %v2206_v56, %v2206_v56  ;;  %v1086_v37 = vrot.slane %v2206_v56, 6 }
 0x474   :  { %v990_v2 = vrot.slane %v988_v63, 1 }
 0x476   :  { %1000 = vmatmul.bf16.vlgmr.msrb.gmra.mxu1 %v990_v2  ;;  %1013 = vmatmul.bf16.vlgmr.msrb.gmra.mxu2 %v990_v2 }
 0x477   :  { %1026 = vmatmul.bf16.vlgmr.msrb.gmra.mxu3 %v990_v2 }
 0x4f3   :  { %v1001_v3 = vpop.f32.mrf.mxu1 }
 0x4f4   :  { %v1002_v4 = vadd.f32 %v1001_v3, %v2014_v38 }
 0x4f6   :  { %v1032_v6 = vrot.slane %v1002_v4, 4 }
 0x4f8   :  { %v1034_v15 = vadd.f32 %v1032_v6, %v2020_v47 }
 0x4f9   :  { %v1014_v30 = vpop.f32.mrf.mxu2 }
 0x4fa   :  { %v1405_v19 = vmul.f32 -1.442695, %v1034_v15  ;;  %v1015_v36 = vadd.f32 %v1014_v30, %v2025_v57  ;;  %v1027_v11 = vpop.f32.mrf.mxu3 }
 0x4fb   :  { %v1003_v14 = vpop.f32.mrf.mxu1  ;;  %v1028_v29 = vadd.f32 %v1027_v11, %v2031_v18 }
 0x4fc   :  { %1519 = vpow2.f32 %v1405_v19  ;;  %v1055_v21 = vrot.slane %v1015_v36, 4 }
 0x4fd   :  { %v1078_v1 = vrot.slane %v1028_v29, 4 }
 0x4fe   :  { %v1057_v28 = vadd.f32 %v1055_v21, %v2023_v51 }
 0x500   :  { %v1406_v20 = vmul.f32 -1.442695, %v1057_v28 }
 0x501   :  { %v1016_v33 = vpop.f32.mrf.mxu2 }
 0x502   :  { %v1520_v45 = vpop.eup %1519  ;;  %1521 = vpow2.f32 %v1406_v20  ;;  %v1029_v7 = vpop.f32.mrf.mxu3 }
 0x503   :  { %v1038_v54 = vadd.f32 1.0, %v1520_v45 }
 0x505   :  { %1523 = vrcp.f32 %v1038_v54  ;;  %v1050_v24 = vand.u32 2147483648, %v1038_v54  ;;  %v1048_v44 = vand.u32 2147483647, %v1038_v54  ;;  %vm1044_vm1 = vweird.f32 %v1038_v54 }
 0x507   :  { %v1051_v35 = vor.u32 1.1754944e-38, %v1050_v24  ;;  %vm1049_vm3 = vcmp.eq.f32.partialorder %v1048_v44, 8.507059e+37 }
 0x508   :  { %v1522_v0 = vpop.eup %1521 }
 0x509   :  { %v1061_v8 = vadd.f32 1.0, %v1522_v0 }
 0x50b   :  { %v1524_v13 = vpop.eup %1523  ;;  %1525 = vrcp.f32 %v1061_v8  ;;  %v1073_v26 = vand.u32 2147483648, %v1061_v8  ;;  %v1071_v42 = vand.u32 2147483647, %v1061_v8  ;;  %vm1067_vm5 = vweird.f32 %v1061_v8 }
 0x50c   :  { %v1040_v16 = vmul.f32 %v1524_v13, %v1038_v54  ;;  %vm1045_vm0 = vweird.f32 %v1524_v13 }
 0x50d   :  { %vm1046_vm2 = vmor %vm1044_vm1, %vm1045_vm0  ;;  %v1074_v31 = vor.u32 1.1754944e-38, %v1073_v26  ;;  %vm1072_vm7 = vcmp.eq.f32.partialorder %v1071_v42, 8.507059e+37 }
 0x50e   :  { %v1041_v25 = vsub.f32 1.0, %v1040_v16 }
 0x510   :  { %v1042_v34 = vmul.f32 %v1524_v13, %v1041_v25 }
 0x511   :  { %v1526_v59 = vpop.eup %1525 }
 0x512   :  { %v1063_v23 = vmul.f32 %v1526_v59, %v1061_v8  ;;  %v1043_v9 = vadd.f32 %v1524_v13, %v1042_v34  ;;  %vm1068_vm4 = vweird.f32 %v1526_v59 }
 0x513   :  { %vm1069_vm6 = vmor %vm1067_vm5, %vm1068_vm4 }
 0x514   :  { %v1064_v46 = vsub.f32 1.0, %v1063_v23  ;;  %v1047_v55 = vsel %vm1046_vm2, %v1524_v13, %v1043_v9 }
 0x515   :  { %v1052_v22 = vsel %vm1049_vm3, %v1051_v35, %v1047_v55 }
 0x516   :  { %v1065_v10 = vmul.f32 %v1526_v59, %v1064_v46  ;;  %v1080_v17 = vmul.f32 %v1078_v1, %v1052_v22 }
 0x518   :  { %v1081_v43 = vadd.f32 %v1080_v17, %v2183_v60  ;;  %v1066_v27 = vadd.f32 %v1526_v59, %v1065_v10 }
 0x51a   :  { %1527 = vtanh.f32 %v1081_v43  ;;  %v1070_v39 = vsel %vm1069_vm6, %v1526_v59, %v1066_v27 }
 0x51b   :  { %v1075_v58 = vsel %vm1072_vm7, %v1074_v31, %v1070_v39 }
 0x51c   :  { %v1083_v40 = vsub.f32 1.0, %v1075_v58  ;;  %v1088_v12 = vmul.f32 %v1086_v37, %v1075_v58 }
 0x520   :  { %v1528_v41 = vpop.eup %1527 }
 0x521   :  { %v1084_v32 = vmul.f32 %v1528_v41, %v1083_v40 }
 0x523   :  { %v2217_v48 = vadd.f32 %v1088_v12, %v1084_v32 }
 0x525   :  { %v1090_v61 = vpack.c.bf16 %v2217_v48, %v2217_v48  ;;  %v1188_v46 = vrot.slane %v2217_v48, 6 }
 0x527   :  { %v1092_v49 = vrot.slane %v1090_v61, 2 }
 0x529   :  { %1102 = vmatmul.bf16.vlgmr.msra.gmra.mxu0 %v1092_v49  ;;  %1115 = vmatmul.bf16.vlgmr.msra.gmra.mxu1 %v1092_v49 }
 0x52a   :  { %1128 = vmatmul.bf16.vlgmr.msra.gmra.mxu2 %v1092_v49 }
 0x5a6   :  { %v1103_v50 = vpop.f32.mrf.mxu0  ;;  %v1116_v53 = vpop.f32.mrf.mxu1 }
 0x5a7   :  { %v1104_v62 = vadd.f32 %v1103_v50, %v2014_v38  ;;  %v1117_v52 = vadd.f32 %v1116_v53, %v2025_v57 }
 0x5a9   :  { %v1134_v5 = vrot.slane %v1104_v62, 2  ;;  %v1157_v56 = vrot.slane %v1117_v52, 2 }
 0x5ab   :  { %v1136_v63 = vadd.f32 %v1134_v5, %v2020_v47  ;;  %v1159_v2 = vadd.f32 %v1157_v56, %v2023_v51 }
 0x5ad   :  { %v1407_v3 = vmul.f32 -1.442695, %v1136_v63  ;;  %v1408_v4 = vmul.f32 -1.442695, %v1159_v2  ;;  %v1129_v6 = vpop.f32.mrf.mxu2 }
 0x5ae   :  { %v1105_v15 = vpop.f32.mrf.mxu0  ;;  %v1118_v30 = vpop.f32.mrf.mxu1  ;;  %v1130_v45 = vadd.f32 %v1129_v6, %v2031_v18 }
 0x5af   :  { %1529 = vpow2.f32 %v1407_v3 }
 0x5b0   :  { %1531 = vpow2.f32 %v1408_v4  ;;  %v1180_v25 = vrot.slane %v1130_v45, 2 }
 0x5b5   :  { %v1530_v19 = vpop.eup %1529  ;;  %v1131_v36 = vpop.f32.mrf.mxu2 }
 0x5b6   :  { %v1532_v11 = vpop.eup %1531  ;;  %v1140_v14 = vadd.f32 1.0, %v1530_v19 }
 0x5b7   :  { %v1163_v38 = vadd.f32 1.0, %v1532_v11 }
 0x5b8   :  { %1533 = vrcp.f32 %v1140_v14  ;;  %v1152_v33 = vand.u32 2147483648, %v1140_v14  ;;  %v1150_v54 = vand.u32 2147483647, %v1140_v14  ;;  %vm1146_vm9 = vweird.f32 %v1140_v14 }
 0x5b9   :  { %1535 = vrcp.f32 %v1163_v38  ;;  %v1175_v34 = vand.u32 2147483648, %v1163_v38  ;;  %vm1169_vm13 = vweird.f32 %v1163_v38  ;;  %v1173_v59 = vand.u32 2147483647, %v1163_v38 }
 0x5ba   :  { %v1153_v13 = vor.u32 1.1754944e-38, %v1152_v33  ;;  %vm1151_vm11 = vcmp.eq.f32.partialorder %v1150_v54, 8.507059e+37 }
 0x5bb   :  { %v1176_v9 = vor.u32 1.1754944e-38, %v1175_v34  ;;  %vm1174_vm15 = vcmp.eq.f32.partialorder %v1173_v59, 8.507059e+37 }
 0x5be   :  { %v1534_v57 = vpop.eup %1533 }
 0x5bf   :  { %v1536_v21 = vpop.eup %1535  ;;  %v1142_v28 = vmul.f32 %v1534_v57, %v1140_v14  ;;  %vm1147_vm8 = vweird.f32 %v1534_v57 }
 0x5c0   :  { %v1165_v47 = vmul.f32 %v1536_v21, %v1163_v38  ;;  %vm1148_vm10 = vmor %vm1146_vm9, %vm1147_vm8  ;;  %vm1170_vm12 = vweird.f32 %v1536_v21 }
 0x5c1   :  { %v1143_v20 = vsub.f32 1.0, %v1142_v28  ;;  %vm1171_vm14 = vmor %vm1169_vm13, %vm1170_vm12 }
 0x5c2   :  { %v1166_v51 = vsub.f32 1.0, %v1165_v47 }
 0x5c3   :  { %v1144_v7 = vmul.f32 %v1534_v57, %v1143_v20 }
 0x5c4   :  { %v1167_v0 = vmul.f32 %v1536_v21, %v1166_v51 }
 0x5c5   :  { %v1145_v8 = vadd.f32 %v1534_v57, %v1144_v7 }
 0x5c6   :  { %v1168_v29 = vadd.f32 %v1536_v21, %v1167_v0 }
 0x5c7   :  { %v1149_v16 = vsel %vm1148_vm10, %v1534_v57, %v1145_v8 }
 0x5c8   :  { %v1154_v24 = vsel %vm1151_vm11, %v1153_v13, %v1149_v16  ;;  %v1172_v23 = vsel %vm1171_vm14, %v1536_v21, %v1168_v29 }
 0x5c9   :  { %v1182_v44 = vmul.f32 %v1180_v25, %v1154_v24  ;;  %v1177_v35 = vsel %vm1174_vm15, %v1176_v9, %v1172_v23 }
 0x5ca   :  { %v1185_v55 = vsub.f32 1.0, %v1177_v35  ;;  %v1190_v10 = vmul.f32 %v1188_v46, %v1177_v35 }
 0x5cb   :  { %v1183_v18 = vadd.f32 %v1182_v44, %v2183_v60 }
 0x5cd   :  { %1537 = vtanh.f32 %v1183_v18 }
 0x5d3   :  { %v1538_v1 = vpop.eup %1537 }
 0x5d4   :  { %v1186_v22 = vmul.f32 %v1538_v1, %v1185_v55 }
 0x5d6   :  { %v1191_v17 = vadd.f32 %v1190_v10, %v1186_v22 }
 0x5d8   :  { %1192 = vst [vmem:[%s2236_s5 - $0x6] sm:$0xc0] %v1191_v17 }

// kernel: train_fn.3
= control target key start
LH: loop header
LB: loop body
LE: loop exit
PB: predicated region body
PF: predicated region fallthrough
CT: control target
= control target key end

     0   :  { %s5009_s13 = smov 0   ;;  %s5011_s14 = smov 0   ;;  %s6962_s0 = inlined_call_operand.vmem [shape: bf16[2,14,128], index: 0, kind: input, shape index: {}]   ;;  %s6963_s1 = inlined_call_operand.vmem [shape: bf16[2,128], index: 1, kind: input, shape index: {}]   ;;  %s6964_s2 = inlined_call_operand.vmem [shape: bf16[2,128,384], index: 2, kind: input, shape index: {}]   ;;  %s6965_s3 = inlined_call_operand.vmem [shape: bf16[2,128,384], index: 3, kind: input, shape index: {}]   ;;  %s6966_s4 = inlined_call_operand.vmem [shape: bf16[2,128,384], index: 4, kind: input, shape index: {}]   ;;  %s6967_s5 = inlined_call_operand.vmem [shape: f32[2,1,384], index: 5, kind: input, shape index: {}]   ;;  %s6968_s6 = inlined_call_operand.vmem [shape: f32[2,1,384], index: 6, kind: input, shape index: {}]   ;;  %s6969_s7 = inlined_call_operand.vmem [shape: bf16[2,128,256], index: 7, kind: input, shape index: {}]   ;;  %s6970_s8 = inlined_call_operand.vmem [shape: f32[2,1,256], index: 8, kind: input, shape index: {}]   ;;  %s6971_s9 = inlined_call_operand.vmem [shape: s32[2,14,1], index: 9, kind: input, shape index: {}]   ;;  %s6972_s10 = inlined_call_operand.vmem [shape: f32[2,1,128], index: 10, kind: output, shape index: {}]  }
   0x1   :  { %s5013_s15 = smov 0  }
   0x2 LB: > { %s5025_s16 = sadd.s32 4294967295, %s4946_s15   ;;  %s5028_s17 = sadd.s32 1, %s4946_s15   ;;  %s4946_s15 = sphi %s5013_s15, %s7178_s15   ;;  %s4942_s14 = sphi %s5011_s14, %s7177_s14   ;;  %s4938_s13 = sphi %s5009_s13, %s7176_s13  }
   0x3   : > { %s171_s18 = ssub.s32 %s4946_s15, %s5028_s17  ;;  %s174_s19 = sadd.s32 1, %s4942_s14 }
   0x4   : > { %p172_p0 = scmp.eq.s32.totalorder %s171_s18, 0  ;;  %p181_p1 = scmp.ne.s32.totalorder %s4942_s14, %s4938_s13 }
   0x5   : > { %p182_p2 = scmp.eq.s32.totalorder %s4946_s15, 0  ;;  %p3734_p4 = scmp.ge.s32.totalorder %s4946_s15, 2 }
   0x6   : > { %s5037_s20 = scalar_select %p172_p0, %s4942_s14, %s174_s19  }
   0x7   : > { %p5039_p3 = por %p182_p2, %p181_p1  ;;  %299 = sbr.rel (%p3734_p4) target bundleno = 53 (0x35), region = 48 }
   0xc   : > { %302 = sbr.rel (!%p5039_p3) target bundleno = 48 (0x30), region = 52  ;;  %s304_s22 = sand.u32 (%p5039_p3), 1, %s4942_s14  }
   0xd   : > { %s3736_s23 = sshll.u32 (%p5039_p3), %s4946_s15, 2  ;;  %s3735_s24 = sshll.u32 (%p5039_p3), %s304_s22, 7 }
   0xe   : > { %s5051_s27 = scalar_lea.vmem (%p5039_p3), %s6969_s7, %s3736_s23  ;;  %s5055_s28 = scalar_lea.vmem (%p5039_p3), [#allocation6], %s3735_s24 }
   0xf   : > { %v325_v0 = vld [vmem:[%s5051_s27] sm:$0xf] (%p5039_p3)  ;;  %v327_v1 = vld [vmem:[%s5051_s27 + $0x8] sm:$0xf] (%p5039_p3)  ;;  %v329_v2 = vld [vmem:[%s5051_s27 + $0x10] sm:$0xf] (%p5039_p3) }
  0x10   : > { %326 = vst [vmem:[%s5055_s28] sm:$0xf] (%p5039_p3), %v325_v0  ;;  %v331_v3 = vld [vmem:[%s5051_s27 + $0x18] sm:$0xf] (%p5039_p3)  ;;  %v333_v4 = vld [vmem:[%s5051_s27 + $0x20] sm:$0xf] (%p5039_p3) }
  0x11   : > { %328 = vst [vmem:[%s5055_s28 + $0x4] sm:$0xf] %v327_v1  ;;  %v335_v5 = vld [vmem:[%s5051_s27 + $0x28] sm:$0xf]  ;;  %v337_v6 = vld [vmem:[%s5051_s27 + $0x30] sm:$0xf] }
  0x12   : > { %330 = vst [vmem:[%s5055_s28 + $0x8] sm:$0xf] %v329_v2  ;;  %v339_v7 = vld [vmem:[%s5051_s27 + $0x38] sm:$0xf]  ;;  %v341_v8 = vld [vmem:[%s5051_s27 + $0x40] sm:$0xf] }
  0x13   : > { %332 = vst [vmem:[%s5055_s28 + $0xc] sm:$0xf] %v331_v3  ;;  %v343_v9 = vld [vmem:[%s5051_s27 + $0x48] sm:$0xf]  ;;  %v345_v10 = vld [vmem:[%s5051_s27 + $0x50] sm:$0xf] }
  0x14   : > { %334 = vst [vmem:[%s5055_s28 + $0x10] sm:$0xf] %v333_v4  ;;  %v347_v11 = vld [vmem:[%s5051_s27 + $0x58] sm:$0xf]  ;;  %v349_v12 = vld [vmem:[%s5051_s27 + $0x60] sm:$0xf] }
  0x15   : > { %336 = vst [vmem:[%s5055_s28 + $0x14] sm:$0xf] %v335_v5  ;;  %v351_v13 = vld [vmem:[%s5051_s27 + $0x68] sm:$0xf]  ;;  %v353_v14 = vld [vmem:[%s5051_s27 + $0x70] sm:$0xf] }
  0x16   : > { %338 = vst [vmem:[%s5055_s28 + $0x18] sm:$0xf] %v337_v6  ;;  %v355_v15 = vld [vmem:[%s5051_s27 + $0x78] sm:$0xf]  ;;  %v357_v16 = vld [vmem:[%s5051_s27 + $0x80] sm:$0xf] }
  0x17   : > { %340 = vst [vmem:[%s5055_s28 + $0x1c] sm:$0xf] %v339_v7  ;;  %v359_v17 = vld [vmem:[%s5051_s27 + $0x88] sm:$0xf]  ;;  %v361_v18 = vld [vmem:[%s5051_s27 + $0x90] sm:$0xf] }
  0x18   : > { %342 = vst [vmem:[%s5055_s28 + $0x20] sm:$0xf] %v341_v8  ;;  %v363_v19 = vld [vmem:[%s5051_s27 + $0x98] sm:$0xf]  ;;  %v365_v20 = vld [vmem:[%s5051_s27 + $0xa0] sm:$0xf] }
  0x19   : > { %344 = vst [vmem:[%s5055_s28 + $0x24] sm:$0xf] %v343_v9  ;;  %v367_v21 = vld [vmem:[%s5051_s27 + $0xa8] sm:$0xf]  ;;  %v369_v22 = vld [vmem:[%s5051_s27 + $0xb0] sm:$0xf] }
  0x1a   : > { %346 = vst [vmem:[%s5055_s28 + $0x28] sm:$0xf] %v345_v10  ;;  %v371_v23 = vld [vmem:[%s5051_s27 + $0xb8] sm:$0xf]  ;;  %v373_v24 = vld [vmem:[%s5051_s27 + $0xc0] sm:$0xf] }
  0x1b   : > { %348 = vst [vmem:[%s5055_s28 + $0x2c] sm:$0xf] %v347_v11  ;;  %v375_v25 = vld [vmem:[%s5051_s27 + $0xc8] sm:$0xf]  ;;  %v377_v26 = vld [vmem:[%s5051_s27 + $0xd0] sm:$0xf] }
  0x1c   : > { %350 = vst [vmem:[%s5055_s28 + $0x30] sm:$0xf] %v349_v12  ;;  %v379_v27 = vld [vmem:[%s5051_s27 + $0xd8] sm:$0xf]  ;;  %v381_v28 = vld [vmem:[%s5051_s27 + $0xe0] sm:$0xf] }
  0x1d   : > { %352 = vst [vmem:[%s5055_s28 + $0x34] sm:$0xf] %v351_v13  ;;  %v383_v29 = vld [vmem:[%s5051_s27 + $0xe8] sm:$0xf]  ;;  %v385_v30 = vld [vmem:[%s5051_s27 + $0xf0] sm:$0xf] }
  0x1e   : > { %354 = vst [vmem:[%s5055_s28 + $0x38] sm:$0xf] %v353_v14  ;;  %v387_v31 = vld [vmem:[%s5051_s27 + $0xf8] sm:$0xf] }
  0x1f   : > { %356 = vst [vmem:[%s5055_s28 + $0x3c] sm:$0xf] %v355_v15 }
  0x20   : > { %358 = vst [vmem:[%s5055_s28 + $0x40] sm:$0xf] %v357_v16 }
  0x21   : > { %360 = vst [vmem:[%s5055_s28 + $0x44] sm:$0xf] %v359_v17 }
  0x22   : > { %362 = vst [vmem:[%s5055_s28 + $0x48] sm:$0xf] %v361_v18 }
  0x23   : > { %364 = vst [vmem:[%s5055_s28 + $0x4c] sm:$0xf] %v363_v19 }
  0x24   : > { %366 = vst [vmem:[%s5055_s28 + $0x50] sm:$0xf] %v365_v20 }
  0x25   : > { %368 = vst [vmem:[%s5055_s28 + $0x54] sm:$0xf] %v367_v21 }
  0x26   : > { %370 = vst [vmem:[%s5055_s28 + $0x58] sm:$0xf] %v369_v22 }
  0x27   : > { %372 = vst [vmem:[%s5055_s28 + $0x5c] sm:$0xf] %v371_v23 }
  0x28   : > { %374 = vst [vmem:[%s5055_s28 + $0x60] sm:$0xf] %v373_v24 }
  0x29   : > { %376 = vst [vmem:[%s5055_s28 + $0x64] sm:$0xf] %v375_v25 }
  0x2a   : > { %378 = vst [vmem:[%s5055_s28 + $0x68] sm:$0xf] %v377_v26 }
  0x2b   : > { %380 = vst [vmem:[%s5055_s28 + $0x6c] sm:$0xf] %v379_v27 }
  0x2c   : > { %382 = vst [vmem:[%s5055_s28 + $0x70] sm:$0xf] %v381_v28 }
  0x2d   : > { %384 = vst [vmem:[%s5055_s28 + $0x74] sm:$0xf] %v383_v29 }
  0x2e   : > { %386 = vst [vmem:[%s5055_s28 + $0x78] sm:$0xf] %v385_v30 }
  0x2f   : > { %388 = vst [vmem:[%s5055_s28 + $0x7c] sm:$0xf] %v387_v31 }
  0x30 PF: > { %476 = sbr.rel (!%p5039_p3) target bundleno = 53 (0x35), region = 93  ;;  %s478_s29 = sand.u32 (%p5039_p3), 1, %s4942_s14  }
  0x31   : > { %s481_s12 = scalar_lea.vmem (%p5039_p3), %s6970_s8, %s4946_s15  ;;  %s3737_s18 = sshll.u32 (%p5039_p3), %s478_s29, 1 }
  0x32   : > { %v498_v32 = vld [vmem:[%s481_s12] sm:$0x1] (%p5039_p3)  ;;  %v500_v33 = vld [vmem:[%s481_s12 + $0x2] sm:$0x1] (%p5039_p3)  ;;  %s480_s19 = scalar_lea.vmem (%p5039_p3), [#allocation7], %s3737_s18 }
  0x33   : > { %499 = vst [vmem:[%s480_s19] sm:$0x1] (%p5039_p3), %v498_v32 }
  0x34   : > { %501 = vst [vmem:[%s480_s19 + $0x1] sm:$0x1] (%p5039_p3), %v500_v33 }
  0x35 PF: > { %p3738_p5 = scmp.ge.s32.totalorder %s4946_s15, 1  ;;  %p520_p6 = scmp.lt.s32.totalorder %s4946_s15, 3 }
  0x37   : > { %p521_p7 = pnand %p3738_p5, %p520_p6 }
  0x38   : > { %s527_s21 = sand.u32 (!%p521_p7), 1, %s4938_s13   ;;  %p3741_p8 = scmp.ne.s32.totalorder (!%p521_p7), %s5025_s16, 0 }
  0x39   : > { %524 = sbr.rel (%p521_p7) target bundleno = 2203 (0x89b), region = 127  ;;  %s3739_s22 = sshll.u32 (!%p521_p7), %s527_s21, 7 }
  0x3a   : > { %s5129_s23 = sshll.u32 (!%p521_p7), %s527_s21, 1  ;;  %s5131_s24 = scalar_lea.vmem (!%p521_p7), [#allocation6], %s3739_s22 }
  0x3b   : > { %s536_s25 = scalar_lea.vmem (!%p521_p7), [#allocation7], %s5129_s23 }
  0x3e   : > { %574 = sbr.rel (%p3741_p8) target bundleno = 1485 (0x5cd), region = 139 }
  0x43   : > { %v3828_v34 = vld [vmem:[%s6965_s3 + $0xa8] sm:$0xf]  ;;  %v4603_v35 = vld [vmem:[%s6965_s3 + $0xb0] sm:$0xf0]  ;;  %v4602_v36 = vld [vmem:[%s6965_s3 + $0xac] sm:$0xf] }
  0x44   : > { %v3829_v37 = vor.u32 %v4603_v35, %v3828_v34  ;;  %v3830_v38 = vld [vmem:[%s6965_s3 + $0xb4] sm:$0xf0]  ;;  %v3928_v39 = vld [vmem:[%s6964_s2 + $0xa8] sm:$0xf]  ;;  %v4579_v40 = vld [vmem:[%s6964_s2 + $0xb0] sm:$0xf0] }
  0x45   : > { %v3833_v41 = vor.u32 %v4602_v36, %v3830_v38  ;;  %v3929_v42 = vor.u32 %v4579_v40, %v3928_v39  ;;  %v3816_v43 = vld [vmem:[%s6965_s3 + $0x90] sm:$0xf]  ;;  %v4600_v44 = vld [vmem:[%s6965_s3 + $0x98] sm:$0xf0]  ;;  %v4599_v45 = vld [vmem:[%s6965_s3 + $0x94] sm:$0xf] }
  0x46   : > { %778 = vmatpush.bf16.msra.mxu0 %v3829_v37  ;;  %v3817_v46 = vor.u32 %v4600_v44, %v3816_v43  ;;  %v3818_v47 = vld [vmem:[%s6965_s3 + $0x9c] sm:$0xf0]  ;;  %v3916_v48 = vld [vmem:[%s6964_s2 + $0x90] sm:$0xf]  ;;  %v4576_v49 = vld [vmem:[%s6964_s2 + $0x98] sm:$0xf0] }
  0x47   : > { %791 = vmatpush.bf16.msra.mxu1 %v3833_v41  ;;  %984 = vmatpush.bf16.msra.mxu3 %v3929_v42  ;;  %v3821_v50 = vor.u32 %v4599_v45, %v3818_v47  ;;  %v3917_v51 = vor.u32 %v4576_v49, %v3916_v48  ;;  %v3836_v52 = vld [vmem:[%s6965_s3 + $0xb0] sm:$0xf]  ;;  %v4604_v53 = vld [vmem:[%s6965_s3 + $0xb8] sm:$0xf0]  ;;  %v3804_v54 = vld [vmem:[%s6965_s3 + $0x78] sm:$0xf] }
  0x48   : > { %v3837_v55 = vor.u32 %v4604_v53, %v3836_v52  ;;  %v4597_v56 = vld [vmem:[%s6965_s3 + $0x80] sm:$0xf0]  ;;  %v4596_v57 = vld [vmem:[%s6965_s3 + $0x7c] sm:$0xf]  ;;  %v3806_v58 = vld [vmem:[%s6965_s3 + $0x84] sm:$0xf0] }
  0x49   : > { %v3904_v59 = vld [vmem:[%s6964_s2 + $0x78] sm:$0xf]  ;;  %v4573_v60 = vld [vmem:[%s6964_s2 + $0x80] sm:$0xf0]  ;;  %v3805_v62 = vor.u32 %v4597_v56, %v3804_v54  ;;  %v3792_v0 = vld [vmem:[%s6965_s3 + $0x60] sm:$0xf]  ;;  %v3809_v2 = vor.u32 %v4596_v57, %v3806_v58 }
  0x4a   : > { %v3824_v61 = vld [vmem:[%s6965_s3 + $0x98] sm:$0xf]  ;;  %779 = vmatpush.bf16.msra.mxu0 %v3817_v46  ;;  %804 = vmatpush.bf16.msra.mxu2 %v3837_v55  ;;  %v4601_v63 = vld [vmem:[%s6965_s3 + $0xa0] sm:$0xf0]  ;;  %v4594_v1 = vld [vmem:[%s6965_s3 + $0x68] sm:$0xf0]  ;;  %v3905_v3 = vor.u32 %v4573_v60, %v3904_v59 }
  0x4b   : > { %792 = vmatpush.bf16.msra.mxu1 %v3821_v50  ;;  %985 = vmatpush.bf16.msra.mxu3 %v3917_v51  ;;  %v3825_v4 = vor.u32 %v4601_v63, %v3824_v61  ;;  %v4593_v5 = vld [vmem:[%s6965_s3 + $0x64] sm:$0xf]  ;;  %v3794_v6 = vld [vmem:[%s6965_s3 + $0x6c] sm:$0xf0]  ;;  %v3892_v7 = vld [vmem:[%s6964_s2 + $0x60] sm:$0xf]  ;;  %v3793_v11 = vor.u32 %v4594_v1, %v3792_v0 }
  0x4c   : > { %v4570_v8 = vld [vmem:[%s6964_s2 + $0x68] sm:$0xf0]  ;;  %v3812_v9 = vld [vmem:[%s6965_s3 + $0x80] sm:$0xf]  ;;  %v3780_v13 = vld [vmem:[%s6965_s3 + $0x48] sm:$0xf]  ;;  %v3797_v15 = vor.u32 %v4593_v5, %v3794_v6 }
  0x4d   : > { %v4598_v10 = vld [vmem:[%s6965_s3 + $0x88] sm:$0xf0]  ;;  %v4591_v14 = vld [vmem:[%s6965_s3 + $0x50] sm:$0xf0]  ;;  %v3893_v16 = vor.u32 %v4570_v8, %v3892_v7  ;;  %v3800_v18 = vld [vmem:[%s6965_s3 + $0x68] sm:$0xf] }
  0x4e   : > { %780 = vmatpush.bf16.msra.mxu0 %v3805_v62  ;;  %805 = vmatpush.bf16.msra.mxu2 %v3825_v4  ;;  %v3813_v12 = vor.u32 %v4598_v10, %v3812_v9  ;;  %v4590_v17 = vld [vmem:[%s6965_s3 + $0x4c] sm:$0xf]  ;;  %v4595_v19 = vld [vmem:[%s6965_s3 + $0x70] sm:$0xf0]  ;;  %v3782_v20 = vld [vmem:[%s6965_s3 + $0x54] sm:$0xf0]  ;;  %v3781_v23 = vor.u32 %v4591_v14, %v3780_v13 }
  0x4f   : > { %793 = vmatpush.bf16.msra.mxu1 %v3809_v2  ;;  %986 = vmatpush.bf16.msra.mxu3 %v3905_v3  ;;  %v3880_v21 = vld [vmem:[%s6964_s2 + $0x48] sm:$0xf]  ;;  %v4567_v22 = vld [vmem:[%s6964_s2 + $0x50] sm:$0xf0]  ;;  %v3801_v24 = vor.u32 %v4595_v19, %v3800_v18  ;;  %v3768_v25 = vld [vmem:[%s6965_s3 + $0x30] sm:$0xf]  ;;  %v3785_v27 = vor.u32 %v4590_v17, %v3782_v20 }
  0x50   : > { %v4588_v26 = vld [vmem:[%s6965_s3 + $0x38] sm:$0xf0]  ;;  %v3881_v28 = vor.u32 %v4567_v22, %v3880_v21  ;;  %v4587_v29 = vld [vmem:[%s6965_s3 + $0x34] sm:$0xf]  ;;  %v3788_v30 = vld [vmem:[%s6965_s3 + $0x50] sm:$0xf] }
  0x51   : > { %v4592_v31 = vld [vmem:[%s6965_s3 + $0x58] sm:$0xf0]  ;;  %v3770_v32 = vld [vmem:[%s6965_s3 + $0x3c] sm:$0xf0]  ;;  %v3868_v33 = vld [vmem:[%s6964_s2 + $0x30] sm:$0xf]  ;;  %v3769_v35 = vor.u32 %v4588_v26, %v3768_v25 }
  0x52   : > { %781 = vmatpush.bf16.msra.mxu0 %v3793_v11  ;;  %806 = vmatpush.bf16.msra.mxu2 %v3813_v12  ;;  %v4564_v34 = vld [vmem:[%s6964_s2 + $0x38] sm:$0xf0]  ;;  %v3789_v36 = vor.u32 %v4592_v31, %v3788_v30  ;;  %v3756_v37 = vld [vmem:[%s6965_s3 + $0x18] sm:$0xf]  ;;  %v4585_v38 = vld [vmem:[%s6965_s3 + $0x20] sm:$0xf0]  ;;  %v3773_v39 = vor.u32 %v4587_v29, %v3770_v32 }
  0x53   : > { %794 = vmatpush.bf16.msra.mxu1 %v3797_v15  ;;  %987 = vmatpush.bf16.msra.mxu3 %v3893_v16  ;;  %v3869_v40 = vor.u32 %v4564_v34, %v3868_v33  ;;  %v4584_v41 = vld [vmem:[%s6965_s3 + $0x1c] sm:$0xf]  ;;  %v3776_v42 = vld [vmem:[%s6965_s3 + $0x38] sm:$0xf]  ;;  %v4589_v43 = vld [vmem:[%s6965_s3 + $0x40] sm:$0xf0]  ;;  %v3757_v47 = vor.u32 %v4585_v38, %v3756_v37 }
  0x54   : > { %v3758_v44 = vld [vmem:[%s6965_s3 + $0x24] sm:$0xf0]  ;;  %v3856_v45 = vld [vmem:[%s6964_s2 + $0x18] sm:$0xf]  ;;  %v4561_v46 = vld [vmem:[%s6964_s2 + $0x20] sm:$0xf0]  ;;  %v3777_v48 = vor.u32 %v4589_v43, %v3776_v42 }
  0x55   : > { %v3744_v49 = vld [vmem:[%s6965_s3] sm:$0xf]  ;;  %v4582_v50 = vld [vmem:[%s6965_s3 + $0x8] sm:$0xf0]  ;;  %v4581_v51 = vld [vmem:[%s6965_s3 + $0x4] sm:$0xf]  ;;  %v3761_v52 = vor.u32 %v4584_v41, %v3758_v44  ;;  %v3857_v53 = vor.u32 %v4561_v46, %v3856_v45 }
  0x56   : > { %782 = vmatpush.bf16.msra.mxu0 %v3781_v23  ;;  %807 = vmatpush.bf16.msra.mxu2 %v3801_v24  ;;  %v3746_v54 = vld [vmem:[%s6965_s3 + $0xc] sm:$0xf0]  ;;  %v3764_v55 = vld [vmem:[%s6965_s3 + $0x20] sm:$0xf]  ;;  %v4586_v56 = vld [vmem:[%s6965_s3 + $0x28] sm:$0xf0]  ;;  %v3745_v63 = vor.u32 %v4582_v50, %v3744_v49 }
  0x57   : > { %795 = vmatpush.bf16.msra.mxu1 %v3785_v27  ;;  %988 = vmatpush.bf16.msra.mxu3 %v3881_v28  ;;  %v3844_v57 = vld [vmem:[%s6964_s2] sm:$0xf]  ;;  %v4558_v58 = vld [vmem:[%s6964_s2 + $0x8] sm:$0xf0]  ;;  %v3930_v60 = vld [vmem:[%s6964_s2 + $0xb4] sm:$0xf0]  ;;  %v3765_v2 = vor.u32 %v4586_v56, %v3764_v55  ;;  %v3749_v3 = vor.u32 %v4581_v51, %v3746_v54 }
  0x58   : > { %v4578_v59 = vld [vmem:[%s6964_s2 + $0xac] sm:$0xf]  ;;  %v3936_v61 = vld [vmem:[%s6964_s2 + $0xb0] sm:$0xf]  ;;  %v4580_v62 = vld [vmem:[%s6964_s2 + $0xb8] sm:$0xf0]  ;;  %v3845_v4 = vor.u32 %v4558_v58, %v3844_v57 }
  0x59   : > { %v4675_v0 = vld [vmem:[%s6965_s3 + $0x16c] sm:$0xf]  ;;  %v4093_v1 = vld [vmem:[%s6965_s3 + $0x174] sm:$0xf0]  ;;  %v3752_v5 = vld [vmem:[%s6965_s3 + $0x8] sm:$0xf]  ;;  %v3933_v7 = vor.u32 %v4578_v59, %v3930_v60  ;;  %v3937_v8 = vor.u32 %v4580_v62, %v3936_v61 }
  0x5a   : > { %783 = vmatpush.bf16.msra.mxu0 %v3769_v35  ;;  %808 = vmatpush.bf16.msra.mxu2 %v3789_v36  ;;  %v4583_v6 = vld [vmem:[%s6965_s3 + $0x10] sm:$0xf0]  ;;  %v4091_v10 = vld [vmem:[%s6965_s3 + $0x168] sm:$0xf]  ;;  %v4096_v12 = vor.u32 %v4675_v0, %v4093_v1  ;;  %v3918_v13 = vld [vmem:[%s6964_s2 + $0x9c] sm:$0xf0] }
  0x5b   : > { %796 = vmatpush.bf16.msra.mxu1 %v3773_v39  ;;  %989 = vmatpush.bf16.msra.mxu3 %v3869_v40  ;;  %v4575_v9 = vld [vmem:[%s6964_s2 + $0x94] sm:$0xf]  ;;  %v3924_v14 = vld [vmem:[%s6964_s2 + $0x98] sm:$0xf]  ;;  %v4577_v15 = vld [vmem:[%s6964_s2 + $0xa0] sm:$0xf0]  ;;  %v3753_v18 = vor.u32 %v4583_v6, %v3752_v5 }
  0x5c   : > { %v4676_v11 = vld [vmem:[%s6965_s3 + $0x170] sm:$0xf0]  ;;  %v4081_v17 = vld [vmem:[%s6965_s3 + $0x15c] sm:$0xf0]  ;;  %v4572_v20 = vld [vmem:[%s6964_s2 + $0x7c] sm:$0xf]  ;;  %v3921_v22 = vor.u32 %v4575_v9, %v3918_v13  ;;  %v3925_v23 = vor.u32 %v4577_v15, %v3924_v14 }
  0x5d   : > { %v4672_v16 = vld [vmem:[%s6965_s3 + $0x154] sm:$0xf]  ;;  %v4092_v19 = vor.u32 %v4676_v11, %v4091_v10  ;;  %v4079_v21 = vld [vmem:[%s6965_s3 + $0x150] sm:$0xf]  ;;  %v4673_v24 = vld [vmem:[%s6965_s3 + $0x158] sm:$0xf0] }
  0x5e   : > { %784 = vmatpush.bf16.msra.mxu0 %v3757_v47  ;;  %809 = vmatpush.bf16.msra.mxu2 %v3777_v48  ;;  %v3840_v25 = vld [vmem:[%s6962_s0] sm:$0xf]  ;;  %v4556_v26 = vld [vmem:[%s6962_s0] sm:$0x70]  ;;  %v4084_v27 = vor.u32 %v4672_v16, %v4081_v17  ;;  %v3906_v28 = vld [vmem:[%s6964_s2 + $0x84] sm:$0xf0]  ;;  %v4080_v34 = vor.u32 %v4673_v24, %v4079_v21 }
  0x5f   : > { %797 = vmatpush.bf16.msra.mxu1 %v3761_v52  ;;  %990 = vmatpush.bf16.msra.mxu3 %v3857_v53  ;;  %v3912_v29 = vld [vmem:[%s6964_s2 + $0x80] sm:$0xf]  ;;  %v4574_v30 = vld [vmem:[%s6964_s2 + $0x88] sm:$0xf0]  ;;  %v5393_v31 = vor.u32 %v4556_v26, %v3840_v25  ;;  %v4669_v32 = vld [vmem:[%s6965_s3 + $0x13c] sm:$0xf]  ;;  %v3909_v36 = vor.u32 %v4572_v20, %v3906_v28 }
  0x60   : > { %v4069_v33 = vld [vmem:[%s6965_s3 + $0x144] sm:$0xf0]  ;;  %v5405_v35 = vld [vmem:[%s6963_s1] sm:$0x1]  ;;  %v3913_v37 = vor.u32 %v4574_v30, %v3912_v29  ;;  %v4569_v38 = vld [vmem:[%s6964_s2 + $0x64] sm:$0xf] }
  0x61   : > { %v4067_v39 = vld [vmem:[%s6965_s3 + $0x138] sm:$0xf]  ;;  %v4670_v40 = vld [vmem:[%s6965_s3 + $0x140] sm:$0xf0]  ;;  %v4072_v41 = vor.u32 %v4669_v32, %v4069_v33  ;;  %v3894_v42 = vld [vmem:[%s6964_s2 + $0x6c] sm:$0xf0] }
  0x62   : > { %785 = vmatpush.bf16.msra.mxu0 %v3745_v63  ;;  %810 = vmatpush.bf16.msra.mxu2 %v3765_v2  ;;  %v3900_v43 = vld [vmem:[%s6964_s2 + $0x68] sm:$0xf]  ;;  %v4571_v44 = vld [vmem:[%s6964_s2 + $0x70] sm:$0xf0]  ;;  %v4666_v45 = vld [vmem:[%s6965_s3 + $0x124] sm:$0xf]  ;;  %v4068_v47 = vor.u32 %v4670_v40, %v4067_v39  ;;  %v3897_v48 = vor.u32 %v4569_v38, %v3894_v42 }
  0x63   : > { %798 = vmatpush.bf16.msra.mxu1 %v3749_v3  ;;  %991 = vmatpush.bf16.msra.mxu3 %v3845_v4  ;;  %v4057_v46 = vld [vmem:[%s6965_s3 + $0x12c] sm:$0xf0]  ;;  %v3901_v49 = vor.u32 %v4571_v44, %v3900_v43  ;;  %v4566_v50 = vld [vmem:[%s6964_s2 + $0x4c] sm:$0xf]  ;;  %v4055_v51 = vld [vmem:[%s6965_s3 + $0x120] sm:$0xf] }
  0x64   : > { %v4667_v52 = vld [vmem:[%s6965_s3 + $0x128] sm:$0xf0]  ;;  %v4060_v53 = vor.u32 %v4666_v45, %v4057_v46  ;;  %v3882_v54 = vld [vmem:[%s6964_s2 + $0x54] sm:$0xf0]  ;;  %v3888_v55 = vld [vmem:[%s6964_s2 + $0x50] sm:$0xf] }
  0x65   : > { %786 = vmatmul.bf16.vlgmr.msra.gmra.mxu0 %v5405_v35  ;;  %v4568_v56 = vld [vmem:[%s6964_s2 + $0x58] sm:$0xf0]  ;;  %v4663_v57 = vld [vmem:[%s6965_s3 + $0x10c] sm:$0xf]  ;;  %v4045_v58 = vld [vmem:[%s6965_s3 + $0x114] sm:$0xf0]  ;;  %v4056_v59 = vor.u32 %v4667_v52, %v4055_v51  ;;  %v3885_v60 = vor.u32 %v4566_v50, %v3882_v54 }
  0x66   : > { %998 = vmatpush.bf16.msrb.mxu0 %v3933_v7  ;;  %811 = vmatpush.bf16.msra.mxu2 %v3753_v18  ;;  %v3889_v61 = vor.u32 %v4568_v56, %v3888_v55  ;;  %v4563_v62 = vld [vmem:[%s6964_s2 + $0x34] sm:$0xf]  ;;  %v4043_v63 = vld [vmem:[%s6965_s3 + $0x108] sm:$0xf]  ;;  %v4048_v1 = vor.u32 %v4663_v57, %v4045_v58  ;;  %v3870_v2 = vld [vmem:[%s6964_s2 + $0x3c] sm:$0xf0] }
  0x67   : > { %1012 = vmatpush.bf16.msrb.mxu1 %v3937_v8  ;;  %1278 = vmatpush.bf16.msrb.mxu3 %v4096_v12  ;;  %v4664_v0 = vld [vmem:[%s6965_s3 + $0x110] sm:$0xf0]  ;;  %v3876_v3 = vld [vmem:[%s6964_s2 + $0x38] sm:$0xf]  ;;  %v4565_v4 = vld [vmem:[%s6964_s2 + $0x40] sm:$0xf0]  ;;  %v3873_v8 = vor.u32 %v4563_v62, %v3870_v2 }
  0x68   : > { %992 = vmatmul.bf16.vlgmr.msra.gmra.mxu3 %v5393_v31  ;;  %799 = vmatmul.bf16.vlgmr.msra.gmra.mxu1 %v5405_v35  ;;  %v4660_v5 = vld [vmem:[%s6965_s3 + $0xf4] sm:$0xf]  ;;  %v4033_v6 = vld [vmem:[%s6965_s3 + $0xfc] sm:$0xf0]  ;;  %v4044_v7 = vor.u32 %v4664_v0, %v4043_v63  ;;  %v3877_v9 = vor.u32 %v4565_v4, %v3876_v3  ;;  %v4560_v10 = vld [vmem:[%s6964_s2 + $0x1c] sm:$0xf] }
  0x69   : > { %812 = vmatmul.bf16.vlgmr.msra.gmra.mxu2 %v5405_v35  ;;  %v4031_v11 = vld [vmem:[%s6965_s3 + $0xf0] sm:$0xf]  ;;  %v4661_v12 = vld [vmem:[%s6965_s3 + $0xf8] sm:$0xf0]  ;;  %v4036_v13 = vor.u32 %v4660_v5, %v4033_v6  ;;  %v3858_v14 = vld [vmem:[%s6964_s2 + $0x24] sm:$0xf0] }
  0x6a   : > { %1265 = vmatpush.bf16.msrb.mxu2 %v4092_v19  ;;  %999 = vmatpush.bf16.msrb.mxu0 %v3921_v22  ;;  %v3864_v15 = vld [vmem:[%s6964_s2 + $0x20] sm:$0xf]  ;;  %v4562_v16 = vld [vmem:[%s6964_s2 + $0x28] sm:$0xf0]  ;;  %v4657_v17 = vld [vmem:[%s6965_s3 + $0xdc] sm:$0xf]  ;;  %v4032_v19 = vor.u32 %v4661_v12, %v4031_v11  ;;  %v3861_v22 = vor.u32 %v4560_v10, %v3858_v14 }
  0x6b   : > { %1013 = vmatpush.bf16.msrb.mxu1 %v3925_v23  ;;  %1279 = vmatpush.bf16.msrb.mxu3 %v4084_v27  ;;  %v4021_v18 = vld [vmem:[%s6965_s3 + $0xe4] sm:$0xf0]  ;;  %v4557_v20 = vld [vmem:[%s6964_s2 + $0x4] sm:$0xf]  ;;  %v3846_v21 = vld [vmem:[%s6964_s2 + $0xc] sm:$0xf0]  ;;  %v3865_v23 = vor.u32 %v4562_v16, %v3864_v15 }
  0x6c   : > { %v3852_v24 = vld [vmem:[%s6964_s2 + $0x8] sm:$0xf]  ;;  %v4019_v25 = vld [vmem:[%s6965_s3 + $0xd8] sm:$0xf]  ;;  %v4658_v26 = vld [vmem:[%s6965_s3 + $0xe0] sm:$0xf0]  ;;  %v4024_v27 = vor.u32 %v4657_v17, %v4021_v18  ;;  %v3849_v40 = vor.u32 %v4557_v20, %v3846_v21 }
  0x6d   : > { %v4559_v28 = vld [vmem:[%s6964_s2 + $0x10] sm:$0xf0]  ;;  %v4654_v29 = vld [vmem:[%s6965_s3 + $0xc4] sm:$0xf]  ;;  %v4009_v30 = vld [vmem:[%s6965_s3 + $0xcc] sm:$0xf0]  ;;  %v4020_v39 = vor.u32 %v4658_v26, %v4019_v25 }
  0x6e   : > { %1266 = vmatpush.bf16.msrb.mxu2 %v4080_v34  ;;  %1000 = vmatpush.bf16.msrb.mxu0 %v3909_v36  ;;  %v4099_v32 = vld [vmem:[%s6965_s3 + $0x170] sm:$0xf]  ;;  %v4677_v33 = vld [vmem:[%s6965_s3 + $0x178] sm:$0xf0]  ;;  %v4191_v34 = vld [vmem:[%s6964_s2 + $0x168] sm:$0xf]  ;;  %v4012_v44 = vor.u32 %v4654_v29, %v4009_v30 }
  0x6f   : > { %1014 = vmatpush.bf16.msrb.mxu1 %v3913_v37  ;;  %1280 = vmatpush.bf16.msrb.mxu3 %v4072_v41  ;;  %v4652_v36 = vld [vmem:[%s6964_s2 + $0x170] sm:$0xf0]  ;;  %v4199_v37 = vld [vmem:[%s6964_s2 + $0x170] sm:$0xf]  ;;  %v4653_v38 = vld [vmem:[%s6964_s2 + $0x178] sm:$0xf0]  ;;  %v3853_v41 = vor.u32 %v4559_v28, %v3852_v24  ;;  %v4100_v45 = vor.u32 %v4677_v33, %v4099_v32 }
  0x70   : > { %v4007_v42 = vld [vmem:[%s6965_s3 + $0xc0] sm:$0xf]  ;;  %v4655_v43 = vld [vmem:[%s6965_s3 + $0xc8] sm:$0xf0]  ;;  %v4087_v50 = vld [vmem:[%s6965_s3 + $0x158] sm:$0xf] }
  0x71   : > { %v4651_v46 = vld [vmem:[%s6964_s2 + $0x16c] sm:$0xf]  ;;  %v4674_v51 = vld [vmem:[%s6965_s3 + $0x160] sm:$0xf0]  ;;  %v4179_v52 = vld [vmem:[%s6964_s2 + $0x150] sm:$0xf]  ;;  %v4008_v56 = vor.u32 %v4655_v43, %v4007_v42 }
  0x72   : > { %1267 = vmatpush.bf16.msrb.mxu2 %v4068_v47  ;;  %1001 = vmatpush.bf16.msrb.mxu0 %v3897_v48  ;;  %v4193_v47 = vld [vmem:[%s6964_s2 + $0x174] sm:$0xf0]  ;;  %v4192_v48 = vor.u32 %v4652_v36, %v4191_v34  ;;  %v4650_v55 = vld [vmem:[%s6964_s2 + $0x160] sm:$0xf0]  ;;  %v4088_v58 = vor.u32 %v4674_v51, %v4087_v50  ;;  %v4075_v63 = vld [vmem:[%s6965_s3 + $0x140] sm:$0xf] }
  0x73   : > { %1015 = vmatpush.bf16.msrb.mxu1 %v3901_v49  ;;  %1281 = vmatpush.bf16.msrb.mxu3 %v4060_v53  ;;  %v4200_v49 = vor.u32 %v4653_v38, %v4199_v37  ;;  %v4649_v53 = vld [vmem:[%s6964_s2 + $0x158] sm:$0xf0]  ;;  %v4187_v54 = vld [vmem:[%s6964_s2 + $0x158] sm:$0xf]  ;;  %v4196_v57 = vor.u32 %v4651_v46, %v4193_v47  ;;  %v4671_v0 = vld [vmem:[%s6965_s3 + $0x148] sm:$0xf0] }
  0x74   : > { %v4188_v62 = vor.u32 %v4650_v55, %v4187_v54  ;;  %v4646_v2 = vld [vmem:[%s6964_s2 + $0x140] sm:$0xf0]  ;;  %v4175_v3 = vld [vmem:[%s6964_s2 + $0x140] sm:$0xf]  ;;  %v4647_v4 = vld [vmem:[%s6964_s2 + $0x148] sm:$0xf0]  ;;  %v4076_v6 = vor.u32 %v4671_v0, %v4075_v63 }
  0x75   : > { %v4176_v10 = vor.u32 %v4647_v4, %v4175_v3  ;;  %v4063_v11 = vld [vmem:[%s6965_s3 + $0x128] sm:$0xf]  ;;  %v4668_v12 = vld [vmem:[%s6965_s3 + $0x130] sm:$0xf0]  ;;  %v4642_v18 = vld [vmem:[%s6964_s2 + $0x124] sm:$0xf] }
  0x76   : > { %1268 = vmatpush.bf16.msrb.mxu2 %v4056_v59  ;;  %1002 = vmatpush.bf16.msrb.mxu0 %v3885_v60  ;;  %v4648_v59 = vld [vmem:[%s6964_s2 + $0x154] sm:$0xf]  ;;  %v4181_v60 = vld [vmem:[%s6964_s2 + $0x15c] sm:$0xf0]  ;;  %v4163_v14 = vld [vmem:[%s6964_s2 + $0x128] sm:$0xf]  ;;  %v4064_v17 = vor.u32 %v4668_v12, %v4063_v11 }
  0x77   : > { %1016 = vmatpush.bf16.msrb.mxu1 %v3889_v61  ;;  %1282 = vmatpush.bf16.msrb.mxu3 %v4048_v1  ;;  %v4180_v61 = vor.u32 %v4649_v53, %v4179_v52  ;;  %v4167_v1 = vld [vmem:[%s6964_s2 + $0x138] sm:$0xf]  ;;  %v4184_v5 = vor.u32 %v4648_v59, %v4181_v60  ;;  %v4644_v15 = vld [vmem:[%s6964_s2 + $0x130] sm:$0xf0]  ;;  %v4143_v24 = vld [vmem:[%s6964_s2 + $0x108] sm:$0xf] }
  0x78   : > { %v4164_v21 = vor.u32 %v4644_v15, %v4163_v14  ;;  %v4640_v25 = vld [vmem:[%s6964_s2 + $0x110] sm:$0xf0]  ;;  %v4151_v26 = vld [vmem:[%s6964_s2 + $0x110] sm:$0xf]  ;;  %v4639_v30 = vld [vmem:[%s6964_s2 + $0x10c] sm:$0xf] }
  0x79   : > { %v4145_v32 = vld [vmem:[%s6964_s2 + $0x114] sm:$0xf0]  ;;  %v4144_v33 = vor.u32 %v4640_v25, %v4143_v24  ;;  %v4662_v37 = vld [vmem:[%s6965_s3 + $0x100] sm:$0xf0]  ;;  %v4131_v38 = vld [vmem:[%s6964_s2 + $0xf0] sm:$0xf] }
  0x7a   : > { %1269 = vmatpush.bf16.msrb.mxu2 %v4044_v7  ;;  %1003 = vmatpush.bf16.msrb.mxu0 %v3873_v8  ;;  %v4645_v7 = vld [vmem:[%s6964_s2 + $0x13c] sm:$0xf]  ;;  %v4169_v8 = vld [vmem:[%s6964_s2 + $0x144] sm:$0xf0]  ;;  %v4039_v36 = vld [vmem:[%s6965_s3 + $0xf8] sm:$0xf]  ;;  %v4148_v42 = vor.u32 %v4639_v30, %v4145_v32 }
  0x7b   : > { %1017 = vmatpush.bf16.msrb.mxu1 %v3877_v9  ;;  %1283 = vmatpush.bf16.msrb.mxu3 %v4036_v13  ;;  %v4168_v9 = vor.u32 %v4646_v2, %v4167_v1  ;;  %v4155_v13 = vld [vmem:[%s6964_s2 + $0x120] sm:$0xf]  ;;  %v4172_v16 = vor.u32 %v4645_v7, %v4169_v8  ;;  %v4040_v43 = vor.u32 %v4662_v37, %v4039_v36  ;;  %v4119_v50 = vld [vmem:[%s6964_s2 + $0xd8] sm:$0xf]  ;;  %v4634_v51 = vld [vmem:[%s6964_s2 + $0xe0] sm:$0xf0] }
  0x7c   : > { %v4127_v52 = vld [vmem:[%s6964_s2 + $0xe0] sm:$0xf]  ;;  %v4635_v53 = vld [vmem:[%s6964_s2 + $0xe8] sm:$0xf0]  ;;  %v4015_v55 = vld [vmem:[%s6965_s3 + $0xc8] sm:$0xf]  ;;  %v4120_v60 = vor.u32 %v4634_v51, %v4119_v50 }
  0x7d   : > { %v4121_v59 = vld [vmem:[%s6964_s2 + $0xe4] sm:$0xf0]  ;;  %v4631_v63 = vld [vmem:[%s6964_s2 + $0xc8] sm:$0xf0]  ;;  %v4632_v1 = vld [vmem:[%s6964_s2 + $0xd0] sm:$0xf0] }
  0x7e   : > { %1270 = vmatpush.bf16.msrb.mxu2 %v4032_v19  ;;  %1004 = vmatpush.bf16.msrb.mxu0 %v3861_v22  ;;  %v4157_v19 = vld [vmem:[%s6964_s2 + $0x12c] sm:$0xf0]  ;;  %v4115_v0 = vld [vmem:[%s6964_s2 + $0xc8] sm:$0xf]  ;;  %v4627_v3 = vld [vmem:[%s6966_s4 + $0xb0] sm:$0xf0] }
  0x7f   : > { %1018 = vmatpush.bf16.msrb.mxu1 %v3865_v23  ;;  %1284 = vmatpush.bf16.msrb.mxu3 %v4024_v27  ;;  %v4051_v22 = vld [vmem:[%s6965_s3 + $0x110] sm:$0xf]  ;;  %v4665_v23 = vld [vmem:[%s6965_s3 + $0x118] sm:$0xf0]  ;;  %v4160_v28 = vor.u32 %v4642_v18, %v4157_v19  ;;  %v4320_v2 = vld [vmem:[%s6966_s4 + $0xa8] sm:$0xf] }
  0x80   : > { %v4641_v27 = vld [vmem:[%s6964_s2 + $0x118] sm:$0xf0]  ;;  %v4052_v29 = vor.u32 %v4665_v23, %v4051_v22  ;;  %v4626_v4 = vld [vmem:[%s6966_s4 + $0xac] sm:$0xf]  ;;  %v4109_v11 = vld [vmem:[%s6964_s2 + $0xcc] sm:$0xf0]  ;;  %v5756_v15 = vor.u32 %v4627_v3, %v4320_v2 }
  0x81   : > { %v4152_v34 = vor.u32 %v4641_v27, %v4151_v26  ;;  %v4624_v14 = vld [vmem:[%s6966_s4 + $0x98] sm:$0xf0]  ;;  %v4328_v18 = vld [vmem:[%s6966_s4 + $0xb0] sm:$0xf]  ;;  %v4103_v23 = vld [vmem:[%s6962_s0 + $0x8] sm:$0xf] }
  0x82   : > { %1271 = vmatpush.bf16.msrb.mxu2 %v4020_v39  ;;  %1005 = vmatpush.bf16.msrb.mxu0 %v3849_v40  ;;  %v4637_v39 = vld [vmem:[%s6964_s2 + $0xf8] sm:$0xf0]  ;;  %v4139_v40 = vld [vmem:[%s6964_s2 + $0xf8] sm:$0xf]  ;;  %v4629_v24 = vld [vmem:[%s6962_s0 + $0x8] sm:$0x70] }
  0x83   : > { %1019 = vmatpush.bf16.msrb.mxu1 %v3853_v41  ;;  %1285 = vmatpush.bf16.msrb.mxu3 %v4012_v44  ;;  %v4638_v41 = vld [vmem:[%s6964_s2 + $0x100] sm:$0xf0]  ;;  %v4636_v44 = vld [vmem:[%s6964_s2 + $0xf4] sm:$0xf]  ;;  %v4132_v46 = vor.u32 %v4637_v39, %v4131_v38  ;;  %v4628_v19 = vld [vmem:[%s6966_s4 + $0xb8] sm:$0xf0]  ;;  %v4104_v32 = vor.u32 %v4629_v24, %v4103_v23 }
  0x84   : > { %v4140_v47 = vor.u32 %v4638_v41, %v4139_v40  ;;  %v4404_v25 = vld [vmem:[%s6966_s4 + $0x150] sm:$0xf]  ;;  %v4697_v26 = vld [vmem:[%s6966_s4 + $0x158] sm:$0xf0]  ;;  %v5786_v27 = vor.u32 %v4628_v19, %v4328_v18  ;;  %v4296_v30 = vld [vmem:[%s6966_s4 + $0x78] sm:$0xf] }
  0x85   : > { %1006 = vmatmul.bf16.vlgmr.msrb.gmra.mxu0 %v5393_v31  ;;  %v5804_v36 = vor.u32 %v4697_v26, %v4404_v25  ;;  %v4621_v37 = vld [vmem:[%s6966_s4 + $0x80] sm:$0xf0]  ;;  %v4620_v38 = vld [vmem:[%s6966_s4 + $0x7c] sm:$0xf]  ;;  %v4298_v39 = vld [vmem:[%s6966_s4 + $0x84] sm:$0xf0] }
  0x86   : > { %1291 = vmatpush.bf16.msra.mxu0 %v4100_v45  ;;  %1272 = vmatpush.bf16.msrb.mxu2 %v4008_v56  ;;  %v4133_v45 = vld [vmem:[%s6964_s2 + $0xfc] sm:$0xf0]  ;;  %v4392_v40 = vld [vmem:[%s6966_s4 + $0x138] sm:$0xf]  ;;  %v4694_v41 = vld [vmem:[%s6966_s4 + $0x140] sm:$0xf0] }
  0x87   : > { %1468 = vmatpush.bf16.msra.mxu1 %v4192_v48  ;;  %1496 = vmatpush.bf16.msra.mxu3 %v4200_v49  ;;  %v4027_v48 = vld [vmem:[%s6965_s3 + $0xe0] sm:$0xf]  ;;  %v4659_v49 = vld [vmem:[%s6965_s3 + $0xe8] sm:$0xf0]  ;;  %v4136_v54 = vor.u32 %v4636_v44, %v4133_v45  ;;  %v5829_v44 = vor.u32 %v4620_v38, %v4298_v39  ;;  %v4286_v50 = vld [vmem:[%s6966_s4 + $0x6c] sm:$0xf0] }
  0x88   : > { %1286 = vmatmul.bf16.vlgmr.msrb.gmra.mxu3 %v5405_v35  ;;  %1020 = vmatmul.bf16.vlgmr.msrb.gmra.mxu1 %v5393_v31  ;;  %v4643_v31 = vld [vmem:[%s6964_s2 + $0x128] sm:$0xf0]  ;;  %v4028_v56 = vor.u32 %v4659_v49, %v4027_v48  ;;  %v4284_v45 = vld [vmem:[%s6966_s4 + $0x60] sm:$0xf]  ;;  %v4617_v49 = vld [vmem:[%s6966_s4 + $0x64] sm:$0xf] }
  0x89   : > { %1273 = vmatmul.bf16.vlgmr.msrb.gmra.mxu2 %v5405_v35  ;;  %v4156_v20 = vor.u32 %v4643_v31, %v4155_v13  ;;  %v4116_v13 = vor.u32 %v4632_v1, %v4115_v0  ;;  %v4308_v31 = vld [vmem:[%s6966_s4 + $0x90] sm:$0xf]  ;;  %7038 = vst [vmem:[#allocation10_spill] sm:$0xff] %v5829_v44  ;;  %v4618_v48 = vld [vmem:[%s6966_s4 + $0x68] sm:$0xf0]  ;;  %vm838_vm0 = vcmask 1041408  }
  0x8a   : > { %1482 = vmatpush.bf16.msra.mxu2 %v4196_v57  ;;  %1292 = vmatpush.bf16.msra.mxu0 %v4088_v58  ;;  %v4656_v57 = vld [vmem:[%s6965_s3 + $0xd0] sm:$0xf0]  ;;  %v4633_v58 = vld [vmem:[%s6964_s2 + $0xdc] sm:$0xf]  ;;  %v4380_v51 = vld [vmem:[%s6966_s4 + $0x120] sm:$0xf] }
  0x8b   : > { %1469 = vmatpush.bf16.msra.mxu1 %v4180_v61  ;;  %1497 = vmatpush.bf16.msra.mxu3 %v4188_v62  ;;  %v4128_v61 = vor.u32 %v4635_v53, %v4127_v52  ;;  %v4107_v62 = vld [vmem:[%s6964_s2 + $0xc0] sm:$0xf]  ;;  %v4124_v7 = vor.u32 %v4633_v58, %v4121_v59  ;;  %v4016_v8 = vor.u32 %v4656_v57, %v4015_v55  ;;  %v4691_v52 = vld [vmem:[%s6966_s4 + $0x128] sm:$0xf0]  ;;  %v4292_v57 = vld [vmem:[%s6966_s4 + $0x68] sm:$0xf] }
  0x8c   : > { %v4108_v12 = vor.u32 %v4631_v63, %v4107_v62  ;;  %v5865_v55 = vor.u32 %v4617_v49, %v4286_v50  ;;  %v4619_v58 = vld [vmem:[%s6966_s4 + $0x70] sm:$0xf0]  ;;  %v5877_v59 = vor.u32 %v4691_v52, %v4380_v51  ;;  %v4274_v62 = vld [vmem:[%s6966_s4 + $0x54] sm:$0xf0]  ;;  %v4368_v63 = vld [vmem:[%s6966_s4 + $0x108] sm:$0xf] }
  0x8d   : > { %v4688_v0 = vld [vmem:[%s6966_s4 + $0x110] sm:$0xf0]  ;;  %v5895_v1 = vor.u32 %v4619_v58, %v4292_v57  ;;  %v4268_v18 = vld [vmem:[%s6966_s4 + $0x38] sm:$0xf]  ;;  %v4613_v19 = vld [vmem:[%s6966_s4 + $0x40] sm:$0xf0] }
  0x8e   : > { %1483 = vmatpush.bf16.msra.mxu2 %v4184_v5  ;;  %1293 = vmatpush.bf16.msra.mxu0 %v4076_v6  ;;  %v4322_v5 = vld [vmem:[%s6966_s4 + $0xb4] sm:$0xf0]  ;;  %v4416_v6 = vld [vmem:[%s6966_s4 + $0x168] sm:$0xf]  ;;  %7040 = vst [vmem:[#allocation12_spill] sm:$0xff] %v5865_v55  ;;  %vm842_vm1 = vcmask 1043456  }
  0x8f   : > { %1470 = vmatpush.bf16.msra.mxu1 %v4168_v9  ;;  %1498 = vmatpush.bf16.msra.mxu3 %v4176_v10  ;;  %v4700_v9 = vld [vmem:[%s6966_s4 + $0x170] sm:$0xf0]  ;;  %v4630_v10 = vld [vmem:[%s6964_s2 + $0xc4] sm:$0xf]  ;;  %v4608_v23 = vld [vmem:[%s6966_s4 + $0x1c] sm:$0xf] }
  0x90   : > { %v4112_v22 = vor.u32 %v4630_v10, %v4109_v11  ;;  %v4262_v10 = vld [vmem:[%s6966_s4 + $0x3c] sm:$0xf0]  ;;  %v4356_v11 = vld [vmem:[%s6966_s4 + $0xf0] sm:$0xf]  ;;  %v4250_v24 = vld [vmem:[%s6966_s4 + $0x24] sm:$0xf0] }
  0x91   : > { %v4344_v25 = vld [vmem:[%s6966_s4 + $0xd8] sm:$0xf]  ;;  %v4682_v26 = vld [vmem:[%s6966_s4 + $0xe0] sm:$0xf0]  ;;  %v4256_v38 = vld [vmem:[%s6966_s4 + $0x20] sm:$0xf] }
  0x92   : > { %1484 = vmatpush.bf16.msra.mxu2 %v4172_v16  ;;  %1294 = vmatpush.bf16.msra.mxu0 %v4064_v17  ;;  %v5758_v16 = vor.u32 %v4626_v4, %v4322_v5  ;;  %v4623_v17 = vld [vmem:[%s6966_s4 + $0x94] sm:$0xf]  ;;  %v4260_v4 = vld [vmem:[%s6966_s4 + $0x30] sm:$0xf]  ;;  %v4610_v39 = vld [vmem:[%s6966_s4 + $0x28] sm:$0xf0] }
  0x93   : > { %1471 = vmatpush.bf16.msra.mxu1 %v4156_v20  ;;  %1499 = vmatpush.bf16.msra.mxu3 %v4164_v21  ;;  %v5769_v20 = vor.u32 %v4700_v9, %v4416_v6  ;;  %v4310_v21 = vld [vmem:[%s6966_s4 + $0x9c] sm:$0xf0]  ;;  %v4280_v5 = vld [vmem:[%s6966_s4 + $0x50] sm:$0xf]  ;;  %v4616_v6 = vld [vmem:[%s6966_s4 + $0x58] sm:$0xf0]  ;;  %v6015_v52 = vor.u32 %v4610_v39, %v4256_v38 }
  0x94   : > { %v4611_v9 = vld [vmem:[%s6966_s4 + $0x34] sm:$0xf]  ;;  %v4418_v49 = vld [vmem:[%s6966_s4 + $0x174] sm:$0xf0]  ;;  %v4424_v50 = vld [vmem:[%s6966_s4 + $0x170] sm:$0xf] }
  0x95   : > { %v4701_v51 = vld [vmem:[%s6966_s4 + $0x178] sm:$0xf0]  ;;  %v4687_v38 = vld [vmem:[%s6966_s4 + $0x10c] sm:$0xf]  ;;  %v4370_v39 = vld [vmem:[%s6966_s4 + $0x114] sm:$0xf0] }
  0x96   : > { %1485 = vmatpush.bf16.msra.mxu2 %v4160_v28  ;;  %1295 = vmatpush.bf16.msra.mxu0 %v4052_v29  ;;  %v5790_v28 = vor.u32 %v4624_v14, %v4308_v31  ;;  %v5792_v29 = vor.u32 %v4623_v17, %v4310_v21  ;;  %v5937_v14 = vor.u32 %v4611_v9, %v4262_v10  ;;  %v4248_v17 = vld [vmem:[%s6966_s4 + $0x18] sm:$0xf]  ;;  %v4693_v10 = vld [vmem:[%s6966_s4 + $0x13c] sm:$0xf]  ;;  %vm846_vm2 = vcmask 1045504  }
  0x97   : > { %1472 = vmatpush.bf16.msra.mxu1 %v4144_v33  ;;  %1500 = vmatpush.bf16.msra.mxu3 %v4152_v34  ;;  %v4316_v33 = vld [vmem:[%s6966_s4 + $0x98] sm:$0xf]  ;;  %v4625_v34 = vld [vmem:[%s6966_s4 + $0xa0] sm:$0xf0] }
  0x98   : > { %7036 = vst [vmem:[#allocation8_spill] sm:$0xff] %v5792_v29 }
  0x99   : > { %7044 = vst [vmem:[#allocation16_spill] sm:$0xff] %v5937_v14 }
  0x9a   : > { %1486 = vmatpush.bf16.msra.mxu2 %v4148_v42  ;;  %1296 = vmatpush.bf16.msra.mxu0 %v4040_v43  ;;  %v5823_v42 = vor.u32 %v4625_v34, %v4316_v33  ;;  %v5827_v43 = vor.u32 %v4621_v37, %v4296_v30  ;;  %v4236_v30 = vld [vmem:[%s6966_s4] sm:$0xf]  ;;  %v5976_v34 = vor.u32 %v4608_v23, %v4250_v24  ;;  %v4606_v37 = vld [vmem:[%s6966_s4 + $0x8] sm:$0xf0]  ;;  %v4690_v23 = vld [vmem:[%s6966_s4 + $0x124] sm:$0xf] }
  0x9b   : > { %1473 = vmatpush.bf16.msra.mxu1 %v4132_v46  ;;  %1501 = vmatpush.bf16.msra.mxu3 %v4140_v47  ;;  %v4622_v46 = vld [vmem:[%s6966_s4 + $0x88] sm:$0xf0]  ;;  %v5841_v47 = vor.u32 %v4694_v41, %v4392_v40  ;;  %v5988_v40 = vor.u32 %v4682_v26, %v4344_v25  ;;  %v4605_v41 = vld [vmem:[%s6966_s4 + $0x4] sm:$0xf]  ;;  %v4382_v24 = vld [vmem:[%s6966_s4 + $0x12c] sm:$0xf0] }
  0x9c   : > { %7037 = vst [vmem:[#allocation9_spill] sm:$0xff] %v5827_v43  ;;  %v4388_v26 = vld [vmem:[%s6966_s4 + $0x128] sm:$0xf] }
  0x9d   : > { %7046 = vst [vmem:[#allocation18_spill] sm:$0xff] %v5976_v34 }
  0x9e   : > { %1487 = vmatpush.bf16.msra.mxu2 %v4136_v54  ;;  %1297 = vmatpush.bf16.msra.mxu0 %v4028_v56  ;;  %v5863_v54 = vor.u32 %v4618_v48, %v4284_v45  ;;  %v4272_v56 = vld [vmem:[%s6966_s4 + $0x48] sm:$0xf]  ;;  %v4238_v45 = vld [vmem:[%s6966_s4 + $0xc] sm:$0xf0]  ;;  %v4699_v48 = vld [vmem:[%s6966_s4 + $0x16c] sm:$0xf] }
  0x9f   : > { %1474 = vmatpush.bf16.msra.mxu1 %v4120_v60  ;;  %1502 = vmatpush.bf16.msra.mxu3 %v4128_v61  ;;  %v4615_v60 = vld [vmem:[%s6966_s4 + $0x50] sm:$0xf0]  ;;  %v4614_v61 = vld [vmem:[%s6966_s4 + $0x4c] sm:$0xf]  ;;  %v6021_v57 = vor.u32 %v4605_v41, %v4238_v45  ;;  %v4376_v45 = vld [vmem:[%s6966_s4 + $0x110] sm:$0xf] }
  0xa0   : > { %7039 = vst [vmem:[#allocation11_spill] sm:$0xff] %v5863_v54  ;;  %v5899_v2 = vor.u32 %v4615_v60, %v4272_v56  ;;  %v5901_v3 = vor.u32 %v4614_v61, %v4274_v62  ;;  %v6019_v56 = vor.u32 %v4606_v37, %v4236_v30  ;;  %v6026_v60 = vor.u32 %v4699_v48, %v4418_v49  ;;  %v4244_v61 = vld [vmem:[%s6966_s4 + $0x8] sm:$0xf]  ;;  %v4607_v62 = vld [vmem:[%s6966_s4 + $0x10] sm:$0xf0] }
  0xa1   : > { %7048 = vst [vmem:[#allocation20_spill] sm:$0xff] %v6021_v57  ;;  %v4692_v30 = vld [vmem:[%s6966_s4 + $0x130] sm:$0xf0]  ;;  %v6099_v37 = vor.u32 %v4690_v23, %v4382_v24  ;;  %v4358_v49 = vld [vmem:[%s6966_s4 + $0xfc] sm:$0xf0] }
  0xa2   : > { %1488 = vmatpush.bf16.msra.mxu2 %v4124_v7  ;;  %1298 = vmatpush.bf16.msra.mxu0 %v4016_v8  ;;  %7041 = vst [vmem:[#allocation13_spill] sm:$0xff] %v5899_v2  ;;  %v5913_v7 = vor.u32 %v4688_v0, %v4368_v63  ;;  %v4612_v8 = vld [vmem:[%s6966_s4 + $0x38] sm:$0xf0]  ;;  %v4696_v63 = vld [vmem:[%s6966_s4 + $0x154] sm:$0xf]  ;;  %v6109_v41 = vor.u32 %v4692_v30, %v4388_v26 }
  0xa3   : > { %1475 = vmatpush.bf16.msra.mxu1 %v4108_v12  ;;  %1503 = vmatpush.bf16.msra.mxu3 %v4116_v13  ;;  %7042 = vst [vmem:[#allocation14_spill] sm:$0xff] %v5901_v3  ;;  %v4685_v12 = vld [vmem:[%s6966_s4 + $0xf8] sm:$0xf0]  ;;  %v5931_v13 = vor.u32 %v4616_v6, %v4280_v5  ;;  %v5935_v31 = vor.u32 %v4612_v8, %v4260_v4  ;;  %v4406_v0 = vld [vmem:[%s6966_s4 + $0x15c] sm:$0xf0] }
  0xa4   : > { %v5949_v21 = vor.u32 %v4685_v12, %v4356_v11  ;;  %7047 = vst [vmem:[#allocation19_spill] sm:$0xff] %v6019_v56  ;;  %v6040_v4 = vor.u32 %v4701_v51, %v4424_v50  ;;  %v4412_v5 = vld [vmem:[%s6966_s4 + $0x158] sm:$0xf]  ;;  %v4698_v6 = vld [vmem:[%s6966_s4 + $0x160] sm:$0xf0]  ;;  %v6051_v8 = vor.u32 %v4607_v62, %v4244_v61  ;;  %v6055_v9 = vor.u32 %v4696_v63, %v4406_v0 }
  0xa5   : > { %1299 = vmatmul.bf16.vlgmr.msra.gmra.mxu0 %v5405_v35  ;;  %v4304_v35 = vld [vmem:[%s6966_s4 + $0x80] sm:$0xf]  ;;  %7043 = vst [vmem:[#allocation15_spill] sm:$0xff] %v5935_v31  ;;  %v4394_v11 = vld [vmem:[%s6966_s4 + $0x144] sm:$0xf0]  ;;  %v6064_v12 = vor.u32 %v4698_v6, %v4412_v5 }
  0xa6   : > { %1680 = vmatpush.bf16.msrb.mxu0 %v5756_v15  ;;  %1489 = vmatpush.bf16.msra.mxu2 %v4112_v22  ;;  %v5859_v53 = vor.u32 %v4622_v46, %v4304_v35  ;;  %v4609_v22 = vld [vmem:[%s6966_s4 + $0x20] sm:$0xf0]  ;;  %v4332_v35 = vld [vmem:[%s6966_s4 + $0xc0] sm:$0xf]  ;;  %v4679_v46 = vld [vmem:[%s6966_s4 + $0xc8] sm:$0xf0] }
  0xa7   : > { %1693 = vmatpush.bf16.msrb.mxu1 %v5758_v16  ;;  %1854 = vmatpush.bf16.msrb.mxu3 %v5769_v20  ;;  %v5974_v33 = vor.u32 %v4609_v22, %v4248_v17  ;;  %v6024_v58 = vor.u32 %v4679_v46, %v4332_v35  ;;  %v4948_v17 = vmov 0   ;;  %v6078_v22 = vor.u32 %v4693_v10, %v4394_v11  ;;  %v4689_v35 = vld [vmem:[%s6966_s4 + $0x118] sm:$0xf0]  ;;  %v4684_v48 = vld [vmem:[%s6966_s4 + $0xf4] sm:$0xf] }
  0xa8   : > { %1504 = vmatmul.bf16.vlgmr.msra.gmra.mxu3 %v4104_v32  ;;  %1476 = vmatmul.bf16.vlgmr.msra.gmra.mxu1 %v4104_v32  ;;  %v6119_v46 = vor.u32 %v4687_v38, %v4370_v39  ;;  %v6129_v50 = vor.u32 %v4689_v35, %v4376_v45  ;;  %v4364_v51 = vld [vmem:[%s6966_s4 + $0xf8] sm:$0xf]  ;;  %v4686_v61 = vld [vmem:[%s6966_s4 + $0x100] sm:$0xf0]  ;;  %v6139_v62 = vor.u32 %v4684_v48, %v4358_v49  ;;  %v4681_v63 = vld [vmem:[%s6966_s4 + $0xdc] sm:$0xf] }
  0xa9   : > { %1490 = vmatmul.bf16.vlgmr.msra.gmra.mxu2 %v4104_v32  ;;  %v5970_v32 = vor.u32 %v4613_v19, %v4268_v18  ;;  %7045 = vst [vmem:[#allocation17_spill] sm:$0xff] %v5974_v33  ;;  %v4400_v18 = vld [vmem:[%s6966_s4 + $0x140] sm:$0xf]  ;;  %v4695_v19 = vld [vmem:[%s6966_s4 + $0x148] sm:$0xf0]  ;;  %v6149_v5 = vor.u32 %v4686_v61, %v4364_v51 }
  0xaa   : > { %1706 = vmatpush.bf16.msrb.mxu2 %v5786_v27  ;;  %1681 = vmatpush.bf16.msrb.mxu0 %v5790_v28  ;;  %v6088_v25 = vor.u32 %v4695_v19, %v4400_v18  ;;  %7049 = vst [vmem:[#allocation21_spill] sm:$0xff] %v6129_v50  ;;  %v4346_v0 = vld [vmem:[%s6966_s4 + $0xe4] sm:$0xf0]  ;;  %v4352_v6 = vld [vmem:[%s6966_s4 + $0xe0] sm:$0xf] }
  0xab   : > { %1694 = vmatpush.bf16.msrb.mxu1 %v5792_v29  ;;  %1855 = vmatpush.bf16.msrb.mxu3 %v5804_v36  ;;  %7050 = vst [vmem:[#allocation22_spill] sm:$0xff] %v6149_v5  ;;  %v4683_v10 = vld [vmem:[%s6966_s4 + $0xe8] sm:$0xf0]  ;;  %v6159_v11 = vor.u32 %v4681_v63, %v4346_v0  ;;  %v4678_v18 = vld [vmem:[%s6966_s4 + $0xc4] sm:$0xf] }
  0xac   : > { %v4334_v19 = vld [vmem:[%s6966_s4 + $0xcc] sm:$0xf0]  ;;  %v6169_v23 = vor.u32 %v4683_v10, %v4352_v6  ;;  %v4340_v24 = vld [vmem:[%s6966_s4 + $0xc8] sm:$0xf]  ;;  %v4680_v26 = vld [vmem:[%s6966_s4 + $0xd0] sm:$0xf0] }
  0xad   : > { %v6179_v30 = vor.u32 %v4678_v18, %v4334_v19  ;;  %v6183_v38 = vor.u32 %v4680_v26, %v4340_v24  ;;  %v6203_v39 = vld [vmem:[%s6967_s5] sm:$0x7] }
  0xae   : > { %1707 = vmatpush.bf16.msrb.mxu2 %v5823_v42  ;;  %1682 = vmatpush.bf16.msrb.mxu0 %v5827_v43  ;;  %7051 = vst [vmem:[#allocation23_spill] sm:$0xff] %v6169_v23  ;;  %v646_v26 = vperm.slane %v6203_v39, 2 }
  0xaf   : > { %1695 = vmatpush.bf16.msrb.mxu1 %v5829_v44  ;;  %1856 = vmatpush.bf16.msrb.mxu3 %v5841_v47  ;;  %7052 = vst [vmem:[#allocation24_spill] sm:$0xff] %v6183_v38 }
  0xb2   : > { %1708 = vmatpush.bf16.msrb.mxu2 %v5859_v53  ;;  %1683 = vmatpush.bf16.msrb.mxu0 %v5863_v54 }
  0xb3   : > { %1696 = vmatpush.bf16.msrb.mxu1 %v5865_v55  ;;  %1857 = vmatpush.bf16.msrb.mxu3 %v5877_v59 }
  0xb6   : > { %1709 = vmatpush.bf16.msrb.mxu2 %v5895_v1  ;;  %1684 = vmatpush.bf16.msrb.mxu0 %v5899_v2 }
  0xb7   : > { %1697 = vmatpush.bf16.msrb.mxu1 %v5901_v3  ;;  %1858 = vmatpush.bf16.msrb.mxu3 %v5913_v7 }
  0xba   : > { %1710 = vmatpush.bf16.msrb.mxu2 %v5931_v13  ;;  %1685 = vmatpush.bf16.msrb.mxu0 %v5935_v31 }
  0xbb   : > { %1698 = vmatpush.bf16.msrb.mxu1 %v5937_v14  ;;  %1859 = vmatpush.bf16.msrb.mxu3 %v5949_v21 }
  0xbe   : > { %1711 = vmatpush.bf16.msrb.mxu2 %v5970_v32  ;;  %1686 = vmatpush.bf16.msrb.mxu0 %v5974_v33 }
  0xbf   : > { %1699 = vmatpush.bf16.msrb.mxu1 %v5976_v34  ;;  %1860 = vmatpush.bf16.msrb.mxu3 %v5988_v40 }
  0xc2   : > { %1712 = vmatpush.bf16.msrb.mxu2 %v6015_v52  ;;  %1687 = vmatpush.bf16.msrb.mxu0 %v6019_v56 }
  0xc3   : > { %1700 = vmatpush.bf16.msrb.mxu1 %v6021_v57  ;;  %1861 = vmatpush.bf16.msrb.mxu3 %v6024_v58 }
  0xc5   : > { %1688 = vmatmul.bf16.vlgmr.msrb.gmra.mxu0 %v4948_v17 }
  0xc6   : > { %1867 = vmatpush.bf16.msra.mxu0 %v6026_v60  ;;  %1701 = vmatmul.bf16.vlgmr.msrb.gmra.mxu1 %v4948_v17 }
  0xc7   : > { %1880 = vmatpush.bf16.msra.mxu1 %v6040_v4  ;;  %2001 = vmatpush.bf16.msra.mxu3 %v5758_v16 }
  0xc8   : > { %1862 = vmatmul.bf16.vlgmr.msrb.gmra.mxu3 %v4948_v17  ;;  %1713 = vmatpush.bf16.msrb.mxu2 %v6051_v8 }
  0xca   : > { %1868 = vmatpush.bf16.msra.mxu0 %v6055_v9 }
  0xcb   : > { %1881 = vmatpush.bf16.msra.mxu1 %v6064_v12  ;;  %2002 = vmatpush.bf16.msra.mxu3 %v5792_v29 }
  0xcc   : > { %1988 = vmatpush.bf16.msra.mxu2 %v5756_v15 }
  0xcd   : > { %1714 = vmatmul.bf16.vlgmr.msrb.gmra.mxu2 %v4948_v17 }
  0xce   : > { %1869 = vmatpush.bf16.msra.mxu0 %v6078_v22 }
  0xcf   : > { %1882 = vmatpush.bf16.msra.mxu1 %v6088_v25  ;;  %2003 = vmatpush.bf16.msra.mxu3 %v5829_v44 }
  0xd0   : > { %1989 = vmatpush.bf16.msra.mxu2 %v5790_v28 }
  0xd2   : > { %1870 = vmatpush.bf16.msra.mxu0 %v6099_v37 }
  0xd3   : > { %1883 = vmatpush.bf16.msra.mxu1 %v6109_v41  ;;  %2004 = vmatpush.bf16.msra.mxu3 %v5865_v55 }
  0xd4   : > { %1990 = vmatpush.bf16.msra.mxu2 %v5827_v43 }
  0xd6   : > { %1871 = vmatpush.bf16.msra.mxu0 %v6119_v46 }
  0xd7   : > { %1884 = vmatpush.bf16.msra.mxu1 %v6129_v50  ;;  %2005 = vmatpush.bf16.msra.mxu3 %v5901_v3 }
  0xd8   : > { %1991 = vmatpush.bf16.msra.mxu2 %v5863_v54 }
  0xda   : > { %1872 = vmatpush.bf16.msra.mxu0 %v6139_v62 }
  0xdb   : > { %1885 = vmatpush.bf16.msra.mxu1 %v6149_v5  ;;  %2006 = vmatpush.bf16.msra.mxu3 %v5937_v14 }
  0xdc   : > { %1992 = vmatpush.bf16.msra.mxu2 %v5899_v2 }
  0xde   : > { %1873 = vmatpush.bf16.msra.mxu0 %v6159_v11 }
  0xdf   : > { %1886 = vmatpush.bf16.msra.mxu1 %v6169_v23  ;;  %2007 = vmatpush.bf16.msra.mxu3 %v5976_v34 }
  0xe0   : > { %1993 = vmatpush.bf16.msra.mxu2 %v5935_v31 }
  0xe2   : > { %1874 = vmatpush.bf16.msra.mxu0 %v6179_v30  ;;  %v787_v45 = vpop.f32.mrf.mxu0 }
  0xe3   : > { %1887 = vmatpush.bf16.msra.mxu1 %v6183_v38  ;;  %2008 = vmatpush.bf16.msra.mxu3 %v6021_v57 }
  0xe4   : > { %1994 = vmatpush.bf16.msra.mxu2 %v5974_v33 }
  0xe5   : > { %1875 = vmatmul.bf16.vlgmr.msra.gmra.mxu0 %v4948_v17  ;;  %v6213_v48 = vpop.f32.mrf.mxu1 }
  0xe6   : > { %2014 = vmatpush.bf16.msrb.mxu0 %v5786_v27  ;;  %1888 = vmatmul.bf16.vlgmr.msra.gmra.mxu1 %v4948_v17  ;;  %v644_v17 = vperm.slane %v6203_v39, 0 }
  0xe7   : > { %2028 = vmatpush.bf16.msrb.mxu1 %v5769_v20  ;;  %2054 = vmatpush.bf16.msrb.mxu3 %v6040_v4 }
  0xe8   : > { %1995 = vmatpush.bf16.msra.mxu2 %v6019_v56  ;;  %v788_v35 = vadd.f32 %v787_v45, %v644_v17 }
  0xea   : > { %2015 = vmatpush.bf16.msrb.mxu0 %v5823_v42  ;;  %v820_v49 = vrot.slane %v788_v35, 6  ;;  %v826_v51 = vrot.slane %v788_v35, 4  ;;  %v832_v61 = vrot.slane %v788_v35, 2  ;;  %v789_v24 = vpop.f32.mrf.mxu0 }
  0xeb   : > { %2029 = vmatpush.bf16.msrb.mxu1 %v5804_v36  ;;  %2055 = vmatpush.bf16.msrb.mxu3 %v6064_v12  ;;  %v993_v10 = vpop.f32.mrf.mxu3 }
  0xec   : > { %2041 = vmatpush.bf16.msrb.mxu2 %v6026_v60  ;;  %v839_v63 = vsel %vm838_vm0, %v788_v35, %v820_v49  ;;  %v813_v18 = vpop.f32.mrf.mxu2 }
  0xed   : > { %v6222_v0 = vsel %vm842_vm1, %v839_v63, %v826_v51  ;;  %v802_v17 = vpop.f32.mrf.mxu1  ;;  %v814_v45 = vadd.f32 %v813_v18, %v646_v26 }
  0xee   : > { %2016 = vmatpush.bf16.msrb.mxu0 %v5859_v53  ;;  %7053 = vst [vmem:[#allocation25_spill] sm:$0xff] %v6222_v0  ;;  %v847_v6 = vsel %vm846_vm2, %v6222_v0, %v832_v61 }
  0xef   : > { %2030 = vmatpush.bf16.msrb.mxu1 %v5841_v47  ;;  %2056 = vmatpush.bf16.msrb.mxu3 %v6088_v25  ;;  %v6228_v19 = vadd.f32 %v993_v10, %v847_v6  ;;  %v822_v49 = vrot.slane %v814_v45, 6  ;;  %v828_v51 = vrot.slane %v814_v45, 4  ;;  %v834_v63 = vrot.slane %v814_v45, 2 }
  0xf0   : > { %2042 = vmatpush.bf16.msrb.mxu2 %v6055_v9 }
  0xf1   : > { %7054 = vst [vmem:[#allocation26_spill] sm:$0xff] %v6228_v19  ;;  %v841_v61 = vsel %vm838_vm0, %v814_v45, %v822_v49 }
  0xf2   : > { %2017 = vmatpush.bf16.msrb.mxu0 %v5895_v1  ;;  %v6248_v6 = vsel %vm842_vm1, %v841_v61, %v828_v51  ;;  %v4004_v61 = vld [vmem:[%s6967_s5 + $0x3] sm:$0x7] }
  0xf3   : > { %2031 = vmatpush.bf16.msrb.mxu1 %v5877_v59  ;;  %2057 = vmatpush.bf16.msrb.mxu3 %v6109_v41  ;;  %7055 = vst [vmem:[#allocation27_spill] sm:$0xff] %v6248_v6  ;;  %v6251_v10 = vpop.f32.mrf.mxu3  ;;  %v849_v18 = vsel %vm846_vm2, %v6248_v6, %v834_v63 }
  0xf4   : > { %2043 = vmatpush.bf16.msrb.mxu2 %v6078_v22  ;;  %v815_v35 = vpop.f32.mrf.mxu2  ;;  %7056 = vst [vmem:[#allocation28_spill] sm:$0xff] %v6251_v10  ;;  %v1133_v10 = vperm.slane %v4004_v61, 2 }
  0xf6   : > { %2018 = vmatpush.bf16.msrb.mxu0 %v5931_v13 }
  0xf7   : > { %2032 = vmatpush.bf16.msrb.mxu1 %v5913_v7  ;;  %2058 = vmatpush.bf16.msrb.mxu3 %v6129_v50 }
  0xf8   : > { %2044 = vmatpush.bf16.msrb.mxu2 %v6099_v37 }
  0xfa   : > { %2019 = vmatpush.bf16.msrb.mxu0 %v5970_v32 }
  0xfb   : > { %2033 = vmatpush.bf16.msrb.mxu1 %v5949_v21  ;;  %2059 = vmatpush.bf16.msrb.mxu3 %v6149_v5 }
  0xfc   : > { %2045 = vmatpush.bf16.msrb.mxu2 %v6119_v46 }
  0xfe   : > { %2020 = vmatpush.bf16.msrb.mxu0 %v6015_v52 }
  0xff   : > { %2034 = vmatpush.bf16.msrb.mxu1 %v5988_v40  ;;  %2060 = vmatpush.bf16.msrb.mxu3 %v6169_v23 }
 0x100   : > { %2046 = vmatpush.bf16.msrb.mxu2 %v6139_v62 }
 0x102   : > { %2021 = vmatpush.bf16.msrb.mxu0 %v6051_v8  ;;  %v1007_v35 = vpop.f32.mrf.mxu0 }
 0x103   : > { %2035 = vmatpush.bf16.msrb.mxu1 %v6024_v58  ;;  %2061 = vmatpush.bf16.msrb.mxu3 %v6183_v38 }
 0x104   : > { %2047 = vmatpush.bf16.msrb.mxu2 %v6159_v11 }
 0x105   : > { %v1021_v24 = vpop.f32.mrf.mxu1 }
 0x106   : > { %2189 = vmatpush.bf16.msra.mxu0 %v5756_v15  ;;  %v6257_v26 = vadd.f32 %v1021_v24, %v849_v18  ;;  %v1131_v24 = vperm.slane %v4004_v61, 0 }
 0x107   : > { %2202 = vmatpush.bf16.msra.mxu1 %v5758_v16 }
 0x108   : > { %2048 = vmatpush.bf16.msrb.mxu2 %v6179_v30 }
 0x10a   : > { %2190 = vmatpush.bf16.msra.mxu0 %v5790_v28  ;;  %v6273_v18 = vpop.f32.mrf.mxu0 }
 0x10b   : > { %2203 = vmatpush.bf16.msra.mxu1 %v5792_v29  ;;  %v1287_v17 = vpop.f32.mrf.mxu3  ;;  %7058 = vst [vmem:[#allocation30_spill] sm:$0xff] %v6273_v18 }
 0x10c   : > { %v1274_v45 = vpop.f32.mrf.mxu2 }
 0x10d   : > { %v6271_v63 = vpop.f32.mrf.mxu1  ;;  %v1275_v6 = vadd.f32 %v1274_v45, %v1131_v24 }
 0x10e   : > { %2191 = vmatpush.bf16.msra.mxu0 %v5827_v43  ;;  %7057 = vst [vmem:[#allocation29_spill] sm:$0xff] %v6271_v63 }
 0x10f   : > { %2204 = vmatpush.bf16.msra.mxu1 %v5829_v44  ;;  %v1307_v0 = vrot.slane %v1275_v6, 6 }
 0x112   : > { %2192 = vmatpush.bf16.msra.mxu0 %v5863_v54 }
 0x113   : > { %2205 = vmatpush.bf16.msra.mxu1 %v5865_v55  ;;  %v1289_v49 = vpop.f32.mrf.mxu3 }
 0x114   : > { %v1276_v51 = vpop.f32.mrf.mxu2  ;;  %v1132_v49 = vperm.slane %v4004_v61, 1 }
 0x116   : > { %2193 = vmatpush.bf16.msra.mxu0 %v5899_v2 }
 0x117   : > { %2206 = vmatpush.bf16.msra.mxu1 %v5901_v3 }
 0x11a   : > { %2194 = vmatpush.bf16.msra.mxu0 %v5935_v31 }
 0x11b   : > { %2207 = vmatpush.bf16.msra.mxu1 %v5937_v14  ;;  %v6277_v14 = vadd.f32 %v1287_v17, %v1132_v49 }
 0x11d   : > { %v1308_v45 = vrot.slane %v6277_v14, 6  ;;  %v1314_v18 = vrot.slane %v6277_v14, 4 }
 0x11e   : > { %2195 = vmatpush.bf16.msra.mxu0 %v5974_v33 }
 0x11f   : > { %2208 = vmatpush.bf16.msra.mxu1 %v5976_v34 }
 0x122   : > { %2196 = vmatpush.bf16.msra.mxu0 %v6019_v56  ;;  %v1300_v33 = vpop.f32.mrf.mxu0  ;;  %v1313_v56 = vrot.slane %v1275_v6, 4 }
 0x123   : > { %2209 = vmatpush.bf16.msra.mxu1 %v6021_v57  ;;  %v6275_v34 = vadd.f32 %v1300_v33, %v1133_v10  ;;  %v1325_v57 = vsel %vm838_vm0, %v1275_v6, %v1307_v0  ;;  %v645_v33 = vperm.slane %v6203_v39, 1 }
 0x124   : > { %v1328_v63 = vsel %vm842_vm1, %v1325_v57, %v1313_v56  ;;  %v1326_v56 = vsel %vm838_vm0, %v6277_v14, %v1308_v45  ;;  %v1058_v45 = vld [vmem:[%s6968_s6] sm:$0x7] }
 0x125   : > { %v1477_v51 = vpop.f32.mrf.mxu1  ;;  %v1309_v31 = vrot.slane %v6275_v34, 6  ;;  %v1315_v24 = vrot.slane %v6275_v34, 4  ;;  %v1329_v39 = vsel %vm842_vm1, %v1326_v56, %v1314_v18  ;;  %v6315_v18 = vperm.slane %v1058_v45, 1 }
 0x126   : > { %v1319_v56 = vrot.slane %v1275_v6, 2 }
 0x127   : > { %v1327_v17 = vsel %vm838_vm0, %v6275_v34, %v1309_v31  ;;  %7064 = vst [vmem:[#allocation36_spill] sm:$0xff] %v6315_v18 }
 0x128   : > { %v6297_v57 = vsel %vm842_vm1, %v1327_v17, %v1315_v24  ;;  %v6313_v24 = vperm.slane %v1058_v45, 0 }
 0x12a   : > { %v1302_v61 = vpop.f32.mrf.mxu0  ;;  %7063 = vst [vmem:[#allocation35_spill] sm:$0xff] %v6313_v24 }
 0x12b   : > { %v6281_v38 = vpop.f32.mrf.mxu3  ;;  %v801_v61 = vadd.f32 %v6213_v48, %v645_v33 }
 0x12c   : > { %v6287_v10 = vpop.f32.mrf.mxu2 }
 0x12d   : > { %v1479_v49 = vpop.f32.mrf.mxu1  ;;  %v821_v31 = vrot.slane %v801_v61, 6  ;;  %v833_v54 = vrot.slane %v801_v61, 2 }
 0x12e   : > { %v6291_v0 = vadd.f32 %v1479_v49, %v1328_v63 }
 0x12f   : > { %v840_v55 = vsel %vm838_vm0, %v801_v61, %v821_v31 }
 0x130   : > { %7059 = vst [vmem:[#allocation31_spill] sm:$0xff] %v6291_v0  ;;  %v827_v0 = vrot.slane %v801_v61, 4 }
 0x132   : > { %v6311_v48 = vsel %vm842_vm1, %v840_v55, %v827_v0  ;;  %v6326_v55 = vld [vmem:[%s6968_s6 + $0x3] sm:$0x7] }
 0x133   : > { %v1507_v3 = vpop.f32.mrf.mxu3  ;;  %7062 = vst [vmem:[#allocation34_spill] sm:$0xff] %v6311_v48 }
 0x134   : > { %v6302_v2 = vadd.f32 %v1507_v3, %v6297_v57  ;;  %v1493_v23 = vpop.f32.mrf.mxu2  ;;  %v848_v3 = vsel %vm846_vm2, %v6311_v48, %v833_v54  ;;  %v6331_v54 = vperm.slane %v6326_v55, 0 }
 0x135   : > { %v6304_v49 = vadd.f32 %v1493_v23, %v1329_v39  ;;  %v6319_v17 = vadd.f32 %v1007_v35, %v848_v3  ;;  %v1331_v35 = vsel %vm846_vm2, %v1328_v63, %v1319_v56 }
 0x136   : > { %7060 = vst [vmem:[#allocation32_spill] sm:$0xff] %v6302_v2 }
 0x137   : > { %7061 = vst [vmem:[#allocation33_spill] sm:$0xff] %v6304_v49  ;;  %v6334_v49 = vadd.f32 %v1477_v51, %v1331_v35 }
 0x138   : > { %7065 = vst [vmem:[#allocation37_spill] sm:$0xff] %v6319_v17 }
 0x139   : > { %7066 = vst [vmem:[#allocation38_spill] sm:$0xff] %v6331_v54 }
 0x13a   : > { %7067 = vst [vmem:[#allocation39_spill] sm:$0xff] %v6334_v49 }
 0x142   : > { %v1689_v23 = vpop.f32.mrf.mxu0 }
 0x143   : > { %v1702_v33 = vpop.f32.mrf.mxu1  ;;  %v1690_v61 = vadd.f32 %v1689_v23, %v6313_v24 }
 0x144   : > { %v1703_v31 = vadd.f32 %v1702_v33, %v6315_v18 }
 0x145   : > { %v1893_v0 = vadd.f32 %v1690_v61, %v6228_v19 }
 0x146   : > { %v1913_v2 = vadd.f32 %v1703_v31, %v6319_v17 }
 0x147   : > { %v4426_v3 = vmul.f32 -1.442695, %v1893_v0 }
 0x148   : > { %v4427_v6 = vmul.f32 -1.442695, %v1913_v2 }
 0x149   : > { %4750 = vpow2.f32 %v4426_v3 }
 0x14a   : > { %4752 = vpow2.f32 %v4427_v6  ;;  %v1691_v48 = vpop.f32.mrf.mxu0 }
 0x14b   : > { %v1863_v23 = vpop.f32.mrf.mxu3  ;;  %v1704_v18 = vpop.f32.mrf.mxu1  ;;  %v1320_v48 = vrot.slane %v6277_v14, 2 }
 0x14c   : > { %v1864_v33 = vadd.f32 %v1863_v23, %v6331_v54  ;;  %v6342_v23 = vperm.slane %v1058_v45, 2 }
 0x14e   : > { %v1940_v61 = vadd.f32 %v1864_v33, %v6334_v49  ;;  %7068 = vst [vmem:[#allocation40_spill] sm:$0xff] %v6342_v23 }
 0x14f   : > { %v4751_v17 = vpop.eup %4750 }
 0x150   : > { %v1715_v19 = vpop.f32.mrf.mxu2  ;;  %v4428_v31 = vmul.f32 -1.442695, %v1940_v61  ;;  %v4753_v24 = vpop.eup %4752  ;;  %v1897_v5 = vadd.f32 1.0, %v4751_v17  ;;  %v6345_v61 = vperm.slane %v6326_v55, 1 }
 0x151   : > { %v1917_v63 = vadd.f32 1.0, %v4753_v24  ;;  %v1716_v14 = vadd.f32 %v1715_v19, %v6342_v23 }
 0x152   : > { %4754 = vpow2.f32 %v4428_v31  ;;  %v1909_v24 = vand.u32 2147483648, %v1897_v5  ;;  %7069 = vst [vmem:[#allocation41_spill] sm:$0xff] %v6345_v61  ;;  %v1332_v31 = vsel %vm846_vm2, %v1329_v39, %v1320_v48  ;;  %vm1903_vm4 = vweird.f32 %v1897_v5 }
 0x153   : > { %v1865_v56 = vpop.f32.mrf.mxu3  ;;  %4756 = vrcp.f32 %v1897_v5  ;;  %v6350_v45 = vadd.f32 %v6287_v10, %v1332_v31  ;;  %vm1923_vm8 = vweird.f32 %v1917_v63  ;;  %v1927_v10 = vand.u32 2147483647, %v1917_v63 }
 0x154   : > { %4758 = vrcp.f32 %v1917_v63 }
 0x155   : > { %7070 = vst [vmem:[#allocation42_spill] sm:$0xff] %v6350_v45  ;;  %vm1928_vm10 = vcmp.eq.f32.partialorder %v1927_v10, 8.507059e+37 }
 0x158   : > { %v1717_v2 = vpop.f32.mrf.mxu2  ;;  %v4755_v51 = vpop.eup %4754 }
 0x159   : > { %v6338_v0 = vadd.f32 1.0, %v4755_v51  ;;  %v4757_v35 = vpop.eup %4756  ;;  %v1907_v2 = vand.u32 2147483647, %v1897_v5 }
 0x15a   : > { %v4759_v3 = vpop.eup %4758  ;;  %v1899_v18 = vmul.f32 %v4757_v35, %v1897_v5  ;;  %vm1904_vm3 = vweird.f32 %v4757_v35  ;;  %v1929_v5 = vand.u32 2147483648, %v1917_v63 }
 0x15b   : > { %4760 = vrcp.f32 %v6338_v0  ;;  %v1919_v6 = vmul.f32 %v4759_v3, %v1917_v63  ;;  %vm1905_vm5 = vmor %vm1903_vm4, %vm1904_vm3  ;;  %vm1924_vm6 = vweird.f32 %v4759_v3  ;;  %vm1908_vm7 = vcmp.eq.f32.partialorder %v1907_v2, 8.507059e+37 }
 0x15c   : > { %v1900_v17 = vsub.f32 1.0, %v1899_v18  ;;  %v1910_v18 = vor.u32 1.1754944e-38, %v1909_v24  ;;  %vm1925_vm9 = vmor %vm1923_vm8, %vm1924_vm6  ;;  %v1930_v50 = vor.u32 1.1754944e-38, %v1929_v5  ;;  %vm1950_vm12 = vweird.f32 %v6338_v0 }
 0x15d   : > { %v1920_v33 = vsub.f32 1.0, %v1919_v6  ;;  %v1954_v63 = vand.u32 2147483647, %v6338_v0 }
 0x15e   : > { %v1901_v56 = vmul.f32 %v4757_v35, %v1900_v17 }
 0x15f   : > { %v1921_v51 = vmul.f32 %v4759_v3, %v1920_v33  ;;  %vm1955_vm14 = vcmp.eq.f32.partialorder %v1954_v63, 8.507059e+37 }
 0x160   : > { %v1902_v54 = vadd.f32 %v4757_v35, %v1901_v56 }
 0x161   : > { %v4761_v49 = vpop.eup %4760  ;;  %v1922_v33 = vadd.f32 %v4759_v3, %v1921_v51 }
 0x162   : > { %v1876_v44 = vpop.f32.mrf.mxu0  ;;  %v1946_v39 = vmul.f32 %v4761_v49, %v6338_v0  ;;  %v1906_v48 = vsel %vm1905_vm5, %v4757_v35, %v1902_v54  ;;  %vm1951_vm11 = vweird.f32 %v4761_v49 }
 0x163   : > { %v1877_v6 = vadd.f32 %v1876_v44, %v6345_v61  ;;  %v1889_v43 = vpop.f32.mrf.mxu1  ;;  %v1911_v17 = vsel %vm1908_vm7, %v1910_v18, %v1906_v48  ;;  %v1926_v61 = vsel %vm1925_vm9, %v4759_v3, %v1922_v33  ;;  %v1956_v18 = vand.u32 2147483648, %v6338_v0  ;;  %vm1952_vm13 = vmor %vm1950_vm12, %vm1951_vm11 }
 0x164   : > { %v1947_v56 = vsub.f32 1.0, %v1946_v39  ;;  %v1933_v23 = vmul.f32 %v1911_v17, %v1716_v14  ;;  %v1931_v2 = vsel %vm1928_vm10, %v1930_v50, %v1926_v61  ;;  %v6358_v14 = vperm.slane %v6326_v55, 2 }
 0x165   : > { %v1960_v19 = vadd.f32 %v1877_v6, %v6350_v45  ;;  %v1936_v3 = vsub.f32 1.0, %v1931_v2  ;;  %v1321_v17 = vrot.slane %v6275_v34, 2  ;;  %v1957_v61 = vor.u32 1.1754944e-38, %v1956_v18 }
 0x166   : > { %v1934_v24 = vadd.f32 %v1933_v23, %v6257_v26  ;;  %v1948_v44 = vmul.f32 %v4761_v49, %v1947_v56  ;;  %7071 = vst [vmem:[#allocation43_spill] sm:$0xff] %v6358_v14  ;;  %v1938_v33 = vmul.f32 0.0, %v1931_v2 }
 0x167   : > { %v4429_v31 = vmul.f32 -1.442695, %v1960_v19  ;;  %v1890_v19 = vadd.f32 %v1889_v43, %v6358_v14  ;;  %v1333_v0 = vsel %vm846_vm2, %v6297_v57, %v1321_v17  ;;  %v7073_v17 = vld [vmem:[#allocation9_spill] sm:$0xff] }
 0x168   : > { %v1949_v51 = vadd.f32 %v4761_v49, %v1948_v44 }
 0x169   : > { %4762 = vpow2.f32 %v4429_v31 }
 0x16a   : > { %4764 = vtanh.f32 %v1934_v24  ;;  %v1878_v54 = vpop.f32.mrf.mxu0  ;;  %v1953_v48 = vsel %vm1952_vm13, %v4761_v49, %v1949_v51  ;;  %v6371_v49 = vadd.f32 %v6281_v38, %v1333_v0  ;;  %v7079_v0 = vld [vmem:[#allocation13_spill] sm:$0xff] }
 0x16b   : > { %v1891_v35 = vpop.f32.mrf.mxu1  ;;  %v1958_v55 = vsel %vm1955_vm14, %v1957_v61, %v1953_v48  ;;  %v7072_v48 = vld [vmem:[#allocation21_spill] sm:$0xff]  ;;  %v7075_v61 = vld [vmem:[#allocation22_spill] sm:$0xff] }
 0x16c   : > { %v1980_v10 = vmul.f32 %v1958_v55, %v1890_v19  ;;  %v7077_v19 = vld [vmem:[#allocation12_spill] sm:$0xff]  ;;  %v7078_v55 = vld [vmem:[#allocation23_spill] sm:$0xff] }
 0x16e   : > { %v1981_v57 = vadd.f32 %v1980_v10, %v6371_v49  ;;  %v7081_v10 = vld [vmem:[#allocation24_spill] sm:$0xff] }
 0x16f   : > { %v4763_v23 = vpop.eup %4762 }
 0x170   : > { %v4765_v6 = vpop.eup %4764  ;;  %v1964_v39 = vadd.f32 1.0, %v4763_v23 }
 0x171   : > { %v1937_v50 = vmul.f32 %v4765_v6, %v1936_v3 }
 0x172   : > { %4766 = vrcp.f32 %v1964_v39  ;;  %v1976_v24 = vand.u32 2147483648, %v1964_v39  ;;  %v1974_v54 = vand.u32 2147483647, %v1964_v39  ;;  %vm1970_vm3 = vweird.f32 %v1964_v39 }
 0x173   : > { %v6364_v56 = vadd.f32 %v1938_v33, %v1937_v50  ;;  %4768 = vtanh.f32 %v1981_v57  ;;  %v7074_v50 = vld [vmem:[#allocation10_spill] sm:$0xff]  ;;  %v7076_v33 = vld [vmem:[#allocation11_spill] sm:$0xff]  ;;  %v7084_v57 = vld [vmem:[#allocation17_spill] sm:$0xff] }
 0x174   : > { %v1977_v35 = vor.u32 1.1754944e-38, %v1976_v24  ;;  %vm1975_vm5 = vcmp.eq.f32.partialorder %v1974_v54, 8.507059e+37  ;;  %v7086_v24 = vld [vmem:[#allocation19_spill] sm:$0xff] }
 0x175   : > { %v1987_v5 = vpack.c.bf16 %v6364_v56, %v6364_v56 }
 0x177   : > { %1996 = vmatmul.bf16.vlgmr.msra.gmra.mxu2 %v1987_v5  ;;  %2009 = vmatmul.bf16.vlgmr.msra.gmra.mxu3 %v1987_v5 }
 0x178   : > { %v4767_v34 = vpop.eup %4766  ;;  %2022 = vmatmul.bf16.vlgmr.msrb.gmra.mxu0 %v1987_v5  ;;  %2215 = vmatpush.bf16.msra.mxu2 %v5786_v27  ;;  %v7080_v5 = vld [vmem:[#allocation14_spill] sm:$0xff] }
 0x179   : > { %v1966_v43 = vmul.f32 %v4767_v34, %v1964_v39  ;;  %2232 = vmatpush.bf16.msra.mxu3 %v5769_v20  ;;  %2245 = vmatpush.bf16.msrb.mxu0 %v6026_v60  ;;  %vm1971_vm15 = vweird.f32 %v4767_v34  ;;  %v4769_v63 = vpop.eup %4768 }
 0x17a   : > { %vm1972_vm4 = vmor %vm1970_vm3, %vm1971_vm15 }
 0x17b   : > { %v1967_v31 = vsub.f32 1.0, %v1966_v43  ;;  %v7083_v43 = vld [vmem:[#allocation16_spill] sm:$0xff] }
 0x17c   : > { %2216 = vmatpush.bf16.msra.mxu2 %v5823_v42 }
 0x17d   : > { %v1968_v44 = vmul.f32 %v4767_v34, %v1967_v31  ;;  %2233 = vmatpush.bf16.msra.mxu3 %v5804_v36  ;;  %2246 = vmatpush.bf16.msrb.mxu0 %v6055_v9  ;;  %v7085_v31 = vld [vmem:[#allocation18_spill] sm:$0xff] }
 0x17f   : > { %v1969_v38 = vadd.f32 %v4767_v34, %v1968_v44  ;;  %v7087_v44 = vld [vmem:[#allocation20_spill] sm:$0xff] }
 0x180   : > { %2217 = vmatpush.bf16.msra.mxu2 %v5859_v53 }
 0x181   : > { %v1973_v2 = vsel %vm1972_vm4, %v4767_v34, %v1969_v38  ;;  %2234 = vmatpush.bf16.msra.mxu3 %v5841_v47  ;;  %2247 = vmatpush.bf16.msrb.mxu0 %v6078_v22  ;;  %v7082_v34 = vld [vmem:[#allocation15_spill] sm:$0xff] }
 0x182   : > { %v1978_v51 = vsel %vm1975_vm5, %v1977_v35, %v1973_v2  ;;  %v7088_v2 = vld [vmem:[#allocation35_spill] sm:$0xff] }
 0x183   : > { %v1983_v18 = vsub.f32 1.0, %v1978_v51  ;;  %v1985_v3 = vmul.f32 0.0, %v1978_v51 }
 0x184   : > { %2218 = vmatpush.bf16.msra.mxu2 %v5895_v1 }
 0x185   : > { %v1984_v23 = vmul.f32 %v4769_v63, %v1983_v18  ;;  %2235 = vmatpush.bf16.msra.mxu3 %v5877_v59  ;;  %2248 = vmatpush.bf16.msrb.mxu0 %v6099_v37  ;;  %v7089_v18 = vld [vmem:[#allocation36_spill] sm:$0xff] }
 0x187   : > { %v6386_v6 = vadd.f32 %v1985_v3, %v1984_v23 }
 0x188   : > { %2219 = vmatpush.bf16.msra.mxu2 %v5931_v13 }
 0x189   : > { %v2027_v39 = vpack.c.bf16 %v6386_v6, %v6386_v6  ;;  %2236 = vmatpush.bf16.msra.mxu3 %v5913_v7  ;;  %2249 = vmatpush.bf16.msrb.mxu0 %v6119_v46 }
 0x18b   : > { %2036 = vmatmul.bf16.vlgmr.msrb.gmra.mxu1 %v2027_v39  ;;  %2049 = vmatmul.bf16.vlgmr.msrb.gmra.mxu2 %v2027_v39 }
 0x18c   : > { %2062 = vmatmul.bf16.vlgmr.msrb.gmra.mxu3 %v2027_v39  ;;  %2258 = vmatpush.bf16.msrb.mxu1 %v6040_v4 }
 0x18d   : > { %2220 = vmatpush.bf16.msra.mxu2 %v5970_v32  ;;  %2237 = vmatpush.bf16.msra.mxu3 %v5949_v21 }
 0x18e   : > { %2250 = vmatpush.bf16.msrb.mxu0 %v6139_v62 }
 0x190   : > { %2259 = vmatpush.bf16.msrb.mxu1 %v6064_v12 }
 0x191   : > { %2221 = vmatpush.bf16.msra.mxu2 %v6015_v52  ;;  %2238 = vmatpush.bf16.msra.mxu3 %v5988_v40 }
 0x192   : > { %2251 = vmatpush.bf16.msrb.mxu0 %v6159_v11 }
 0x194   : > { %2260 = vmatpush.bf16.msrb.mxu1 %v6088_v25 }
 0x195   : > { %2222 = vmatpush.bf16.msra.mxu2 %v6051_v8  ;;  %2239 = vmatpush.bf16.msra.mxu3 %v6024_v58 }
 0x196   : > { %2252 = vmatpush.bf16.msrb.mxu0 %v6179_v30 }
 0x198   : > { %2261 = vmatpush.bf16.msrb.mxu1 %v6109_v41 }
 0x199   : > { %2393 = vmatpush.bf16.msrb.mxu2 %v5756_v15  ;;  %2406 = vmatpush.bf16.msrb.mxu3 %v5758_v16 }
 0x19c   : > { %2262 = vmatpush.bf16.msrb.mxu1 %v7072_v48 }
 0x19d   : > { %2394 = vmatpush.bf16.msrb.mxu2 %v5790_v28  ;;  %2407 = vmatpush.bf16.msrb.mxu3 %v5792_v29 }
 0x1a0   : > { %2263 = vmatpush.bf16.msrb.mxu1 %v7075_v61 }
 0x1a1   : > { %2395 = vmatpush.bf16.msrb.mxu2 %v7073_v17  ;;  %2408 = vmatpush.bf16.msrb.mxu3 %v7074_v50 }
 0x1a4   : > { %2264 = vmatpush.bf16.msrb.mxu1 %v7078_v55 }
 0x1a5   : > { %2396 = vmatpush.bf16.msrb.mxu2 %v7076_v33  ;;  %2409 = vmatpush.bf16.msrb.mxu3 %v7077_v19  ;;  %v7092_v33 = vld [vmem:[#allocation38_spill] sm:$0xff] }
 0x1a8   : > { %2265 = vmatpush.bf16.msrb.mxu1 %v7081_v10 }
 0x1a9   : > { %2397 = vmatpush.bf16.msrb.mxu2 %v7079_v0  ;;  %2410 = vmatpush.bf16.msrb.mxu3 %v7080_v5  ;;  %v7091_v5 = vld [vmem:[#allocation37_spill] sm:$0xff] }
 0x1ad   : > { %2398 = vmatpush.bf16.msrb.mxu2 %v7082_v34  ;;  %2411 = vmatpush.bf16.msrb.mxu3 %v7083_v43  ;;  %v7090_v34 = vld [vmem:[#allocation26_spill] sm:$0xff] }
 0x1b1   : > { %2399 = vmatpush.bf16.msrb.mxu2 %v7084_v57  ;;  %2412 = vmatpush.bf16.msrb.mxu3 %v7085_v31 }
 0x1b5   : > { %2400 = vmatpush.bf16.msrb.mxu2 %v7086_v24  ;;  %2413 = vmatpush.bf16.msrb.mxu3 %v7087_v44 }
 0x1f5   : > { %v2023_v54 = vpop.f32.mrf.mxu0 }
 0x1fa   : > { %v1997_v38 = vpop.f32.mrf.mxu2  ;;  %v2010_v35 = vpop.f32.mrf.mxu3 }
 0x1fb   : > { %v1998_v51 = vadd.f32 %v1997_v38, %v7088_v2  ;;  %v2011_v63 = vadd.f32 %v2010_v35, %v7089_v18 }
 0x1fd   : > { %v2068_v23 = vrot.slane %v1998_v51, 6  ;;  %v2091_v3 = vrot.slane %v2011_v63, 6  ;;  %v2025_v39 = vpop.f32.mrf.mxu0  ;;  %v7093_v63 = vld [vmem:[#allocation39_spill] sm:$0xff] }
 0x1ff   : > { %v2070_v43 = vadd.f32 %v2068_v23, %v7090_v34  ;;  %v2093_v57 = vadd.f32 %v2091_v3, %v7091_v5 }
 0x201   : > { %v4430_v0 = vmul.f32 -1.442695, %v2070_v43  ;;  %v4431_v31 = vmul.f32 -1.442695, %v2093_v57  ;;  %v7094_v43 = vld [vmem:[#allocation41_spill] sm:$0xff] }
 0x202   : > { %v1999_v19 = vpop.f32.mrf.mxu2  ;;  %v2012_v24 = vpop.f32.mrf.mxu3 }
 0x203   : > { %4770 = vpow2.f32 %v4430_v0 }
 0x204   : > { %4772 = vpow2.f32 %v4431_v31 }
 0x208   : > { %v2037_v44 = vpop.f32.mrf.mxu1 }
 0x209   : > { %v4771_v10 = vpop.eup %4770  ;;  %v2038_v50 = vadd.f32 %v2037_v44, %v7092_v33  ;;  %v7095_v33 = vld [vmem:[#allocation40_spill] sm:$0xff] }
 0x20a   : > { %v4773_v38 = vpop.eup %4772  ;;  %v2074_v2 = vadd.f32 1.0, %v4771_v10  ;;  %v2024_v18 = vadd.f32 %v2023_v54, %v7095_v33 }
 0x20b   : > { %v2097_v35 = vadd.f32 1.0, %v4773_v38  ;;  %v2127_v51 = vrot.slane %v2038_v50, 6 }
 0x20c   : > { %4774 = vrcp.f32 %v2074_v2  ;;  %v2086_v55 = vand.u32 2147483648, %v2074_v2  ;;  %vm2080_vm7 = vweird.f32 %v2074_v2 }
 0x20d   : > { %4776 = vrcp.f32 %v2097_v35  ;;  %v2129_v23 = vadd.f32 %v2127_v51, %v7093_v63  ;;  %vm2103_vm11 = vweird.f32 %v2097_v35 }
 0x20e   : > { %v2050_v39 = vpop.f32.mrf.mxu2 }
 0x20f   : > { %v4432_v3 = vmul.f32 -1.442695, %v2129_v23  ;;  %v2051_v57 = vadd.f32 %v2050_v39, %v7094_v43  ;;  %v2063_v19 = vpop.f32.mrf.mxu3  ;;  %v2084_v39 = vand.u32 2147483647, %v2074_v2 }
 0x210   : > { %v2039_v24 = vpop.f32.mrf.mxu1 }
 0x211   : > { %4778 = vpow2.f32 %v4432_v3  ;;  %v2150_v0 = vrot.slane %v2051_v57, 6  ;;  %vm2085_vm9 = vcmp.eq.f32.partialorder %v2084_v39, 8.507059e+37  ;;  %v2064_v39 = vadd.f32 %v2063_v19, %v6358_v14 }
 0x212   : > { %v4775_v31 = vpop.eup %4774 }
 0x213   : > { %v4777_v5 = vpop.eup %4776  ;;  %v2076_v34 = vmul.f32 %v4775_v31, %v2074_v2  ;;  %v2152_v44 = vadd.f32 %v2150_v0, %v6350_v45  ;;  %vm2081_vm6 = vweird.f32 %v4775_v31  ;;  %v2087_v0 = vor.u32 1.1754944e-38, %v2086_v55 }
 0x214   : > { %v2099_v10 = vmul.f32 %v4777_v5, %v2097_v35  ;;  %vm2082_vm8 = vmor %vm2080_vm7, %vm2081_vm6  ;;  %vm2104_vm10 = vweird.f32 %v4777_v5 }
 0x215   : > { %v2077_v38 = vsub.f32 1.0, %v2076_v34  ;;  %v4433_v50 = vmul.f32 -1.442695, %v2152_v44  ;;  %v2114_v34 = vrot.slane %v2024_v18, 6  ;;  %vm2105_vm12 = vmor %vm2103_vm11, %vm2104_vm10 }
 0x216   : > { %v2100_v51 = vsub.f32 1.0, %v2099_v10  ;;  %v2052_v63 = vpop.f32.mrf.mxu2 }
 0x217   : > { %v4779_v23 = vpop.eup %4778  ;;  %v2078_v17 = vmul.f32 %v4775_v31, %v2077_v38  ;;  %4780 = vpow2.f32 %v4433_v50  ;;  %v2065_v3 = vpop.f32.mrf.mxu3  ;;  %v2109_v38 = vand.u32 2147483648, %v2097_v35  ;;  %v2107_v50 = vand.u32 2147483647, %v2097_v35 }
 0x218   : > { %v2101_v57 = vmul.f32 %v4777_v5, %v2100_v51  ;;  %v2133_v24 = vadd.f32 1.0, %v4779_v23 }
 0x219   : > { %v2079_v43 = vadd.f32 %v4775_v31, %v2078_v17  ;;  %v2110_v55 = vor.u32 1.1754944e-38, %v2109_v38  ;;  %vm2108_vm13 = vcmp.eq.f32.partialorder %v2107_v50, 8.507059e+37 }
 0x21a   : > { %4782 = vrcp.f32 %v2133_v24  ;;  %v2102_v10 = vadd.f32 %v4777_v5, %v2101_v57  ;;  %v2143_v57 = vand.u32 2147483647, %v2133_v24  ;;  %vm2139_vm15 = vweird.f32 %v2133_v24 }
 0x21b   : > { %v2083_v44 = vsel %vm2082_vm8, %v4775_v31, %v2079_v43  ;;  %v2145_v31 = vand.u32 2147483648, %v2133_v24 }
 0x21c   : > { %v2088_v54 = vsel %vm2085_vm9, %v2087_v0, %v2083_v44  ;;  %v2106_v2 = vsel %vm2105_vm12, %v4777_v5, %v2102_v10  ;;  %vm2144_vm4 = vcmp.eq.f32.partialorder %v2143_v57, 8.507059e+37 }
 0x21d   : > { %v4781_v63 = vpop.eup %4780  ;;  %v2116_v33 = vmul.f32 %v2114_v34, %v2088_v54  ;;  %v2111_v43 = vsel %vm2108_vm13, %v2110_v55, %v2106_v2  ;;  %v2122_v34 = vrot.slane %v6364_v56, 6  ;;  %v2146_v5 = vor.u32 1.1754944e-38, %v2145_v31 }
 0x21e   : > { %v2156_v45 = vadd.f32 1.0, %v4781_v63  ;;  %v2119_v35 = vsub.f32 1.0, %v2111_v43 }
 0x21f   : > { %v2117_v51 = vadd.f32 %v2116_v33, %v6257_v26  ;;  %v2124_v63 = vmul.f32 %v2122_v34, %v2111_v43 }
 0x220   : > { %v4783_v17 = vpop.eup %4782  ;;  %4784 = vrcp.f32 %v2156_v45  ;;  %v2166_v14 = vand.u32 2147483647, %v2156_v45  ;;  %vm2162_vm6 = vweird.f32 %v2156_v45 }
 0x221   : > { %v2135_v23 = vmul.f32 %v4783_v17, %v2133_v24  ;;  %4786 = vtanh.f32 %v2117_v51  ;;  %vm2140_vm14 = vweird.f32 %v4783_v17  ;;  %v2173_v51 = vrot.slane %v2064_v39, 6 }
 0x222   : > { %vm2141_vm3 = vmor %vm2139_vm15, %vm2140_vm14  ;;  %vm2167_vm8 = vcmp.eq.f32.partialorder %v2166_v14, 8.507059e+37 }
 0x223   : > { %v2136_v18 = vsub.f32 1.0, %v2135_v23  ;;  %v2168_v23 = vand.u32 2147483648, %v2156_v45 }
 0x225   : > { %v2137_v3 = vmul.f32 %v4783_v17, %v2136_v18 }
 0x226   : > { %v4785_v0 = vpop.eup %4784 }
 0x227   : > { %v4787_v33 = vpop.eup %4786  ;;  %v2158_v44 = vmul.f32 %v4785_v0, %v2156_v45  ;;  %v2138_v54 = vadd.f32 %v4783_v17, %v2137_v3  ;;  %vm2163_vm5 = vweird.f32 %v4785_v0 }
 0x228   : > { %v2120_v10 = vmul.f32 %v4787_v33, %v2119_v35  ;;  %vm2164_vm7 = vmor %vm2162_vm6, %vm2163_vm5  ;;  %v2181_v35 = vrot.slane %v6386_v6, 6 }
 0x229   : > { %v2159_v38 = vsub.f32 1.0, %v2158_v44  ;;  %v2142_v50 = vsel %vm2141_vm3, %v4783_v17, %v2138_v54  ;;  %v2169_v17 = vor.u32 1.1754944e-38, %v2168_v23  ;;  %v7104_v23 = vld [vmem:[#allocation15_spill] sm:$0xff] }
 0x22a   : > { %v2147_v19 = vsel %vm2144_vm4, %v2146_v5, %v2142_v50  ;;  %v6438_v2 = vadd.f32 %v2124_v63, %v2120_v10  ;;  %v7096_v5 = vld [vmem:[#allocation9_spill] sm:$0xff]  ;;  %v7097_v10 = vld [vmem:[#allocation23_spill] sm:$0xff]  ;;  %v7098_v63 = vld [vmem:[#allocation10_spill] sm:$0xff] }
 0x22b   : > { %v2160_v55 = vmul.f32 %v4785_v0, %v2159_v38  ;;  %v2175_v18 = vmul.f32 %v2173_v51, %v2147_v19  ;;  %v7099_v38 = vld [vmem:[#allocation11_spill] sm:$0xff]  ;;  %v7100_v50 = vld [vmem:[#allocation24_spill] sm:$0xff]  ;;  %v7102_v19 = vld [vmem:[#allocation13_spill] sm:$0xff] }
 0x22c   : > { %v2185_v3 = vpack.c.bf16 %v6438_v2, %v6438_v2  ;;  %v7101_v51 = vld [vmem:[#allocation12_spill] sm:$0xff] }
 0x22d   : > { %v2161_v24 = vadd.f32 %v4785_v0, %v2160_v55  ;;  %v2176_v31 = vadd.f32 %v2175_v18, %v6371_v49  ;;  %v7103_v55 = vld [vmem:[#allocation14_spill] sm:$0xff]  ;;  %v7105_v18 = vld [vmem:[#allocation16_spill] sm:$0xff] }
 0x22e   : > { %v2187_v43 = vrot.slane %v2185_v3, 1  ;;  %v7106_v3 = vld [vmem:[#allocation17_spill] sm:$0xff] }
 0x22f   : > { %v2165_v57 = vsel %vm2164_vm7, %v4785_v0, %v2161_v24  ;;  %4788 = vtanh.f32 %v2176_v31  ;;  %v7107_v24 = vld [vmem:[#allocation18_spill] sm:$0xff]  ;;  %v7108_v31 = vld [vmem:[#allocation19_spill] sm:$0xff] }
 0x230   : > { %2197 = vmatmul.bf16.vlgmr.msra.gmra.mxu0 %v2187_v43  ;;  %2210 = vmatmul.bf16.vlgmr.msra.gmra.mxu1 %v2187_v43  ;;  %v2170_v39 = vsel %vm2167_vm8, %v2169_v17, %v2165_v57 }
 0x231   : > { %2223 = vmatmul.bf16.vlgmr.msra.gmra.mxu2 %v2187_v43  ;;  %2419 = vmatpush.bf16.msra.mxu0 %v5786_v27  ;;  %v2178_v45 = vsub.f32 1.0, %v2170_v39  ;;  %v2183_v0 = vmul.f32 %v2181_v35, %v2170_v39  ;;  %v7109_v43 = vld [vmem:[#allocation20_spill] sm:$0xff]  ;;  %v7110_v39 = vld [vmem:[#allocation35_spill] sm:$0xff] }
 0x232   : > { %2436 = vmatpush.bf16.msra.mxu1 %v5769_v20  ;;  %2449 = vmatpush.bf16.msra.mxu2 %v6026_v60  ;;  %v7111_v35 = vld [vmem:[#allocation36_spill] sm:$0xff] }
 0x235   : > { %v4789_v34 = vpop.eup %4788  ;;  %2420 = vmatpush.bf16.msra.mxu0 %v5823_v42 }
 0x236   : > { %v2179_v33 = vmul.f32 %v4789_v34, %v2178_v45  ;;  %2437 = vmatpush.bf16.msra.mxu1 %v5804_v36  ;;  %2450 = vmatpush.bf16.msra.mxu2 %v6055_v9 }
 0x238   : > { %v6450_v14 = vadd.f32 %v2183_v0, %v2179_v33 }
 0x239   : > { %2421 = vmatpush.bf16.msra.mxu0 %v5859_v53 }
 0x23a   : > { %v2228_v44 = vpack.c.bf16 %v6450_v14, %v6450_v14  ;;  %2438 = vmatpush.bf16.msra.mxu1 %v5841_v47  ;;  %2451 = vmatpush.bf16.msra.mxu2 %v6078_v22 }
 0x23c   : > { %v2230_v54 = vrot.slane %v2228_v44, 1  ;;  %v7112_v44 = vld [vmem:[#allocation26_spill] sm:$0xff] }
 0x23d   : > { %2422 = vmatpush.bf16.msra.mxu0 %v5895_v1 }
 0x23e   : > { %2240 = vmatmul.bf16.vlgmr.msra.gmra.mxu3 %v2230_v54  ;;  %2439 = vmatpush.bf16.msra.mxu1 %v5877_v59 }
 0x23f   : > { %2462 = vmatpush.bf16.msra.mxu3 %v6040_v4  ;;  %2452 = vmatpush.bf16.msra.mxu2 %v6099_v37 }
 0x240   : > { %2253 = vmatmul.bf16.vlgmr.msrb.gmra.mxu0 %v2230_v54  ;;  %2266 = vmatmul.bf16.vlgmr.msrb.gmra.mxu1 %v2230_v54 }
 0x241   : > { %2423 = vmatpush.bf16.msra.mxu0 %v5931_v13 }
 0x242   : > { %2440 = vmatpush.bf16.msra.mxu1 %v5913_v7 }
 0x243   : > { %2463 = vmatpush.bf16.msra.mxu3 %v6064_v12  ;;  %2453 = vmatpush.bf16.msra.mxu2 %v6119_v46 }
 0x245   : > { %2424 = vmatpush.bf16.msra.mxu0 %v5970_v32 }
 0x246   : > { %2441 = vmatpush.bf16.msra.mxu1 %v5949_v21 }
 0x247   : > { %2464 = vmatpush.bf16.msra.mxu3 %v6088_v25  ;;  %2454 = vmatpush.bf16.msra.mxu2 %v6139_v62 }
 0x249   : > { %2425 = vmatpush.bf16.msra.mxu0 %v6015_v52 }
 0x24a   : > { %2442 = vmatpush.bf16.msra.mxu1 %v5988_v40 }
 0x24b   : > { %2465 = vmatpush.bf16.msra.mxu3 %v6109_v41  ;;  %2455 = vmatpush.bf16.msra.mxu2 %v6159_v11 }
 0x24d   : > { %2426 = vmatpush.bf16.msra.mxu0 %v6051_v8 }
 0x24e   : > { %2443 = vmatpush.bf16.msra.mxu1 %v6024_v58 }
 0x24f   : > { %2466 = vmatpush.bf16.msra.mxu3 %v7072_v48  ;;  %2456 = vmatpush.bf16.msra.mxu2 %v6179_v30 }
 0x251   : > { %2597 = vmatpush.bf16.msrb.mxu0 %v5756_v15 }
 0x252   : > { %2610 = vmatpush.bf16.msrb.mxu1 %v5758_v16 }
 0x253   : > { %2467 = vmatpush.bf16.msra.mxu3 %v7075_v61 }
 0x255   : > { %2598 = vmatpush.bf16.msrb.mxu0 %v5790_v28 }
 0x256   : > { %2611 = vmatpush.bf16.msrb.mxu1 %v5792_v29 }
 0x257   : > { %2468 = vmatpush.bf16.msra.mxu3 %v7097_v10 }
 0x259   : > { %2599 = vmatpush.bf16.msrb.mxu0 %v7096_v5 }
 0x25a   : > { %2612 = vmatpush.bf16.msrb.mxu1 %v7098_v63 }
 0x25b   : > { %2469 = vmatpush.bf16.msra.mxu3 %v7100_v50 }
 0x25d   : > { %2600 = vmatpush.bf16.msrb.mxu0 %v7099_v38  ;;  %v7117_v38 = vld [vmem:[#allocation39_spill] sm:$0xff] }
 0x25e   : > { %2613 = vmatpush.bf16.msrb.mxu1 %v7101_v51 }
 0x261   : > { %2601 = vmatpush.bf16.msrb.mxu0 %v7102_v19 }
 0x262   : > { %2614 = vmatpush.bf16.msrb.mxu1 %v7103_v55 }
 0x265   : > { %2602 = vmatpush.bf16.msrb.mxu0 %v7104_v23  ;;  %v7113_v23 = vld [vmem:[#allocation37_spill] sm:$0xff] }
 0x266   : > { %2615 = vmatpush.bf16.msrb.mxu1 %v7105_v18 }
 0x269   : > { %2603 = vmatpush.bf16.msrb.mxu0 %v7106_v3 }
 0x26a   : > { %2616 = vmatpush.bf16.msrb.mxu1 %v7107_v24 }
 0x26d   : > { %2604 = vmatpush.bf16.msrb.mxu0 %v7108_v31 }
 0x26e   : > { %2617 = vmatpush.bf16.msrb.mxu1 %v7109_v43 }
 0x2ad   : > { %v2198_v17 = vpop.f32.mrf.mxu0  ;;  %v2211_v57 = vpop.f32.mrf.mxu1 }
 0x2ae   : > { %v2199_v45 = vadd.f32 %v2198_v17, %v7110_v39  ;;  %v2212_v34 = vadd.f32 %v2211_v57, %v7111_v35 }
 0x2b0   : > { %v2272_v33 = vrot.slane %v2199_v45, 4  ;;  %v2295_v0 = vrot.slane %v2212_v34, 4  ;;  %v7114_v45 = vld [vmem:[#allocation41_spill] sm:$0xff] }
 0x2b2   : > { %v2274_v54 = vadd.f32 %v2272_v33, %v7112_v44  ;;  %v2297_v18 = vadd.f32 %v2295_v0, %v7113_v23 }
 0x2b4   : > { %v4434_v50 = vmul.f32 -1.442695, %v2274_v54  ;;  %v4435_v3 = vmul.f32 -1.442695, %v2297_v18  ;;  %v2224_v55 = vpop.f32.mrf.mxu2  ;;  %v7115_v18 = vld [vmem:[#allocation38_spill] sm:$0xff] }
 0x2b5   : > { %v2200_v24 = vpop.f32.mrf.mxu0  ;;  %v2213_v19 = vpop.f32.mrf.mxu1 }
 0x2b6   : > { %4790 = vpow2.f32 %v4434_v50  ;;  %v7116_v24 = vld [vmem:[#allocation42_spill] sm:$0xff] }
 0x2b7   : > { %4792 = vpow2.f32 %v4435_v3 }
 0x2bc   : > { %v4791_v43 = vpop.eup %4790  ;;  %v2226_v31 = vpop.f32.mrf.mxu2 }
 0x2bd   : > { %v4793_v10 = vpop.eup %4792  ;;  %v2278_v51 = vadd.f32 1.0, %v4791_v43  ;;  %v2254_v17 = vpop.f32.mrf.mxu0 }
 0x2be   : > { %v6500_v39 = vpop.f32.mrf.mxu1  ;;  %v2301_v57 = vadd.f32 1.0, %v4793_v10  ;;  %v2255_v34 = vadd.f32 %v2254_v17, %v7114_v45 }
 0x2bf   : > { %4794 = vrcp.f32 %v2278_v51  ;;  %v2290_v48 = vand.u32 2147483648, %v2278_v51  ;;  %vm2284_vm10 = vweird.f32 %v2278_v51 }
 0x2c0   : > { %4796 = vrcp.f32 %v2301_v57  ;;  %v2354_v33 = vrot.slane %v2255_v34, 4  ;;  %v7118_v34 = vld [vmem:[#allocation40_spill] sm:$0xff]  ;;  %vm2307_vm14 = vweird.f32 %v2301_v57 }
 0x2c1   : > { %v2241_v0 = vpop.f32.mrf.mxu3  ;;  %v2225_v5 = vadd.f32 %v2224_v55, %v7118_v34 }
 0x2c2   : > { %v2242_v54 = vadd.f32 %v2241_v0, %v7115_v18  ;;  %v2356_v19 = vadd.f32 %v2354_v33, %v7116_v24  ;;  %v2288_v33 = vand.u32 2147483647, %v2278_v51 }
 0x2c4   : > { %v2331_v50 = vrot.slane %v2242_v54, 4  ;;  %v4437_v23 = vmul.f32 -1.442695, %v2356_v19  ;;  %vm2289_vm12 = vcmp.eq.f32.partialorder %v2288_v33, 8.507059e+37 }
 0x2c5   : > { %v4795_v3 = vpop.eup %4794  ;;  %v2256_v31 = vpop.f32.mrf.mxu0 }
 0x2c6   : > { %v2269_v44 = vpop.f32.mrf.mxu1  ;;  %v4797_v43 = vpop.eup %4796  ;;  %v2280_v35 = vmul.f32 %v4795_v3, %v2278_v51  ;;  %v2333_v61 = vadd.f32 %v2331_v50, %v7117_v38  ;;  %4798 = vpow2.f32 %v4437_v23  ;;  %vm2285_vm9 = vweird.f32 %v4795_v3 }
 0x2c7   : > { %v2303_v10 = vmul.f32 %v4797_v43, %v2301_v57  ;;  %vm2286_vm11 = vmor %vm2284_vm10, %vm2285_vm9  ;;  %v2291_v31 = vor.u32 1.1754944e-38, %v2290_v48  ;;  %v2318_v23 = vrot.slane %v2225_v5, 4  ;;  %vm2308_vm13 = vweird.f32 %v4797_v43 }
 0x2c8   : > { %v2281_v17 = vsub.f32 1.0, %v2280_v35  ;;  %v4436_v45 = vmul.f32 -1.442695, %v2333_v61  ;;  %vm2309_vm15 = vmor %vm2307_vm14, %vm2308_vm13 }
 0x2c9   : > { %v2304_v63 = vsub.f32 1.0, %v2303_v10  ;;  %v2243_v0 = vpop.f32.mrf.mxu3 }
 0x2ca   : > { %v2282_v18 = vmul.f32 %v4795_v3, %v2281_v17  ;;  %4800 = vpow2.f32 %v4436_v45  ;;  %v2313_v0 = vand.u32 2147483648, %v2301_v57 }
 0x2cb   : > { %v2305_v54 = vmul.f32 %v4797_v43, %v2304_v63  ;;  %v2311_v63 = vand.u32 2147483647, %v2301_v57 }
 0x2cc   : > { %v2283_v19 = vadd.f32 %v4795_v3, %v2282_v18  ;;  %v4799_v44 = vpop.eup %4798  ;;  %v2314_v18 = vor.u32 1.1754944e-38, %v2313_v0 }
 0x2cd   : > { %v6507_v35 = vadd.f32 1.0, %v4799_v44  ;;  %v2306_v55 = vadd.f32 %v4797_v43, %v2305_v54  ;;  %vm2312_vm3 = vcmp.eq.f32.partialorder %v2311_v63, 8.507059e+37  ;;  %v2326_v44 = vrot.slane %v6438_v2, 6 }
 0x2ce   : > { %v2287_v50 = vsel %vm2286_vm11, %v4795_v3, %v2283_v19 }
 0x2cf   : > { %v2292_v61 = vsel %vm2289_vm12, %v2291_v31, %v2287_v50  ;;  %4802 = vrcp.f32 %v6507_v35  ;;  %v2310_v48 = vsel %vm2309_vm15, %v4797_v43, %v2306_v55  ;;  %v3181_v43 = vsel %vm838_vm0, %v6364_v56, %v6438_v2 }
 0x2d0   : > { %v4801_v10 = vpop.eup %4800  ;;  %v2320_v17 = vmul.f32 %v2318_v23, %v2292_v61  ;;  %v2315_v3 = vsel %vm2312_vm3, %v2314_v18, %v2310_v48  ;;  %vm2366_vm9 = vweird.f32 %v6507_v35 }
 0x2d1   : > { %v2337_v45 = vadd.f32 1.0, %v4801_v10  ;;  %v2323_v19 = vsub.f32 1.0, %v2315_v3  ;;  %v2328_v61 = vmul.f32 %v2326_v44, %v2315_v3 }
 0x2d2   : > { %v2321_v51 = vadd.f32 %v2320_v17, %v6257_v26  ;;  %v7119_v17 = vld [vmem:[#allocation43_spill] sm:$0xff] }
 0x2d3   : > { %4804 = vrcp.f32 %v2337_v45  ;;  %v2349_v55 = vand.u32 2147483648, %v2337_v45  ;;  %v2268_v63 = vadd.f32 %v6500_v39, %v7119_v17  ;;  %v2347_v48 = vand.u32 2147483647, %v2337_v45 }
 0x2d4   : > { %4806 = vtanh.f32 %v2321_v51  ;;  %vm2343_vm5 = vweird.f32 %v2337_v45 }
 0x2d5   : > { %v4803_v5 = vpop.eup %4802  ;;  %v2350_v56 = vor.u32 1.1754944e-38, %v2349_v55  ;;  %v2377_v44 = vrot.slane %v2268_v63, 4  ;;  %vm2348_vm7 = vcmp.eq.f32.partialorder %v2347_v48, 8.507059e+37  ;;  %v2385_v55 = vrot.slane %v6450_v14, 6 }
 0x2d6   : > { %v2362_v33 = vmul.f32 %v4803_v5, %v6507_v35  ;;  %vm2367_vm8 = vweird.f32 %v4803_v5 }
 0x2d7   : > { %vm2368_vm10 = vmor %vm2366_vm9, %vm2367_vm8 }
 0x2d8   : > { %v2363_v23 = vsub.f32 1.0, %v2362_v33 }
 0x2d9   : > { %v4805_v54 = vpop.eup %4804 }
 0x2da   : > { %v4807_v31 = vpop.eup %4806  ;;  %v2339_v50 = vmul.f32 %v4805_v54, %v2337_v45  ;;  %vm2344_vm4 = vweird.f32 %v4805_v54  ;;  %v2364_v18 = vmul.f32 %v4803_v5, %v2363_v23  ;;  %v2370_v45 = vand.u32 2147483647, %v6507_v35 }
 0x2db   : > { %v2324_v57 = vmul.f32 %v4807_v31, %v2323_v19  ;;  %vm2345_vm6 = vmor %vm2343_vm5, %vm2344_vm4 }
 0x2dc   : > { %v2340_v10 = vsub.f32 1.0, %v2339_v50  ;;  %v2365_v50 = vadd.f32 %v4803_v5, %v2364_v18  ;;  %vm2371_vm11 = vcmp.eq.f32.partialorder %v2370_v45, 8.507059e+37  ;;  %v3198_v18 = vsel %vm838_vm0, %v6386_v6, %v6450_v14  ;;  %v7120_v6 = vld [vmem:[#allocation21_spill] sm:$0xff]  ;;  %v7129_v45 = vld [vmem:[#allocation24_spill] sm:$0xff] }
 0x2dd   : > { %v6516_v0 = vadd.f32 %v2328_v61, %v2324_v57  ;;  %v2372_v57 = vand.u32 2147483648, %v6507_v35  ;;  %v7121_v14 = vld [vmem:[#allocation9_spill] sm:$0xff] }
 0x2de   : > { %v2341_v51 = vmul.f32 %v4805_v54, %v2340_v10  ;;  %v2369_v61 = vsel %vm2368_vm10, %v4803_v5, %v2365_v50  ;;  %v7126_v50 = vld [vmem:[#allocation23_spill] sm:$0xff] }
 0x2df   : > { %v2389_v19 = vpack.c.bf16 %v6516_v0, %v6516_v0  ;;  %v6524_v3 = vsel %vm842_vm1, %v3181_v43, %v6516_v0  ;;  %v2373_v10 = vor.u32 1.1754944e-38, %v2372_v57  ;;  %v7127_v57 = vld [vmem:[#allocation13_spill] sm:$0xff] }
 0x2e0   : > { %v2342_v33 = vadd.f32 %v4805_v54, %v2341_v51 }
 0x2e1   : > { %v2391_v2 = vrot.slane %v2389_v19, 2  ;;  %v2374_v43 = vsel %vm2371_vm11, %v2373_v10, %v2369_v61  ;;  %v7131_v61 = vld [vmem:[#allocation16_spill] sm:$0xff]  ;;  %v7132_v10 = vld [vmem:[#allocation17_spill] sm:$0xff] }
 0x2e2   : > { %v2346_v31 = vsel %vm2345_vm6, %v4805_v54, %v2342_v33  ;;  %v2382_v35 = vsub.f32 1.0, %v2374_v43  ;;  %v2387_v51 = vmul.f32 %v2385_v55, %v2374_v43  ;;  %v7133_v43 = vld [vmem:[#allocation18_spill] sm:$0xff]  ;;  %v7135_v55 = vld [vmem:[#allocation20_spill] sm:$0xff] }
 0x2e3   : > { %v2351_v39 = vsel %vm2348_vm7, %v2350_v56, %v2346_v31  ;;  %2401 = vmatmul.bf16.vlgmr.msrb.gmra.mxu2 %v2391_v2  ;;  %2414 = vmatmul.bf16.vlgmr.msrb.gmra.mxu3 %v2391_v2  ;;  %v7124_v31 = vld [vmem:[#allocation11_spill] sm:$0xff] }
 0x2e4   : > { %v2379_v23 = vmul.f32 %v2377_v44, %v2351_v39  ;;  %2427 = vmatmul.bf16.vlgmr.msra.gmra.mxu0 %v2391_v2  ;;  %2623 = vmatpush.bf16.msrb.mxu2 %v5786_v27  ;;  %v7122_v2 = vld [vmem:[#allocation10_spill] sm:$0xff]  ;;  %v7125_v39 = vld [vmem:[#allocation12_spill] sm:$0xff] }
 0x2e5   : > { %2640 = vmatpush.bf16.msrb.mxu3 %v5769_v20  ;;  %2653 = vmatpush.bf16.msra.mxu0 %v6026_v60  ;;  %v7123_v44 = vld [vmem:[#allocation22_spill] sm:$0xff] }
 0x2e6   : > { %v2380_v54 = vadd.f32 %v2379_v23, %v6371_v49  ;;  %v7128_v23 = vld [vmem:[#allocation14_spill] sm:$0xff] }
 0x2e8   : > { %4808 = vtanh.f32 %v2380_v54  ;;  %2624 = vmatpush.bf16.msrb.mxu2 %v5823_v42  ;;  %v7130_v54 = vld [vmem:[#allocation15_spill] sm:$0xff] }
 0x2e9   : > { %2641 = vmatpush.bf16.msrb.mxu3 %v5804_v36  ;;  %2654 = vmatpush.bf16.msra.mxu0 %v6055_v9 }
 0x2ec   : > { %2625 = vmatpush.bf16.msrb.mxu2 %v5859_v53 }
 0x2ed   : > { %2642 = vmatpush.bf16.msrb.mxu3 %v5841_v47  ;;  %2655 = vmatpush.bf16.msra.mxu0 %v6078_v22 }
 0x2ee   : > { %v4809_v5 = vpop.eup %4808 }
 0x2ef   : > { %v2383_v63 = vmul.f32 %v4809_v5, %v2382_v35  ;;  %v7134_v35 = vld [vmem:[#allocation19_spill] sm:$0xff] }
 0x2f0   : > { %2626 = vmatpush.bf16.msrb.mxu2 %v5895_v1 }
 0x2f1   : > { %v6541_v48 = vadd.f32 %v2387_v51, %v2383_v63  ;;  %2643 = vmatpush.bf16.msrb.mxu3 %v5877_v59  ;;  %2656 = vmatpush.bf16.msra.mxu0 %v6099_v37 }
 0x2f3   : > { %v2432_v19 = vpack.c.bf16 %v6541_v48, %v6541_v48  ;;  %v6552_v33 = vsel %vm842_vm1, %v3198_v18, %v6541_v48  ;;  %v7136_v18 = vld [vmem:[#allocation35_spill] sm:$0xff] }
 0x2f4   : > { %2627 = vmatpush.bf16.msrb.mxu2 %v5931_v13 }
 0x2f5   : > { %v2434_v56 = vrot.slane %v2432_v19, 2  ;;  %2644 = vmatpush.bf16.msrb.mxu3 %v5913_v7  ;;  %2657 = vmatpush.bf16.msra.mxu0 %v6119_v46 }
 0x2f7   : > { %2444 = vmatmul.bf16.vlgmr.msra.gmra.mxu1 %v2434_v56  ;;  %2457 = vmatmul.bf16.vlgmr.msra.gmra.mxu2 %v2434_v56 }
 0x2f8   : > { %2470 = vmatmul.bf16.vlgmr.msra.gmra.mxu3 %v2434_v56  ;;  %2666 = vmatpush.bf16.msra.mxu1 %v6040_v4  ;;  %v7137_v56 = vld [vmem:[#allocation36_spill] sm:$0xff] }
 0x2f9   : > { %2628 = vmatpush.bf16.msrb.mxu2 %v5970_v32  ;;  %2645 = vmatpush.bf16.msrb.mxu3 %v5949_v21 }
 0x2fa   : > { %2658 = vmatpush.bf16.msra.mxu0 %v6139_v62 }
 0x2fc   : > { %2667 = vmatpush.bf16.msra.mxu1 %v6064_v12 }
 0x2fd   : > { %2629 = vmatpush.bf16.msrb.mxu2 %v6015_v52  ;;  %2646 = vmatpush.bf16.msrb.mxu3 %v5988_v40 }
 0x2fe   : > { %2659 = vmatpush.bf16.msra.mxu0 %v6159_v11 }
 0x300   : > { %2668 = vmatpush.bf16.msra.mxu1 %v6088_v25 }
 0x301   : > { %2630 = vmatpush.bf16.msrb.mxu2 %v6051_v8  ;;  %2647 = vmatpush.bf16.msrb.mxu3 %v6024_v58 }
 0x302   : > { %2660 = vmatpush.bf16.msra.mxu0 %v6179_v30 }
 0x304   : > { %2669 = vmatpush.bf16.msra.mxu1 %v6109_v41 }
 0x305   : > { %2780 = vmatpush.bf16.msra.mxu2 %v5756_v15  ;;  %2793 = vmatpush.bf16.msra.mxu3 %v5758_v16 }
 0x308   : > { %2670 = vmatpush.bf16.msra.mxu1 %v7120_v6 }
 0x309   : > { %2781 = vmatpush.bf16.msra.mxu2 %v5790_v28  ;;  %2794 = vmatpush.bf16.msra.mxu3 %v5792_v29  ;;  %v7140_v29 = vld [vmem:[#allocation38_spill] sm:$0xff] }
 0x30c   : > { %2671 = vmatpush.bf16.msra.mxu1 %v7123_v44 }
 0x30d   : > { %2782 = vmatpush.bf16.msra.mxu2 %v7121_v14  ;;  %2795 = vmatpush.bf16.msra.mxu3 %v7122_v2 }
 0x310   : > { %2672 = vmatpush.bf16.msra.mxu1 %v7126_v50 }
 0x311   : > { %2783 = vmatpush.bf16.msra.mxu2 %v7124_v31  ;;  %2796 = vmatpush.bf16.msra.mxu3 %v7125_v39  ;;  %v7139_v31 = vld [vmem:[#allocation37_spill] sm:$0xff] }
 0x314   : > { %2673 = vmatpush.bf16.msra.mxu1 %v7129_v45  ;;  %v7138_v45 = vld [vmem:[#allocation26_spill] sm:$0xff] }
 0x315   : > { %2784 = vmatpush.bf16.msra.mxu2 %v7127_v57  ;;  %2797 = vmatpush.bf16.msra.mxu3 %v7128_v23 }
 0x319   : > { %2785 = vmatpush.bf16.msra.mxu2 %v7130_v54  ;;  %2798 = vmatpush.bf16.msra.mxu3 %v7131_v61 }
 0x31d   : > { %2786 = vmatpush.bf16.msra.mxu2 %v7132_v10  ;;  %2799 = vmatpush.bf16.msra.mxu3 %v7133_v43 }
 0x321   : > { %2787 = vmatpush.bf16.msra.mxu2 %v7134_v35  ;;  %2800 = vmatpush.bf16.msra.mxu3 %v7135_v55 }
 0x361   : > { %v2428_v5 = vpop.f32.mrf.mxu0 }
 0x366   : > { %v2402_v63 = vpop.f32.mrf.mxu2  ;;  %v2415_v51 = vpop.f32.mrf.mxu3 }
 0x367   : > { %v2403_v19 = vadd.f32 %v2402_v63, %v7136_v18  ;;  %v2416_v23 = vadd.f32 %v2415_v51, %v7137_v56 }
 0x369   : > { %v2476_v57 = vrot.slane %v2403_v19, 2  ;;  %v2499_v39 = vrot.slane %v2416_v23, 2  ;;  %v2430_v54 = vpop.f32.mrf.mxu0 }
 0x36b   : > { %v2478_v61 = vadd.f32 %v2476_v57, %v7138_v45  ;;  %v2501_v10 = vadd.f32 %v2499_v39, %v7139_v31  ;;  %v7141_v39 = vld [vmem:[#allocation41_spill] sm:$0xff] }
 0x36d   : > { %v4438_v2 = vmul.f32 -1.442695, %v2478_v61  ;;  %v4439_v43 = vmul.f32 -1.442695, %v2501_v10 }
 0x36e   : > { %v2404_v50 = vpop.f32.mrf.mxu2  ;;  %v2417_v35 = vpop.f32.mrf.mxu3 }
 0x36f   : > { %4810 = vpow2.f32 %v4438_v2 }
 0x370   : > { %4812 = vpow2.f32 %v4439_v43 }
 0x374   : > { %v2445_v55 = vpop.f32.mrf.mxu1 }
 0x375   : > { %v4811_v14 = vpop.eup %4810  ;;  %v2446_v44 = vadd.f32 %v2445_v55, %v7140_v29 }
 0x376   : > { %v4813_v63 = vpop.eup %4812  ;;  %v2482_v18 = vadd.f32 1.0, %v4811_v14 }
 0x377   : > { %v2505_v51 = vadd.f32 1.0, %v4813_v63  ;;  %v2535_v19 = vrot.slane %v2446_v44, 2  ;;  %v2429_v63 = vadd.f32 %v2428_v5, %v7118_v34 }
 0x378   : > { %4814 = vrcp.f32 %v2482_v18  ;;  %v2494_v29 = vand.u32 2147483648, %v2482_v18  ;;  %vm2488_vm13 = vweird.f32 %v2482_v18 }
 0x379   : > { %4816 = vrcp.f32 %v2505_v51  ;;  %v2537_v57 = vadd.f32 %v2535_v19, %v7117_v38  ;;  %vm2511_vm4 = vweird.f32 %v2505_v51 }
 0x37a   : > { %v2458_v23 = vpop.f32.mrf.mxu2 }
 0x37b   : > { %v4440_v31 = vmul.f32 -1.442695, %v2537_v57  ;;  %v2459_v45 = vadd.f32 %v2458_v23, %v7141_v39  ;;  %v2471_v50 = vpop.f32.mrf.mxu3  ;;  %v2492_v23 = vand.u32 2147483647, %v2482_v18 }
 0x37c   : > { %v2447_v54 = vpop.f32.mrf.mxu1 }
 0x37d   : > { %4818 = vpow2.f32 %v4440_v31  ;;  %v2558_v2 = vrot.slane %v2459_v45, 2  ;;  %vm2493_vm15 = vcmp.eq.f32.partialorder %v2492_v23, 8.507059e+37  ;;  %v2472_v23 = vadd.f32 %v2471_v50, %v7119_v17 }
 0x37e   : > { %v4815_v61 = vpop.eup %4814 }
 0x37f   : > { %v4817_v10 = vpop.eup %4816  ;;  %v2484_v43 = vmul.f32 %v4815_v61, %v2482_v18  ;;  %v2560_v35 = vadd.f32 %v2558_v2, %v7116_v24  ;;  %vm2489_vm12 = vweird.f32 %v4815_v61  ;;  %v2495_v24 = vor.u32 1.1754944e-38, %v2494_v29 }
 0x380   : > { %v2507_v14 = vmul.f32 %v4817_v10, %v2505_v51  ;;  %vm2490_vm14 = vmor %vm2488_vm13, %vm2489_vm12  ;;  %v2522_v2 = vrot.slane %v2429_v63, 2  ;;  %vm2512_vm3 = vweird.f32 %v4817_v10 }
 0x381   : > { %v2485_v55 = vsub.f32 1.0, %v2484_v43  ;;  %v4441_v44 = vmul.f32 -1.442695, %v2560_v35  ;;  %vm2513_vm5 = vmor %vm2511_vm4, %vm2512_vm3 }
 0x382   : > { %v2508_v38 = vsub.f32 1.0, %v2507_v14  ;;  %v2460_v19 = vpop.f32.mrf.mxu2 }
 0x383   : > { %v4819_v57 = vpop.eup %4818  ;;  %v2486_v56 = vmul.f32 %v4815_v61, %v2485_v55  ;;  %4820 = vpow2.f32 %v4441_v44  ;;  %v2473_v31 = vpop.f32.mrf.mxu3  ;;  %v2517_v55 = vand.u32 2147483648, %v2505_v51  ;;  %v2515_v44 = vand.u32 2147483647, %v2505_v51 }
 0x384   : > { %v2509_v45 = vmul.f32 %v4817_v10, %v2508_v38  ;;  %v2541_v54 = vadd.f32 1.0, %v4819_v57 }
 0x385   : > { %v2487_v39 = vadd.f32 %v4815_v61, %v2486_v56  ;;  %v2518_v29 = vor.u32 1.1754944e-38, %v2517_v55  ;;  %vm2516_vm6 = vcmp.eq.f32.partialorder %v2515_v44, 8.507059e+37  ;;  %v2581_v44 = vrot.slane %v2472_v23, 2 }
 0x386   : > { %4822 = vrcp.f32 %v2541_v54  ;;  %v2510_v35 = vadd.f32 %v4817_v10, %v2509_v45  ;;  %v2553_v63 = vand.u32 2147483648, %v2541_v54  ;;  %v2551_v45 = vand.u32 2147483647, %v2541_v54 }
 0x387   : > { %v2491_v43 = vsel %vm2490_vm14, %v4815_v61, %v2487_v39  ;;  %vm2547_vm8 = vweird.f32 %v2541_v54 }
 0x388   : > { %v2496_v5 = vsel %vm2493_vm15, %v2495_v24, %v2491_v43  ;;  %v2514_v18 = vsel %vm2513_vm5, %v4817_v10, %v2510_v35  ;;  %v2554_v10 = vor.u32 1.1754944e-38, %v2553_v63  ;;  %vm2552_vm10 = vcmp.eq.f32.partialorder %v2551_v45, 8.507059e+37 }
 0x389   : > { %v4821_v14 = vpop.eup %4820  ;;  %v2524_v19 = vmul.f32 %v2522_v2, %v2496_v5  ;;  %v2519_v61 = vsel %vm2516_vm6, %v2518_v29, %v2514_v18  ;;  %v2530_v2 = vrot.slane %v6516_v0, 6 }
 0x38a   : > { %v2564_v34 = vadd.f32 1.0, %v4821_v14  ;;  %v2527_v51 = vsub.f32 1.0, %v2519_v61 }
 0x38b   : > { %v2525_v38 = vadd.f32 %v2524_v19, %v6257_v26  ;;  %v2532_v14 = vmul.f32 %v2530_v2, %v2519_v61 }
 0x38c   : > { %v4823_v56 = vpop.eup %4822  ;;  %4824 = vrcp.f32 %v2564_v34  ;;  %v2576_v29 = vand.u32 2147483648, %v2564_v34  ;;  %v2574_v0 = vand.u32 2147483647, %v2564_v34  ;;  %vm2570_vm12 = vweird.f32 %v2564_v34 }
 0x38d   : > { %v2543_v57 = vmul.f32 %v4823_v56, %v2541_v54  ;;  %4826 = vtanh.f32 %v2525_v38  ;;  %vm2548_vm7 = vweird.f32 %v4823_v56 }
 0x38e   : > { %vm2549_vm9 = vmor %vm2547_vm8, %vm2548_vm7  ;;  %vm2575_vm14 = vcmp.eq.f32.partialorder %v2574_v0, 8.507059e+37  ;;  %v7155_v0 = vld [vmem:[#allocation18_spill] sm:$0xff] }
 0x38f   : > { %v2544_v39 = vsub.f32 1.0, %v2543_v57 }
 0x391   : > { %v2545_v31 = vmul.f32 %v4823_v56, %v2544_v39 }
 0x392   : > { %v4825_v24 = vpop.eup %4824 }
 0x393   : > { %v4827_v26 = vpop.eup %4826  ;;  %v2566_v43 = vmul.f32 %v4825_v24, %v2564_v34  ;;  %v2546_v5 = vadd.f32 %v4823_v56, %v2545_v31  ;;  %vm2571_vm11 = vweird.f32 %v4825_v24  ;;  %v2577_v31 = vor.u32 1.1754944e-38, %v2576_v29  ;;  %v7153_v29 = vld [vmem:[#allocation16_spill] sm:$0xff] }
 0x394   : > { %v2528_v35 = vmul.f32 %v4827_v26, %v2527_v51  ;;  %vm2572_vm13 = vmor %vm2570_vm12, %vm2571_vm11 }
 0x395   : > { %v2567_v19 = vsub.f32 1.0, %v2566_v43  ;;  %v2550_v55 = vsel %vm2549_vm9, %v4823_v56, %v2546_v5 }
 0x396   : > { %v2555_v50 = vsel %vm2552_vm10, %v2554_v10, %v2550_v55  ;;  %v6602_v38 = vadd.f32 %v2532_v14, %v2528_v35  ;;  %v7143_v35 = vld [vmem:[#allocation8_spill] sm:$0xff]  ;;  %v7144_v14 = vld [vmem:[#allocation9_spill] sm:$0xff]  ;;  %v7146_v55 = vld [vmem:[#allocation10_spill] sm:$0xff] }
 0x397   : > { %v2568_v18 = vmul.f32 %v4825_v24, %v2567_v19  ;;  %v2583_v57 = vmul.f32 %v2581_v44, %v2555_v50  ;;  %v7145_v19 = vld [vmem:[#allocation23_spill] sm:$0xff]  ;;  %v7149_v50 = vld [vmem:[#allocation12_spill] sm:$0xff] }
 0x398   : > { %v2593_v39 = vpack.c.bf16 %v6602_v38, %v6602_v38  ;;  %v3183_v54 = vsel %vm846_vm2, %v6524_v3, %v6602_v38  ;;  %v7147_v44 = vld [vmem:[#allocation11_spill] sm:$0xff] }
 0x399   : > { %v2569_v61 = vadd.f32 %v4825_v24, %v2568_v18  ;;  %v2584_v56 = vadd.f32 %v2583_v57, %v6371_v49  ;;  %v3186_v63 = vpack.c.bf16 %v3183_v54, %v3183_v54  ;;  %v2589_v49 = vrot.slane %v6541_v48, 6  ;;  %v7150_v18 = vld [vmem:[#allocation13_spill] sm:$0xff]  ;;  %v7157_v54 = vld [vmem:[#allocation20_spill] sm:$0xff] }
 0x39a   : > { %v2595_v23 = vrot.slane %v2593_v39, 3  ;;  %v7154_v57 = vld [vmem:[#allocation17_spill] sm:$0xff]  ;;  %v7156_v39 = vld [vmem:[#allocation19_spill] sm:$0xff] }
 0x39b   : > { %v2573_v45 = vsel %vm2572_vm13, %v4825_v24, %v2569_v61  ;;  %4828 = vtanh.f32 %v2584_v56  ;;  %3188 = vst [vmem:[#allocation2] sm:$0xf] %v3186_v63  ;;  %v7158_v63 = vld [vmem:[#allocation25_spill] sm:$0xff] }
 0x39c   : > { %2605 = vmatmul.bf16.vlgmr.msrb.gmra.mxu0 %v2595_v23  ;;  %2618 = vmatmul.bf16.vlgmr.msrb.gmra.mxu1 %v2595_v23  ;;  %v2578_v51 = vsel %vm2575_vm14, %v2577_v31, %v2573_v45  ;;  %v7160_v45 = vld [vmem:[#allocation34_spill] sm:$0xff] }
 0x39d   : > { %2631 = vmatmul.bf16.vlgmr.msrb.gmra.mxu2 %v2595_v23  ;;  %2806 = vmatpush.bf16.msrb.mxu0 %v5786_v27  ;;  %v2586_v34 = vsub.f32 1.0, %v2578_v51  ;;  %v2591_v2 = vmul.f32 %v2589_v49, %v2578_v51  ;;  %v7159_v23 = vld [vmem:[#allocation28_spill] sm:$0xff]  ;;  %v7161_v51 = vld [vmem:[#allocation30_spill] sm:$0xff]  ;;  %v7162_v49 = vld [vmem:[#allocation35_spill] sm:$0xff] }
 0x39e   : > { %2820 = vmatpush.bf16.msrb.mxu1 %v5769_v20  ;;  %2833 = vmatpush.bf16.msrb.mxu2 %v6026_v60  ;;  %v6668_v31 = vadd.f32 %v7159_v23, %v7158_v63  ;;  %v7166_v63 = vld [vmem:[#allocation38_spill] sm:$0xff] }
 0x3a1   : > { %v4829_v3 = vpop.eup %4828  ;;  %2807 = vmatpush.bf16.msrb.mxu0 %v5823_v42 }
 0x3a2   : > { %v2587_v24 = vmul.f32 %v4829_v3, %v2586_v34  ;;  %2821 = vmatpush.bf16.msrb.mxu1 %v5804_v36  ;;  %2834 = vmatpush.bf16.msrb.mxu2 %v6055_v9  ;;  %v6672_v34 = vadd.f32 %v7161_v51, %v7160_v45 }
 0x3a4   : > { %v6617_v26 = vadd.f32 %v2591_v2, %v2587_v24  ;;  %v7163_v24 = vld [vmem:[#allocation36_spill] sm:$0xff] }
 0x3a5   : > { %2808 = vmatpush.bf16.msrb.mxu0 %v5859_v53 }
 0x3a6   : > { %v2636_v43 = vpack.c.bf16 %v6617_v26, %v6617_v26  ;;  %v3200_v48 = vsel %vm846_vm2, %v6552_v33, %v6617_v26  ;;  %2822 = vmatpush.bf16.msrb.mxu1 %v5841_v47  ;;  %2835 = vmatpush.bf16.msrb.mxu2 %v6078_v22  ;;  %v7142_v33 = vld [vmem:[#allocation22_spill] sm:$0xff] }
 0x3a7   : > { %v3203_v5 = vpack.c.bf16 %v3200_v48, %v3200_v48 }
 0x3a8   : > { %v2638_v10 = vrot.slane %v2636_v43, 3 }
 0x3a9   : > { %3206 = vst [vmem:[#allocation2 + $0x8] sm:$0xf] %v3203_v5  ;;  %2809 = vmatpush.bf16.msrb.mxu0 %v5895_v1 }
 0x3aa   : > { %2648 = vmatmul.bf16.vlgmr.msrb.gmra.mxu3 %v2638_v10  ;;  %2823 = vmatpush.bf16.msrb.mxu1 %v5877_v59 }
 0x3ab   : > { %2846 = vmatpush.bf16.msrb.mxu3 %v6040_v4  ;;  %2836 = vmatpush.bf16.msrb.mxu2 %v6099_v37 }
 0x3ac   : > { %2661 = vmatmul.bf16.vlgmr.msra.gmra.mxu0 %v2638_v10  ;;  %2674 = vmatmul.bf16.vlgmr.msra.gmra.mxu1 %v2638_v10 }
 0x3ad   : > { %2810 = vmatpush.bf16.msrb.mxu0 %v5931_v13 }
 0x3ae   : > { %2824 = vmatpush.bf16.msrb.mxu1 %v5913_v7 }
 0x3af   : > { %2847 = vmatpush.bf16.msrb.mxu3 %v6064_v12  ;;  %2837 = vmatpush.bf16.msrb.mxu2 %v6119_v46 }
 0x3b1   : > { %2811 = vmatpush.bf16.msrb.mxu0 %v5970_v32 }
 0x3b2   : > { %2825 = vmatpush.bf16.msrb.mxu1 %v5949_v21 }
 0x3b3   : > { %2848 = vmatpush.bf16.msrb.mxu3 %v6088_v25  ;;  %2838 = vmatpush.bf16.msrb.mxu2 %v6139_v62 }
 0x3b5   : > { %2812 = vmatpush.bf16.msrb.mxu0 %v6015_v52 }
 0x3b6   : > { %2826 = vmatpush.bf16.msrb.mxu1 %v5988_v40 }
 0x3b7   : > { %2849 = vmatpush.bf16.msrb.mxu3 %v6109_v41  ;;  %2839 = vmatpush.bf16.msrb.mxu2 %v6159_v11 }
 0x3b9   : > { %2813 = vmatpush.bf16.msrb.mxu0 %v6051_v8 }
 0x3ba   : > { %2827 = vmatpush.bf16.msrb.mxu1 %v6024_v58 }
 0x3bb   : > { %2850 = vmatpush.bf16.msrb.mxu3 %v7120_v6  ;;  %2840 = vmatpush.bf16.msrb.mxu2 %v6179_v30 }
 0x3bd   : > { %2981 = vmatpush.bf16.msra.mxu0 %v5756_v15  ;;  %v7148_v15 = vld [vmem:[#allocation24_spill] sm:$0xff] }
 0x3be   : > { %2994 = vmatpush.bf16.msra.mxu1 %v5758_v16  ;;  %v7151_v16 = vld [vmem:[#allocation14_spill] sm:$0xff] }
 0x3bf   : > { %2851 = vmatpush.bf16.msrb.mxu3 %v7142_v33 }
 0x3c1   : > { %2982 = vmatpush.bf16.msra.mxu0 %v5790_v28  ;;  %v7152_v28 = vld [vmem:[#allocation15_spill] sm:$0xff] }
 0x3c2   : > { %2995 = vmatpush.bf16.msra.mxu1 %v7143_v35 }
 0x3c3   : > { %2852 = vmatpush.bf16.msrb.mxu3 %v7145_v19 }
 0x3c5   : > { %2983 = vmatpush.bf16.msra.mxu0 %v7144_v14 }
 0x3c6   : > { %2996 = vmatpush.bf16.msra.mxu1 %v7146_v55 }
 0x3c7   : > { %2853 = vmatpush.bf16.msrb.mxu3 %v7148_v15 }
 0x3c9   : > { %2984 = vmatpush.bf16.msra.mxu0 %v7147_v44 }
 0x3ca   : > { %2997 = vmatpush.bf16.msra.mxu1 %v7149_v50 }
 0x3cd   : > { %2985 = vmatpush.bf16.msra.mxu0 %v7150_v18 }
 0x3ce   : > { %2998 = vmatpush.bf16.msra.mxu1 %v7151_v16 }
 0x3d1   : > { %2986 = vmatpush.bf16.msra.mxu0 %v7152_v28 }
 0x3d2   : > { %2999 = vmatpush.bf16.msra.mxu1 %v7153_v29 }
 0x3d5   : > { %2987 = vmatpush.bf16.msra.mxu0 %v7154_v57 }
 0x3d6   : > { %3000 = vmatpush.bf16.msra.mxu1 %v7155_v0  ;;  %v7164_v0 = vld [vmem:[#allocation41_spill] sm:$0xff] }
 0x3d9   : > { %2988 = vmatpush.bf16.msra.mxu0 %v7156_v39 }
 0x3da   : > { %3001 = vmatpush.bf16.msra.mxu1 %v7157_v54  ;;  %v7165_v54 = vld [vmem:[#allocation33_spill] sm:$0xff] }
 0x419   : > { %v2606_v61 = vpop.f32.mrf.mxu0  ;;  %v2619_v56 = vpop.f32.mrf.mxu1 }
 0x41a   : > { %v2607_v3 = vadd.f32 %v2606_v61, %v7162_v49  ;;  %v2620_v2 = vadd.f32 %v2619_v56, %v7163_v24 }
 0x41c   : > { %v2679_v43 = vadd.f32 %v2607_v3, %v6668_v31  ;;  %v2699_v48 = vadd.f32 %v2620_v2, %v6672_v34 }
 0x41e   : > { %v4442_v5 = vmul.f32 -1.442695, %v2679_v43  ;;  %v4443_v10 = vmul.f32 -1.442695, %v2699_v48  ;;  %v7167_v43 = vld [vmem:[#allocation31_spill] sm:$0xff] }
 0x420   : > { %4830 = vpow2.f32 %v4442_v5  ;;  %v2632_v35 = vpop.f32.mrf.mxu2 }
 0x421   : > { %4832 = vpow2.f32 %v4443_v10  ;;  %v2608_v14 = vpop.f32.mrf.mxu0  ;;  %v2621_v55 = vpop.f32.mrf.mxu1 }
 0x426   : > { %v4831_v44 = vpop.eup %4830 }
 0x427   : > { %v4833_v50 = vpop.eup %4832  ;;  %v2683_v18 = vadd.f32 1.0, %v4831_v44 }
 0x428   : > { %v2703_v16 = vadd.f32 1.0, %v4833_v50  ;;  %v2634_v28 = vpop.f32.mrf.mxu2 }
 0x429   : > { %4834 = vrcp.f32 %v2683_v18  ;;  %v2662_v29 = vpop.f32.mrf.mxu0  ;;  %v6678_v57 = vpop.f32.mrf.mxu1  ;;  %v2695_v28 = vand.u32 2147483648, %v2683_v18  ;;  %vm2689_vm15 = vweird.f32 %v2683_v18 }
 0x42a   : > { %4836 = vrcp.f32 %v2703_v16  ;;  %v2663_v39 = vadd.f32 %v2662_v29, %v7164_v0  ;;  %vm2709_vm6 = vweird.f32 %v2703_v16 }
 0x42c   : > { %v2749_v61 = vadd.f32 %v2663_v39, %v7165_v54  ;;  %v2693_v39 = vand.u32 2147483647, %v2683_v18 }
 0x42d   : > { %v2649_v56 = vpop.f32.mrf.mxu3 }
 0x42e   : > { %v2650_v23 = vadd.f32 %v2649_v56, %v7166_v63  ;;  %v4445_v51 = vmul.f32 -1.442695, %v2749_v61  ;;  %v2696_v63 = vor.u32 1.1754944e-38, %v2695_v28  ;;  %vm2694_vm4 = vcmp.eq.f32.partialorder %v2693_v39, 8.507059e+37 }
 0x42f   : > { %v4835_v45 = vpop.eup %4834 }
 0x430   : > { %v4837_v3 = vpop.eup %4836  ;;  %v2685_v2 = vmul.f32 %v4835_v45, %v2683_v18  ;;  %v2729_v48 = vadd.f32 %v2650_v23, %v7167_v43  ;;  %4838 = vpow2.f32 %v4445_v51  ;;  %vm2690_vm2 = vweird.f32 %v4835_v45  ;;  %v7168_v23 = vld [vmem:[#allocation40_spill] sm:$0xff] }
 0x431   : > { %v2705_v5 = vmul.f32 %v4837_v3, %v2703_v16  ;;  %v2664_v10 = vpop.f32.mrf.mxu0  ;;  %v2677_v14 = vpop.f32.mrf.mxu1  ;;  %vm2691_vm3 = vmor %vm2689_vm15, %vm2690_vm2  ;;  %v2633_v43 = vadd.f32 %v2632_v35, %v7168_v23  ;;  %vm2710_vm5 = vweird.f32 %v4837_v3  ;;  %v2713_v18 = vand.u32 2147483647, %v2703_v16 }
 0x432   : > { %v2686_v55 = vsub.f32 1.0, %v2685_v2  ;;  %v4444_v44 = vmul.f32 -1.442695, %v2729_v48  ;;  %v7169_v14 = vld [vmem:[#allocation27_spill] sm:$0xff]  ;;  %vm2711_vm7 = vmor %vm2709_vm6, %vm2710_vm5 }
 0x433   : > { %v2706_v50 = vsub.f32 1.0, %v2705_v5  ;;  %vm2714_vm8 = vcmp.eq.f32.partialorder %v2713_v18, 8.507059e+37 }
 0x434   : > { %v2687_v29 = vmul.f32 %v4835_v45, %v2686_v55  ;;  %4840 = vpow2.f32 %v4444_v44  ;;  %v7170_v55 = vld [vmem:[#allocation29_spill] sm:$0xff] }
 0x435   : > { %v2707_v54 = vmul.f32 %v4837_v3, %v2706_v50  ;;  %v2651_v56 = vpop.f32.mrf.mxu3  ;;  %v6689_v44 = vadd.f32 %v7170_v55, %v7169_v14  ;;  %v2715_v50 = vand.u32 2147483648, %v2703_v16 }
 0x436   : > { %v2688_v0 = vadd.f32 %v4835_v45, %v2687_v29  ;;  %v4839_v61 = vpop.eup %4838 }
 0x437   : > { %v6685_v10 = vadd.f32 1.0, %v4839_v61  ;;  %v2708_v48 = vadd.f32 %v4837_v3, %v2707_v54 }
 0x438   : > { %v2692_v51 = vsel %vm2691_vm3, %v4835_v45, %v2688_v0  ;;  %v2716_v45 = vor.u32 1.1754944e-38, %v2715_v50 }
 0x439   : > { %v2697_v2 = vsel %vm2694_vm4, %v2696_v63, %v2692_v51  ;;  %4842 = vrcp.f32 %v6685_v10  ;;  %v2712_v0 = vsel %vm2711_vm7, %v4837_v3, %v2708_v48  ;;  %vm2759_vm14 = vweird.f32 %v6685_v10 }
 0x43a   : > { %v4841_v5 = vpop.eup %4840  ;;  %v2719_v29 = vmul.f32 %v2697_v2, %v2633_v43  ;;  %v2717_v63 = vsel %vm2714_vm8, %v2716_v45, %v2712_v0  ;;  %v2725_v43 = vrot.slane %v6602_v38, 6  ;;  %v2676_v45 = vadd.f32 %v6678_v57, %v7119_v17  ;;  %v7171_v57 = vld [vmem:[#allocation32_spill] sm:$0xff] }
 0x43b   : > { %v2733_v28 = vadd.f32 1.0, %v4841_v5  ;;  %v2722_v61 = vsub.f32 1.0, %v2717_v63 }
 0x43c   : > { %v2720_v35 = vadd.f32 %v2719_v29, %v6689_v44  ;;  %v2727_v14 = vmul.f32 %v2725_v43, %v2717_v63 }
 0x43d   : > { %4844 = vrcp.f32 %v2733_v28  ;;  %v2745_v29 = vand.u32 2147483648, %v2733_v28  ;;  %v2743_v50 = vand.u32 2147483647, %v2733_v28  ;;  %vm2739_vm10 = vweird.f32 %v2733_v28 }
 0x43e   : > { %4846 = vtanh.f32 %v2720_v35 }
 0x43f   : > { %v4843_v54 = vpop.eup %4842  ;;  %v2746_v38 = vor.u32 1.1754944e-38, %v2745_v29  ;;  %vm2744_vm12 = vcmp.eq.f32.partialorder %v2743_v50, 8.507059e+37 }
 0x440   : > { %v2755_v39 = vmul.f32 %v4843_v54, %v6685_v10  ;;  %vm2760_vm13 = vweird.f32 %v4843_v54 }
 0x441   : > { %vm2761_vm2 = vmor %vm2759_vm14, %vm2760_vm13 }
 0x442   : > { %v2756_v5 = vsub.f32 1.0, %v2755_v39 }
 0x443   : > { %v4845_v56 = vpop.eup %4844 }
 0x444   : > { %v4847_v51 = vpop.eup %4846  ;;  %v2735_v2 = vmul.f32 %v4845_v56, %v2733_v28  ;;  %vm2740_vm9 = vweird.f32 %v4845_v56  ;;  %v2757_v18 = vmul.f32 %v4843_v54, %v2756_v5  ;;  %v2765_v28 = vand.u32 2147483648, %v6685_v10 }
 0x445   : > { %v2723_v16 = vmul.f32 %v4847_v51, %v2722_v61  ;;  %vm2741_vm11 = vmor %vm2739_vm10, %vm2740_vm9  ;;  %v2763_v51 = vand.u32 2147483647, %v6685_v10 }
 0x446   : > { %v2736_v55 = vsub.f32 1.0, %v2735_v2  ;;  %v2758_v61 = vadd.f32 %v4843_v54, %v2757_v18  ;;  %v2775_v2 = vrot.slane %v6617_v26, 6  ;;  %v7173_v26 = vld [vmem:[#allocation31_spill] sm:$0xff] }
 0x447   : > { %v6695_v3 = vadd.f32 %v2727_v14, %v2723_v16  ;;  %vm2764_vm15 = vcmp.eq.f32.partialorder %v2763_v51, 8.507059e+37 }
 0x448   : > { %v2737_v48 = vmul.f32 %v4845_v56, %v2736_v55 }
 0x449   : > { %v2779_v35 = vpack.c.bf16 %v6695_v3, %v6695_v3 }
 0x44a   : > { %v2738_v0 = vadd.f32 %v4845_v56, %v2737_v48 }
 0x44b   : > { %2788 = vmatmul.bf16.vlgmr.msra.gmra.mxu2 %v2779_v35  ;;  %2801 = vmatmul.bf16.vlgmr.msra.gmra.mxu3 %v2779_v35 }
 0x44c   : > { %v2742_v63 = vsel %vm2741_vm11, %v4845_v56, %v2738_v0  ;;  %2814 = vmatmul.bf16.vlgmr.msrb.gmra.mxu0 %v2779_v35  ;;  %3007 = vmatpush.bf16.msra.mxu2 %v5786_v27  ;;  %v2762_v27 = vsel %vm2761_vm2, %v4843_v54, %v2758_v61  ;;  %v7175_v35 = vld [vmem:[#allocation33_spill] sm:$0xff] }
 0x44d   : > { %v2747_v39 = vsel %vm2744_vm12, %v2746_v38, %v2742_v63  ;;  %3024 = vmatpush.bf16.msra.mxu3 %v5769_v20  ;;  %3037 = vmatpush.bf16.msrb.mxu0 %v6026_v60  ;;  %v2766_v20 = vor.u32 1.1754944e-38, %v2765_v28 }
 0x44e   : > { %v2769_v43 = vmul.f32 %v2747_v39, %v2676_v45 }
 0x44f   : > { %v2767_v60 = vsel %vm2764_vm15, %v2766_v20, %v2762_v27 }
 0x450   : > { %v2770_v56 = vadd.f32 %v2769_v43, %v7171_v57  ;;  %3008 = vmatpush.bf16.msra.mxu2 %v5823_v42  ;;  %v2772_v10 = vsub.f32 1.0, %v2767_v60 }
 0x451   : > { %3025 = vmatpush.bf16.msra.mxu3 %v5804_v36  ;;  %3038 = vmatpush.bf16.msrb.mxu0 %v6055_v9  ;;  %v2777_v36 = vmul.f32 %v2775_v2, %v2767_v60 }
 0x452   : > { %4848 = vtanh.f32 %v2770_v56 }
 0x454   : > { %3009 = vmatpush.bf16.msra.mxu2 %v5859_v53 }
 0x455   : > { %3026 = vmatpush.bf16.msra.mxu3 %v5841_v47  ;;  %3039 = vmatpush.bf16.msrb.mxu0 %v6078_v22 }
 0x458   : > { %v4849_v16 = vpop.eup %4848  ;;  %3010 = vmatpush.bf16.msra.mxu2 %v5895_v1 }
 0x459   : > { %v2773_v42 = vmul.f32 %v4849_v16, %v2772_v10  ;;  %3027 = vmatpush.bf16.msra.mxu3 %v5877_v59  ;;  %3040 = vmatpush.bf16.msrb.mxu0 %v6099_v37 }
 0x45b   : > { %v6718_v9 = vadd.f32 %v2777_v36, %v2773_v42 }
 0x45c   : > { %3011 = vmatpush.bf16.msra.mxu2 %v5931_v13 }
 0x45d   : > { %v2819_v47 = vpack.c.bf16 %v6718_v9, %v6718_v9  ;;  %3028 = vmatpush.bf16.msra.mxu3 %v5913_v7  ;;  %3041 = vmatpush.bf16.msrb.mxu0 %v6119_v46 }
 0x45f   : > { %2828 = vmatmul.bf16.vlgmr.msrb.gmra.mxu1 %v2819_v47  ;;  %2841 = vmatmul.bf16.vlgmr.msrb.gmra.mxu2 %v2819_v47 }
 0x460   : > { %2854 = vmatmul.bf16.vlgmr.msrb.gmra.mxu3 %v2819_v47  ;;  %3050 = vmatpush.bf16.msrb.mxu1 %v6040_v4 }
 0x461   : > { %3012 = vmatpush.bf16.msra.mxu2 %v5970_v32  ;;  %3029 = vmatpush.bf16.msra.mxu3 %v5949_v21 }
 0x462   : > { %3042 = vmatpush.bf16.msrb.mxu0 %v6139_v62 }
 0x464   : > { %3051 = vmatpush.bf16.msrb.mxu1 %v6064_v12 }
 0x465   : > { %3013 = vmatpush.bf16.msra.mxu2 %v6015_v52  ;;  %3030 = vmatpush.bf16.msra.mxu3 %v5988_v40 }
 0x466   : > { %3043 = vmatpush.bf16.msrb.mxu0 %v6159_v11 }
 0x468   : > { %3052 = vmatpush.bf16.msrb.mxu1 %v6088_v25 }
 0x469   : > { %3014 = vmatpush.bf16.msra.mxu2 %v6051_v8  ;;  %3031 = vmatpush.bf16.msra.mxu3 %v6024_v58 }
 0x46a   : > { %3044 = vmatpush.bf16.msrb.mxu0 %v6179_v30 }
 0x46c   : > { %3053 = vmatpush.bf16.msrb.mxu1 %v6109_v41  ;;  %v7172_v41 = vld [vmem:[#allocation38_spill] sm:$0xff] }
 0x470   : > { %3054 = vmatpush.bf16.msrb.mxu1 %v7120_v6 }
 0x474   : > { %3055 = vmatpush.bf16.msrb.mxu1 %v7142_v33 }
 0x478   : > { %3056 = vmatpush.bf16.msrb.mxu1 %v7145_v19 }
 0x47c   : > { %3057 = vmatpush.bf16.msrb.mxu1 %v7148_v15  ;;  %v7174_v15 = vld [vmem:[#allocation41_spill] sm:$0xff] }
 0x4c9   : > { %v2815_v53 = vpop.f32.mrf.mxu0 }
 0x4ca   : > { %v2816_v39 = vadd.f32 %v2815_v53, %v7168_v23 }
 0x4cc   : > { %v2906_v42 = vrot.slane %v2816_v39, 6 }
 0x4ce   : > { %v2789_v59 = vpop.f32.mrf.mxu2  ;;  %v2802_v1 = vpop.f32.mrf.mxu3 }
 0x4cf   : > { %v2790_v7 = vadd.f32 %v2789_v59, %v7162_v49  ;;  %v2803_v13 = vadd.f32 %v2802_v1, %v7163_v24 }
 0x4d1   : > { %v2860_v21 = vrot.slane %v2790_v7, 6  ;;  %v2883_v32 = vrot.slane %v2803_v13, 6  ;;  %v2817_v40 = vpop.f32.mrf.mxu0 }
 0x4d3   : > { %v2862_v52 = vadd.f32 %v2860_v21, %v6668_v31  ;;  %v2885_v58 = vadd.f32 %v2883_v32, %v6672_v34 }
 0x4d5   : > { %v4446_v4 = vmul.f32 -1.442695, %v2862_v52  ;;  %v4447_v8 = vmul.f32 -1.442695, %v2885_v58 }
 0x4d6   : > { %v2791_v12 = vpop.f32.mrf.mxu2  ;;  %v2804_v22 = vpop.f32.mrf.mxu3 }
 0x4d7   : > { %4850 = vpow2.f32 %v4446_v4  ;;  %v2914_v22 = vrot.slane %v6695_v3, 6 }
 0x4d8   : > { %4852 = vpow2.f32 %v4447_v8 }
 0x4dc   : > { %v2829_v25 = vpop.f32.mrf.mxu1 }
 0x4dd   : > { %v4851_v37 = vpop.eup %4850  ;;  %v2830_v46 = vadd.f32 %v2829_v25, %v7172_v41 }
 0x4de   : > { %v4853_v62 = vpop.eup %4852  ;;  %v2866_v11 = vadd.f32 1.0, %v4851_v37 }
 0x4df   : > { %v2889_v30 = vadd.f32 1.0, %v4853_v62  ;;  %v2919_v6 = vrot.slane %v2830_v46, 6 }
 0x4e0   : > { %4854 = vrcp.f32 %v2866_v11  ;;  %v2878_v61 = vand.u32 2147483648, %v2866_v11  ;;  %v2876_v56 = vand.u32 2147483647, %v2866_v11  ;;  %vm2872_vm4 = vweird.f32 %v2866_v11 }
 0x4e1   : > { %4856 = vrcp.f32 %v2889_v30  ;;  %v2921_v33 = vadd.f32 %v2919_v6, %v7173_v26  ;;  %v2901_v7 = vand.u32 2147483648, %v2889_v30  ;;  %vm2895_vm8 = vweird.f32 %v2889_v30 }
 0x4e2   : > { %v2842_v19 = vpop.f32.mrf.mxu2  ;;  %v2879_v16 = vor.u32 1.1754944e-38, %v2878_v61  ;;  %vm2877_vm6 = vcmp.eq.f32.partialorder %v2876_v56, 8.507059e+37  ;;  %v2899_v13 = vand.u32 2147483647, %v2889_v30 }
 0x4e3   : > { %v2843_v54 = vadd.f32 %v2842_v19, %v7174_v15  ;;  %v2855_v5 = vpop.f32.mrf.mxu3  ;;  %v4448_v14 = vmul.f32 -1.442695, %v2921_v33  ;;  %v2902_v58 = vor.u32 1.1754944e-38, %v2901_v7 }
 0x4e4   : > { %v2831_v55 = vpop.f32.mrf.mxu1  ;;  %vm2900_vm10 = vcmp.eq.f32.partialorder %v2899_v13, 8.507059e+37  ;;  %v2856_v25 = vadd.f32 %v2855_v5, %v7119_v17 }
 0x4e5   : > { %v2942_v29 = vrot.slane %v2843_v54, 6  ;;  %4858 = vpow2.f32 %v4448_v14 }
 0x4e6   : > { %v4855_v48 = vpop.eup %4854 }
 0x4e7   : > { %v4857_v50 = vpop.eup %4856  ;;  %v2868_v18 = vmul.f32 %v4855_v48, %v2866_v11  ;;  %v2944_v0 = vadd.f32 %v2942_v29, %v7175_v35  ;;  %vm2873_vm3 = vweird.f32 %v4855_v48 }
 0x4e8   : > { %v2891_v38 = vmul.f32 %v4857_v50, %v2889_v30  ;;  %vm2874_vm5 = vmor %vm2872_vm4, %vm2873_vm3  ;;  %vm2896_vm7 = vweird.f32 %v4857_v50 }
 0x4e9   : > { %v2869_v45 = vsub.f32 1.0, %v2868_v18  ;;  %v4449_v63 = vmul.f32 -1.442695, %v2944_v0  ;;  %vm2897_vm9 = vmor %vm2895_vm8, %vm2896_vm7 }
 0x4ea   : > { %v2892_v28 = vsub.f32 1.0, %v2891_v38  ;;  %v2844_v43 = vpop.f32.mrf.mxu2 }
 0x4eb   : > { %v2870_v51 = vmul.f32 %v4855_v48, %v2869_v45  ;;  %4860 = vpow2.f32 %v4449_v63  ;;  %v2857_v27 = vpop.f32.mrf.mxu3  ;;  %v4859_v20 = vpop.eup %4858 }
 0x4ec   : > { %v2893_v60 = vmul.f32 %v4857_v50, %v2892_v28  ;;  %v2925_v2 = vadd.f32 1.0, %v4859_v20  ;;  %v2973_v20 = vrot.slane %v6718_v9, 6 }
 0x4ed   : > { %v2871_v10 = vadd.f32 %v4855_v48, %v2870_v51 }
 0x4ee   : > { %4862 = vrcp.f32 %v2925_v2  ;;  %v2894_v53 = vadd.f32 %v4857_v50, %v2893_v60  ;;  %v2937_v37 = vand.u32 2147483648, %v2925_v2  ;;  %v2935_v11 = vand.u32 2147483647, %v2925_v2 }
 0x4ef   : > { %v2875_v36 = vsel %vm2874_vm5, %v4855_v48, %v2871_v10  ;;  %vm2931_vm12 = vweird.f32 %v2925_v2 }
 0x4f0   : > { %v2880_v47 = vsel %vm2877_vm6, %v2879_v16, %v2875_v36  ;;  %v2898_v40 = vsel %vm2897_vm9, %v4857_v50, %v2894_v53  ;;  %v2938_v29 = vor.u32 1.1754944e-38, %v2937_v37  ;;  %vm2936_vm14 = vcmp.eq.f32.partialorder %v2935_v11, 8.507059e+37 }
 0x4f1   : > { %v4861_v59 = vpop.eup %4860  ;;  %v2908_v1 = vmul.f32 %v2906_v42, %v2880_v47  ;;  %v2903_v8 = vsel %vm2900_vm10, %v2902_v58, %v2898_v40  ;;  %v2965_v50 = vrot.slane %v2856_v25, 6 }
 0x4f2   : > { %v2948_v21 = vadd.f32 1.0, %v4861_v59  ;;  %v2911_v30 = vsub.f32 1.0, %v2903_v8  ;;  %v2916_v14 = vmul.f32 %v2914_v22, %v2903_v8 }
 0x4f3   : > { %v2909_v32 = vadd.f32 %v2908_v1, %v6689_v44 }
 0x4f4   : > { %4864 = vrcp.f32 %v2948_v21  ;;  %v4863_v52 = vpop.eup %4862  ;;  %v2960_v38 = vand.u32 2147483648, %v2948_v21  ;;  %vm2954_vm15 = vweird.f32 %v2948_v21  ;;  %v2958_v61 = vand.u32 2147483647, %v2948_v21 }
 0x4f5   : > { %4866 = vtanh.f32 %v2909_v32  ;;  %v2927_v4 = vmul.f32 %v4863_v52, %v2925_v2  ;;  %vm2932_vm11 = vweird.f32 %v4863_v52 }
 0x4f6   : > { %vm2933_vm13 = vmor %vm2931_vm12, %vm2932_vm11  ;;  %v2961_v56 = vor.u32 1.1754944e-38, %v2960_v38  ;;  %vm2959_vm4 = vcmp.eq.f32.partialorder %v2958_v61, 8.507059e+37 }
 0x4f7   : > { %v2928_v12 = vsub.f32 1.0, %v2927_v4 }
 0x4f9   : > { %v2929_v62 = vmul.f32 %v4863_v52, %v2928_v12 }
 0x4fa   : > { %v4865_v46 = vpop.eup %4864 }
 0x4fb   : > { %v4867_v6 = vpop.eup %4866  ;;  %v2950_v33 = vmul.f32 %v4865_v46, %v2948_v21  ;;  %v2930_v19 = vadd.f32 %v4863_v52, %v2929_v62  ;;  %vm2955_vm2 = vweird.f32 %v4865_v46 }
 0x4fc   : > { %v2912_v54 = vmul.f32 %v4867_v6, %v2911_v30  ;;  %vm2956_vm3 = vmor %vm2954_vm15, %vm2955_vm2 }
 0x4fd   : > { %v2951_v55 = vsub.f32 1.0, %v2950_v33  ;;  %v2934_v48 = vsel %vm2933_vm13, %v4863_v52, %v2930_v19  ;;  %vm3190_vm13 = vcmask 7168  }
 0x4fe   : > { %v6754_v18 = vadd.f32 %v2916_v14, %v2912_v54  ;;  %v2939_v0 = vsel %vm2936_vm14, %v2938_v29, %v2934_v48  ;;  %vm3192_vm14 = vcmask 5120  }
 0x4ff   : > { %v2952_v5 = vmul.f32 %v4865_v46, %v2951_v55  ;;  %v2967_v45 = vmul.f32 %v2965_v50, %v2939_v0 }
 0x500   : > { %v2977_v63 = vpack.c.bf16 %v6754_v18, %v6754_v18 }
 0x501   : > { %v2953_v39 = vadd.f32 %v4865_v46, %v2952_v5  ;;  %v2968_v28 = vadd.f32 %v2967_v45, %v7171_v57 }
 0x502   : > { %v2979_v43 = vrot.slane %v2977_v63, 1 }
 0x503   : > { %v2957_v51 = vsel %vm2956_vm3, %v4865_v46, %v2953_v39  ;;  %4868 = vtanh.f32 %v2968_v28 }
 0x504   : > { %2989 = vmatmul.bf16.vlgmr.msra.gmra.mxu0 %v2979_v43  ;;  %3002 = vmatmul.bf16.vlgmr.msra.gmra.mxu1 %v2979_v43  ;;  %v2962_v27 = vsel %vm2959_vm4, %v2961_v56, %v2957_v51 }
 0x505   : > { %3015 = vmatmul.bf16.vlgmr.msra.gmra.mxu2 %v2979_v43  ;;  %v2970_v60 = vsub.f32 1.0, %v2962_v27  ;;  %v2975_v16 = vmul.f32 %v2973_v20, %v2962_v27 }
 0x509   : > { %v4869_v10 = vpop.eup %4868 }
 0x50a   : > { %v2971_v2 = vmul.f32 %v4869_v10, %v2970_v60 }
 0x50c   : > { %v6760_v42 = vadd.f32 %v2975_v16, %v2971_v2 }
 0x50e   : > { %v3020_v36 = vpack.c.bf16 %v6760_v42, %v6760_v42 }
 0x510   : > { %v3022_v47 = vrot.slane %v3020_v36, 1 }
 0x512   : > { %3032 = vmatmul.bf16.vlgmr.msra.gmra.mxu3 %v3022_v47 }
 0x514   : > { %3045 = vmatmul.bf16.vlgmr.msrb.gmra.mxu0 %v3022_v47  ;;  %3058 = vmatmul.bf16.vlgmr.msrb.gmra.mxu1 %v3022_v47 }
 0x581   : > { %v2990_v53 = vpop.f32.mrf.mxu0  ;;  %v3003_v59 = vpop.f32.mrf.mxu1 }
 0x582   : > { %v2991_v1 = vadd.f32 %v2990_v53, %v7162_v49  ;;  %v3004_v7 = vadd.f32 %v3003_v59, %v7163_v24 }
 0x584   : > { %v3064_v13 = vrot.slane %v2991_v1, 4  ;;  %v3087_v21 = vrot.slane %v3004_v7, 4 }
 0x586   : > { %v3066_v32 = vadd.f32 %v3064_v13, %v6668_v31  ;;  %v3089_v40 = vadd.f32 %v3087_v21, %v6672_v34  ;;  %v3118_v21 = vrot.slane %v6754_v18, 6 }
 0x588   : > { %v4450_v52 = vmul.f32 -1.442695, %v3066_v32  ;;  %v4451_v58 = vmul.f32 -1.442695, %v3089_v40  ;;  %v3016_v4 = vpop.f32.mrf.mxu2  ;;  %v4949_v40 = vmov -inf  }
 0x589   : > { %v2992_v8 = vpop.f32.mrf.mxu0  ;;  %v3005_v12 = vpop.f32.mrf.mxu1  ;;  %v3017_v63 = vadd.f32 %v3016_v4, %v7168_v23  ;;  %3191 = vst.msk [vmem:[#allocation3] sm:$0xff] %vm3190_vm13, %v4949_v40 }
 0x58a   : > { %4870 = vpow2.f32 %v4450_v52  ;;  %3193 = vst.msk [vmem:[#allocation3 + $0x8] sm:$0x3f] %vm3192_vm14, %v4949_v40  ;;  %v4950_v8 = vmov 0.0  }
 0x58b   : > { %4872 = vpow2.f32 %v4451_v58  ;;  %3194 = vst.msk [vmem:[#allocation4] sm:$0xff] %vm3190_vm13, %v4950_v8 }
 0x58c   : > { %3195 = vst.msk [vmem:[#allocation4 + $0x8] sm:$0x3f] %vm3192_vm14, %v4950_v8 }
 0x58d   : > { %3196 = vst.msk [vmem:[#allocation5] sm:$0xff] %vm3190_vm13, %v4950_v8 }
 0x58e   : > { %3197 = vst.msk [vmem:[#allocation5 + $0x8] sm:$0x3f] %vm3192_vm14, %v4950_v8 }
 0x58f   : > { %3209 = vst.msk [vmem:[#allocation3 + $0x10] sm:$0xff] %vm3190_vm13, %v4949_v40 }
 0x590   : > { %v4871_v22 = vpop.eup %4870  ;;  %v3018_v25 = vpop.f32.mrf.mxu2  ;;  %3210 = vst.msk [vmem:[#allocation3 + $0x18] sm:$0x3f] %vm3192_vm14, %v4949_v40 }
 0x591   : > { %v4873_v37 = vpop.eup %4872  ;;  %v3070_v46 = vadd.f32 1.0, %v4871_v22  ;;  %v3046_v49 = vpop.f32.mrf.mxu0  ;;  %3212 = vst.msk [vmem:[#allocation4 + $0x10] sm:$0xff] %vm3190_vm13, %v4950_v8 }
 0x592   : > { %v6768_v62 = vpop.f32.mrf.mxu1  ;;  %v3093_v24 = vadd.f32 1.0, %v4873_v37  ;;  %v3047_v11 = vadd.f32 %v3046_v49, %v7174_v15  ;;  %v3184_v37 = vsel %vm838_vm0, %v6695_v3, %v6754_v18  ;;  %3213 = vst.msk [vmem:[#allocation4 + $0x18] sm:$0x3f] %vm3192_vm14, %v4950_v8 }
 0x593   : > { %4874 = vrcp.f32 %v3070_v46  ;;  %v3082_v38 = vand.u32 2147483648, %v3070_v46  ;;  %vm3076_vm6 = vweird.f32 %v3070_v46  ;;  %3215 = vst.msk [vmem:[#allocation5 + $0x10] sm:$0xff] %vm3190_vm13, %v4950_v8 }
 0x594   : > { %4876 = vrcp.f32 %v3093_v24  ;;  %v3146_v31 = vrot.slane %v3047_v11, 4  ;;  %v3105_v23 = vand.u32 2147483648, %v3093_v24  ;;  %vm3099_vm10 = vweird.f32 %v3093_v24  ;;  %3216 = vst.msk [vmem:[#allocation5 + $0x18] sm:$0x3f] %vm3192_vm14, %v4950_v8 }
 0x595   : > { %v3033_v34 = vpop.f32.mrf.mxu3  ;;  %v3083_v51 = vor.u32 1.1754944e-38, %v3082_v38  ;;  %v3103_v16 = vand.u32 2147483647, %v3093_v24 }
 0x596   : > { %v3148_v30 = vadd.f32 %v3146_v31, %v7175_v35  ;;  %v3034_v6 = vadd.f32 %v3033_v34, %v7172_v41  ;;  %v3080_v41 = vand.u32 2147483647, %v3070_v46  ;;  %v3106_v59 = vor.u32 1.1754944e-38, %v3105_v23 }
 0x597   : > { %vm3104_vm12 = vcmp.eq.f32.partialorder %v3103_v16, 8.507059e+37 }
 0x598   : > { %v4453_v19 = vmul.f32 -1.442695, %v3148_v30  ;;  %v3123_v54 = vrot.slane %v3034_v6, 4  ;;  %vm3081_vm8 = vcmp.eq.f32.partialorder %v3080_v41, 8.507059e+37  ;;  %v3201_v41 = vsel %vm838_vm0, %v6718_v9, %v6760_v42 }
 0x599   : > { %v4875_v33 = vpop.eup %4874  ;;  %v3048_v14 = vpop.f32.mrf.mxu0 }
 0x59a   : > { %v3061_v55 = vpop.f32.mrf.mxu1  ;;  %v4877_v29 = vpop.eup %4876  ;;  %v3072_v48 = vmul.f32 %v4875_v33, %v3070_v46  ;;  %4878 = vpow2.f32 %v4453_v19  ;;  %v3125_v5 = vadd.f32 %v3123_v54, %v7173_v26  ;;  %vm3077_vm5 = vweird.f32 %v4875_v33 }
 0x59b   : > { %v3095_v50 = vmul.f32 %v4877_v29, %v3093_v24  ;;  %vm3078_vm7 = vmor %vm3076_vm6, %vm3077_vm5  ;;  %v3110_v26 = vrot.slane %v3017_v63, 4  ;;  %vm3100_vm9 = vweird.f32 %v4877_v29  ;;  %v3060_v24 = vadd.f32 %v6768_v62, %v7119_v17 }
 0x59c   : > { %v3073_v15 = vsub.f32 1.0, %v3072_v48  ;;  %v4452_v45 = vmul.f32 -1.442695, %v3125_v5  ;;  %vm3101_vm11 = vmor %vm3099_vm10, %vm3100_vm9 }
 0x59d   : > { %v3096_v0 = vsub.f32 1.0, %v3095_v50  ;;  %v3035_v39 = vpop.f32.mrf.mxu3  ;;  %v3169_v17 = vrot.slane %v3060_v24, 4 }
 0x59e   : > { %v3074_v35 = vmul.f32 %v4875_v33, %v3073_v15  ;;  %4880 = vpow2.f32 %v4452_v45  ;;  %v3177_v15 = vrot.slane %v6760_v42, 6 }
 0x59f   : > { %v3097_v61 = vmul.f32 %v4877_v29, %v3096_v0 }
 0x5a0   : > { %v3075_v28 = vadd.f32 %v4875_v33, %v3074_v35  ;;  %v4879_v43 = vpop.eup %4878 }
 0x5a1   : > { %v6775_v27 = vadd.f32 1.0, %v4879_v43  ;;  %v3098_v60 = vadd.f32 %v4877_v29, %v3097_v61 }
 0x5a2   : > { %v3079_v56 = vsel %vm3078_vm7, %v4875_v33, %v3075_v28 }
 0x5a3   : > { %v3084_v20 = vsel %vm3081_vm8, %v3083_v51, %v3079_v56  ;;  %4882 = vrcp.f32 %v6775_v27  ;;  %v3102_v53 = vsel %vm3101_vm11, %v4877_v29, %v3098_v60  ;;  %v3164_v54 = vand.u32 2147483648, %v6775_v27 }
 0x5a4   : > { %v3112_v10 = vmul.f32 %v3110_v26, %v3084_v20  ;;  %v4881_v2 = vpop.eup %4880  ;;  %v3107_v7 = vsel %vm3104_vm12, %v3106_v59, %v3102_v53  ;;  %vm3158_vm6 = vweird.f32 %v6775_v27  ;;  %v3162_v55 = vand.u32 2147483647, %v6775_v27 }
 0x5a5   : > { %v3129_v47 = vadd.f32 1.0, %v4881_v2  ;;  %v3115_v13 = vsub.f32 1.0, %v3107_v7  ;;  %v3120_v4 = vmul.f32 %v3118_v21, %v3107_v7  ;;  %v3165_v50 = vor.u32 1.1754944e-38, %v3164_v54 }
 0x5a6   : > { %v3113_v36 = vadd.f32 %v3112_v10, %v6689_v44  ;;  %vm3163_vm8 = vcmp.eq.f32.partialorder %v3162_v55, 8.507059e+37 }
 0x5a7   : > { %v3141_v11 = vand.u32 2147483648, %v3129_v47  ;;  %v3139_v30 = vand.u32 2147483647, %v3129_v47  ;;  %vm3135_vm15 = vweird.f32 %v3129_v47 }
 0x5a8   : > { %4884 = vtanh.f32 %v3113_v36 }
 0x5a9   : > { %4886 = vrcp.f32 %v3129_v47  ;;  %v4883_v1 = vpop.eup %4882  ;;  %v3142_v18 = vor.u32 1.1754944e-38, %v3141_v11  ;;  %vm3140_vm4 = vcmp.eq.f32.partialorder %v3139_v30, 8.507059e+37 }
 0x5aa   : > { %v3154_v32 = vmul.f32 %v4883_v1, %v6775_v27  ;;  %vm3159_vm5 = vweird.f32 %v4883_v1 }
 0x5ab   : > { %vm3160_vm7 = vmor %vm3158_vm6, %vm3159_vm5 }
 0x5ac   : > { %v3155_v25 = vsub.f32 1.0, %v3154_v32 }
 0x5ae   : > { %v4885_v52 = vpop.eup %4884  ;;  %v3156_v6 = vmul.f32 %v4883_v1, %v3155_v25 }
 0x5af   : > { %v4887_v44 = vpop.eup %4886  ;;  %v3116_v58 = vmul.f32 %v4885_v52, %v3115_v13 }
 0x5b0   : > { %v3131_v12 = vmul.f32 %v4887_v44, %v3129_v47  ;;  %vm3136_vm2 = vweird.f32 %v4887_v44  ;;  %v3157_v33 = vadd.f32 %v4883_v1, %v3156_v6 }
 0x5b1   : > { %v3121_v22 = vadd.f32 %v3120_v4, %v3116_v58  ;;  %vm3137_vm3 = vmor %vm3135_vm15, %vm3136_vm2 }
 0x5b2   : > { %v3132_v46 = vsub.f32 1.0, %v3131_v12  ;;  %v3161_v48 = vsel %vm3160_vm7, %v4883_v1, %v3157_v33 }
 0x5b3   : > { %v3185_v49 = vsel %vm842_vm1, %v3184_v37, %v3121_v22  ;;  %v3166_v5 = vsel %vm3163_vm8, %v3165_v50, %v3161_v48 }
 0x5b4   : > { %v3187_v31 = vpack.c.bf16 %v3185_v49, %v3185_v49  ;;  %v3133_v34 = vmul.f32 %v4887_v44, %v3132_v46  ;;  %v3174_v0 = vsub.f32 1.0, %v3166_v5  ;;  %v3179_v45 = vmul.f32 %v3177_v15, %v3166_v5 }
 0x5b6   : > { %3189 = vst [vmem:[#allocation2 + $0x4] sm:$0x7] %v3187_v31  ;;  %v3134_v3 = vadd.f32 %v4887_v44, %v3133_v34 }
 0x5b8   : > { %v3138_v62 = vsel %vm3137_vm3, %v4887_v44, %v3134_v3 }
 0x5b9   : > { %v3143_v19 = vsel %vm3140_vm4, %v3142_v18, %v3138_v62 }
 0x5ba   : > { %v3171_v14 = vmul.f32 %v3169_v17, %v3143_v19 }
 0x5bc   : > { %v3172_v29 = vadd.f32 %v3171_v14, %v7171_v57 }
 0x5be   : > { %4888 = vtanh.f32 %v3172_v29 }
 0x5c4   : > { %v4889_v38 = vpop.eup %4888 }
 0x5c5   : > { %v3175_v63 = vmul.f32 %v4889_v38, %v3174_v0 }
 0x5c7   : > { %v3180_v35 = vadd.f32 %v3179_v45, %v3175_v63 }
 0x5c9   : > { %v3202_v39 = vsel %vm842_vm1, %v3201_v41, %v3180_v35 }
 0x5ca   : > { %v3204_v61 = vpack.c.bf16 %v3202_v39, %v3202_v39 }
 0x5cc   : > { %3207 = vst [vmem:[#allocation2 + $0xc] sm:$0x7] %v3204_v61 }
 0x5cd PF: > { %v4710_v57 = vld [vmem:[%s5131_s24 + $0x38] sm:$0xff]  ;;  %v4709_v43 = vld [vmem:[%s5131_s24 + $0x30] sm:$0xff]  ;;  %v4951_v9 = vmov 0   ;;  %v4708_v42 = vld [vmem:[%s5131_s24 + $0x28] sm:$0xff]  ;;  %v3310_v52 = vlaneseq  ;;  %s4454_s26 = sshll.u32 %s5025_s16, 7  ;;  %vm3328_vm1 = vcmask 1045504  }
 0x5ce   : > { %v4719_v28 = vld [vmem:[%s5131_s24 + $0x78] sm:$0xff]  ;;  %3294 = vmatpush.bf16.msra.mxu0 %v4710_v57  ;;  %v4718_v51 = vld [vmem:[%s5131_s24 + $0x70] sm:$0xff]  ;;  %4890 = vset.pattern.permute.xlu0 %v4951_v9  ;;  %v4717_v56 = vld [vmem:[%s5131_s24 + $0x68] sm:$0xff]  ;;  %v3312_v58 = vstv %s4454_s26  ;;  %vm3334_vm10 = vcmask 7168   ;;  %vm3336_vm11 = vcmask 5120   ;;  %p4546_p9 = scmp.ne.s32.totalorder %s5025_s16, 1 }
 0x5cf   : > { %3463 = vmatpush.bf16.msra.mxu1 %v4719_v28  ;;  %4891 = vset.pattern.permute.xlu2 %v4951_v9  ;;  %v3308_v26 = vld [vmem:[%s6971_s9] sm:$0xff]  ;;  %v4707_v27 = vld [vmem:[%s5131_s24 + $0x20] sm:$0xff]  ;;  %v3309_v60 = vld [vmem:[%s6971_s9 + $0x8] sm:$0x3f]  ;;  %v3311_v44 = vand.u32 127, %v3310_v52 }
 0x5d0   : > { %4892 = vset.pattern.permute.xlu1 %v4951_v9  ;;  %3315 = vperm.xlu0 %4890, %v3308_v26   ;;  %v4716_v20 = vld [vmem:[%s5131_s24 + $0x60] sm:$0xff]  ;;  %v4706_v23 = vld [vmem:[%s5131_s24 + $0x18] sm:$0xff]  ;;  %v4705_v2 = vld [vmem:[%s5131_s24 + $0x10] sm:$0xff] }
 0x5d1   : > { %v4715_v10 = vld [vmem:[%s5131_s24 + $0x58] sm:$0xff]  ;;  %v4714_v16 = vld [vmem:[%s5131_s24 + $0x50] sm:$0xff]  ;;  %v4704_v36 = vld [vmem:[%s5131_s24 + $0x8] sm:$0xff]  ;;  %v6831_v4 = vadd.s32 %v3312_v58, %v3311_v44 }
 0x5d2   : > { %3295 = vmatpush.bf16.msra.mxu0 %v4709_v43  ;;  %v4713_v47 = vld [vmem:[%s5131_s24 + $0x48] sm:$0xff]  ;;  %v4703_v53 = vld [vmem:[%s5131_s24] sm:$0xff]  ;;  %v4457_v1 = vld [vmem:[#allocation2] sm:$0xf] }
 0x5d3   : > { %3464 = vmatpush.bf16.msra.mxu1 %v4718_v51  ;;  %v4712_v59 = vld [vmem:[%s5131_s24 + $0x40] sm:$0xff]  ;;  %v4702_v7 = vld [vmem:[#allocation2] sm:$0x70]  ;;  %v4510_v13 = vld [vmem:[#allocation2 + $0x8] sm:$0xf] }
 0x5d4   : > { %v4711_v21 = vld [vmem:[#allocation2 + $0x8] sm:$0x70]  ;;  %v4458_v32 = vor.u32 %v4702_v7, %v4457_v1  ;;  %v4893_v8 = vld [vmem:[%s536_s25] ss:$0 sm:$0xff]  ;;  %v4894_v22 = vld [vmem:[%s536_s25 + $0x1] ss:$0 sm:$0xff] }
 0x5d5   : > { %v4511_v40 = vor.u32 %v4711_v21, %v4510_v13  ;;  %v6852_v33 = vld [vmem:[#allocation3] sm:$0xff]  ;;  %v6854_v19 = vld [vmem:[#allocation3 + $0x10] sm:$0xff]  ;;  %v6872_v38 = vld [vmem:[#allocation3 + $0x18] sm:$0x3f] }
 0x5d6   : > { %3296 = vmatpush.bf16.msra.mxu0 %v4708_v42  ;;  %v3322_v54 = vld [vmem:[#allocation5] sm:$0xff]  ;;  %v6874_v45 = vld [vmem:[#allocation3 + $0x8] sm:$0x3f] }
 0x5d7   : > { %3465 = vmatpush.bf16.msra.mxu1 %v4717_v56  ;;  %v3323_v28 = vld [vmem:[#allocation5 + $0x8] sm:$0x3f]  ;;  %v4544_v42 = vld [vmem:[%s6971_s9 + $0x10] sm:$0xff] }
 0x5d8   : > { %3318 = vperm.xlu0 %4890, %v3309_v60   ;;  %v4545_v51 = vld [vmem:[%s6971_s9 + $0x18] sm:$0x3f] }
 0x5da   : > { %3297 = vmatpush.bf16.msra.mxu0 %v4707_v27 }
 0x5db   : > { %3466 = vmatpush.bf16.msra.mxu1 %v4716_v20 }
 0x5de   : > { %3298 = vmatpush.bf16.msra.mxu0 %v4706_v23 }
 0x5df   : > { %3467 = vmatpush.bf16.msra.mxu1 %v4715_v10 }
 0x5e2   : > { %3299 = vmatpush.bf16.msra.mxu0 %v4705_v2 }
 0x5e3   : > { %3468 = vmatpush.bf16.msra.mxu1 %v4714_v16 }
 0x5e6   : > { %3300 = vmatpush.bf16.msra.mxu0 %v4704_v36 }
 0x5e7   : > { %3469 = vmatpush.bf16.msra.mxu1 %v4713_v47 }
 0x5ea   : > { %3301 = vmatpush.bf16.msra.mxu0 %v4703_v53 }
 0x5eb   : > { %3470 = vmatpush.bf16.msra.mxu1 %v4712_v59 }
 0x5ed   : > { %3302 = vmatmul.bf16.vlgmr.msra.gmra.mxu0 %v4458_v32 }
 0x5ee   : > { %3471 = vmatmul.bf16.vlgmr.msra.gmra.mxu1 %v4511_v40 }
 0x642   : > { %v3316_v12 = vpop.permute.xlu0 %3315 }
 0x643   : > { %vm3320_vm0 = vcmp.eq.s32.totalorder %v6831_v4, %v3316_v12 }
 0x64a   : > { %v3319_v18 = vpop.permute.xlu0 %3318 }
 0x64b   : > { %vm3321_vm9 = vcmp.eq.s32.totalorder %v6831_v4, %v3319_v18 }
 0x66a   : > { %v3303_v25 = vpop.f32.mrf.mxu0 }
 0x66b   : > { %v3472_v37 = vpop.f32.mrf.mxu1  ;;  %v3304_v46 = vadd.f32 %v4893_v8, %v3303_v25 }
 0x66c   : > { %v6838_v49 = vadd.f32 %v4894_v22, %v3472_v37 }
 0x66d   : > { %3340 = vmax.xlane.f32.xlu2 %v3304_v46  ;;  %v3324_v24 = vsel %vm3320_vm0, %v3304_v46, 0.0 }
 0x66e   : > { %3505 = vmax.xlane.f32.xlu0 %v6838_v49  ;;  %3326 = vadd.xlane.f32.xlu1 %v3324_v24 }
 0x672   : > { %v3305_v11 = vpop.f32.mrf.mxu0 }
 0x673   : > { %v3474_v31 = vpop.f32.mrf.mxu1  ;;  %v6841_v34 = vadd.f32 %v4893_v8, %v3305_v11 }
 0x674   : > { %v6843_v30 = vadd.f32 %v4894_v22, %v3474_v31  ;;  %v3347_v22 = vld [vmem:[#allocation4] sm:$0xff] }
 0x675   : > { %v3342_v3 = vsel %vm3328_vm1, %v6841_v34, -inf  ;;  %v3325_v17 = vsel %vm3321_vm9, %v6841_v34, 0.0 }
 0x676   : > { %v3507_v6 = vsel %vm3328_vm1, %v6843_v30, -inf  ;;  %3343 = vmax.xlane.f32.xlu1 %v3342_v3  ;;  %v3329_v62 = vsel %vm3328_vm1, %v3325_v17, 0.0  ;;  %v3513_v17 = vld [vmem:[#allocation4 + $0x10] sm:$0xff] }
 0x677   : > { %3508 = vmax.xlane.f32.xlu2 %v3507_v6 }
 0x67e   : > { %3330 = vadd.xlane.f32.xlu1 %v3329_v62 }
 0x6e0   : > { %v3341_v14 = vpop.xlane.xlu2 %3340 }
 0x6e1   : > { %v3506_v55 = vpop.xlane.xlu0 %3505  ;;  %v6857_v29 = vmax.f32 %v6852_v33, %v3341_v14  ;;  %v3327_v48 = vpop.xlane.xlu1 %3326 }
 0x6e2   : > { %v6860_v50 = vmax.f32 %v6854_v19, %v3506_v55  ;;  %v3332_v5 = vadd.f32 %v3327_v48, %v3322_v54  ;;  %v3348_v55 = vld [vmem:[#allocation4 + $0x8] sm:$0x3f] }
 0x6e3   : > { %v3349_v15 = vsub.f32 %v6852_v33, %v6857_v29  ;;  %3382 = vst.msk [vmem:[#allocation3] sm:$0xff] %vm3334_vm10, %v6857_v29  ;;  %3359 = vperm.xlu2 %4891, %v6857_v29  }
 0x6e4   : > { %v3515_v0 = vsub.f32 %v6854_v19, %v6860_v50  ;;  %3335 = vst.msk [vmem:[#allocation5] sm:$0xff] %vm3334_vm10, %v3332_v5 }
 0x6e5   : > { %3548 = vst.msk [vmem:[#allocation3 + $0x10] sm:$0xff] %vm3334_vm10, %v6860_v50  ;;  %v3351_v8 = vmul.f32 1.442695, %v3349_v15  ;;  %v3514_v15 = vld [vmem:[#allocation4 + $0x18] sm:$0x3f] }
 0x6e6   : > { %v3517_v31 = vmul.f32 1.442695, %v3515_v0 }
 0x6e9   : > { %v3344_v35 = vpop.xlane.xlu1 %3343 }
 0x6ea   : > { %v3509_v63 = vpop.xlane.xlu2 %3508  ;;  %v6880_v39 = vmax.f32 %v6874_v45, %v3344_v35 }
 0x6eb   : > { %v6877_v41 = vmax.f32 %v6872_v38, %v3509_v63 }
 0x6ec   : > { %v3350_v57 = vsub.f32 %v6874_v45, %v6880_v39  ;;  %3364 = vperm.xlu1 %4892, %v6880_v39   ;;  %3383 = vst.msk [vmem:[#allocation3 + $0x8] sm:$0x3f] %vm3336_vm11, %v6880_v39 }
 0x6ed   : > { %v3516_v61 = vsub.f32 %v6872_v38, %v6877_v41  ;;  %3549 = vst.msk [vmem:[#allocation3 + $0x18] sm:$0x3f] %vm3336_vm11, %v6877_v41  ;;  %3530 = vperm.xlu2 %4891, %v6877_v41  }
 0x6ee   : > { %v3353_v3 = vmul.f32 1.442695, %v3350_v57 }
 0x6ef   : > { %v3519_v19 = vmul.f32 1.442695, %v3516_v61 }
 0x6f1   : > { %v3331_v43 = vpop.xlane.xlu1 %3330 }
 0x6f2   : > { %v3333_v9 = vadd.f32 %v3331_v43, %v3323_v28 }
 0x6f4   : > { %3337 = vst.msk [vmem:[#allocation5 + $0x8] sm:$0x3f] %vm3336_vm11, %v3333_v9  ;;  %3484 = vperm.xlu1 %4892, %v4545_v51  }
 0x6f5   : > { %3525 = vperm.xlu2 %4891, %v6860_v50  }
 0x6fd   : > { %3481 = vperm.xlu2 %4891, %v4544_v42  }
 0x73d   : > { %v3360_v56 = vpop.permute.xlu2 %3359 }
 0x73e   : > { %v3367_v26 = vsub.f32 %v3304_v46, %v3360_v56 }
 0x740   : > { %v3369_v27 = vmul.f32 1.442695, %v3367_v26 }
 0x742   : > { %4895 = vpow2.f32 %v3369_v27 }
 0x747   : > { %v3531_v20 = vpop.permute.xlu2 %3530 }
 0x748   : > { %v4896_v60 = vpop.eup %4895  ;;  %v3534_v21 = vsub.f32 %v6843_v30, %v3531_v20 }
 0x749   : > { %3373 = vadd.xlane.f32.xlu1 %v4896_v60 }
 0x74a   : > { %v3537_v40 = vmul.f32 1.442695, %v3534_v21 }
 0x74f   : > { %v3526_v23 = vpop.permute.xlu2 %3525 }
 0x750   : > { %v3533_v36 = vsub.f32 %v6838_v49, %v3526_v23 }
 0x752   : > { %v3535_v53 = vmul.f32 1.442695, %v3533_v36 }
 0x754   : > { %4897 = vpow2.f32 %v3535_v53 }
 0x757   : > { %v3482_v10 = vpop.permute.xlu2 %3481 }
 0x758   : > { %vm3486_vm12 = vcmp.eq.s32.totalorder %v6831_v4, %v3482_v10 }
 0x759   : > { %v3491_v2 = vsel %vm3486_vm12, %v6838_v49, 0.0  ;;  %v3489_v49 = vld [vmem:[#allocation5 + $0x10] sm:$0xff] }
 0x75a   : > { %3493 = vadd.xlane.f32.xlu2 %v3491_v2  ;;  %v4898_v32 = vpop.eup %4897 }
 0x75e   : > { %v3365_v16 = vpop.permute.xlu1 %3364 }
 0x75f   : > { %v3368_v59 = vsub.f32 %v6841_v34, %v3365_v16  ;;  %v3490_v34 = vld [vmem:[#allocation5 + $0x18] sm:$0x3f] }
 0x761   : > { %v3371_v13 = vmul.f32 1.442695, %v3368_v59 }
 0x763   : > { %4899 = vpow2.f32 %v3371_v13 }
 0x764   : > { %4901 = vpow2.f32 %v3537_v40 }
 0x765   : > { %4903 = vpow2.f32 %v3351_v8 }
 0x766   : > { %v3485_v47 = vpop.permute.xlu1 %3484  ;;  %4905 = vpow2.f32 %v3517_v31 }
 0x767   : > { %vm3487_vm13 = vcmp.eq.s32.totalorder %v6831_v4, %v3485_v47  ;;  %4907 = vpow2.f32 %v3353_v3 }
 0x768   : > { %v3492_v1 = vsel %vm3487_vm13, %v6843_v30, 0.0  ;;  %4909 = vpow2.f32 %v3519_v19 }
 0x769   : > { %v3495_v7 = vsel %vm3328_vm1, %v3492_v1, 0.0  ;;  %v4900_v52 = vpop.eup %4899 }
 0x76a   : > { %3496 = vadd.xlane.f32.xlu0 %v3495_v7  ;;  %v3375_v44 = vsel %vm3328_vm1, %v4900_v52, 0.0  ;;  %v4902_v58 = vpop.eup %4901 }
 0x76b   : > { %v3541_v4 = vsel %vm3328_vm1, %v4902_v58, 0.0  ;;  %v4904_v12 = vpop.eup %4903 }
 0x76c   : > { %v3355_v25 = vmul.f32 %v4904_v12, %v3347_v22  ;;  %v4906_v18 = vpop.eup %4905 }
 0x76d   : > { %v3521_v62 = vmul.f32 %v4906_v18, %v3513_v17  ;;  %v4908_v14 = vpop.eup %4907 }
 0x76e   : > { %v3356_v29 = vmul.f32 %v4908_v14, %v3348_v55  ;;  %v4910_v5 = vpop.eup %4909 }
 0x76f   : > { %v3522_v0 = vmul.f32 %v4910_v5, %v3514_v15 }
 0x772   : > { %3539 = vadd.xlane.f32.xlu0 %v4898_v32 }
 0x77a   : > { %3376 = vadd.xlane.f32.xlu0 %v3375_v44 }
 0x782   : > { %3542 = vadd.xlane.f32.xlu0 %v3541_v4 }
 0x7bc   : > { %v3374_v37 = vpop.xlane.xlu1 %3373 }
 0x7bd   : > { %v3378_v46 = vadd.f32 %v3374_v37, %v3355_v25 }
 0x7bf   : > { %3380 = vst.msk [vmem:[#allocation4] sm:$0xff] %vm3334_vm10, %v3378_v46 }
 0x7cd   : > { %v3494_v24 = vpop.xlane.xlu2 %3493 }
 0x7ce   : > { %v3498_v11 = vadd.f32 %v3494_v24, %v3489_v49 }
 0x7d0   : > { %3500 = vst.msk [vmem:[#allocation5 + $0x10] sm:$0xff] %vm3334_vm10, %v3498_v11 }
 0x7dd   : > { %v3497_v30 = vpop.xlane.xlu0 %3496 }
 0x7de   : > { %v3499_v6 = vadd.f32 %v3497_v30, %v3490_v34 }
 0x7e0   : > { %3501 = vst.msk [vmem:[#allocation5 + $0x18] sm:$0x3f] %vm3336_vm11, %v3499_v6 }
 0x7e5   : > { %v3540_v33 = vpop.xlane.xlu0 %3539 }
 0x7e6   : > { %v3544_v54 = vadd.f32 %v3540_v33, %v3521_v62 }
 0x7e8   : > { %3546 = vst.msk [vmem:[#allocation4 + $0x10] sm:$0xff] %vm3334_vm10, %v3544_v54 }
 0x7ed   : > { %v3377_v48 = vpop.xlane.xlu0 %3376 }
 0x7ee   : > { %v3379_v50 = vadd.f32 %v3377_v48, %v3356_v29 }
 0x7f0   : > { %3381 = vst.msk [vmem:[#allocation4 + $0x8] sm:$0x3f] %vm3336_vm11, %v3379_v50 }
 0x7f4   : > { %3553 = sbr.rel (%p4546_p9) target bundleno = 2203 (0x89b), region = 143 }
 0x7f5   : > { %v3543_v45 = vpop.xlane.xlu0 %3542 }
 0x7f6   : > { %v3545_v63 = vadd.f32 %v3543_v45, %v3522_v0 }
 0x7f8   : > { %3547 = vst.msk [vmem:[#allocation4 + $0x18] sm:$0x3f] %vm3336_vm11, %v3545_v63 }
 0x7f9   : > { %v3556_v38 = vld [vmem:[#allocation4] sm:$0xff]  ;;  %v4952_v35 = vmov 0   ;;  %v3557_v41 = vld [vmem:[#allocation4 + $0x8] sm:$0x3f]  ;;  %v3564_v39 = vld [vmem:[%s6971_s9] sm:$0xff]  ;;  %v4953_v57 = vmov 0.0  }
 0x7fa   : > { %4911 = vset.pattern.permute.xlu0 %v4952_v35  ;;  %4912 = vlog2.f32 %v3556_v38  ;;  %v3565_v61 = vld [vmem:[%s6971_s9 + $0x8] sm:$0x3f]  ;;  %vm3566_vm14 = vcmp.ne.s32.totalorder %v3564_v39, 0  ;;  %v3619_v51 = vld [vmem:[#allocation4 + $0x10] sm:$0xff]  ;;  %v4549_v9 = vld [vmem:[%s6971_s9 + $0x10] sm:$0xff] }
 0x7fb   : > { %4914 = vlog2.f32 %v3557_v41  ;;  %vm3567_vm2 = vcmp.ne.s32.totalorder %v3565_v61, 0  ;;  %v4547_v28 = vsel %vm3566_vm14, 1.0, %v4953_v57  ;;  %v4550_v27 = vld [vmem:[%s6971_s9 + $0x18] sm:$0x3f]  ;;  %vm3629_vm15 = vcmp.ne.s32.totalorder %v4549_v9, 0  ;;  %v3554_v2 = vld [vmem:[#allocation3] sm:$0xff] }
 0x7fc   : > { %v4548_v43 = vsel %vm3567_vm2, 1.0, %v4953_v57  ;;  %v3587_v42 = vsel %vm3334_vm10, %v4547_v28, 0.0  ;;  %4916 = vlog2.f32 %v3619_v51  ;;  %vm3630_vm3 = vcmp.ne.s32.totalorder %v4550_v27, 0  ;;  %v3555_v59 = vld [vmem:[#allocation3 + $0x8] sm:$0x3f]  ;;  %v3572_v21 = vld [vmem:[#allocation5] sm:$0xff] }
 0x7fd   : > { %v3588_v56 = vsel %vm3336_vm11, %v4548_v43, 0.0  ;;  %v4551_v60 = vsel %vm3629_vm15, 1.0, %v4953_v57  ;;  %v4552_v23 = vsel %vm3630_vm3, 1.0, %v4953_v57  ;;  %v3573_v44 = vld [vmem:[#allocation5 + $0x8] sm:$0x3f]  ;;  %v3617_v58 = vld [vmem:[#allocation3 + $0x10] sm:$0xff] }
 0x7fe   : > { %v3589_v20 = vadd.f32 %v3588_v56, %v3587_v42  ;;  %v3650_v36 = vsel %vm3334_vm10, %v4551_v60, 0.0  ;;  %v3651_v47 = vsel %vm3336_vm11, %v4552_v23, 0.0  ;;  %v3618_v25 = vld [vmem:[#allocation3 + $0x18] sm:$0x3f]  ;;  %v3635_v24 = vld [vmem:[#allocation5 + $0x10] sm:$0xff] }
 0x7ff   : > { %v3620_v26 = vld [vmem:[#allocation4 + $0x18] sm:$0x3f]  ;;  %v3652_v7 = vadd.f32 %v3651_v47, %v3650_v36 }
 0x800   : > { %4918 = vlog2.f32 %v3620_v26  ;;  %v4913_v10 = vpop.eup %4912  ;;  %v3590_v16 = vrot.slane %v3589_v20, 4  ;;  %v3636_v6 = vld [vmem:[#allocation5 + $0x18] sm:$0x3f] }
 0x801   : > { %v4915_v53 = vpop.eup %4914  ;;  %v3559_v1 = vmul.f32 0.6931472, %v4913_v10  ;;  %v3653_v4 = vrot.slane %v3652_v7, 4 }
 0x802   : > { %v3561_v13 = vmul.f32 0.6931472, %v4915_v53  ;;  %v3591_v32 = vadd.f32 %v3590_v16, %v3589_v20  ;;  %v4917_v40 = vpop.eup %4916 }
 0x803   : > { %v3562_v52 = vadd.f32 %v3559_v1, %v3554_v2  ;;  %v3622_v37 = vmul.f32 0.6931472, %v4917_v40  ;;  %v3654_v11 = vadd.f32 %v3653_v4, %v3652_v7 }
 0x804   : > { %v3563_v12 = vadd.f32 %v3561_v13, %v3555_v59  ;;  %v3592_v22 = vrot.slane %v3591_v32, 2 }
 0x805   : > { %v3574_v46 = vsub.f32 %v3562_v52, %v3572_v21  ;;  %v3625_v30 = vadd.f32 %v3622_v37, %v3617_v58  ;;  %v3655_v17 = vrot.slane %v3654_v11, 2 }
 0x806   : > { %v4919_v8 = vpop.eup %4918  ;;  %v3575_v31 = vsub.f32 %v3563_v12, %v3573_v44  ;;  %v3593_v34 = vadd.f32 %v3592_v22, %v3591_v32 }
 0x807   : > { %v3624_v49 = vmul.f32 0.6931472, %v4919_v8  ;;  %v3576_v3 = vmul.f32 %v4547_v28, %v3574_v46  ;;  %v3637_v54 = vsub.f32 %v3625_v30, %v3635_v24  ;;  %v3656_v55 = vadd.f32 %v3655_v17, %v3654_v11 }
 0x808   : > { %v3577_v62 = vmul.f32 %v4548_v43, %v3575_v31  ;;  %v3594_v33 = vrot.slane %v3593_v34, 1 }
 0x809   : > { %v3626_v18 = vadd.f32 %v3624_v49, %v3618_v25  ;;  %v3578_v19 = vsel %vm3334_vm10, %v3576_v3, 0.0  ;;  %v3639_v50 = vmul.f32 %v4551_v60, %v3637_v54  ;;  %v3657_v0 = vrot.slane %v3656_v55, 1 }
 0x80a   : > { %v3579_v29 = vsel %vm3336_vm11, %v3577_v62, 0.0  ;;  %v3595_v48 = vadd.f32 %v3594_v33, %v3593_v34 }
 0x80b   : > { %v3638_v14 = vsub.f32 %v3626_v18, %v3636_v6  ;;  %v3580_v5 = vadd.f32 %v3579_v29, %v3578_v19  ;;  %v3641_v63 = vsel %vm3334_vm10, %v3639_v50, 0.0  ;;  %v3658_v35 = vadd.f32 %v3657_v0, %v3656_v55 }
 0x80c   : > { %4920 = vrcp.f32 %v3595_v48  ;;  %v3607_v42 = vand.u32 2147483648, %v3595_v48  ;;  %vm3601_vm4 = vweird.f32 %v3595_v48  ;;  %v3605_v60 = vand.u32 2147483647, %v3595_v48 }
 0x80d   : > { %v3640_v15 = vmul.f32 %v4552_v23, %v3638_v14  ;;  %v3581_v45 = vrot.slane %v3580_v5, 4  ;;  %4922 = vrcp.f32 %v3658_v35  ;;  %vm3664_vm7 = vweird.f32 %v3658_v35 }
 0x80e   : > { %v3608_v2 = vor.u32 1.1754944e-38, %v3607_v42  ;;  %v3670_v47 = vand.u32 2147483648, %v3658_v35  ;;  %vm3606_vm0 = vcmp.eq.f32.partialorder %v3605_v60, 8.507059e+37  ;;  %v3668_v1 = vand.u32 2147483647, %v3658_v35 }
 0x80f   : > { %v3642_v38 = vsel %vm3336_vm11, %v3640_v15, 0.0  ;;  %v3582_v39 = vadd.f32 %v3581_v45, %v3580_v5 }
 0x810   : > { %v3643_v41 = vadd.f32 %v3642_v38, %v3641_v63  ;;  %v3671_v52 = vor.u32 1.1754944e-38, %v3670_v47  ;;  %vm3669_vm9 = vcmp.eq.f32.partialorder %v3668_v1, 8.507059e+37 }
 0x811   : > { %v3583_v57 = vrot.slane %v3582_v39, 2 }
 0x812   : > { %v3644_v61 = vrot.slane %v3643_v41, 4  ;;  %v4921_v28 = vpop.eup %4920 }
 0x813   : > { %v3584_v51 = vadd.f32 %v3583_v57, %v3582_v39  ;;  %v3597_v9 = vmul.f32 %v4921_v28, %v3595_v48  ;;  %v4923_v26 = vpop.eup %4922  ;;  %vm3602_vm5 = vweird.f32 %v4921_v28 }
 0x814   : > { %v3645_v43 = vadd.f32 %v3644_v61, %v3643_v41  ;;  %v3660_v23 = vmul.f32 %v4923_v26, %v3658_v35  ;;  %vm3603_vm6 = vmor %vm3601_vm4, %vm3602_vm5  ;;  %vm3665_vm8 = vweird.f32 %v4923_v26 }
 0x815   : > { %v3585_v27 = vrot.slane %v3584_v51, 1  ;;  %v3598_v20 = vsub.f32 1.0, %v3597_v9  ;;  %vm3666_vm1 = vmor %vm3664_vm7, %vm3665_vm8 }
 0x816   : > { %v3646_v56 = vrot.slane %v3645_v43, 2  ;;  %v3661_v36 = vsub.f32 1.0, %v3660_v23 }
 0x817   : > { %v3599_v10 = vmul.f32 %v4921_v28, %v3598_v20  ;;  %v3586_v53 = vadd.f32 %v3585_v27, %v3584_v51 }
 0x818   : > { %v3647_v16 = vadd.f32 %v3646_v56, %v3645_v43  ;;  %v3662_v7 = vmul.f32 %v4923_v26, %v3661_v36 }
 0x819   : > { %v3600_v59 = vadd.f32 %v4921_v28, %v3599_v10 }
 0x81a   : > { %v3648_v21 = vrot.slane %v3647_v16, 1  ;;  %v3663_v40 = vadd.f32 %v4923_v26, %v3662_v7 }
 0x81b   : > { %v3604_v13 = vsel %vm3603_vm6, %v4921_v28, %v3600_v59 }
 0x81c   : > { %v3609_v32 = vsel %vm3606_vm0, %v3608_v2, %v3604_v13  ;;  %v3667_v58 = vsel %vm3666_vm1, %v4923_v26, %v3663_v40  ;;  %v3649_v4 = vadd.f32 %v3648_v21, %v3647_v16 }
 0x81d   : > { %v3610_v44 = vmul.f32 %v3609_v32, %v3586_v53  ;;  %v3672_v8 = vsel %vm3669_vm9, %v3671_v52, %v3667_v58 }
 0x81e   : > { %v3673_v12 = vmul.f32 %v3672_v8, %v3649_v4 }
 0x81f   : > { %3613 = vperm.xlu0 %4911, %v3610_v44  }
 0x827   : > { %3676 = vperm.xlu0 %4911, %v3673_v12  }
 0x891   : > { %v3614_v22 = vpop.permute.xlu0 %3613 }
 0x892   : > { %3616 = vst [vmem:[%s6972_s10] sm:$0x1] %v3614_v22 }
 0x899   : > { %v3677_v25 = vpop.permute.xlu0 %3676 }
 0x89a   : > { %4553 = vst [vmem:[%s6972_s10 + $0x1] sm:$0x1] %v3677_v25 }
 0x89b PF: > { %p17_p10 = scmp.ge.s32.totalorder %s5028_s17, 4   ;;  %s7176_s13 = smov %s4942_s14 }
 0x89c   : > { %s7177_s14 = smov %s5037_s20  ;;  %s7178_s15 = smov %s5028_s17 }
 0x89d   :  { %19 = sbr.rel (!%p17_p10) target bundleno = 2 (0x2), region = 200 }

</bundles_post_ra>
